<compile_context>
chip_gen: v6e
topology: v6e:2x2x1
jax: 0.10.0
libtpu: 0.0.40
codegen_flags: <defaults>
</compile_context>

<pallas_src>
import jax
import jax.numpy as jnp
from jax.experimental import pallas as pl
from jax.experimental.pallas import tpu as pltpu


def _round_up(n, m):
    return ((n + m - 1) // m) * m


def ann_kernel(x_ref, w1_ref, b1_ref, w2_ref, b2_ref, o_ref):
    # In-kernel bf16 cast of the batch tile (avoids a separate wrapper cast
    # pass over x in HBM; rides in MXU slack on the VPU).
    x = x_ref[...].astype(w1_ref.dtype)
    # fc1 on the MXU: (TILE_B, F) bf16 @ (F, HP) bf16 -> f32 accumulation.
    h = jnp.dot(x, w1_ref[...], preferred_element_type=jnp.float32)
    # Bias + ReLU on the VPU in f32 (correct/safe on v5e's non-bf16 VPU).
    h = jnp.maximum(h + b1_ref[...], 0.0)
    # fc2 (single output unit): elementwise multiply + lane reduction instead
    # of an N=1 MXU matmul that would use <1% of the MXU output columns.
    out = jnp.sum(h * w2_ref[...], axis=-1)                      # (TILE_B,)
    # Lane-dense store: one (1, TILE_B) row per grid step (unmasked vst).
    o_ref[...] = (out[None, :] + b2_ref[0, 0]).astype(o_ref.dtype)


def prepare_params(w1, b1, w2, b2, *, compute_dtype=jnp.bfloat16):
    """One-time padding/casting of the tiny weights (hoisted out of the forward).

    w1: (F, H); b1: (1, H) or (H,); w2: (H, 1) or (H,); b2: (1, 1) or (1,).
    Zero-padded hidden columns are exact no-ops: relu(0 + 0) = 0 and the
    matching w2 entries are 0.
    """
    F, H = w1.shape
    HP = _round_up(H, 128)  # full lane width; matches v5e's 128-wide MXU too
    w1p = jnp.zeros((F, HP), compute_dtype).at[:, :H].set(w1.astype(compute_dtype))
    b1p = jnp.zeros((1, HP), jnp.float32).at[:, :H].set(
        b1.reshape(1, H).astype(jnp.float32))
    w2p = jnp.zeros((1, HP), jnp.float32).at[:, :H].set(
        w2.reshape(1, H).astype(jnp.float32))
    b2p = b2.reshape(1, 1).astype(jnp.float32)
    return w1p, b1p, w2p, b2p


def _pick_tile_b(B):
    """Batch-tile size per TPU generation.

    Single-TC parts (v5e/v6e): one tile per call (fewest grid steps).
    Dual-TC v7x: >=4 tiles so megacore sharding keeps both cores busy while
    each still double-buffers.  ~2 KiB of live VMEM per batch row, so cap
    tile_b well under the scoped VMEM limit (32 MiB default on v7x).
    """
    try:
        kind = jax.devices()[0].device_kind.lower()
    except Exception:  # pragma: no cover - defensive; fall back to single-TC path
        kind = ""
    two_tc = ("v7" in kind) or ("7x" in kind)
    vmem_cap_rows = 8192 if two_tc else 16384
    tile = pl.cdiv(B, 4) if two_tc else B
    # Multiple of 128 => lane-dense (1, tile_b) output blocks, BP >= 128.
    tile = max(128, min(_round_up(tile, 128), vmem_cap_rows))
    return tile


def ann_forward(x, params, *, tile_b=None):
    """Forward pass of ANN: fc2(relu(fc1(x))).

    x: (B, F) f32; params: output of prepare_params().  Returns (B, 1) f32.
    """
    w1p, b1p, w2p, b2p = params
    B, F = x.shape
    HP = w1p.shape[1]

    if tile_b is None:
        tile_b = _pick_tile_b(B)
    else:
        tile_b = max(128, _round_up(tile_b, 128))

    BP = _round_up(B, tile_b)
    num_tiles = BP // tile_b

    xp = x if BP == B else jnp.pad(x, ((0, BP - B), (0, 0)))

    out_row = pl.pallas_call(
        ann_kernel,
        out_shape=jax.ShapeDtypeStruct((1, BP), jnp.float32),
        grid=(num_tiles,),
        in_specs=[
            # x streams: one f32 batch tile per grid step (double-buffered DMA).
            pl.BlockSpec((tile_b, F), lambda i: (i, 0)),
            # Weights / bias stay resident across all batch tiles.
            pl.BlockSpec((F, HP), lambda i: (0, 0)),
            pl.BlockSpec((1, HP), lambda i: (0, 0)),
            pl.BlockSpec((1, HP), lambda i: (0, 0)),
            # fc2 bias: a single scalar -> SMEM, not a lane-padded VMEM tile.
            pl.BlockSpec(memory_space=pltpu.MemorySpace.SMEM),
        ],
        # Lane-dense output: (1, tile_b) blocks of a (1, BP) row.
        out_specs=pl.BlockSpec((1, tile_b), lambda i: (0, i)),
        compiler_params=pltpu.CompilerParams(
            # Batch tiles are independent -> shard across TensorCores on v7x.
            dimension_semantics=("parallel",),
        ),
    )(xp, w1p, b1p, w2p, b2p)

    # (1, BP) row-major == batch order; drop padded rows, restore (B, 1).
    return out_row.reshape(BP, 1)[:B]


def init_params(key, input_size, hidden_size, output_size):
    # Deterministic init mimicking PyTorch's nn.Linear default:
    # U(-1/sqrt(fan_in), 1/sqrt(fan_in)) for both weights and biases.
    k1, k2, k3, k4 = jax.random.split(key, 4)
    lim1 = 1.0 / jnp.sqrt(jnp.float32(input_size))
    lim2 = 1.0 / jnp.sqrt(jnp.float32(hidden_size))
    w1 = jax.random.uniform(k1, (input_size, hidden_size), jnp.float32, -lim1, lim1)
    b1 = jax.random.uniform(k2, (1, hidden_size), jnp.float32, -lim1, lim1)
    w2 = jax.random.uniform(k3, (hidden_size, output_size), jnp.float32, -lim2, lim2)
    b2 = jax.random.uniform(k4, (1, output_size), jnp.float32, -lim2, lim2)
    return w1, b1, w2, b2


if __name__ == "__main__":
    key = jax.random.PRNGKey(0)
    batch = 1024        # small in bytes; 1 tile on v5e/v6e, 4 tiles on v7x
    input_size = 8      # X_train.shape[1] in the original script (synthetic here)
    hidden_size = 64
    output_size = 1

    kx, kp = jax.random.split(key)
    x = jax.random.normal(kx, (batch, input_size), jnp.float32)
    w1, b1, w2, b2 = init_params(kp, input_size, hidden_size, output_size)

    # One-time parameter prep (padding/cast hoisted out of the forward).
    params = prepare_params(w1, b1, w2, b2)

    out = ann_forward(x, params)
    out = jax.block_until_ready(out)
    assert out.shape == (batch, output_size)

    # Tight check: reference that applies the same bf16 rounding to the fc1
    # operands (kernel accumulates in f32; fc2 is exact f32 multiply-reduce).
    xb = x.astype(jnp.bfloat16).astype(jnp.float32)
    w1b = w1.astype(jnp.bfloat16).astype(jnp.float32)
    h_ref = jnp.maximum(xb @ w1b + b1, 0.0)
    ref_bf16 = jnp.sum(h_ref * w2.reshape(1, -1), axis=-1, keepdims=True) + b2
    assert jnp.allclose(out, ref_bf16, atol=1e-3, rtol=1e-3)

    # Loose sanity check against the pure-f32 PyTorch-equivalent forward
    # (bf16 fc1 inputs drift slightly from full f32).
    ref_f32 = jnp.maximum(x @ w1 + b1, 0.0) @ w2 + b2
    assert jnp.allclose(out, ref_f32, atol=1e-1, rtol=1e-1)

    print("KERNEL_OK")
</pallas_src>

<mosaic_0001>
module attributes {stable_mosaic.version = 11 : i64} {
  func.func @ann_kernel(%arg0: i32, %arg1: memref<1024x8xf32, #tpu.memory_space<vmem>>, %arg2: memref<8x128xbf16, #tpu.memory_space<vmem>>, %arg3: memref<1x128xf32, #tpu.memory_space<vmem>>, %arg4: memref<1x128xf32, #tpu.memory_space<vmem>>, %arg5: memref<1x1xf32, #tpu.memory_space<smem>>, %arg6: memref<1x1024xf32, #tpu.memory_space<vmem>>) attributes {dimension_semantics = [#tpu.dimension_semantics<parallel>], iteration_bounds = array<i64: 1>, scalar_prefetch = 0 : i64, scratch_operands = 0 : i64, tpu.core_type = #tpu.core_type<tc>, window_params = [{transform_indices = @transform_0, window_bounds = array<i64: 1024, 8>}, {pipeline_mode = #tpu.pipeline_mode<synchronous>, transform_indices = @transform_1, window_bounds = array<i64: 8, 128>}, {pipeline_mode = #tpu.pipeline_mode<synchronous>, transform_indices = @transform_2, window_bounds = array<i64: 1, 128>}, {pipeline_mode = #tpu.pipeline_mode<synchronous>, transform_indices = @transform_3, window_bounds = array<i64: 1, 128>}, {transform_indices = @transform_4, window_bounds = array<i64: 1, 1>}, {transform_indices = @transform_5, window_bounds = array<i64: 1, 1024>}]} {
    %c0 = arith.constant 0 : index
    %c0_0 = arith.constant 0 : index
    %0 = vector.load %arg1[%c0, %c0_0] : memref<1024x8xf32, #tpu.memory_space<vmem>>, vector<1024x8xf32>
    %1 = arith.truncf %0 : vector<1024x8xf32> to vector<1024x8xbf16>
    %c0_1 = arith.constant 0 : index
    %c0_2 = arith.constant 0 : index
    %2 = vector.load %arg2[%c0_1, %c0_2] : memref<8x128xbf16, #tpu.memory_space<vmem>>, vector<8x128xbf16>
    %cst = arith.constant dense<0.000000e+00> : vector<1024x128xf32>
    %3 = tpu.matmul %1, %2, %cst {dimension_numbers = #tpu.dot_dimension_numbers<[1], [0], [0], [1], [0, 0, 1, 1], [], []>} : vector<1024x8xbf16>, vector<8x128xbf16>, vector<1024x128xf32> -> vector<1024x128xf32>
    %c0_3 = arith.constant 0 : index
    %c0_4 = arith.constant 0 : index
    %4 = vector.load %arg3[%c0_3, %c0_4] : memref<1x128xf32, #tpu.memory_space<vmem>>, vector<1x128xf32>
    %5 = vector.broadcast %4 : vector<1x128xf32> to vector<1024x128xf32>
    %6 = arith.addf %3, %5 : vector<1024x128xf32>
    %cst_5 = arith.constant 0.000000e+00 : f32
    %7 = vector.broadcast %cst_5 : f32 to vector<1024x128xf32>
    %8 = arith.maximumf %6, %7 : vector<1024x128xf32>
    %c0_6 = arith.constant 0 : index
    %c0_7 = arith.constant 0 : index
    %9 = vector.load %arg4[%c0_6, %c0_7] : memref<1x128xf32, #tpu.memory_space<vmem>>, vector<1x128xf32>
    %10 = vector.broadcast %9 : vector<1x128xf32> to vector<1024x128xf32>
    %11 = arith.mulf %8, %10 : vector<1024x128xf32>
    %cst_8 = arith.constant dense<0.000000e+00> : vector<1024xf32>
    %12 = vector.multi_reduction <add>, %11, %cst_8 [1] : vector<1024x128xf32> to vector<1024xf32>
    %13 = vector.shape_cast %12 : vector<1024xf32> to vector<1x1024xf32>
    %c0_9 = arith.constant 0 : index
    %c0_10 = arith.constant 0 : index
    %14 = memref.load %arg5[%c0_9, %c0_10] : memref<1x1xf32, #tpu.memory_space<smem>>
    %15 = vector.broadcast %14 : f32 to vector<1x1024xf32>
    %16 = arith.addf %13, %15 : vector<1x1024xf32>
    %c0_11 = arith.constant 0 : index
    %c0_12 = arith.constant 0 : index
    %17 = vector.load %arg6[%c0_11, %c0_12] : memref<1x1024xf32, #tpu.memory_space<vmem>>, vector<1x1024xf32>
    tpu.vector_store %arg6[%c0_11, %c0_12], %16 {strides = array<i32>} : memref<1x1024xf32, #tpu.memory_space<vmem>>, vector<1x1024xf32>,
    return
  }
  func.func @transform_0(%arg0: i32) -> (i32, i32) {
    %c0_i32 = arith.constant 0 : i32
    %c0_i32_0 = arith.constant 0 : i32
    return %arg0, %c0_i32 : i32, i32
  }
  func.func @transform_1(%arg0: i32) -> (i32, i32) {
    %c0_i32 = arith.constant 0 : i32
    %c0_i32_0 = arith.constant 0 : i32
    %c0_i32_1 = arith.constant 0 : i32
    return %c0_i32, %c0_i32_0 : i32, i32
  }
  func.func @transform_2(%arg0: i32) -> (i32, i32) {
    %c0_i32 = arith.constant 0 : i32
    %c0_i32_0 = arith.constant 0 : i32
    %c0_i32_1 = arith.constant 0 : i32
    return %c0_i32, %c0_i32_0 : i32, i32
  }
  func.func @transform_3(%arg0: i32) -> (i32, i32) {
    %c0_i32 = arith.constant 0 : i32
    %c0_i32_0 = arith.constant 0 : i32
    %c0_i32_1 = arith.constant 0 : i32
    return %c0_i32, %c0_i32_0 : i32, i32
  }
  func.func @transform_4(%arg0: i32) -> (i32, i32) {
    %c0_i32 = arith.constant 0 : i32
    %c0_i32_0 = arith.constant 0 : i32
    %c0_i32_1 = arith.constant 0 : i32
    return %c0_i32, %c0_i32_0 : i32, i32
  }
  func.func @transform_5(%arg0: i32) -> (i32, i32) {
    %c0_i32 = arith.constant 0 : i32
    %c0_i32_0 = arith.constant 0 : i32
    return %c0_i32, %arg0 : i32, i32
  }
}

</mosaic_0001>

<bundles_post_ra>
// kernel: tpu_custom_call.1
= control target key start
LH: loop header
LB: loop body
LE: loop exit
PB: predicated region body
PF: predicated region fallthrough
CT: control target
= control target key end

     0   :  { %vm416_vm0 = vcmask 1043456   ;;  %vm223_vm1 = vcmask 64512   ;;  %s18167_s0 = inlined_call_operand.vmem [shape: f32[1024,8], index: 0, kind: input, shape index: {}]   ;;  %s18168_s1 = inlined_call_operand.vmem [shape: bf16[8,128], index: 1, kind: input, shape index: {}]   ;;  %s18169_s2 = inlined_call_operand.vmem [shape: f32[1,128], index: 2, kind: input, shape index: {}]   ;;  %s18170_s3 = inlined_call_operand.vmem [shape: f32[1,128], index: 3, kind: input, shape index: {}]   ;;  %s18171_s4 = inlined_call_operand.<no memory space> [shape: f32[1,1], index: 4, kind: input, shape index: {}]   ;;  %s18172_s5 = inlined_call_operand.hbm [shape: f32[1,1024], index: 5, kind: output, shape index: {}]  }
   0x1   :  { %v215_v0 = vld [vmem:[%s18168_s1] sm:$0xf]  ;;  %v24_v2 = vld [vmem:[%s18167_s0 + $0x8] sm:$0xff]  ;;  %v25_v7 = vld [vmem:[%s18167_s0 + $0x10] sm:$0xff] }
   0x2   :  { %v23_v1 = vld [vmem:[%s18167_s0] sm:$0xff]  ;;  %13486 = vmatprep.subr.msk.bf16.mxu0 %vm416_vm0, %v215_v0  ;;  %13487 = vmatprep.subr.msk.bf16.mxu1 %vm416_vm0, %v215_v0  ;;  %v418_v3 = vsel %vm416_vm0, %v215_v0, 0  ;;  %v88_v6 = vld [vmem:[%s18167_s0 + $0x208] sm:$0xff]  ;;  %v26_v9 = vld [vmem:[%s18167_s0 + $0x18] sm:$0xff] }
   0x3   :  { %v151_v4 = vpack.c.bf16 %v24_v2, %v23_v1  ;;  %v87_v5 = vld [vmem:[%s18167_s0 + $0x200] sm:$0xff]  ;;  %13355 = vmatpush3.bf16.msra.mxu0 %v418_v3  ;;  %13485 = vmatpush3.bf16.msra.mxu1 %v418_v3  ;;  %v89_v10 = vld [vmem:[%s18167_s0 + $0x210] sm:$0xff]  ;;  %v90_v11 = vld [vmem:[%s18167_s0 + $0x218] sm:$0xff]  ;;  %v152_v12 = vpack.c.bf16 %v26_v9, %v25_v7 }
   0x4   :  { %v183_v8 = vpack.c.bf16 %v88_v6, %v87_v5  ;;  %v184_v13 = vpack.c.bf16 %v90_v11, %v89_v10  ;;  %v27_v14 = vld [vmem:[%s18167_s0 + $0x20] sm:$0xff]  ;;  %v28_v15 = vld [vmem:[%s18167_s0 + $0x28] sm:$0xff]  ;;  %v29_v19 = vld [vmem:[%s18167_s0 + $0x30] sm:$0xff] }
   0x5   :  { %13356 = vmatprep.mubr.msk.bf16.mxu0 %vm223_vm1, %v151_v4  ;;  %v153_v16 = vpack.c.bf16 %v28_v15, %v27_v14  ;;  %v91_v17 = vld [vmem:[%s18167_s0 + $0x220] sm:$0xff]  ;;  %v92_v18 = vld [vmem:[%s18167_s0 + $0x228] sm:$0xff]  ;;  %v30_v20 = vld [vmem:[%s18167_s0 + $0x38] sm:$0xff] }
   0x6   :  { %13420 = vmatprep.mubr.msk.bf16.mxu1 %vm223_vm1, %v183_v8  ;;  %13357 = vmatmul.mubr.msk.bf16.vlgmr.msra.gmra.mxu0 %vm223_vm1, %v152_v12  ;;  %v185_v21 = vpack.c.bf16 %v92_v18, %v91_v17  ;;  %v93_v22 = vld [vmem:[%s18167_s0 + $0x230] sm:$0xff]  ;;  %v94_v23 = vld [vmem:[%s18167_s0 + $0x238] sm:$0xff]  ;;  %v31_v24 = vld [vmem:[%s18167_s0 + $0x40] sm:$0xff]  ;;  %v154_v28 = vpack.c.bf16 %v30_v20, %v29_v19 }
   0x7   :  { %13421 = vmatmul.mubr.msk.bf16.vlgmr.msra.gmra.mxu1 %vm223_vm1, %v184_v13  ;;  %13360 = vmatprep.mubr.msk.bf16.mxu0 %vm223_vm1, %v153_v16  ;;  %v32_v25 = vld [vmem:[%s18167_s0 + $0x48] sm:$0xff]  ;;  %v95_v26 = vld [vmem:[%s18167_s0 + $0x240] sm:$0xff]  ;;  %v186_v29 = vpack.c.bf16 %v94_v23, %v93_v22  ;;  %v33_v32 = vld [vmem:[%s18167_s0 + $0x50] sm:$0xff] }
   0x8   :  { %13424 = vmatprep.mubr.msk.bf16.mxu1 %vm223_vm1, %v185_v21  ;;  %v96_v27 = vld [vmem:[%s18167_s0 + $0x248] sm:$0xff]  ;;  %v155_v30 = vpack.c.bf16 %v32_v25, %v31_v24  ;;  %v34_v33 = vld [vmem:[%s18167_s0 + $0x58] sm:$0xff]  ;;  %v97_v34 = vld [vmem:[%s18167_s0 + $0x250] sm:$0xff] }
   0x9   :  { %v187_v31 = vpack.c.bf16 %v96_v27, %v95_v26  ;;  %v98_v35 = vld [vmem:[%s18167_s0 + $0x258] sm:$0xff]  ;;  %v35_v36 = vld [vmem:[%s18167_s0 + $0x60] sm:$0xff]  ;;  %v36_v37 = vld [vmem:[%s18167_s0 + $0x68] sm:$0xff]  ;;  %v156_v40 = vpack.c.bf16 %v34_v33, %v33_v32 }
   0xa   :  { %v99_v38 = vld [vmem:[%s18167_s0 + $0x260] sm:$0xff]  ;;  %v100_v39 = vld [vmem:[%s18167_s0 + $0x268] sm:$0xff]  ;;  %v188_v41 = vpack.c.bf16 %v98_v35, %v97_v34  ;;  %v157_v42 = vpack.c.bf16 %v36_v37, %v35_v36  ;;  %v37_v44 = vld [vmem:[%s18167_s0 + $0x70] sm:$0xff] }
   0xb   :  { %v189_v43 = vpack.c.bf16 %v100_v39, %v99_v38  ;;  %v38_v45 = vld [vmem:[%s18167_s0 + $0x78] sm:$0xff]  ;;  %v101_v46 = vld [vmem:[%s18167_s0 + $0x270] sm:$0xff]  ;;  %v39_v48 = vld [vmem:[%s18167_s0 + $0x80] sm:$0xff] }
   0xc   :  { %v102_v47 = vld [vmem:[%s18167_s0 + $0x278] sm:$0xff]  ;;  %v40_v49 = vld [vmem:[%s18167_s0 + $0x88] sm:$0xff]  ;;  %v103_v50 = vld [vmem:[%s18167_s0 + $0x280] sm:$0xff]  ;;  %v158_v52 = vpack.c.bf16 %v38_v45, %v37_v44 }
   0xd   :  { %v104_v51 = vld [vmem:[%s18167_s0 + $0x288] sm:$0xff]  ;;  %v190_v53 = vpack.c.bf16 %v102_v47, %v101_v46  ;;  %v159_v54 = vpack.c.bf16 %v40_v49, %v39_v48  ;;  %v41_v56 = vld [vmem:[%s18167_s0 + $0x90] sm:$0xff]  ;;  %v42_v57 = vld [vmem:[%s18167_s0 + $0x98] sm:$0xff] }
   0xe   :  { %13361 = vmatmul.mubr.msk.bf16.gmra.mxu0 %vm223_vm1, %v154_v28  ;;  %v191_v55 = vpack.c.bf16 %v104_v51, %v103_v50  ;;  %v105_v58 = vld [vmem:[%s18167_s0 + $0x290] sm:$0xff]  ;;  %v106_v59 = vld [vmem:[%s18167_s0 + $0x298] sm:$0xff]  ;;  %v43_v60 = vld [vmem:[%s18167_s0 + $0xa0] sm:$0xff]  ;;  %v160_v0 = vpack.c.bf16 %v42_v57, %v41_v56 }
   0xf   :  { %13425 = vmatmul.mubr.msk.bf16.gmra.mxu1 %vm223_vm1, %v186_v29  ;;  %13364 = vmatprep.mubr.msk.bf16.mxu0 %vm223_vm1, %v155_v30  ;;  %v44_v61 = vld [vmem:[%s18167_s0 + $0xa8] sm:$0xff]  ;;  %v107_v62 = vld [vmem:[%s18167_s0 + $0x2a0] sm:$0xff]  ;;  %v192_v1 = vpack.c.bf16 %v106_v59, %v105_v58 }
  0x10   :  { %13428 = vmatprep.mubr.msk.bf16.mxu1 %vm223_vm1, %v187_v31  ;;  %v108_v63 = vld [vmem:[%s18167_s0 + $0x2a8] sm:$0xff]  ;;  %v161_v2 = vpack.c.bf16 %v44_v61, %v43_v60 }
  0x11   :  { %v193_v3 = vpack.c.bf16 %v108_v63, %v107_v62 }
  0x16   :  { %13365 = vmatmul.mubr.msk.bf16.gmra.mxu0 %vm223_vm1, %v156_v40 }
  0x17   :  { %13429 = vmatmul.mubr.msk.bf16.gmra.mxu1 %vm223_vm1, %v188_v41  ;;  %13368 = vmatprep.mubr.msk.bf16.mxu0 %vm223_vm1, %v157_v42 }
  0x18   :  { %13432 = vmatprep.mubr.msk.bf16.mxu1 %vm223_vm1, %v189_v43 }
  0x1e   :  { %13369 = vmatmul.mubr.msk.bf16.gmra.mxu0 %vm223_vm1, %v158_v52 }
  0x1f   :  { %13433 = vmatmul.mubr.msk.bf16.gmra.mxu1 %vm223_vm1, %v190_v53  ;;  %13372 = vmatprep.mubr.msk.bf16.mxu0 %vm223_vm1, %v159_v54 }
  0x20   :  { %13436 = vmatprep.mubr.msk.bf16.mxu1 %vm223_vm1, %v191_v55 }
  0x21   :  { %11 = vsyncpa [#allocation4], 0  ;;  %v45_v4 = vld [vmem:[%s18167_s0 + $0xb0] sm:$0xff]  ;;  %v46_v5 = vld [vmem:[%s18167_s0 + $0xb8] sm:$0xff]  ;;  %vm12505_vm2 = vcmask 130112   ;;  %vm12512_vm3 = vcmask 195712  }
  0x22   :  { %v109_v6 = vld [vmem:[%s18167_s0 + $0x2b0] sm:$0xff]  ;;  %v110_v7 = vld [vmem:[%s18167_s0 + $0x2b8] sm:$0xff]  ;;  %v47_v8 = vld [vmem:[%s18167_s0 + $0xc0] sm:$0xff]  ;;  %v162_v12 = vpack.c.bf16 %v46_v5, %v45_v4  ;;  %vm12519_vm4 = vcmask 261312   ;;  %vm12526_vm5 = vcmask 326912   ;;  %vm12533_vm6 = vcmask 392512  }
  0x23   :  { %v48_v9 = vld [vmem:[%s18167_s0 + $0xc8] sm:$0xff]  ;;  %v111_v10 = vld [vmem:[%s18167_s0 + $0x2c0] sm:$0xff]  ;;  %v194_v13 = vpack.c.bf16 %v110_v7, %v109_v6  ;;  %v49_v16 = vld [vmem:[%s18167_s0 + $0xd0] sm:$0xff]  ;;  %vm12540_vm7 = vcmask 458112   ;;  %vm12547_vm8 = vcmask 523712   ;;  %vm12554_vm9 = vcmask 589312  }
  0x24   :  { %v112_v11 = vld [vmem:[%s18167_s0 + $0x2c8] sm:$0xff]  ;;  %v163_v14 = vpack.c.bf16 %v48_v9, %v47_v8  ;;  %v50_v17 = vld [vmem:[%s18167_s0 + $0xd8] sm:$0xff]  ;;  %v113_v18 = vld [vmem:[%s18167_s0 + $0x2d0] sm:$0xff]  ;;  %vm12561_vm10 = vcmask 654912   ;;  %vm12568_vm11 = vcmask 720512   ;;  %vm12575_vm12 = vcmask 786112  }
  0x25   :  { %v195_v15 = vpack.c.bf16 %v112_v11, %v111_v10  ;;  %v114_v19 = vld [vmem:[%s18167_s0 + $0x2d8] sm:$0xff]  ;;  %v51_v20 = vld [vmem:[%s18167_s0 + $0xe0] sm:$0xff]  ;;  %v52_v21 = vld [vmem:[%s18167_s0 + $0xe8] sm:$0xff]  ;;  %v164_v24 = vpack.c.bf16 %v50_v17, %v49_v16  ;;  %vm12582_vm13 = vcmask 851712   ;;  %vm12589_vm14 = vcmask 917312  }
  0x26   :  { %13373 = vmatmul.mubr.msk.bf16.gmra.mxu0 %vm223_vm1, %v160_v0  ;;  %v115_v22 = vld [vmem:[%s18167_s0 + $0x2e0] sm:$0xff]  ;;  %v116_v23 = vld [vmem:[%s18167_s0 + $0x2e8] sm:$0xff]  ;;  %v196_v25 = vpack.c.bf16 %v114_v19, %v113_v18  ;;  %v165_v26 = vpack.c.bf16 %v52_v21, %v51_v20  ;;  %v53_v28 = vld [vmem:[%s18167_s0 + $0xf0] sm:$0xff]  ;;  %vm12596_vm15 = vcmask 982912   ;;  %vm12603_vm0 = vcmask 1048512  }
  0x27   :  { %13437 = vmatmul.mubr.msk.bf16.gmra.mxu1 %vm223_vm1, %v192_v1  ;;  %13376 = vmatprep.mubr.msk.bf16.mxu0 %vm223_vm1, %v161_v2  ;;  %v197_v27 = vpack.c.bf16 %v116_v23, %v115_v22  ;;  %v54_v29 = vld [vmem:[%s18167_s0 + $0xf8] sm:$0xff]  ;;  %v117_v30 = vld [vmem:[%s18167_s0 + $0x2f0] sm:$0xff]  ;;  %v55_v32 = vld [vmem:[%s18167_s0 + $0x100] sm:$0xff] }
  0x28   :  { %13440 = vmatprep.mubr.msk.bf16.mxu1 %vm223_vm1, %v193_v3  ;;  %v118_v31 = vld [vmem:[%s18167_s0 + $0x2f8] sm:$0xff]  ;;  %v56_v33 = vld [vmem:[%s18167_s0 + $0x108] sm:$0xff]  ;;  %v119_v34 = vld [vmem:[%s18167_s0 + $0x300] sm:$0xff]  ;;  %v166_v36 = vpack.c.bf16 %v54_v29, %v53_v28 }
  0x29   :  { %v120_v35 = vld [vmem:[%s18167_s0 + $0x308] sm:$0xff]  ;;  %v198_v37 = vpack.c.bf16 %v118_v31, %v117_v30  ;;  %v167_v38 = vpack.c.bf16 %v56_v33, %v55_v32  ;;  %v57_v40 = vld [vmem:[%s18167_s0 + $0x110] sm:$0xff]  ;;  %v58_v41 = vld [vmem:[%s18167_s0 + $0x118] sm:$0xff] }
  0x2a   :  { %v199_v39 = vpack.c.bf16 %v120_v35, %v119_v34  ;;  %v121_v42 = vld [vmem:[%s18167_s0 + $0x310] sm:$0xff]  ;;  %v122_v43 = vld [vmem:[%s18167_s0 + $0x318] sm:$0xff]  ;;  %v59_v44 = vld [vmem:[%s18167_s0 + $0x120] sm:$0xff]  ;;  %v168_v48 = vpack.c.bf16 %v58_v41, %v57_v40 }
  0x2b   :  { %v60_v45 = vld [vmem:[%s18167_s0 + $0x128] sm:$0xff]  ;;  %v123_v46 = vld [vmem:[%s18167_s0 + $0x320] sm:$0xff]  ;;  %v200_v49 = vpack.c.bf16 %v122_v43, %v121_v42  ;;  %v61_v52 = vld [vmem:[%s18167_s0 + $0x130] sm:$0xff] }
  0x2c   :  { %v124_v47 = vld [vmem:[%s18167_s0 + $0x328] sm:$0xff]  ;;  %v169_v50 = vpack.c.bf16 %v60_v45, %v59_v44  ;;  %v62_v53 = vld [vmem:[%s18167_s0 + $0x138] sm:$0xff]  ;;  %v125_v54 = vld [vmem:[%s18167_s0 + $0x330] sm:$0xff] }
  0x2d   :  { %v201_v51 = vpack.c.bf16 %v124_v47, %v123_v46  ;;  %v126_v55 = vld [vmem:[%s18167_s0 + $0x338] sm:$0xff]  ;;  %v63_v56 = vld [vmem:[%s18167_s0 + $0x140] sm:$0xff]  ;;  %v64_v57 = vld [vmem:[%s18167_s0 + $0x148] sm:$0xff]  ;;  %v170_v60 = vpack.c.bf16 %v62_v53, %v61_v52 }
  0x2e   :  { %13377 = vmatmul.mubr.msk.bf16.gmra.mxu0 %vm223_vm1, %v162_v12  ;;  %v127_v58 = vld [vmem:[%s18167_s0 + $0x340] sm:$0xff]  ;;  %v128_v59 = vld [vmem:[%s18167_s0 + $0x348] sm:$0xff]  ;;  %v202_v61 = vpack.c.bf16 %v126_v55, %v125_v54  ;;  %v171_v62 = vpack.c.bf16 %v64_v57, %v63_v56  ;;  %v65_v0 = vld [vmem:[%s18167_s0 + $0x150] sm:$0xff] }
  0x2f   :  { %13441 = vmatmul.mubr.msk.bf16.gmra.mxu1 %vm223_vm1, %v194_v13  ;;  %13380 = vmatprep.mubr.msk.bf16.mxu0 %vm223_vm1, %v163_v14  ;;  %v203_v63 = vpack.c.bf16 %v128_v59, %v127_v58  ;;  %v66_v1 = vld [vmem:[%s18167_s0 + $0x158] sm:$0xff]  ;;  %v129_v2 = vld [vmem:[%s18167_s0 + $0x350] sm:$0xff]  ;;  %v67_v4 = vld [vmem:[%s18167_s0 + $0x160] sm:$0xff] }
  0x30   :  { %13444 = vmatprep.mubr.msk.bf16.mxu1 %vm223_vm1, %v195_v15  ;;  %v130_v3 = vld [vmem:[%s18167_s0 + $0x358] sm:$0xff]  ;;  %v68_v5 = vld [vmem:[%s18167_s0 + $0x168] sm:$0xff]  ;;  %v131_v6 = vld [vmem:[%s18167_s0 + $0x360] sm:$0xff]  ;;  %v172_v8 = vpack.c.bf16 %v66_v1, %v65_v0 }
  0x31   :  { %v132_v7 = vld [vmem:[%s18167_s0 + $0x368] sm:$0xff]  ;;  %v204_v9 = vpack.c.bf16 %v130_v3, %v129_v2  ;;  %v173_v10 = vpack.c.bf16 %v68_v5, %v67_v4  ;;  %v69_v12 = vld [vmem:[%s18167_s0 + $0x170] sm:$0xff]  ;;  %v70_v13 = vld [vmem:[%s18167_s0 + $0x178] sm:$0xff] }
  0x32   :  { %v205_v11 = vpack.c.bf16 %v132_v7, %v131_v6  ;;  %v133_v14 = vld [vmem:[%s18167_s0 + $0x370] sm:$0xff]  ;;  %v134_v15 = vld [vmem:[%s18167_s0 + $0x378] sm:$0xff]  ;;  %v71_v16 = vld [vmem:[%s18167_s0 + $0x180] sm:$0xff]  ;;  %v174_v20 = vpack.c.bf16 %v70_v13, %v69_v12 }
  0x33   :  { %v72_v17 = vld [vmem:[%s18167_s0 + $0x188] sm:$0xff]  ;;  %v135_v18 = vld [vmem:[%s18167_s0 + $0x380] sm:$0xff]  ;;  %v206_v21 = vpack.c.bf16 %v134_v15, %v133_v14 }
  0x34   :  { %v136_v19 = vld [vmem:[%s18167_s0 + $0x388] sm:$0xff]  ;;  %v175_v22 = vpack.c.bf16 %v72_v17, %v71_v16  ;;  %v75_v28 = vld [vmem:[%s18167_s0 + $0x1a0] sm:$0xff] }
  0x35   :  { %v207_v23 = vpack.c.bf16 %v136_v19, %v135_v18  ;;  %v76_v29 = vld [vmem:[%s18167_s0 + $0x1a8] sm:$0xff]  ;;  %v139_v30 = vld [vmem:[%s18167_s0 + $0x3a0] sm:$0xff] }
  0x36   :  { %13381 = vmatmul.mubr.msk.bf16.gmra.mxu0 %vm223_vm1, %v164_v24  ;;  %v73_v24 = vld [vmem:[%s18167_s0 + $0x190] sm:$0xff]  ;;  %v140_v31 = vld [vmem:[%s18167_s0 + $0x3a8] sm:$0xff]  ;;  %v177_v34 = vpack.c.bf16 %v76_v29, %v75_v28  ;;  %v79_v40 = vld [vmem:[%s18167_s0 + $0x1c0] sm:$0xff] }
  0x37   :  { %13445 = vmatmul.mubr.msk.bf16.gmra.mxu1 %vm223_vm1, %v196_v25  ;;  %13384 = vmatprep.mubr.msk.bf16.mxu0 %vm223_vm1, %v165_v26  ;;  %v74_v25 = vld [vmem:[%s18167_s0 + $0x198] sm:$0xff]  ;;  %v137_v26 = vld [vmem:[%s18167_s0 + $0x390] sm:$0xff]  ;;  %v209_v35 = vpack.c.bf16 %v140_v31, %v139_v30  ;;  %v80_v41 = vld [vmem:[%s18167_s0 + $0x1c8] sm:$0xff] }
  0x38   :  { %13448 = vmatprep.mubr.msk.bf16.mxu1 %vm223_vm1, %v197_v27  ;;  %v138_v27 = vld [vmem:[%s18167_s0 + $0x398] sm:$0xff]  ;;  %v176_v32 = vpack.c.bf16 %v74_v25, %v73_v24  ;;  %v143_v42 = vld [vmem:[%s18167_s0 + $0x3c0] sm:$0xff]  ;;  %v144_v43 = vld [vmem:[%s18167_s0 + $0x3c8] sm:$0xff]  ;;  %v179_v46 = vpack.c.bf16 %v80_v41, %v79_v40 }
  0x39   :  { %v208_v33 = vpack.c.bf16 %v138_v27, %v137_v26  ;;  %v211_v47 = vpack.c.bf16 %v144_v43, %v143_v42  ;;  %v83_v52 = vld [vmem:[%s18167_s0 + $0x1e0] sm:$0xff]  ;;  %v84_v53 = vld [vmem:[%s18167_s0 + $0x1e8] sm:$0xff] }
  0x3a   :  { %v147_v54 = vld [vmem:[%s18167_s0 + $0x3e0] sm:$0xff]  ;;  %v148_v55 = vld [vmem:[%s18167_s0 + $0x3e8] sm:$0xff]  ;;  %v181_v58 = vpack.c.bf16 %v84_v53, %v83_v52 }
  0x3b   :  { %v213_v59 = vpack.c.bf16 %v148_v55, %v147_v54  ;;  %v14004_v2 = vld [vmem:[%s18169_s2] ss:$0 sm:$0xff] }
  0x3c   :  { %v14012_v12 = vld [vmem:[%s18170_s3] ss:$0 sm:$0xff] }
  0x3e   :  { %13385 = vmatmul.mubr.msk.bf16.gmra.mxu0 %vm223_vm1, %v166_v36  ;;  %v77_v36 = vld [vmem:[%s18167_s0 + $0x1b0] sm:$0xff] }
  0x3f   :  { %13449 = vmatmul.mubr.msk.bf16.gmra.mxu1 %vm223_vm1, %v198_v37  ;;  %13388 = vmatprep.mubr.msk.bf16.mxu0 %vm223_vm1, %v167_v38  ;;  %v78_v37 = vld [vmem:[%s18167_s0 + $0x1b8] sm:$0xff]  ;;  %v141_v38 = vld [vmem:[%s18167_s0 + $0x3b0] sm:$0xff] }
  0x40   :  { %13452 = vmatprep.mubr.msk.bf16.mxu1 %vm223_vm1, %v199_v39  ;;  %v142_v39 = vld [vmem:[%s18167_s0 + $0x3b8] sm:$0xff]  ;;  %v178_v44 = vpack.c.bf16 %v78_v37, %v77_v36 }
  0x41   :  { %v210_v45 = vpack.c.bf16 %v142_v39, %v141_v38 }
  0x46   :  { %13389 = vmatmul.mubr.msk.bf16.gmra.mxu0 %vm223_vm1, %v168_v48  ;;  %v81_v48 = vld [vmem:[%s18167_s0 + $0x1d0] sm:$0xff] }
  0x47   :  { %13453 = vmatmul.mubr.msk.bf16.gmra.mxu1 %vm223_vm1, %v200_v49  ;;  %13392 = vmatprep.mubr.msk.bf16.mxu0 %vm223_vm1, %v169_v50  ;;  %v82_v49 = vld [vmem:[%s18167_s0 + $0x1d8] sm:$0xff]  ;;  %v145_v50 = vld [vmem:[%s18167_s0 + $0x3d0] sm:$0xff] }
  0x48   :  { %13456 = vmatprep.mubr.msk.bf16.mxu1 %vm223_vm1, %v201_v51  ;;  %v146_v51 = vld [vmem:[%s18167_s0 + $0x3d8] sm:$0xff]  ;;  %v180_v56 = vpack.c.bf16 %v82_v49, %v81_v48 }
  0x49   :  { %v212_v57 = vpack.c.bf16 %v146_v51, %v145_v50 }
  0x4e   :  { %13393 = vmatmul.mubr.msk.bf16.gmra.mxu0 %vm223_vm1, %v170_v60  ;;  %v85_v60 = vld [vmem:[%s18167_s0 + $0x1f0] sm:$0xff] }
  0x4f   :  { %13457 = vmatmul.mubr.msk.bf16.gmra.mxu1 %vm223_vm1, %v202_v61  ;;  %13396 = vmatprep.mubr.msk.bf16.mxu0 %vm223_vm1, %v171_v62  ;;  %v86_v61 = vld [vmem:[%s18167_s0 + $0x1f8] sm:$0xff]  ;;  %v149_v62 = vld [vmem:[%s18167_s0 + $0x3f0] sm:$0xff] }
  0x50   :  { %13460 = vmatprep.mubr.msk.bf16.mxu1 %vm223_vm1, %v203_v63  ;;  %v150_v63 = vld [vmem:[%s18167_s0 + $0x3f8] sm:$0xff]  ;;  %v182_v0 = vpack.c.bf16 %v86_v61, %v85_v60 }
  0x51   :  { %v214_v1 = vpack.c.bf16 %v150_v63, %v149_v62 }
  0x56   :  { %13397 = vmatmul.mubr.msk.bf16.gmra.mxu0 %vm223_vm1, %v172_v8 }
  0x57   :  { %13461 = vmatmul.mubr.msk.bf16.gmra.mxu1 %vm223_vm1, %v204_v9  ;;  %13400 = vmatprep.mubr.msk.bf16.mxu0 %vm223_vm1, %v173_v10 }
  0x58   :  { %13464 = vmatprep.mubr.msk.bf16.mxu1 %vm223_vm1, %v205_v11 }
  0x5e   :  { %13401 = vmatmul.mubr.msk.bf16.gmra.mxu0 %vm223_vm1, %v174_v20 }
  0x5f   :  { %13465 = vmatmul.mubr.msk.bf16.gmra.mxu1 %vm223_vm1, %v206_v21  ;;  %13404 = vmatprep.mubr.msk.bf16.mxu0 %vm223_vm1, %v175_v22 }
  0x60   :  { %13468 = vmatprep.mubr.msk.bf16.mxu1 %vm223_vm1, %v207_v23 }
  0x66   :  { %13405 = vmatmul.mubr.msk.bf16.gmra.mxu0 %vm223_vm1, %v176_v32 }
  0x67   :  { %13469 = vmatmul.mubr.msk.bf16.gmra.mxu1 %vm223_vm1, %v208_v33  ;;  %13408 = vmatprep.mubr.msk.bf16.mxu0 %vm223_vm1, %v177_v34 }
  0x68   :  { %13472 = vmatprep.mubr.msk.bf16.mxu1 %vm223_vm1, %v209_v35 }
  0x6e   :  { %13409 = vmatmul.mubr.msk.bf16.gmra.mxu0 %vm223_vm1, %v178_v44 }
  0x6f   :  { %13473 = vmatmul.mubr.msk.bf16.gmra.mxu1 %vm223_vm1, %v210_v45  ;;  %13412 = vmatprep.mubr.msk.bf16.mxu0 %vm223_vm1, %v179_v46 }
  0x70   :  { %13476 = vmatprep.mubr.msk.bf16.mxu1 %vm223_vm1, %v211_v47 }
  0x76   :  { %13413 = vmatmul.mubr.msk.bf16.gmra.mxu0 %vm223_vm1, %v180_v56 }
  0x77   :  { %13477 = vmatmul.mubr.msk.bf16.gmra.mxu1 %vm223_vm1, %v212_v57  ;;  %13416 = vmatprep.mubr.msk.bf16.mxu0 %vm223_vm1, %v181_v58 }
  0x78   :  { %13480 = vmatprep.mubr.msk.bf16.mxu1 %vm223_vm1, %v213_v59 }
  0x7e   :  { %13417 = vmatmul.mubr.msk.bf16.gmra.mxu0 %vm223_vm1, %v182_v0 }
  0x7f   :  { %13481 = vmatmul.mubr.msk.bf16.gmra.mxu1 %vm223_vm1, %v214_v1 }
  0xc6   :  { %v13358_v3 = vpop.f32.mrf.mxu0 }
  0xc7   :  { %v13422_v4 = vpop.f32.mrf.mxu1  ;;  %v463_v5 = vadd.f32 %v13358_v3, %v14004_v2 }
  0xc8   :  { %v719_v6 = vadd.f32 %v13422_v4, %v14004_v2  ;;  %v454_v7 = vpop.f32.mrf.mxu0 }
  0xc9   :  { %v710_v8 = vpop.f32.mrf.mxu1  ;;  %v967_v9 = vmax.f32 %v463_v5, 0.0  ;;  %v455_v11 = vadd.f32 %v14004_v2, %v454_v7 }
  0xca   :  { %v1031_v10 = vmax.f32 %v719_v6, 0.0  ;;  %v13359_v13 = vpop.f32.mrf.mxu0  ;;  %v711_v15 = vadd.f32 %v14004_v2, %v710_v8 }
  0xcb   :  { %v13423_v14 = vpop.f32.mrf.mxu1  ;;  %v466_v16 = vadd.f32 %v13359_v13, %v14004_v2  ;;  %v965_v18 = vmax.f32 %v455_v11, 0.0  ;;  %v1102_v22 = vmul.f32 %v14012_v12, %v967_v9 }
  0xcc   :  { %v722_v17 = vadd.f32 %v13423_v14, %v14004_v2  ;;  %v457_v19 = vpop.f32.mrf.mxu0  ;;  %v1166_v21 = vmul.f32 %v14012_v12, %v1031_v10  ;;  %v1029_v26 = vmax.f32 %v711_v15, 0.0 }
  0xcd   :  { %v713_v20 = vpop.f32.mrf.mxu1  ;;  %v968_v23 = vmax.f32 %v466_v16, 0.0  ;;  %1232 = vadd.xlane.f32.xlu1 %v1102_v22  ;;  %v458_v28 = vadd.f32 %v14004_v2, %v457_v19  ;;  %v1100_v32 = vmul.f32 %v14012_v12, %v965_v18 }
  0xce   :  { %1360 = vadd.xlane.f32.xlu0 %v1166_v21  ;;  %v13362_v24 = vpop.f32.mrf.mxu0  ;;  %v1032_v27 = vmax.f32 %v722_v17, 0.0  ;;  %v714_v29 = vadd.f32 %v14004_v2, %v713_v20  ;;  %v1164_v37 = vmul.f32 %v14012_v12, %v1029_v26 }
  0xcf   :  { %v13426_v25 = vpop.f32.mrf.mxu1  ;;  %v1103_v31 = vmul.f32 %v14012_v12, %v968_v23  ;;  %v479_v36 = vadd.f32 %v13362_v24, %v14004_v2  ;;  %v966_v38 = vmax.f32 %v458_v28, 0.0 }
  0xd0   :  { %v470_v30 = vpop.f32.mrf.mxu0  ;;  %v1030_v39 = vmax.f32 %v714_v29, 0.0  ;;  %v1167_v42 = vmul.f32 %v14012_v12, %v1032_v27  ;;  %v735_v47 = vadd.f32 %v13426_v25, %v14004_v2 }
  0xd1   :  { %v726_v33 = vpop.f32.mrf.mxu1  ;;  %1234 = vadd.xlane.f32.xlu1 %v1103_v31  ;;  %v971_v46 = vmax.f32 %v479_v36, 0.0  ;;  %v1101_v51 = vmul.f32 %v14012_v12, %v966_v38  ;;  %v471_v56 = vadd.f32 %v14004_v2, %v470_v30 }
  0xd2   :  { %1228 = vadd.xlane.f32.xlu0 %v1100_v32  ;;  %v13363_v34 = vpop.f32.mrf.mxu0  ;;  %v1165_v50 = vmul.f32 %v14012_v12, %v1030_v39  ;;  %v1035_v57 = vmax.f32 %v735_v47, 0.0  ;;  %v727_v4 = vadd.f32 %v14004_v2, %v726_v33 }
  0xd3   :  { %v13427_v35 = vpop.f32.mrf.mxu1  ;;  %v482_v40 = vadd.f32 %v13363_v34, %v14004_v2  ;;  %v1106_v61 = vmul.f32 %v14012_v12, %v971_v46  ;;  %v969_v3 = vmax.f32 %v471_v56, 0.0 }
  0xd4   :  { %v473_v41 = vpop.f32.mrf.mxu0  ;;  %v738_v49 = vadd.f32 %v13427_v35, %v14004_v2  ;;  %v1170_v8 = vmul.f32 %v14012_v12, %v1035_v57  ;;  %v1033_v14 = vmax.f32 %v727_v4, 0.0 }
  0xd5   :  { %v729_v43 = vpop.f32.mrf.mxu1  ;;  %1362 = vadd.xlane.f32.xlu1 %v1167_v42  ;;  %v972_v48 = vmax.f32 %v482_v40, 0.0  ;;  %v474_v58 = vadd.f32 %v14004_v2, %v473_v41  ;;  %v1104_v15 = vmul.f32 %v14012_v12, %v969_v3 }
  0xd6   :  { %1356 = vadd.xlane.f32.xlu0 %v1164_v37  ;;  %v13366_v44 = vpop.f32.mrf.mxu0  ;;  %v1036_v59 = vmax.f32 %v738_v49, 0.0  ;;  %v730_v6 = vadd.f32 %v14004_v2, %v729_v43  ;;  %v1168_v25 = vmul.f32 %v14012_v12, %v1033_v14 }
  0xd7   :  { %v13430_v45 = vpop.f32.mrf.mxu1  ;;  %v1107_v60 = vmul.f32 %v14012_v12, %v972_v48  ;;  %v970_v5 = vmax.f32 %v474_v58, 0.0  ;;  %v495_v17 = vadd.f32 %v13366_v44, %v14004_v2 }
  0xd8   :  { %v486_v52 = vpop.f32.mrf.mxu0  ;;  %v1171_v7 = vmul.f32 %v14012_v12, %v1036_v59  ;;  %v1034_v16 = vmax.f32 %v730_v6, 0.0  ;;  %v751_v24 = vadd.f32 %v13430_v45, %v14004_v2 }
  0xd9   :  { %v14031_v53 = vpop.f32.mrf.mxu1  ;;  %1358 = vadd.xlane.f32.xlu1 %v1165_v50  ;;  %v1105_v19 = vmul.f32 %v14012_v12, %v970_v5  ;;  %v975_v26 = vmax.f32 %v495_v17, 0.0  ;;  %v487_v34 = vadd.f32 %v14004_v2, %v486_v52 }
  0xda   :  { %1230 = vadd.xlane.f32.xlu0 %v1101_v51  ;;  %v13367_v54 = vpop.f32.mrf.mxu0  ;;  %v1169_v29 = vmul.f32 %v14012_v12, %v1034_v16  ;;  %v1039_v35 = vmax.f32 %v751_v24, 0.0  ;;  %v743_v45 = vadd.f32 %v14004_v2, %v14031_v53 }
  0xdb   :  { %v13431_v55 = vpop.f32.mrf.mxu1  ;;  %v498_v18 = vadd.f32 %v13367_v54, %v14004_v2  ;;  %v1110_v39 = vmul.f32 %v14012_v12, %v975_v26  ;;  %v973_v44 = vmax.f32 %v487_v34, 0.0 }
  0xdc   :  { %v489_v62 = vpop.f32.mrf.mxu0  ;;  %v754_v28 = vadd.f32 %v13431_v55, %v14004_v2  ;;  %v1174_v49 = vmul.f32 %v14012_v12, %v1039_v35  ;;  %v1037_v55 = vmax.f32 %v743_v45, 0.0 }
  0xdd   :  { %v745_v63 = vpop.f32.mrf.mxu1  ;;  %1242 = vadd.xlane.f32.xlu1 %v1107_v60  ;;  %v976_v27 = vmax.f32 %v498_v18, 0.0  ;;  %v490_v36 = vadd.f32 %v14004_v2, %v489_v62  ;;  %v1108_v53 = vmul.f32 %v14012_v12, %v973_v44 }
  0xde   :  { %1240 = vadd.xlane.f32.xlu0 %v1106_v61  ;;  %v14037_v0 = vpop.f32.mrf.mxu0  ;;  %v1040_v37 = vmax.f32 %v754_v28, 0.0  ;;  %v746_v47 = vadd.f32 %v14004_v2, %v745_v63  ;;  %v1172_v4 = vmul.f32 %v14012_v12, %v1037_v55 }
  0xdf   :  { %v14039_v1 = vpop.f32.mrf.mxu1  ;;  %v1111_v38 = vmul.f32 %v14012_v12, %v976_v27  ;;  %v974_v46 = vmax.f32 %v490_v36, 0.0  ;;  %v511_v57 = vadd.f32 %v14037_v0, %v14004_v2 }
  0xe0   :  { %v14045_v9 = vpop.f32.mrf.mxu0  ;;  %v1175_v48 = vmul.f32 %v14012_v12, %v1040_v37  ;;  %v1038_v56 = vmax.f32 %v746_v47, 0.0  ;;  %v767_v3 = vadd.f32 %v14039_v1, %v14004_v2 }
  0xe1   :  { %v14047_v10 = vpop.f32.mrf.mxu1  ;;  %1370 = vadd.xlane.f32.xlu1 %v1171_v7  ;;  %v1109_v59 = vmul.f32 %v14012_v12, %v974_v46  ;;  %v979_v0 = vmax.f32 %v511_v57, 0.0  ;;  %v503_v1 = vadd.f32 %v14004_v2, %v14045_v9 }
  0xe2   :  { %1368 = vadd.xlane.f32.xlu0 %v1170_v8  ;;  %v13371_v11 = vpop.f32.mrf.mxu0  ;;  %v1173_v7 = vmul.f32 %v14012_v12, %v1038_v56  ;;  %v1043_v16 = vmax.f32 %v767_v3, 0.0  ;;  %v759_v28 = vadd.f32 %v14004_v2, %v14047_v10 }
  0xe3   :  { %v14049_v13 = vpop.f32.mrf.mxu1  ;;  %v514_v58 = vadd.f32 %v13371_v11, %v14004_v2  ;;  %v977_v9 = vmax.f32 %v503_v1, 0.0 }
  0xe4   :  { %v14055_v20 = vpop.f32.mrf.mxu0  ;;  %v770_v6 = vadd.f32 %v14049_v13, %v14004_v2  ;;  %v1178_v35 = vmul.f32 %v14012_v12, %v1043_v16  ;;  %v1041_v44 = vmax.f32 %v759_v28, 0.0 }
  0xe5   :  { %v14057_v21 = vpop.f32.mrf.mxu1  ;;  %1238 = vadd.xlane.f32.xlu1 %v1105_v19  ;;  %v980_v5 = vmax.f32 %v514_v58, 0.0  ;;  %v506_v17 = vadd.f32 %v14004_v2, %v14055_v20  ;;  %v1114_v19 = vmul.f32 %v14012_v12, %v979_v0  ;;  %v1112_v10 = vmul.f32 %v14012_v12, %v977_v9 }
  0xe6   :  { %1236 = vadd.xlane.f32.xlu0 %v1104_v15  ;;  %v14059_v22 = vpop.f32.mrf.mxu0  ;;  %v1044_v13 = vmax.f32 %v770_v6, 0.0 }
  0xe7   :  { %v14061_v23 = vpop.f32.mrf.mxu1  ;;  %v1115_v18 = vmul.f32 %v14012_v12, %v980_v5  ;;  %v978_v20 = vmax.f32 %v506_v17, 0.0 }
  0xe8   :  { %v14067_v30 = vpop.f32.mrf.mxu0  ;;  %v1179_v34 = vmul.f32 %v14012_v12, %v1044_v13  ;;  %v783_v56 = vadd.f32 %v14061_v23, %v14004_v2 }
  0xe9   :  { %v14069_v31 = vpop.f32.mrf.mxu1  ;;  %1366 = vadd.xlane.f32.xlu1 %v1169_v29  ;;  %v762_v29 = vadd.f32 %v14004_v2, %v14057_v21  ;;  %v527_v21 = vadd.f32 %v14059_v22, %v14004_v2  ;;  %v1113_v47 = vmul.f32 %v14012_v12, %v978_v20  ;;  %v1176_v22 = vmul.f32 %v14012_v12, %v1041_v44 }
  0xea   :  { %1364 = vadd.xlane.f32.xlu0 %v1168_v25  ;;  %v14071_v32 = vpop.f32.mrf.mxu0  ;;  %v519_v23 = vadd.f32 %v14004_v2, %v14067_v30  ;;  %v1047_v6 = vmax.f32 %v783_v56, 0.0  ;;  %v775_v9 = vadd.f32 %v14004_v2, %v14069_v31 }
  0xeb   :  { %v14073_v33 = vpop.f32.mrf.mxu1  ;;  %v1042_v45 = vmax.f32 %v762_v29, 0.0  ;;  %v530_v46 = vadd.f32 %v14071_v32, %v14004_v2  ;;  %v983_v57 = vmax.f32 %v527_v21, 0.0 }
  0xec   :  { %v14079_v40 = vpop.f32.mrf.mxu0  ;;  %v786_v32 = vadd.f32 %v14073_v33, %v14004_v2  ;;  %v981_v30 = vmax.f32 %v519_v23, 0.0  ;;  %v1182_v29 = vmul.f32 %v14012_v12, %v1047_v6 }
  0xed   :  { %v14081_v41 = vpop.f32.mrf.mxu1  ;;  %1250 = vadd.xlane.f32.xlu1 %v1111_v38  ;;  %v984_v58 = vmax.f32 %v530_v46, 0.0  ;;  %v1118_v16 = vmul.f32 %v14012_v12, %v983_v57 }
  0xee   :  { %1248 = vadd.xlane.f32.xlu0 %v1110_v39  ;;  %v14083_v42 = vpop.f32.mrf.mxu0  ;;  %v1048_v33 = vmax.f32 %v786_v32, 0.0  ;;  %v778_v28 = vadd.f32 %v14004_v2, %v14081_v41  ;;  %v1116_v31 = vmul.f32 %v14012_v12, %v981_v30 }
  0xef   :  { %v14085_v43 = vpop.f32.mrf.mxu1  ;;  %v1119_v1 = vmul.f32 %v14012_v12, %v984_v58  ;;  %v543_v41 = vadd.f32 %v14083_v42, %v14004_v2 }
  0xf0   :  { %v14092_v50 = vpop.f32.mrf.mxu0  ;;  %v1183_v20 = vmul.f32 %v14012_v12, %v1048_v33  ;;  %v1046_v21 = vmax.f32 %v778_v28, 0.0  ;;  %v799_v32 = vadd.f32 %v14085_v43, %v14004_v2 }
  0xf1   :  { %v14094_v51 = vpop.f32.mrf.mxu1  ;;  %1378 = vadd.xlane.f32.xlu1 %v1175_v48 }
  0xf2   :  { %1376 = vadd.xlane.f32.xlu0 %v1174_v49  ;;  %v14096_v52 = vpop.f32.mrf.mxu0  ;;  %v1181_v6 = vmul.f32 %v14012_v12, %v1046_v21 }
  0xf3   :  { %v14098_v54 = vpop.f32.mrf.mxu1  ;;  %v546_v46 = vadd.f32 %v14096_v52, %v14004_v2 }
  0xf4   :  { %v14105_v60 = vpop.f32.mrf.mxu0  ;;  %v802_v52 = vadd.f32 %v14098_v54, %v14004_v2 }
  0xf5   :  { %v14107_v61 = vpop.f32.mrf.mxu1  ;;  %1246 = vadd.xlane.f32.xlu1 %v1109_v59  ;;  %v1177_v59 = vmul.f32 %v14012_v12, %v1042_v45  ;;  %v1045_v45 = vmax.f32 %v775_v9, 0.0  ;;  %v988_v23 = vmax.f32 %v546_v46, 0.0  ;;  %v538_v43 = vadd.f32 %v14004_v2, %v14105_v60 }
  0xf6   :  { %1244 = vadd.xlane.f32.xlu0 %v1108_v53  ;;  %v14109_v62 = vpop.f32.mrf.mxu0  ;;  %v1052_v30 = vmax.f32 %v802_v52, 0.0 }
  0xf7   :  { %v14111_v63 = vpop.f32.mrf.mxu1  ;;  %v1180_v42 = vmul.f32 %v14012_v12, %v1045_v45  ;;  %v1123_v9 = vmul.f32 %v14012_v12, %v988_v23  ;;  %v794_v45 = vadd.f32 %v14004_v2, %v14107_v61 }
  0xf8   :  { %v14119_v8 = vpop.f32.mrf.mxu0  ;;  %v1187_v60 = vmul.f32 %v14012_v12, %v1052_v30  ;;  %v815_v52 = vadd.f32 %v14111_v63, %v14004_v2 }
  0xf9   :  { %v14121_v11 = vpop.f32.mrf.mxu1  ;;  %1374 = vadd.xlane.f32.xlu1 %v1173_v7  ;;  %v522_v7 = vadd.f32 %v14004_v2, %v14079_v40 }
  0xfa   :  { %1372 = vadd.xlane.f32.xlu0 %v1172_v4  ;;  %v14123_v14 = vpop.f32.mrf.mxu0  ;;  %v1055_v63 = vmax.f32 %v815_v52, 0.0 }
  0xfb   :  { %v14125_v15 = vpop.f32.mrf.mxu1  ;;  %v982_v40 = vmax.f32 %v522_v7, 0.0  ;;  %v562_v61 = vadd.f32 %v14123_v14, %v14004_v2 }
  0xfc   :  { %v14133_v24 = vpop.f32.mrf.mxu0 }
  0xfd   :  { %v14135_v25 = vpop.f32.mrf.mxu1  ;;  %1258 = vadd.xlane.f32.xlu1 %v1115_v18 }
  0xfe   :  { %1256 = vadd.xlane.f32.xlu0 %v1114_v19  ;;  %v14137_v26 = vpop.f32.mrf.mxu0 }
  0xff   :  { %v14139_v27 = vpop.f32.mrf.mxu1 }
 0x100   :  { %v14147_v36 = vpop.f32.mrf.mxu0 }
 0x101   :  { %v14149_v37 = vpop.f32.mrf.mxu1  ;;  %1386 = vadd.xlane.f32.xlu1 %v1179_v34 }
 0x102   :  { %1384 = vadd.xlane.f32.xlu0 %v1178_v35  ;;  %v14151_v38 = vpop.f32.mrf.mxu0 }
 0x103   :  { %v14153_v39 = vpop.f32.mrf.mxu1 }
 0x104   :  { %v14161_v48 = vpop.f32.mrf.mxu0 }
 0x105   :  { %v14163_v49 = vpop.f32.mrf.mxu1  ;;  %1254 = vadd.xlane.f32.xlu1 %v1113_v47  ;;  %v1117_v47 = vmul.f32 %v14012_v12, %v982_v40 }
 0x106   :  { %1252 = vadd.xlane.f32.xlu0 %v1112_v10  ;;  %v14165_v55 = vpop.f32.mrf.mxu0 }
 0x107   :  { %v14167_v53 = vpop.f32.mrf.mxu1 }
 0x108   :  { %v14175_v3 = vpop.f32.mrf.mxu0 }
 0x109   :  { %v14177_v4 = vpop.f32.mrf.mxu1  ;;  %1382 = vadd.xlane.f32.xlu1 %v1177_v59  ;;  %v987_v59 = vmax.f32 %v543_v41, 0.0 }
 0x10a   :  { %1380 = vadd.xlane.f32.xlu0 %v1176_v22  ;;  %v14179_v0 = vpop.f32.mrf.mxu0 }
 0x10b   :  { %v14181_v5 = vpop.f32.mrf.mxu1  ;;  %v1122_v54 = vmul.f32 %v14012_v12, %v987_v59 }
 0x10c   :  { %v14189_v17 = vpop.f32.mrf.mxu0 }
 0x10d   :  { %v14191_v13 = vpop.f32.mrf.mxu1  ;;  %1266 = vadd.xlane.f32.xlu1 %v1119_v1  ;;  %v535_v1 = vadd.f32 %v14004_v2, %v14092_v50  ;;  %v986_v50 = vmax.f32 %v538_v43, 0.0  ;;  %v992_v43 = vmax.f32 %v562_v61, 0.0  ;;  %v14297_v61 = vstv %s18171_s4 }
 0x10e   :  { %1264 = vadd.xlane.f32.xlu0 %v1118_v16  ;;  %v14193_v18 = vpop.f32.mrf.mxu0  ;;  %v1051_v16 = vmax.f32 %v799_v32, 0.0  ;;  %v1050_v32 = vmax.f32 %v794_v45, 0.0  ;;  %18201 = vst [vmem:[#allocation7_spill] sm:$0xff] %v14297_v61 }
 0x10f   :  { %v14195_v19 = vpop.f32.mrf.mxu1 }
 0x110   :  { %v14203_v34 = vpop.f32.mrf.mxu0  ;;  %v1185_v14 = vmul.f32 %v14012_v12, %v1050_v32  ;;  %v810_v32 = vadd.f32 %v14004_v2, %v14135_v25 }
 0x111   :  { %v14205_v35 = vpop.f32.mrf.mxu1  ;;  %1394 = vadd.xlane.f32.xlu1 %v1183_v20  ;;  %v985_v20 = vmax.f32 %v535_v1, 0.0  ;;  %v18173_v1 = vlaneseq }
 0x112   :  { %1392 = vadd.xlane.f32.xlu0 %v1182_v29  ;;  %v14207_v44 = vpop.f32.mrf.mxu0  ;;  %v791_v29 = vadd.f32 %v14004_v2, %v14094_v51  ;;  %v559_v51 = vadd.f32 %v14109_v62, %v14004_v2  ;;  %v818_v62 = vadd.f32 %v14125_v15, %v14004_v2  ;;  %v554_v15 = vadd.f32 %v14004_v2, %v14133_v24 }
 0x113   :  { %v14209_v10 = vpop.f32.mrf.mxu1  ;;  %v575_v24 = vadd.f32 %v14137_v26, %v14004_v2 }
 0x114   :  { %v14217_v56 = vpop.f32.mrf.mxu0  ;;  %v1049_v46 = vmax.f32 %v791_v29, 0.0  ;;  %v13517_v29 = vmov 1966171168   ;;  %v1056_v45 = vmax.f32 %v818_v62, 0.0  ;;  %v990_v52 = vmax.f32 %v554_v15, 0.0 }
 0x115   :  { %v14219_v22 = vpop.f32.mrf.mxu1  ;;  %1262 = vadd.xlane.f32.xlu1 %v1117_v47  ;;  %v1120_v47 = vmul.f32 %v14012_v12, %v985_v20  ;;  %v14278_v20 = vshrl.u32 %v18173_v1, 7  ;;  %v823_v1 = vadd.f32 %v14004_v2, %v14149_v37  ;;  %v591_v37 = vadd.f32 %v14165_v55, %v14004_v2 }
 0x116   :  { %1260 = vadd.xlane.f32.xlu0 %v1116_v31  ;;  %v14221_v57 = vpop.f32.mrf.mxu0  ;;  %v1186_v31 = vmul.f32 %v14012_v12, %v1051_v16  ;;  %v991_v16 = vmax.f32 %v559_v51, 0.0 }
 0x117   :  { %v14223_v58 = vpop.f32.mrf.mxu1  ;;  %18200 = vst [vmem:[#allocation6_spill] sm:$0xff] %v14278_v20  ;;  %v14309_v26 = vsub.s32 1, %v14278_v20 }
 0x118   :  { %v14231_v7 = vpop.f32.mrf.mxu0 }
 0x119   :  { %1390 = vadd.xlane.f32.xlu1 %v1181_v6  ;;  %v14233_v33 = vpop.f32.mrf.mxu1  ;;  %v1184_v6 = vmul.f32 %v14012_v12, %v1049_v46  ;;  %18203 = vst [vmem:[#allocation9_spill] sm:$0xff] %v14309_v26 }
 0x11a   :  { %1388 = vadd.xlane.f32.xlu0 %v1180_v42  ;;  %v14241_v40 = vpop.f32.mrf.mxu0  ;;  %v1121_v42 = vmul.f32 %v14012_v12, %v986_v50  ;;  %v5843_v50 = vunpack.c.l.s4 %v13517_v29  ;;  %v1054_v29 = vmax.f32 %v810_v32, 0.0  ;;  %v14331_v32 = vsub.s32 6, %v14278_v20 }
 0x11b   :  { %v14243_v28 = vpop.f32.mrf.mxu1 }
 0x11c   :  { %v14251_v21 = vpop.f32.mrf.mxu0  ;;  %18208 = vst [vmem:[#allocation14_spill] sm:$0xff] %v14331_v32 }
 0x11d   :  { %1274 = vadd.xlane.f32.xlu1 %v1123_v9  ;;  %v14253_v41 = vpop.f32.mrf.mxu1 }
 0x11e   :  { %1272 = vadd.xlane.f32.xlu0 %v1122_v54  ;;  %v14261_v59 = vpop.f32.mrf.mxu0  ;;  %v551_v54 = vadd.f32 %v14004_v2, %v14119_v8  ;;  %v807_v8 = vadd.f32 %v14004_v2, %v14121_v11  ;;  %v1190_v11 = vmul.f32 %v14012_v12, %v1055_v63  ;;  %v831_v63 = vadd.f32 %v14139_v27, %v14004_v2 }
 0x11f   :  { %v14263_v23 = vpop.f32.mrf.mxu1 }
 0x120   :  { %v14271_v30 = vpop.f32.mrf.mxu0  ;;  %v989_v51 = vmax.f32 %v551_v54, 0.0  ;;  %v1053_v62 = vmax.f32 %v807_v8, 0.0  ;;  %v14315_v54 = vsub.s32 3, %v14278_v20 }
 0x121   :  { %1402 = vadd.xlane.f32.xlu1 %v1187_v60  ;;  %v14273_v9 = vpop.f32.mrf.mxu1  ;;  %v1127_v60 = vmul.f32 %v14012_v12, %v992_v43  ;;  %v14306_v43 = vsub.s32 0, %v14278_v20 }
 0x122   :  { %1400 = vadd.xlane.f32.xlu0 %v1186_v31  ;;  %v1126_v31 = vmul.f32 %v14012_v12, %v991_v16  ;;  %v14284_v46 = vpop.f32.mrf.mxu0  ;;  %18205 = vst [vmem:[#allocation11_spill] sm:$0xff] %v14315_v54  ;;  %v1124_v8 = vmul.f32 %v14012_v12, %v989_v51  ;;  %v570_v51 = vadd.f32 %v14004_v2, %v14161_v48 }
 0x123   :  { %18202 = vst [vmem:[#allocation8_spill] sm:$0xff] %v14306_v43 }
 0x124   :  { %v14301_v16 = vpop.f32.mrf.mxu0 }
 0x125   :  { %1270 = vadd.xlane.f32.xlu1 %v1121_v42  ;;  %v5844_v42 = vunpack.c.0.s8 %v5843_v50 }
 0x126   :  { %1268 = vadd.xlane.f32.xlu0 %v1120_v47  ;;  %v14286_v47 = vpop.f32.mrf.mxu1  ;;  %v14319_v50 = vpop.f32.mrf.mxu0 }
 0x127   :  { %v14334_v27 = vsub.s32 %v5844_v42, %v14278_v20  ;;  %v826_v42 = vadd.f32 %v14004_v2, %v14163_v49  ;;  %v594_v49 = vadd.f32 %v14179_v0, %v14004_v2  ;;  %v999_v0 = vmax.f32 %v591_v37, 0.0 }
 0x128   :  { %v14303_v25 = vpop.f32.mrf.mxu1  ;;  %v14355_v48 = vpop.f32.mrf.mxu0 }
 0x129   :  { %1398 = vadd.xlane.f32.xlu1 %v1185_v14  ;;  %v14312_v14 = vsub.s32 2, %v14278_v20  ;;  %18209 = vst [vmem:[#allocation15_spill] sm:$0xff] %v14334_v27  ;;  %v1188_v27 = vmul.f32 %v14012_v12, %v1053_v62  ;;  %v839_v62 = vadd.f32 %v14004_v2, %v14177_v4  ;;  %v1058_v54 = vmax.f32 %v826_v42, 0.0 }
 0x12a   :  { %1396 = vadd.xlane.f32.xlu0 %v1184_v6  ;;  %v1191_v6 = vmul.f32 %v14012_v12, %v1056_v45  ;;  %v14321_v15 = vpop.f32.mrf.mxu1  ;;  %v14324_v45 = vsub.s32 4, %v14278_v20 }
 0x12b   :  { %18204 = vst [vmem:[#allocation10_spill] sm:$0xff] %v14312_v14 }
 0x12c   :  { %18206 = vst [vmem:[#allocation12_spill] sm:$0xff] %v14324_v45  ;;  %v14357_v32 = vpop.f32.mrf.mxu1 }
 0x12d   :  { %1282 = vadd.xlane.f32.xlu1 %v1127_v60  ;;  %v14327_v60 = vsub.s32 5, %v14278_v20 }
 0x12e   :  { %1280 = vadd.xlane.f32.xlu0 %v1126_v31  ;;  %v995_v31 = vmax.f32 %v575_v24, 0.0  ;;  %v834_v24 = vadd.f32 %v14153_v39, %v14004_v2  ;;  %v583_v39 = vadd.f32 %v14004_v2, %v14175_v3  ;;  %v586_v3 = vadd.f32 %v14004_v2, %v14189_v17 }
 0x12f   :  { %18207 = vst [vmem:[#allocation13_spill] sm:$0xff] %v14327_v60  ;;  %v1125_v60 = vmul.f32 %v14012_v12, %v990_v52  ;;  %v847_v52 = vadd.f32 %v14167_v53, %v14004_v2 }
 0x130   :  { %v1130_v53 = vmul.f32 %v14012_v12, %v995_v31  ;;  %v1060_v45 = vmax.f32 %v834_v24, 0.0  ;;  %v997_v31 = vmax.f32 %v583_v39, 0.0 }
 0x131   :  { %1410 = vadd.xlane.f32.xlu1 %v1191_v6  ;;  %v567_v6 = vadd.f32 %v14004_v2, %v14147_v36  ;;  %v1059_v36 = vmax.f32 %v831_v63, 0.0  ;;  %v1063_v14 = vmax.f32 %v847_v52, 0.0  ;;  %v14387_v52 = vmul.f32 %v14012_v12, %v1058_v54 }
 0x132   :  { %1408 = vadd.xlane.f32.xlu0 %v1190_v11  ;;  %v578_v11 = vadd.f32 %v14151_v38, %v14004_v2  ;;  %v1189_v38 = vmul.f32 %v14012_v12, %v1054_v29  ;;  %v850_v29 = vadd.f32 %v14181_v5, %v14004_v2  ;;  %v842_v5 = vadd.f32 %v14004_v2, %v14191_v13 }
 0x133   :  { %v993_v55 = vmax.f32 %v567_v6, 0.0  ;;  %v1194_v4 = vmul.f32 %v14012_v12, %v1059_v36  ;;  %v14373_v6 = vpop.f32.mrf.mxu0  ;;  %v607_v36 = vadd.f32 %v14193_v18, %v14004_v2  ;;  %v1195_v13 = vmul.f32 %v14012_v12, %v1060_v45 }
 0x134   :  { %v996_v63 = vmax.f32 %v578_v11, 0.0  ;;  %v1000_v11 = vmax.f32 %v594_v49, 0.0  ;;  %v1064_v24 = vmax.f32 %v850_v29, 0.0  ;;  %v1062_v39 = vmax.f32 %v842_v5, 0.0 }
 0x135   :  { %1278 = vadd.xlane.f32.xlu1 %v1125_v60  ;;  %v1057_v60 = vmax.f32 %v823_v1, 0.0  ;;  %v14375_v1 = vpop.f32.mrf.mxu1  ;;  %v1128_v17 = vmul.f32 %v14012_v12, %v993_v55  ;;  %v14390_v49 = vmul.f32 %v14012_v12, %v999_v0  ;;  %v14395_v29 = vmul.f32 %v14012_v12, %v1063_v14  ;;  %v14397_v18 = vpop.f32.mrf.mxu0 }
 0x136   :  { %1276 = vadd.xlane.f32.xlu0 %v1124_v8  ;;  %v994_v8 = vmax.f32 %v570_v51, 0.0  ;;  %v1061_v51 = vmax.f32 %v839_v62, 0.0  ;;  %v1131_v42 = vmul.f32 %v14012_v12, %v996_v63  ;;  %v863_v62 = vadd.f32 %v14195_v19, %v14004_v2 }
 0x137   :  { %v14399_v45 = vpop.f32.mrf.mxu1  ;;  %v14402_v55 = vmul.f32 %v14012_v12, %v1000_v11  ;;  %v14405_v54 = vmul.f32 %v14012_v12, %v1064_v24  ;;  %v14408_v63 = vmul.f32 %v14012_v12, %v997_v31  ;;  %v1003_v19 = vmax.f32 %v607_v36, 0.0 }
 0x138   :  { %v1129_v37 = vmul.f32 %v14012_v12, %v994_v8  ;;  %v599_v14 = vadd.f32 %v14004_v2, %v14203_v34  ;;  %v855_v8 = vadd.f32 %v14004_v2, %v14205_v35  ;;  %v602_v5 = vadd.f32 %v14004_v2, %v14217_v56 }
 0x139   :  { %1406 = vadd.xlane.f32.xlu1 %v1189_v38  ;;  %v998_v38 = vmax.f32 %v586_v3, 0.0  ;;  %v14419_v3 = vpop.f32.mrf.mxu0  ;;  %v14421_v0 = vpop.f32.mrf.mxu1  ;;  %v866_v31 = vadd.f32 %v14209_v10, %v14004_v2  ;;  %v858_v34 = vadd.f32 %v14004_v2, %v14219_v22  ;;  %v14433_v35 = vmul.f32 %v14012_v12, %v1062_v39 }
 0x13a   :  { %1404 = vadd.xlane.f32.xlu0 %v1188_v27  ;;  %v14380_v27 = vmul.f32 %v14012_v12, %v1057_v60  ;;  %v14411_v60 = vmul.f32 %v14012_v12, %v1061_v51  ;;  %v623_v51 = vadd.f32 %v14221_v57, %v14004_v2  ;;  %v879_v56 = vadd.f32 %v14223_v58, %v14004_v2 }
 0x13b   :  { %v14428_v11 = vmul.f32 %v14012_v12, %v998_v38  ;;  %v615_v10 = vadd.f32 %v14004_v2, %v14231_v7  ;;  %v626_v24 = vadd.f32 %v14241_v40, %v14004_v2  ;;  %v871_v22 = vadd.f32 %v14004_v2, %v14233_v33  ;;  %v14450_v38 = vpop.f32.mrf.mxu0  ;;  %v14452_v58 = vpop.f32.mrf.mxu1 }
 0x13c   :  { %v14448_v57 = vmul.f32 %v14012_v12, %v1003_v19  ;;  %v1002_v7 = vmax.f32 %v602_v5, 0.0  ;;  %v1068_v39 = vmax.f32 %v866_v31, 0.0  ;;  %v618_v40 = vadd.f32 %v14004_v2, %v14251_v21 }
 0x13d   :  { %1290 = vadd.xlane.f32.xlu1 %v1131_v42  ;;  %v1001_v42 = vmax.f32 %v599_v14, 0.0  ;;  %v1007_v33 = vmax.f32 %v623_v51, 0.0  ;;  %v874_v19 = vadd.f32 %v14004_v2, %v14253_v41  ;;  %v1069_v26 = vmax.f32 %v871_v22, 0.0 }
 0x13e   :  { %1288 = vadd.xlane.f32.xlu0 %v1130_v53  ;;  %v610_v53 = vadd.f32 %v14207_v44, %v14004_v2  ;;  %v1067_v44 = vmax.f32 %v863_v62, 0.0  ;;  %v1066_v62 = vmax.f32 %v858_v34, 0.0  ;;  %v14474_v34 = vpop.f32.mrf.mxu1  ;;  %v14477_v41 = vmul.f32 %v14012_v12, %v1068_v39 }
 0x13f   :  { %v14465_v31 = vmul.f32 %v14012_v12, %v1001_v42  ;;  %v14480_v51 = vmul.f32 %v14012_v12, %v1002_v7  ;;  %v887_v7 = vadd.f32 %v14004_v2, %v14273_v9 }
 0x140   :  { %v1004_v36 = vmax.f32 %v610_v53, 0.0  ;;  %v14457_v14 = vmul.f32 %v14012_v12, %v1067_v44  ;;  %v1005_v53 = vmax.f32 %v615_v10, 0.0  ;;  %v1006_v44 = vmax.f32 %v618_v40, 0.0 }
 0x141   :  { %1418 = vadd.xlane.f32.xlu1 %v1195_v13  ;;  %v1065_v13 = vmax.f32 %v855_v8, 0.0  ;;  %v1008_v8 = vmax.f32 %v626_v24, 0.0  ;;  %v1070_v10 = vmax.f32 %v874_v19, 0.0  ;;  %v895_v24 = vadd.f32 %v14263_v23, %v14004_v2 }
 0x142   :  { %1416 = vadd.xlane.f32.xlu0 %v1194_v4  ;;  %v882_v4 = vadd.f32 %v14243_v28, %v14004_v2  ;;  %v1071_v28 = vmax.f32 %v879_v56, 0.0  ;;  %v14462_v5 = vmul.f32 %v14012_v12, %v1004_v36  ;;  %v14483_v56 = vmul.f32 %v14012_v12, %v1066_v62 }
 0x143   :  { %v14468_v21 = vmul.f32 %v14012_v12, %v1065_v13  ;;  %v631_v13 = vadd.f32 %v14004_v2, %v14271_v30  ;;  %v642_v23 = vadd.f32 %v14284_v46, %v14004_v2  ;;  %v634_v62 = vadd.f32 %v14004_v2, %v14301_v16 }
 0x144   :  { %v1072_v43 = vmax.f32 %v882_v4, 0.0  ;;  %v14493_v22 = vmul.f32 %v14012_v12, %v1071_v28  ;;  %v14496_v4 = vmul.f32 %v14012_v12, %v1008_v8  ;;  %v14522_v40 = vmul.f32 %v14012_v12, %v1006_v44 }
 0x145   :  { %1286 = vadd.xlane.f32.xlu1 %v1129_v37  ;;  %v14472_v37 = vpop.f32.mrf.mxu0  ;;  %v890_v30 = vadd.f32 %v14004_v2, %v14303_v25  ;;  %v1075_v9 = vmax.f32 %v895_v24, 0.0  ;;  %v14529_v46 = vmul.f32 %v14012_v12, %v1070_v10  ;;  %v655_v16 = vadd.f32 %v14319_v50, %v14004_v2 }
 0x146   :  { %1284 = vadd.xlane.f32.xlu0 %v1128_v17  ;;  %v639_v17 = vadd.f32 %v14261_v59, %v14004_v2  ;;  %v14488_v59 = vmul.f32 %v14012_v12, %v1007_v33  ;;  %v14499_v42 = vmul.f32 %v14012_v12, %v1072_v43  ;;  %v14515_v43 = vpop.f32.mrf.mxu1  ;;  %v647_v25 = vadd.f32 %v14004_v2, %v14355_v48 }
 0x147   :  { %v14513_v39 = vpop.f32.mrf.mxu0  ;;  %v914_v19 = vadd.f32 %v14375_v1, %v14004_v2  ;;  %v1009_v50 = vmax.f32 %v631_v13, 0.0  ;;  %v1073_v8 = vmax.f32 %v887_v7, 0.0  ;;  %v1074_v10 = vmax.f32 %v890_v30, 0.0 }
 0x148   :  { %v1011_v36 = vmax.f32 %v639_v17, 0.0  ;;  %v14537_v28 = vpop.f32.mrf.mxu1  ;;  %v1010_v17 = vmax.f32 %v634_v62, 0.0  ;;  %v650_v48 = vadd.f32 %v14004_v2, %v14397_v18  ;;  %v14555_v1 = vmul.f32 %v14012_v12, %v1075_v9 }
 0x149   :  { %1414 = vadd.xlane.f32.xlu1 %v14387_v52  ;;  %v14502_v52 = vmul.f32 %v14012_v12, %v1005_v53  ;;  %v14535_v33 = vpop.f32.mrf.mxu0  ;;  %v1012_v53 = vmax.f32 %v642_v23, 0.0  ;;  %v906_v24 = vadd.f32 %v14004_v2, %v14399_v45  ;;  %v1013_v23 = vmax.f32 %v647_v25, 0.0 }
 0x14a   :  { %1412 = vadd.xlane.f32.xlu0 %v14380_v27  ;;  %v14505_v27 = vmul.f32 %v14012_v12, %v1069_v26  ;;  %v898_v26 = vadd.f32 %v14286_v47, %v14004_v2  ;;  %v911_v47 = vadd.f32 %v14321_v15, %v14004_v2  ;;  %v14548_v15 = vmul.f32 %v14012_v12, %v1011_v36  ;;  %v934_v13 = vpop.f32.mrf.mxu1 }
 0x14b   :  { %v678_v36 = vpop.f32.mrf.mxu0  ;;  %v14560_v18 = vmul.f32 %v14012_v12, %v1012_v53  ;;  %v671_v30 = vadd.f32 %v14419_v3, %v14004_v2  ;;  %v1014_v9 = vmax.f32 %v650_v48, 0.0 }
 0x14c   :  { %v1076_v44 = vmax.f32 %v898_v26, 0.0  ;;  %v1080_v26 = vmax.f32 %v914_v19, 0.0 }
 0x14d   :  { %1298 = vadd.xlane.f32.xlu1 %v14402_v55  ;;  %v903_v55 = vadd.f32 %v14004_v2, %v14357_v32  ;;  %v1015_v32 = vmax.f32 %v655_v16, 0.0  ;;  %v14574_v16 = vmul.f32 %v14012_v12, %v1010_v17  ;;  %v13415_v19 = vpop.f32.mrf.mxu0  ;;  %v14592_v17 = vmul.f32 %v14012_v12, %v1013_v23 }
 0x14e   :  { %1296 = vadd.xlane.f32.xlu0 %v14390_v49  ;;  %v658_v49 = vadd.f32 %v14373_v6, %v14004_v2  ;;  %v1079_v6 = vmax.f32 %v911_v47, 0.0  ;;  %v14571_v45 = vmul.f32 %v14012_v12, %v1076_v44  ;;  %v14577_v47 = vmul.f32 %v14012_v12, %v1074_v10 }
 0x14f   :  { %v1077_v62 = vmax.f32 %v903_v55, 0.0  ;;  %18212 = vst [vmem:[#allocation18_spill] sm:$0xff] %v14574_v16  ;;  %v14585_v3 = vmul.f32 %v14012_v12, %v1015_v32  ;;  %v927_v55 = vadd.f32 %v14421_v0, %v14004_v2  ;;  %18216 = vst [vmem:[#allocation22_spill] sm:$0xff] %v14592_v17  ;;  %v1019_v10 = vmax.f32 %v671_v30, 0.0  ;;  %v14606_v2 = vld [vmem:[%s18169_s2] ss:$0 sm:$0xff] }
 0x150   :  { %v1016_v7 = vmax.f32 %v658_v49, 0.0  ;;  %18213 = vst [vmem:[#allocation19_spill] sm:$0xff] %v14577_v47  ;;  %v14582_v25 = vmul.f32 %v14012_v12, %v1079_v6  ;;  %v1078_v49 = vmax.f32 %v906_v24, 0.0  ;;  %v663_v0 = vadd.f32 %v14606_v2, %v14450_v38  ;;  %v14615_v32 = vld [vmem:[%s18170_s3] ss:$0 sm:$0xff]  ;;  %s13519_s2 = smov [#allocation3]  }
 0x151   :  { %1426 = vadd.xlane.f32.xlu1 %v14405_v54  ;;  %v14563_v54 = vmul.f32 %v14012_v12, %v1009_v50  ;;  %18215 = vst [vmem:[#allocation21_spill] sm:$0xff] %v14585_v3  ;;  %v13479_v50 = vpop.f32.mrf.mxu1  ;;  %v919_v48 = vadd.f32 %v14606_v2, %v14452_v58  ;;  %v674_v6 = vadd.f32 %v14606_v2, %v14472_v37  ;;  %v13518_v23 = vmov 0   ;;  %s13215_s3 = sshll.u32 %s13519_s2, 4  ;;  %s13216_s3 = int_to_ptr.vmem [resolvable:$true] %s13215_s3 }
 0x152   :  { %1424 = vadd.xlane.f32.xlu0 %v14395_v29  ;;  %v14566_v29 = vmul.f32 %v14012_v12, %v1073_v8  ;;  %18214 = vst [vmem:[#allocation20_spill] sm:$0xff] %v14582_v25  ;;  %v14601_v44 = vmul.f32 %v14012_v12, %v1016_v7  ;;  %v930_v24 = vadd.f32 %v14606_v2, %v14474_v34  ;;  %v14625_v38 = vsub.s32 7, %v14278_v20  ;;  %s13495_s24 = scalar_lea.vmem %s13216_s3, 128  ;;  %p13500_p1 = scmp.lt.s32.totalorder %s13216_s3, %s13216_s3 }
 0x153   :  { %18210 = vst [vmem:[#allocation16_spill] sm:$0xff] %v14563_v54  ;;  %13491 = vset.pattern.permute.xlu1 %v13518_v23  ;;  %13492 = vset.pattern.permute.xlu0 %v13518_v23  ;;  %v14630_v58 = vmul.f32 %v14615_v32, %v1078_v49  ;;  %v1083_v7 = vmax.f32 %v927_v55, 0.0  ;;  %v666_v37 = vadd.f32 %v14606_v2, %v14513_v39  ;;  %v937_v49 = vpop.f32.mrf.mxu1  ;;  %v1081_v23 = vmax.f32 %v919_v48, 0.0  ;;  %p13496_p0 = scmp.ne.s32.totalorder %s13216_s3, %s13495_s24  ;;  %p13501_p2 = scmp.lt.s32.totalorder %s13495_s24, %s13495_s24 }
 0x154   :  { %18211 = vst [vmem:[#allocation17_spill] sm:$0xff] %v14566_v29  ;;  %18219 = vst [vmem:[#allocation25_spill] sm:$0xff] %v14601_v44  ;;  %v922_v34 = vadd.f32 %v14606_v2, %v14515_v43  ;;  %v687_v30 = vadd.f32 %v14606_v2, %v14535_v33  ;;  %v14647_v39 = vmul.f32 %v14615_v32, %v1019_v10  ;;  %v1017_v43 = vmax.f32 %v663_v0, 0.0 }
 0x155   :  { %1294 = vadd.xlane.f32.xlu1 %v14428_v11  ;;  %v14598_v11 = vmul.f32 %v14012_v12, %v1080_v26  ;;  %18221 = vst [vmem:[#allocation27_spill] sm:$0xff] %v14630_v58  ;;  %v690_v20 = vadd.f32 %v14606_v2, %v13415_v19  ;;  %v1084_v58 = vmax.f32 %v930_v24, 0.0  ;;  %v1018_v10 = vmax.f32 %v666_v37, 0.0  ;;  %p13502_p3 = por %p13501_p2, %p13500_p1 }
 0x156   :  { %1292 = vadd.xlane.f32.xlu0 %v14408_v63  ;;  %v1233_v8 = vpop.xlane.xlu1 %1232  ;;  %v14595_v63 = vmul.f32 %v14012_v12, %v1077_v62  ;;  %v14618_v12 = vmul.f32 %v14615_v32, %v1014_v9  ;;  %v681_v62 = vpop.f32.mrf.mxu0  ;;  %v935_v9 = vadd.f32 %v14606_v2, %v934_v13  ;;  %18222 = vst [vmem:[#allocation28_spill] sm:$0xff] %v14647_v39  ;;  %v1082_v0 = vmax.f32 %v922_v34, 0.0 }
 0x157   :  { %v14589_v53 = vpop.xlane.xlu0 %1360  ;;  %18218 = vst [vmem:[#allocation24_spill] sm:$0xff] %v14598_v11  ;;  %v682_v33 = vadd.f32 %v14606_v2, %v681_v62  ;;  %v14655_v13 = vmul.f32 %v14615_v32, %v1083_v7  ;;  %v938_v48 = vadd.f32 %v14606_v2, %v937_v49  ;;  %v1024_v7 = vmax.f32 %v690_v20, 0.0  ;;  %p13503_p4 = pnand %p13502_p3, %p13496_p0 }
 0x158   :  { %18217 = vst [vmem:[#allocation23_spill] sm:$0xff] %v14595_v63  ;;  %18220 = vst [vmem:[#allocation26_spill] sm:$0xff] %v14618_v12  ;;  %v1020_v63 = vmax.f32 %v674_v6, 0.0  ;;  %v13418_v17 = vpop.f32.mrf.mxu0  ;;  %v1023_v6 = vmax.f32 %v687_v30, 0.0  ;;  %v1085_v39 = vmax.f32 %v935_v9, 0.0  ;;  %v14673_v34 = vmul.f32 %v14615_v32, %v1084_v58 }
 0x159   :  { %1422 = vadd.xlane.f32.xlu1 %v14433_v35  ;;  %v679_v35 = vadd.f32 %v14606_v2, %v678_v36  ;;  %v946_v36 = vadd.f32 %v14606_v2, %v13479_v50  ;;  %18223 = vst [vmem:[#allocation29_spill] sm:$0xff] %v14655_v13  ;;  %v14661_v50 = vadd.f32 %v14297_v61, %v1233_v8  ;;  %v1022_v30 = vmax.f32 %v682_v33, 0.0 }
 0x15a   :  { %1420 = vadd.xlane.f32.xlu0 %v14411_v60  ;;  %v14636_v26 = vpop.xlane.xlu1 %1234  ;;  %v943_v60 = vadd.f32 %v14606_v2, %v14537_v28  ;;  %v13482_v28 = vpop.f32.mrf.mxu1  ;;  %v14670_v37 = vmul.f32 %v14615_v32, %v1020_v63  ;;  %18227 = vst [vmem:[#allocation33_spill] sm:$0xff] %v14673_v34  ;;  %v14680_v8 = vmul.f32 %v14615_v32, %v1018_v10  ;;  %v1086_v63 = vmax.f32 %v938_v48, 0.0  ;;  %v18236_v48 = vld [vmem:[#allocation9_spill] sm:$0xff] }
 0x15b   :  { %v14644_v55 = vpop.xlane.xlu0 %1228  ;;  %v1021_v24 = vmax.f32 %v679_v35, 0.0  ;;  %v1088_v35 = vmax.f32 %v946_v36, 0.0  ;;  %v14683_v20 = vmul.f32 %v14615_v32, %v1082_v0  ;;  %v703_v58 = vadd.f32 %v14606_v2, %v13418_v17  ;;  %v18235_v17 = vld [vmem:[#allocation8_spill] sm:$0xff] }
 0x15c   :  { %v1087_v62 = vmax.f32 %v943_v60, 0.0  ;;  %18226 = vst [vmem:[#allocation32_spill] sm:$0xff] %v14670_v37  ;;  %v694_v60 = vpop.f32.mrf.mxu0  ;;  %v950_v9 = vpop.f32.mrf.mxu1  ;;  %18228 = vst [vmem:[#allocation34_spill] sm:$0xff] %v14680_v8  ;;  %v1552_v36 = vadd.f32 %v14297_v61, %v14589_v53  ;;  %v14703_v10 = vmul.f32 %v14615_v32, %v1024_v7  ;;  %v1809_v0 = vrot.slane %v14661_v50, %v18235_v17 }
 0x15d   :  { %1306 = vadd.xlane.f32.xlu1 %v14462_v5  ;;  %v14664_v5 = vmul.f32 %v14615_v32, %v1017_v43  ;;  %18229 = vst [vmem:[#allocation35_spill] sm:$0xff] %v14683_v20  ;;  %v14692_v33 = vmul.f32 %v14615_v32, %v1021_v24  ;;  %v14710_v24 = vmul.f32 %v14615_v32, %v1022_v30  ;;  %v1027_v30 = vmax.f32 %v703_v58, 0.0 }
 0x15e   :  { %1304 = vadd.xlane.f32.xlu0 %v14448_v57  ;;  %v14658_v19 = vpop.xlane.xlu1 %1362  ;;  %v14667_v57 = vmul.f32 %v14615_v32, %v1081_v23  ;;  %v14689_v23 = vmul.f32 %v14615_v32, %v1023_v6  ;;  %18234 = vst [vmem:[#allocation40_spill] sm:$0xff] %v14703_v10  ;;  %v1813_v6 = vrot.slane %v14661_v50, %v18236_v48  ;;  %v13483_v7 = vpop.f32.mrf.mxu1 }
 0x15f   :  { %18224 = vst [vmem:[#allocation30_spill] sm:$0xff] %v14664_v5  ;;  %v14675_v49 = vpop.xlane.xlu0 %1356  ;;  %18231 = vst [vmem:[#allocation37_spill] sm:$0xff] %v14692_v33  ;;  %v14719_v53 = vadd.f32 %v14606_v2, %v13482_v28  ;;  %v14724_v33 = vmul.f32 %v14615_v32, %v1086_v63  ;;  %v18243_v63 = vld [vmem:[#allocation13_spill] sm:$0xff]  ;;  %v1837_v10 = vrot.slane %v14661_v50, %v14625_v38 }
 0x160   :  { %18225 = vst [vmem:[#allocation31_spill] sm:$0xff] %v14667_v57  ;;  %18230 = vst [vmem:[#allocation36_spill] sm:$0xff] %v14689_v23  ;;  %v18242_v23 = vld [vmem:[#allocation12_spill] sm:$0xff]  ;;  %v1829_v58 = vrot.slane %v14661_v50, %v18243_v63  ;;  %v14748_v57 = vcombine.low %v1809_v0, %v1813_v6  ;;  %v3857_v20 = vrot.slane %v1552_v36, %v18235_v17  ;;  %v953_v8 = vpop.f32.mrf.mxu1 }
 0x161   :  { %1434 = vadd.xlane.f32.xlu1 %v14477_v41  ;;  %v14695_v41 = vmul.f32 %v14615_v32, %v1087_v62  ;;  %18237 = vst [vmem:[#allocation8_spill] sm:$0xff] %v14710_v24  ;;  %v14713_v62 = vmul.f32 %v14615_v32, %v1088_v35  ;;  %18239 = vst [vmem:[#allocation41_spill] sm:$0xff] %v14724_v33  ;;  %v14730_v35 = vadd.f32 %v14606_v2, %v950_v9 }
 0x162   :  { %1432 = vadd.xlane.f32.xlu0 %v14457_v14  ;;  %v14686_v43 = vpop.xlane.xlu1 %1358  ;;  %v14698_v14 = vmul.f32 %v14615_v32, %v1085_v39  ;;  %v14716_v39 = vadd.f32 %v14606_v2, %v694_v60  ;;  %v3861_v13 = vrot.slane %v1552_v36, %v18236_v48  ;;  %v3873_v12 = vrot.slane %v1552_v36, %v18242_v23 }
 0x163   :  { %18232 = vst [vmem:[#allocation38_spill] sm:$0xff] %v14695_v41  ;;  %18238 = vst [vmem:[#allocation9_spill] sm:$0xff] %v14713_v62  ;;  %v18240_v41 = vld [vmem:[#allocation10_spill] sm:$0xff]  ;;  %v18241_v62 = vld [vmem:[#allocation11_spill] sm:$0xff]  ;;  %v14742_v33 = vpop.xlane.xlu0 %1230  ;;  %v3877_v0 = vrot.slane %v1552_v36, %v18243_v63  ;;  %v3885_v25 = vrot.slane %v1552_v36, %v14625_v38  ;;  %v1486_v11 = vadd.f32 %v14297_v61, %v14644_v55 }
 0x164   :  { %18233 = vst [vmem:[#allocation39_spill] sm:$0xff] %v14698_v14  ;;  %v13419_v14 = vpop.f32.mrf.mxu0  ;;  %v1817_v28 = vrot.slane %v14661_v50, %v18240_v41  ;;  %v3865_v34 = vrot.slane %v1552_v36, %v18240_v41  ;;  %v3869_v37 = vrot.slane %v1552_v36, %v18241_v62  ;;  %v14764_v3 = vmul.f32 %v14615_v32, %v1027_v30  ;;  %v18246_v30 = vld [vmem:[#allocation15_spill] sm:$0xff] }
 0x165   :  { %1302 = vadd.xlane.f32.xlu1 %v14480_v51  ;;  %v14727_v24 = vadd.f32 %v14606_v2, %v13419_v14  ;;  %v1821_v51 = vrot.slane %v14661_v50, %v18241_v62  ;;  %v18244_v14 = vld [vmem:[#allocation14_spill] sm:$0xff]  ;;  %v1025_v44 = vmax.f32 %v14716_v39, 0.0  ;;  %v14775_v29 = vadd.f32 %v14606_v2, %v953_v8 }
 0x166   :  { %1300 = vadd.xlane.f32.xlu0 %v14465_v31  ;;  %v14732_v60 = vpop.xlane.xlu1 %1242  ;;  %v1825_v31 = vrot.slane %v14661_v50, %v18242_v23  ;;  %v1833_v9 = vrot.slane %v14661_v50, %v18244_v14  ;;  %v697_v5 = vpop.f32.mrf.mxu0  ;;  %v1091_v50 = vmax.f32 %v14719_v53, 0.0  ;;  %v3881_v6 = vrot.slane %v1552_v36, %v18244_v14  ;;  %18245 = vst [vmem:[#allocation10_spill] sm:$0xff] %v14764_v3 }
 0x167   :  { %v14772_v53 = vadd.f32 %v14606_v2, %v13483_v7  ;;  %v5937_v36 = vcombine.low %v1817_v28, %v1821_v51  ;;  %v5946_v3 = vrot.slane %v14748_v57, %v18246_v30  ;;  %v9072_v39 = vcombine.low %v3857_v20, %v3861_v13  ;;  %v14781_v16 = vpop.xlane.xlu0 %1240 }
 0x168   :  { %v5938_v55 = vcombine.low %v1825_v31, %v1829_v58  ;;  %v5939_v54 = vcombine.low %v1833_v9, %v1837_v10  ;;  %v9073_v7 = vcombine.low %v3865_v34, %v3869_v37  ;;  %v9075_v8 = vcombine.low %v3881_v6, %v3885_v25 }
 0x169   :  { %1430 = vadd.xlane.f32.xlu1 %v14483_v56  ;;  %v1089_v56 = vmax.f32 %v14730_v35, 0.0  ;;  %v1745_v35 = vrot.slane %v1486_v11, %v18235_v17  ;;  %v1749_v28 = vrot.slane %v1486_v11, %v18236_v48  ;;  %v1753_v10 = vrot.slane %v1486_v11, %v18240_v41 }
 0x16a   :  { %1428 = vadd.xlane.f32.xlu0 %v14468_v21  ;;  %v14769_v21 = vadd.f32 %v14606_v2, %v697_v5  ;;  %v14777_v47 = vpop.xlane.xlu1 %1370  ;;  %v1028_v5 = vmax.f32 %v14727_v24, 0.0  ;;  %v9074_v2 = vcombine.low %v3873_v12, %v3877_v0  ;;  %v1757_v57 = vrot.slane %v1486_v11, %v18241_v62 }
 0x16b   :  { %v1761_v13 = vrot.slane %v1486_v11, %v18242_v23  ;;  %v1765_v20 = vrot.slane %v1486_v11, %v18243_v63  ;;  %v5953_v37 = vrot.slane %v5937_v36, %v18246_v30  ;;  %v5960_v25 = vrot.slane %v5938_v55, %v18246_v30  ;;  %v1369_v6 = vpop.xlane.xlu0 %1368 }
 0x16c   :  { %v5967_v12 = vrot.slane %v5939_v54, %v18246_v30  ;;  %v9082_v34 = vrot.slane %v9072_v39, %v18246_v30  ;;  %v9089_v24 = vrot.slane %v9073_v7, %v18246_v30  ;;  %v9096_v51 = vrot.slane %v9074_v2, %v18246_v30 }
 0x16d   :  { %1314 = vadd.xlane.f32.xlu1 %v14496_v4  ;;  %v1769_v4 = vrot.slane %v1486_v11, %v18244_v14  ;;  %v9103_v31 = vrot.slane %v9075_v8, %v18246_v30  ;;  %v14808_v9 = vmul.f32 %v14615_v32, %v1091_v50  ;;  %v5838_v54 = vcombine.low %v1745_v35, %v1749_v28 }
 0x16e   :  { %1312 = vadd.xlane.f32.xlu0 %v14488_v59  ;;  %v1773_v59 = vrot.slane %v1486_v11, %v14625_v38  ;;  %v1550_v11 = vadd.f32 %v14297_v61, %v14675_v49  ;;  %v14805_v58 = vpop.xlane.xlu1 %1238  ;;  %v5839_v0 = vcombine.low %v1753_v10, %v1757_v57  ;;  %v5840_v36 = vcombine.low %v1761_v13, %v1765_v20 }
 0x16f   :  { %v14817_v39 = vmul.f32 %v14615_v32, %v1028_v5  ;;  %v1026_v49 = vmax.f32 %v14769_v21, 0.0  ;;  %v1092_v7 = vmax.f32 %v14772_v53, 0.0  ;;  %v5968_v50 = vcombine.low %v5946_v3, %v5953_v37 }
 0x170   :  { %v5841_v55 = vcombine.low %v1769_v4, %v1773_v59  ;;  %v5969_v2 = vcombine.low %v5960_v25, %v5967_v12  ;;  %v9104_v8 = vcombine.low %v9082_v34, %v9089_v24  ;;  %v5848_v35 = vrot.slane %v5838_v54, %v18246_v30  ;;  %v1237_v4 = vpop.xlane.xlu0 %1236 }
 0x171   :  { %1442 = vadd.xlane.f32.xlu1 %v14499_v42  ;;  %v14811_v42 = vmul.f32 %v14615_v32, %v1025_v44  ;;  %v1090_v44 = vmax.f32 %v14775_v29, 0.0  ;;  %v5855_v28 = vrot.slane %v5839_v0, %v18246_v30  ;;  %v3793_v5 = vrot.slane %v1550_v11, %v18235_v17 }
 0x172   :  { %1440 = vadd.xlane.f32.xlu0 %v14493_v22  ;;  %v14814_v22 = vmul.f32 %v14615_v32, %v1089_v56  ;;  %v9105_v56 = vcombine.low %v9096_v51, %v9103_v31  ;;  %v3797_v21 = vrot.slane %v1550_v11, %v18236_v48  ;;  %v5862_v53 = vrot.slane %v5840_v36, %v18246_v30  ;;  %v14832_v29 = vpop.xlane.xlu1 %1366 }
 0x173   :  { %18247 = vst [vmem:[#allocation11_spill] sm:$0xff] %v14811_v42  ;;  %v5869_v3 = vrot.slane %v5841_v55, %v18246_v30  ;;  %v3809_v10 = vrot.slane %v1550_v11, %v18242_v23  ;;  %v3813_v57 = vrot.slane %v1550_v11, %v18243_v63  ;;  %v3817_v13 = vrot.slane %v1550_v11, %v18244_v14 }
 0x174   :  { %18248 = vst [vmem:[#allocation12_spill] sm:$0xff] %v14814_v22  ;;  %v3821_v20 = vrot.slane %v1550_v11, %v14625_v38  ;;  %v14841_v59 = vmul.f32 %v14615_v32, %v1092_v7  ;;  %v5976_v37 = vrot.slane %v5968_v50, %v18246_v30  ;;  %v5983_v25 = vrot.slane %v5969_v2, %v18246_v30 }
 0x175   :  { %1310 = vadd.xlane.f32.xlu1 %v14522_v40  ;;  %v3801_v40 = vrot.slane %v1550_v11, %v18240_v41  ;;  %v14846_v12 = vmul.f32 %v14615_v32, %v1026_v49  ;;  %v14849_v34 = vmul.f32 %v14615_v32, %v1090_v44  ;;  %v9112_v24 = vrot.slane %v9104_v8, %v18246_v30 }
 0x176   :  { %1308 = vadd.xlane.f32.xlu0 %v14502_v52  ;;  %v3805_v52 = vrot.slane %v1550_v11, %v18241_v62  ;;  %v9119_v51 = vrot.slane %v9105_v56, %v18246_v30  ;;  %v5871_v31 = vcombine.low %v5862_v53, %v5869_v3  ;;  %v8974_v11 = vcombine.low %v3793_v5, %v3797_v21 }
 0x177   :  { %18249 = vst [vmem:[#allocation13_spill] sm:$0xff] %v14849_v34  ;;  %v1553_v54 = vadd.f32 %v14297_v61, %v14658_v19  ;;  %v8976_v36 = vcombine.low %v3809_v10, %v3813_v57  ;;  %v8977_v55 = vcombine.low %v3817_v13, %v3821_v20  ;;  %v14861_v32 = vadd.f32 %v14297_v61, %v14686_v43 }
 0x178   :  { %v8975_v0 = vcombine.low %v3801_v40, %v3805_v52  ;;  %v14865_v49 = vadd.f32 %v14297_v61, %v14742_v33  ;;  %v14873_v19 = vadd.f32 %v14297_v61, %v14732_v60  ;;  %v14877_v7 = vadd.f32 %v14297_v61, %v14781_v16  ;;  %v1251_v33 = vpop.xlane.xlu1 %1250 }
 0x179   :  { %1438 = vadd.xlane.f32.xlu1 %v14529_v46  ;;  %v5870_v46 = vcombine.low %v5848_v35, %v5855_v28  ;;  %v14881_v43 = vadd.f32 %v14297_v61, %v14777_v47  ;;  %v14883_v50 = vcombine.low %v9112_v24, %v9119_v51  ;;  %v5885_v60 = vrot.slane %v5871_v31, %v18246_v30  ;;  %v18253_v24 = vld [vmem:[#allocation18_spill] sm:$0xff]  ;;  %v18254_v51 = vld [vmem:[#allocation16_spill] sm:$0xff] }
 0x17a   :  { %1436 = vadd.xlane.f32.xlu0 %v14505_v27  ;;  %v14855_v27 = vadd.f32 %v14297_v61, %v14636_v26  ;;  %v14869_v26 = vcombine.low %v5976_v37, %v5983_v25  ;;  %18251 = vst [vmem:[#allocation42_spill] sm:$0xff] %v14873_v19  ;;  %v8984_v2 = vrot.slane %v8974_v11, %v18246_v30 }
 0x17b   :  { %18252 = vst [vmem:[#allocation43_spill] sm:$0xff] %v14883_v50  ;;  %v5878_v44 = vrot.slane %v5870_v46, %v18246_v30  ;;  %v8991_v16 = vrot.slane %v8975_v0, %v18246_v30  ;;  %v8998_v8 = vrot.slane %v8976_v36, %v18246_v30  ;;  %v9005_v47 = vrot.slane %v8977_v55, %v18246_v30 }
 0x17c   :  { %18250 = vst [vmem:[#allocation14_spill] sm:$0xff] %v14869_v26  ;;  %v3889_v56 = vrot.slane %v1553_v54, %v18235_v17  ;;  %v3897_v35 = vrot.slane %v1553_v54, %v18240_v41  ;;  %v3901_v28 = vrot.slane %v1553_v54, %v18241_v62  ;;  %v3905_v5 = vrot.slane %v1553_v54, %v18242_v23  ;;  %v14912_v10 = vpop.xlane.xlu1 %1378 }
 0x17d   :  { %1322 = vadd.xlane.f32.xlu1 %v14560_v18  ;;  %v14886_v18 = vadd.f32 %v14297_v61, %v1369_v6  ;;  %v3893_v6 = vrot.slane %v1553_v54, %v18236_v48  ;;  %v3909_v21 = vrot.slane %v1553_v54, %v18243_v63  ;;  %v3913_v53 = vrot.slane %v1553_v54, %v18244_v14 }
 0x17e   :  { %1320 = vadd.xlane.f32.xlu0 %v14548_v15  ;;  %v1365_v15 = vpop.xlane.xlu0 %1364  ;;  %v3917_v3 = vrot.slane %v1553_v54, %v14625_v38  ;;  %v1841_v40 = vrot.slane %v14855_v27, %v18235_v17  ;;  %v1853_v52 = vrot.slane %v14855_v27, %v18241_v62  ;;  %v1857_v57 = vrot.slane %v14855_v27, %v18242_v23 }
 0x17f   :  { %v1861_v13 = vrot.slane %v14855_v27, %v18243_v63  ;;  %v1865_v20 = vrot.slane %v14855_v27, %v18244_v14  ;;  %v1869_v37 = vrot.slane %v14855_v27, %v14625_v38  ;;  %v9006_v46 = vcombine.low %v8984_v2, %v8991_v16 }
 0x180   :  { %v9007_v31 = vcombine.low %v8998_v8, %v9005_v47  ;;  %v9121_v11 = vcombine.low %v3889_v56, %v3893_v6  ;;  %v14926_v54 = vadd.f32 %v14297_v61, %v14805_v58  ;;  %v14929_v0 = vadd.f32 %v14297_v61, %v1237_v4  ;;  %v18257_v8 = vld [vmem:[#allocation19_spill] sm:$0xff]  ;;  %v18258_v4 = vld [vmem:[#allocation17_spill] sm:$0xff] }
 0x181   :  { %1450 = vadd.xlane.f32.xlu1 %v14571_v45  ;;  %v1849_v45 = vrot.slane %v14855_v27, %v18240_v41  ;;  %v9122_v36 = vcombine.low %v3897_v35, %v3901_v28  ;;  %v9123_v55 = vcombine.low %v3905_v5, %v3909_v21  ;;  %v14931_v50 = vcombine.low %v5878_v44, %v5885_v60 }
 0x182   :  { %1448 = vadd.xlane.f32.xlu0 %v14555_v1  ;;  %v1845_v1 = vrot.slane %v14855_v27, %v18236_v48  ;;  %v1249_v25 = vpop.xlane.xlu0 %1248  ;;  %18255 = vst [vmem:[#allocation18_spill] sm:$0xff] %v14926_v54  ;;  %v9124_v27 = vcombine.low %v3913_v53, %v3917_v3  ;;  %v14938_v2 = vadd.f32 %v14297_v61, %v1365_v15  ;;  %v14951_v15 = vpop.xlane.xlu1 %1246 }
 0x183   :  { %18256 = vst [vmem:[#allocation16_spill] sm:$0xff] %v14931_v50  ;;  %v5986_v22 = vcombine.low %v1849_v45, %v1853_v52  ;;  %v5987_v16 = vcombine.low %v1857_v57, %v1861_v13  ;;  %v5988_v58 = vcombine.low %v1865_v20, %v1869_v37  ;;  %v9014_v47 = vrot.slane %v9006_v46, %v18246_v30  ;;  %v18260_v52 = vld [vmem:[#allocation25_spill] sm:$0xff] }
 0x184   :  { %v5985_v26 = vcombine.low %v1841_v40, %v1845_v1  ;;  %v9021_v44 = vrot.slane %v9007_v31, %v18246_v30  ;;  %v9131_v60 = vrot.slane %v9121_v11, %v18246_v30  ;;  %v14946_v56 = vadd.f32 %v14297_v61, %v1251_v33  ;;  %v18261_v57 = vld [vmem:[#allocation21_spill] sm:$0xff] }
 0x185   :  { %1318 = vadd.xlane.f32.xlu1 %v18253_v24  ;;  %v14935_v24 = vadd.f32 %v14297_v61, %v14832_v29  ;;  %v14949_v29 = vadd.f32 %v14297_v61, %v1249_v25  ;;  %v9138_v6 = vrot.slane %v9122_v36, %v18246_v30  ;;  %v9145_v35 = vrot.slane %v9123_v55, %v18246_v30 }
 0x186   :  { %1316 = vadd.xlane.f32.xlu0 %v18254_v51  ;;  %v1377_v28 = vpop.xlane.xlu0 %1376  ;;  %v9152_v5 = vrot.slane %v9124_v27, %v18246_v30  ;;  %v5995_v21 = vrot.slane %v5985_v26, %v18246_v30  ;;  %v6002_v53 = vrot.slane %v5986_v22, %v18246_v30  ;;  %v3825_v33 = vrot.slane %v14861_v32, %v18235_v17  ;;  %v1375_v55 = vpop.xlane.xlu1 %1374 }
 0x187   :  { %18259 = vst [vmem:[#allocation19_spill] sm:$0xff] %v14949_v29  ;;  %v6009_v3 = vrot.slane %v5987_v16, %v18246_v30  ;;  %v6016_v40 = vrot.slane %v5988_v58, %v18246_v30  ;;  %v3829_v1 = vrot.slane %v14861_v32, %v18236_v48  ;;  %v3833_v45 = vrot.slane %v14861_v32, %v18240_v41 }
 0x188   :  { %v3837_v22 = vrot.slane %v14861_v32, %v18241_v62  ;;  %v3841_v26 = vrot.slane %v14861_v32, %v18242_v23  ;;  %v3845_v13 = vrot.slane %v14861_v32, %v18243_v63  ;;  %v3849_v20 = vrot.slane %v14861_v32, %v18244_v14 }
 0x189   :  { %1446 = vadd.xlane.f32.xlu1 %v18257_v8  ;;  %v3853_v37 = vrot.slane %v14861_v32, %v14625_v38  ;;  %v1777_v25 = vrot.slane %v14865_v49, %v18235_v17  ;;  %v1781_v51 = vrot.slane %v14865_v49, %v18236_v48  ;;  %v1785_v46 = vrot.slane %v14865_v49, %v18240_v41 }
 0x18a   :  { %1444 = vadd.xlane.f32.xlu0 %v18258_v4  ;;  %v1789_v31 = vrot.slane %v14865_v49, %v18241_v62  ;;  %v1793_v11 = vrot.slane %v14865_v49, %v18242_v23  ;;  %v1797_v36 = vrot.slane %v14865_v49, %v18243_v63  ;;  %v9153_v32 = vcombine.low %v9131_v60, %v9138_v6  ;;  %v1245_v8 = vpop.xlane.xlu0 %1244  ;;  %v18262_v4 = vld [vmem:[#allocation24_spill] sm:$0xff] }
 0x18b   :  { %v9154_v27 = vcombine.low %v9145_v35, %v9152_v5  ;;  %v1801_v16 = vrot.slane %v14865_v49, %v18244_v14  ;;  %v1805_v58 = vrot.slane %v14865_v49, %v14625_v38  ;;  %v6018_v50 = vcombine.low %v6009_v3, %v6016_v40  ;;  %v1259_v40 = vpop.xlane.xlu1 %1258 }
 0x18c   :  { %v9023_v29 = vcombine.low %v3825_v33, %v3829_v1  ;;  %v14996_v54 = vcombine.low %v9014_v47, %v9021_v44  ;;  %v9024_v34 = vcombine.low %v3833_v45, %v3837_v22  ;;  %v9025_v19 = vcombine.low %v3841_v26, %v3845_v13  ;;  %v18265_v47 = vld [vmem:[#allocation26_spill] sm:$0xff] }
 0x18d   :  { %1330 = vadd.xlane.f32.xlu1 %v18260_v52  ;;  %v18263_v52 = vld [vmem:[#allocation20_spill] sm:$0xff]  ;;  %v9026_v60 = vcombine.low %v3849_v20, %v3853_v37  ;;  %v15000_v6 = vadd.f32 %v14297_v61, %v14912_v10  ;;  %v5887_v35 = vcombine.low %v1777_v25, %v1781_v51  ;;  %v5888_v5 = vcombine.low %v1785_v46, %v1789_v31  ;;  %v18266_v44 = vld [vmem:[#allocation22_spill] sm:$0xff]  ;;  %v18267_v51 = vld [vmem:[#allocation27_spill] sm:$0xff] }
 0x18e   :  { %1328 = vadd.xlane.f32.xlu0 %v18261_v57  ;;  %v6017_v57 = vcombine.low %v5995_v21, %v6002_v53  ;;  %v5889_v49 = vcombine.low %v1793_v11, %v1797_v36  ;;  %v15003_v42 = vadd.f32 %v14297_v61, %v1377_v28  ;;  %v9168_v21 = vrot.slane %v9154_v27, %v18246_v30  ;;  %v1373_v26 = vpop.xlane.xlu0 %1372  ;;  %v18268_v46 = vld [vmem:[#allocation23_spill] sm:$0xff] }
 0x18f   :  { %v5890_v53 = vcombine.low %v1801_v16, %v1805_v58  ;;  %v6032_v10 = vrot.slane %v6018_v50, %v18246_v30  ;;  %v9033_v3 = vrot.slane %v9023_v29, %v18246_v30  ;;  %v9040_v1 = vrot.slane %v9024_v34, %v18246_v30 }
 0x190   :  { %18264 = vst [vmem:[#allocation17_spill] sm:$0xff] %v15003_v42  ;;  %v6025_v33 = vrot.slane %v6017_v57, %v18246_v30  ;;  %v9047_v28 = vrot.slane %v9025_v19, %v18246_v30  ;;  %v9054_v45 = vrot.slane %v9026_v60, %v18246_v30  ;;  %v4017_v22 = vrot.slane %v14881_v43, %v18235_v17 }
 0x191   :  { %1458 = vadd.xlane.f32.xlu1 %v18262_v4  ;;  %v9161_v4 = vrot.slane %v9153_v32, %v18246_v30  ;;  %v5897_v13 = vrot.slane %v5887_v35, %v18246_v30  ;;  %v5904_v20 = vrot.slane %v5888_v5, %v18246_v30  ;;  %v5911_v37 = vrot.slane %v5889_v49, %v18246_v30  ;;  %v1387_v35 = vpop.xlane.xlu1 %1386 }
 0x192   :  { %1456 = vadd.xlane.f32.xlu0 %v18263_v52  ;;  %v4021_v50 = vrot.slane %v14881_v43, %v18236_v48  ;;  %v5918_v29 = vrot.slane %v5890_v53, %v18246_v30  ;;  %v4025_v34 = vrot.slane %v14881_v43, %v18240_v41  ;;  %v4029_v19 = vrot.slane %v14881_v43, %v18241_v62  ;;  %v1257_v53 = vpop.xlane.xlu0 %1256 }
 0x193   :  { %v4033_v25 = vrot.slane %v14881_v43, %v18242_v23  ;;  %v4037_v31 = vrot.slane %v14881_v43, %v18243_v63  ;;  %v4041_v11 = vrot.slane %v14881_v43, %v18244_v14  ;;  %v4045_v36 = vrot.slane %v14881_v43, %v14625_v38 }
 0x194   :  { %v15039_v32 = vadd.f32 %v14297_v61, %v14951_v15  ;;  %v15042_v27 = vadd.f32 %v14297_v61, %v1245_v8  ;;  %v15045_v16 = vadd.f32 %v14297_v61, %v1375_v55  ;;  %v15047_v58 = vcombine.low %v9161_v4, %v9168_v21  ;;  %v18273_v55 = vld [vmem:[#allocation28_spill] sm:$0xff] }
 0x195   :  { %1326 = vadd.xlane.f32.xlu1 %v18265_v47  ;;  %v15050_v52 = vadd.f32 %v14297_v61, %v1373_v26  ;;  %v15053_v57 = vadd.f32 %v14297_v61, %v1259_v40  ;;  %v15055_v60 = vcombine.low %v6025_v33, %v6032_v10  ;;  %v9055_v43 = vcombine.low %v9033_v3, %v9040_v1  ;;  %v18272_v47 = vld [vmem:[#allocation32_spill] sm:$0xff] }
 0x196   :  { %1324 = vadd.xlane.f32.xlu0 %v18266_v44  ;;  %18269 = vst [vmem:[#allocation25_spill] sm:$0xff] %v15042_v27  ;;  %v9056_v15 = vcombine.low %v9047_v28, %v9054_v45  ;;  %v5919_v5 = vcombine.low %v5897_v13, %v5904_v20  ;;  %v5920_v49 = vcombine.low %v5911_v37, %v5918_v29  ;;  %v18276_v29 = vld [vmem:[#allocation29_spill] sm:$0xff] }
 0x197   :  { %18270 = vst [vmem:[#allocation21_spill] sm:$0xff] %v15050_v52  ;;  %18271 = vst [vmem:[#allocation24_spill] sm:$0xff] %v15055_v60  ;;  %v9317_v8 = vcombine.low %v4017_v22, %v4021_v50  ;;  %v9318_v4 = vcombine.low %v4025_v34, %v4029_v19  ;;  %v9319_v21 = vcombine.low %v4033_v25, %v4037_v31  ;;  %v18275_v50 = vld [vmem:[#allocation33_spill] sm:$0xff] }
 0x198   :  { %v9320_v44 = vcombine.low %v4041_v11, %v4045_v36  ;;  %v1937_v40 = vrot.slane %v14877_v7, %v18235_v17  ;;  %v1941_v33 = vrot.slane %v14877_v7, %v18236_v48  ;;  %v1945_v10 = vrot.slane %v14877_v7, %v18240_v41  ;;  %v18287_v60 = vld [vmem:[#allocation9_spill] sm:$0xff] }
 0x199   :  { %1454 = vadd.xlane.f32.xlu1 %v18267_v51  ;;  %v1949_v3 = vrot.slane %v14877_v7, %v18241_v62  ;;  %v1953_v1 = vrot.slane %v14877_v7, %v18242_v23  ;;  %v1957_v28 = vrot.slane %v14877_v7, %v18243_v63  ;;  %v1961_v45 = vrot.slane %v14877_v7, %v18244_v14 }
 0x19a   :  { %1452 = vadd.xlane.f32.xlu0 %v18268_v46  ;;  %v1965_v22 = vrot.slane %v14877_v7, %v14625_v38  ;;  %v15076_v26 = vadd.f32 %v14297_v61, %v1257_v53  ;;  %v9063_v13 = vrot.slane %v9055_v43, %v18246_v30  ;;  %v9070_v20 = vrot.slane %v9056_v15, %v18246_v30  ;;  %v1255_v7 = vpop.xlane.xlu1 %1254 }
 0x19b   :  { %v5927_v37 = vrot.slane %v5919_v5, %v18246_v30  ;;  %v5934_v34 = vrot.slane %v5920_v49, %v18246_v30  ;;  %v9327_v19 = vrot.slane %v9317_v8, %v18246_v30  ;;  %v9334_v25 = vrot.slane %v9318_v4, %v18246_v30  ;;  %v18277_v4 = vld [vmem:[#allocation34_spill] sm:$0xff] }
 0x19c   :  { %18274 = vst [vmem:[#allocation20_spill] sm:$0xff] %v15076_v26  ;;  %v9341_v51 = vrot.slane %v9319_v21, %v18246_v30  ;;  %v9348_v46 = vrot.slane %v9320_v44, %v18246_v30  ;;  %v15088_v31 = vcombine.low %v1937_v40, %v1941_v33  ;;  %v15090_v11 = vcombine.low %v1945_v10, %v1949_v3  ;;  %v18278_v21 = vld [vmem:[#allocation30_spill] sm:$0xff] }
 0x19d   :  { %1338 = vadd.xlane.f32.xlu1 %v18272_v47  ;;  %v15092_v36 = vcombine.low %v1953_v1, %v1957_v28  ;;  %v15094_v43 = vcombine.low %v1961_v45, %v1965_v22  ;;  %v3953_v15 = vrot.slane %v14935_v24, %v18235_v17  ;;  %v3957_v5 = vrot.slane %v14935_v24, %v18236_v48 }
 0x19e   :  { %1336 = vadd.xlane.f32.xlu0 %v18273_v55  ;;  %v3961_v49 = vrot.slane %v14935_v24, %v18240_v41  ;;  %v3965_v8 = vrot.slane %v14935_v24, %v18241_v62  ;;  %v3969_v53 = vrot.slane %v14935_v24, %v18242_v23  ;;  %v3973_v47 = vrot.slane %v14935_v24, %v18243_v63  ;;  %v1383_v22 = vpop.xlane.xlu1 %1382 }
 0x19f   :  { %v15109_v55 = vadd.f32 %v14297_v61, %v1387_v35  ;;  %v3977_v44 = vrot.slane %v14935_v24, %v18244_v14  ;;  %v3981_v40 = vrot.slane %v14935_v24, %v14625_v38  ;;  %v15118_v33 = vadd.f32 %v14297_v61, %v1255_v7 }
 0x1a0   :  { %v15120_v10 = vcombine.low %v9063_v13, %v9070_v20  ;;  %v15122_v3 = vcombine.low %v5927_v37, %v5934_v34  ;;  %v15124_v1 = vcombine.low %v9327_v19, %v9334_v25  ;;  %v15126_v35 = vcombine.low %v9341_v51, %v9348_v46  ;;  %v18283_v34 = vld [vmem:[#allocation31_spill] sm:$0xff] }
 0x1a1   :  { %1466 = vadd.xlane.f32.xlu1 %v18275_v50  ;;  %18279 = vst [vmem:[#allocation26_spill] sm:$0xff] %v15118_v33  ;;  %v6142_v28 = vrot.slane %v15088_v31, %v18246_v30  ;;  %v6149_v45 = vrot.slane %v15090_v11, %v18246_v30  ;;  %v6156_v24 = vrot.slane %v15092_v36, %v18246_v30 }
 0x1a2   :  { %1464 = vadd.xlane.f32.xlu0 %v18276_v29  ;;  %18280 = vst [vmem:[#allocation22_spill] sm:$0xff] %v15120_v10  ;;  %18281 = vst [vmem:[#allocation27_spill] sm:$0xff] %v15122_v3  ;;  %v6163_v13 = vrot.slane %v15094_v43, %v18246_v30  ;;  %v9219_v20 = vcombine.low %v3953_v15, %v3957_v5  ;;  %v9220_v37 = vcombine.low %v3961_v49, %v3965_v8  ;;  %v18282_v29 = vld [vmem:[#allocation35_spill] sm:$0xff] }
 0x1a3   :  { %v9221_v50 = vcombine.low %v3969_v53, %v3973_v47  ;;  %v9222_v19 = vcombine.low %v3977_v44, %v3981_v40  ;;  %v3985_v25 = vrot.slane %v14886_v18, %v18235_v17  ;;  %v3989_v7 = vrot.slane %v14886_v18, %v18236_v48 }
 0x1a4   :  { %v3993_v51 = vrot.slane %v14886_v18, %v18240_v41  ;;  %v3997_v46 = vrot.slane %v14886_v18, %v18241_v62  ;;  %v4001_v31 = vrot.slane %v14886_v18, %v18242_v23  ;;  %v4005_v11 = vrot.slane %v14886_v18, %v18243_v63 }
 0x1a5   :  { %1334 = vadd.xlane.f32.xlu1 %v18277_v4  ;;  %v4009_v36 = vrot.slane %v14886_v18, %v18244_v14  ;;  %v4013_v43 = vrot.slane %v14886_v18, %v14625_v38  ;;  %v2097_v15 = vrot.slane %v14946_v56, %v18235_v17  ;;  %v2101_v5 = vrot.slane %v14946_v56, %v18236_v48  ;;  %v18284_v4 = vld [vmem:[#allocation40_spill] sm:$0xff] }
 0x1a6   :  { %1332 = vadd.xlane.f32.xlu0 %v18278_v21  ;;  %v2105_v49 = vrot.slane %v14946_v56, %v18240_v41  ;;  %v2109_v8 = vrot.slane %v14946_v56, %v18241_v62  ;;  %v2113_v53 = vrot.slane %v14946_v56, %v18242_v23  ;;  %v2117_v47 = vrot.slane %v14946_v56, %v18243_v63  ;;  %v18285_v18 = vld [vmem:[#allocation36_spill] sm:$0xff] }
 0x1a7   :  { %v9229_v21 = vrot.slane %v9219_v20, %v18246_v30  ;;  %v2121_v44 = vrot.slane %v14946_v56, %v18244_v14  ;;  %v2125_v40 = vrot.slane %v14946_v56, %v14625_v38  ;;  %v9243_v26 = vrot.slane %v9221_v50, %v18246_v30 }
 0x1a8   :  { %v9250_v52 = vrot.slane %v9222_v19, %v18246_v30  ;;  %v9268_v27 = vcombine.low %v3985_v25, %v3989_v7  ;;  %v9357_v20 = vrot.slane %v15124_v1, %v18246_v30  ;;  %v9270_v33 = vcombine.low %v4001_v31, %v4005_v11 }
 0x1a9   :  { %1462 = vadd.xlane.f32.xlu1 %v18282_v29  ;;  %v1267_v29 = vpop.xlane.xlu1 %1266  ;;  %v9271_v42 = vcombine.low %v4009_v36, %v4013_v43  ;;  %v6377_v3 = vcombine.low %v2097_v15, %v2101_v5  ;;  %v6378_v10 = vcombine.low %v2105_v49, %v2109_v8  ;;  %v6379_v56 = vcombine.low %v2113_v53, %v2117_v47 }
 0x1aa   :  { %1460 = vadd.xlane.f32.xlu0 %v18283_v34  ;;  %v9236_v34 = vrot.slane %v9220_v37, %v18246_v30  ;;  %v18288_v37 = vld [vmem:[#allocation38_spill] sm:$0xff]  ;;  %v9364_v50 = vrot.slane %v15126_v35, %v18246_v30  ;;  %v15185_v19 = vcombine.low %v6142_v28, %v6149_v45  ;;  %v15187_v25 = vcombine.low %v6156_v24, %v6163_v13  ;;  %v18290_v13 = vld [vmem:[#allocation37_spill] sm:$0xff] }
 0x1ab   :  { %v15191_v1 = vcombine.low %v9243_v26, %v9250_v52  ;;  %v1873_v31 = vrot.slane %v14929_v0, %v18235_v17  ;;  %v1877_v35 = vrot.slane %v14929_v0, %v18236_v48  ;;  %v9299_v45 = vrot.slane %v9271_v42, %v18246_v30 }
 0x1ac   :  { %v15189_v7 = vcombine.low %v9229_v21, %v9236_v34  ;;  %v6387_v24 = vrot.slane %v6377_v3, %v18246_v30  ;;  %v6394_v52 = vrot.slane %v6378_v10, %v18246_v30  ;;  %v6401_v26 = vrot.slane %v6379_v56, %v18246_v30 }
 0x1ad   :  { %1346 = vadd.xlane.f32.xlu1 %v18284_v4  ;;  %v15177_v4 = vadd.f32 %v14297_v61, %v1383_v22  ;;  %v6380_v22 = vcombine.low %v2121_v44, %v2125_v40  ;;  %v1395_v28 = vpop.xlane.xlu1 %1394  ;;  %v1881_v11 = vrot.slane %v14929_v0, %v18240_v41  ;;  %v1885_v36 = vrot.slane %v14929_v0, %v18241_v62  ;;  %v18294_v44 = vld [vmem:[#allocation41_spill] sm:$0xff]  ;;  %v18295_v40 = vld [vmem:[#allocation39_spill] sm:$0xff] }
 0x1ae   :  { %1344 = vadd.xlane.f32.xlu0 %v18285_v18  ;;  %v9269_v18 = vcombine.low %v3993_v51, %v3997_v46  ;;  %v9278_v51 = vrot.slane %v9268_v27, %v18246_v30  ;;  %v18289_v27 = vld [vmem:[#allocation8_spill] sm:$0xff]  ;;  %v1889_v42 = vrot.slane %v14929_v0, %v18242_v23  ;;  %v1893_v10 = vrot.slane %v14929_v0, %v18243_v63 }
 0x1af   :  { %18286 = vst [vmem:[#allocation23_spill] sm:$0xff] %v15177_v4  ;;  %v1897_v3 = vrot.slane %v14929_v0, %v18244_v14  ;;  %v1901_v43 = vrot.slane %v14929_v0, %v14625_v38  ;;  %v15220_v15 = vadd.f32 %v14297_v61, %v1267_v29  ;;  %v15223_v5 = vadd.f32 %v14297_v61, %v1395_v28 }
 0x1b0   :  { %v9285_v46 = vrot.slane %v9269_v18, %v18246_v30  ;;  %v15225_v49 = vcombine.low %v9357_v20, %v9364_v50  ;;  %v15227_v8 = vcombine.low %v1873_v31, %v1877_v35  ;;  %v15243_v20 = vcombine.low %v6387_v24, %v6394_v52  ;;  %v18297_v52 = vld [vmem:[#allocation10_spill] sm:$0xff] }
 0x1b1   :  { %1474 = vadd.xlane.f32.xlu1 %v18287_v60  ;;  %v9292_v60 = vrot.slane %v9270_v33, %v18246_v30  ;;  %v6408_v33 = vrot.slane %v6380_v22, %v18246_v30  ;;  %18291 = vst [vmem:[#allocation32_spill] sm:$0xff] %v15220_v15  ;;  %18292 = vst [vmem:[#allocation28_spill] sm:$0xff] %v15223_v5  ;;  %v15247_v56 = vcombine.low %v1881_v11, %v1885_v36  ;;  %v15253_v22 = vpop.xlane.xlu0 %1384 }
 0x1b2   :  { %1472 = vadd.xlane.f32.xlu0 %v18288_v37  ;;  %18293 = vst [vmem:[#allocation33_spill] sm:$0xff] %v15225_v49  ;;  %v15239_v29 = vcombine.low %v9278_v51, %v9285_v46  ;;  %v15249_v37 = vcombine.low %v1889_v42, %v1893_v10  ;;  %v15251_v50 = vcombine.low %v1897_v3, %v1901_v43  ;;  %18296 = vst [vmem:[#allocation29_spill] sm:$0xff] %v15253_v22 }
 0x1b3   :  { %v15241_v34 = vcombine.low %v9292_v60, %v9299_v45  ;;  %v15245_v18 = vcombine.low %v6401_v26, %v6408_v33  ;;  %v4145_v51 = vrot.slane %v15000_v6, %v18235_v17  ;;  %v4149_v46 = vrot.slane %v15000_v6, %v18236_v48 }
 0x1b4   :  { %v4153_v60 = vrot.slane %v15000_v6, %v18240_v41  ;;  %v4157_v35 = vrot.slane %v15000_v6, %v18241_v62  ;;  %v4161_v28 = vrot.slane %v15000_v6, %v18242_v23  ;;  %v4165_v45 = vrot.slane %v15000_v6, %v18243_v63 }
 0x1b5   :  { %1342 = vadd.xlane.f32.xlu1 %v18289_v27  ;;  %v4169_v24 = vrot.slane %v15000_v6, %v18244_v14  ;;  %v4173_v26 = vrot.slane %v15000_v6, %v14625_v38  ;;  %v3921_v27 = vrot.slane %v14938_v2, %v18235_v17  ;;  %v3929_v33 = vrot.slane %v14938_v2, %v18240_v41  ;;  %v15303_v21 = vpop.xlane.xlu0 %1252 }
 0x1b6   :  { %1340 = vadd.xlane.f32.xlu0 %v18290_v13  ;;  %v3925_v13 = vrot.slane %v14938_v2, %v18236_v48  ;;  %v3933_v11 = vrot.slane %v14938_v2, %v18241_v62  ;;  %v3941_v36 = vrot.slane %v14938_v2, %v18243_v63  ;;  %v3945_v6 = vrot.slane %v14938_v2, %v18244_v14 }
 0x1b7   :  { %v3949_v42 = vrot.slane %v14938_v2, %v14625_v38  ;;  %v2033_v10 = vrot.slane %v15039_v32, %v18235_v17  ;;  %v2037_v3 = vrot.slane %v15039_v32, %v18236_v48  ;;  %v2041_v43 = vrot.slane %v15039_v32, %v18240_v41  ;;  %18298 = vst [vmem:[#allocation34_spill] sm:$0xff] %v15303_v21 }
 0x1b8   :  { %v2057_v0 = vrot.slane %v15039_v32, %v18244_v14  ;;  %v2061_v53 = vrot.slane %v15039_v32, %v14625_v38  ;;  %v9514_v47 = vcombine.low %v4153_v60, %v4157_v35  ;;  %v9515_v31 = vcombine.low %v4161_v28, %v4165_v45 }
 0x1b9   :  { %1470 = vadd.xlane.f32.xlu1 %v18294_v44  ;;  %v2045_v44 = vrot.slane %v15039_v32, %v18241_v62  ;;  %v9516_v61 = vcombine.low %v4169_v24, %v4173_v26  ;;  %v9170_v22 = vcombine.low %v3921_v27, %v3925_v13  ;;  %v9171_v5 = vcombine.low %v3929_v33, %v3933_v11  ;;  %v18302_v13 = vld [vmem:[#allocation12_spill] sm:$0xff] }
 0x1ba   :  { %1468 = vadd.xlane.f32.xlu0 %v18295_v40  ;;  %v2049_v40 = vrot.slane %v15039_v32, %v18242_v23  ;;  %v9173_v4 = vcombine.low %v3945_v6, %v3949_v42  ;;  %v6279_v49 = vcombine.low %v2033_v10, %v2037_v3  ;;  %v6065_v60 = vrot.slane %v15251_v50, %v18246_v30 }
 0x1bb   :  { %v6280_v21 = vcombine.low %v2041_v43, %v2045_v44  ;;  %v9530_v28 = vrot.slane %v9514_v47, %v18246_v30  ;;  %v9537_v45 = vrot.slane %v9515_v31, %v18246_v30 }
 0x1bc   :  { %v6289_v50 = vrot.slane %v6279_v49, %v18246_v30 }
 0x1bd   :  { %1354 = vadd.xlane.f32.xlu1 %v14817_v39  ;;  %v3937_v39 = vrot.slane %v14938_v2, %v18242_v23  ;;  %v9513_v2 = vcombine.low %v4145_v51, %v4149_v46  ;;  %v6282_v51 = vcombine.low %v2057_v0, %v2061_v53  ;;  %v18299_v46 = vld [vmem:[#allocation11_spill] sm:$0xff]  ;;  %v9180_v53 = vrot.slane %v9170_v22, %v18246_v30  ;;  %v15324_v0 = vpop.xlane.xlu0 %1380  ;;  %v18301_v22 = vld [vmem:[#allocation13_spill] sm:$0xff] }
 0x1be   :  { %1352 = vadd.xlane.f32.xlu0 %v18297_v52  ;;  %v2053_v52 = vrot.slane %v15039_v32, %v18243_v63  ;;  %v6058_v32 = vrot.slane %v15249_v37, %v18246_v30  ;;  %v9201_v37 = vrot.slane %v9173_v4, %v18246_v30  ;;  %v6296_v26 = vrot.slane %v6280_v21, %v18246_v30 }
 0x1bf   :  { %v9172_v15 = vcombine.low %v3937_v39, %v3941_v36  ;;  %v9523_v35 = vrot.slane %v9513_v2, %v18246_v30  ;;  %v6310_v31 = vrot.slane %v6282_v51, %v18246_v30  ;;  %v18303_v39 = vrot.slane %v15227_v8, %v18246_v30 }
 0x1c0   :  { %v6067_v6 = vcombine.low %v6058_v32, %v6065_v60  ;;  %v6311_v44 = vcombine.low %v6289_v50, %v6296_v26  ;;  %v9308_v2 = vrot.slane %v15239_v29, %v18246_v30  ;;  %v6417_v8 = vrot.slane %v15243_v20, %v18246_v30 }
 0x1c1   :  { %1482 = vadd.xlane.f32.xlu1 %v14841_v59  ;;  %v6051_v59 = vrot.slane %v15247_v56, %v18246_v30  ;;  %v9544_v56 = vrot.slane %v9516_v61, %v18246_v30  ;;  %v9194_v24 = vrot.slane %v9172_v15, %v18246_v30  ;;  %v18300_v61 = vld [vmem:[#allocation42_spill] sm:$0xff]  ;;  %v9545_v42 = vcombine.low %v9523_v35, %v9530_v28 }
 0x1c2   :  { %1480 = vadd.xlane.f32.xlu0 %v14808_v9  ;;  %v6281_v9 = vcombine.low %v2049_v40, %v2053_v52  ;;  %v1969_v27 = vrot.slane %v18300_v61, %v18235_v17  ;;  %v1973_v15 = vrot.slane %v18300_v61, %v18236_v48  ;;  %v1977_v4 = vrot.slane %v18300_v61, %v18240_v41  ;;  %v15354_v52 = vpop.xlane.xlu0 %1264 }
 0x1c3   :  { %v1985_v49 = vrot.slane %v18300_v61, %v18242_v23  ;;  %v1989_v21 = vrot.slane %v18300_v61, %v18243_v63  ;;  %v1993_v33 = vrot.slane %v18300_v61, %v18244_v14  ;;  %v1997_v11 = vrot.slane %v18300_v61, %v14625_v38 }
 0x1c4   :  { %v6303_v47 = vrot.slane %v6281_v9, %v18246_v30  ;;  %v6066_v36 = vcombine.low %v18303_v39, %v6051_v59  ;;  %v9546_v10 = vcombine.low %v9537_v45, %v9544_v56  ;;  %v9203_v43 = vcombine.low %v9194_v24, %v9201_v37  ;;  %v15368_v56 = vpop.xlane.xlu1 %1262 }
 0x1c5   :  { %1350 = vadd.xlane.f32.xlu1 %v14846_v12  ;;  %v9187_v12 = vrot.slane %v9171_v5, %v18246_v30  ;;  %v1981_v5 = vrot.slane %v18300_v61, %v18241_v62  ;;  %v9315_v9 = vrot.slane %v15241_v34, %v18246_v30  ;;  %v6181_v51 = vcombine.low %v1969_v27, %v1973_v15 }
 0x1c6   :  { %1348 = vadd.xlane.f32.xlu0 %v18299_v46  ;;  %v6312_v40 = vcombine.low %v6303_v47, %v6310_v31  ;;  %v6424_v59 = vrot.slane %v15245_v18, %v18246_v30  ;;  %v6183_v32 = vcombine.low %v1985_v49, %v1989_v21  ;;  %v6184_v60 = vcombine.low %v1993_v33, %v1997_v11  ;;  %v15386_v27 = vpop.xlane.xlu0 %1392 }
 0x1c7   :  { %v9202_v3 = vcombine.low %v9180_v53, %v9187_v12  ;;  %v6182_v46 = vcombine.low %v1977_v4, %v1981_v5  ;;  %v6074_v35 = vrot.slane %v6066_v36, %v18246_v30  ;;  %v6081_v28 = vrot.slane %v6067_v6, %v18246_v30 }
 0x1c8   :  { %v9553_v45 = vrot.slane %v9545_v42, %v18246_v30  ;;  %v9560_v29 = vrot.slane %v9546_v10, %v18246_v30  ;;  %v9217_v53 = vrot.slane %v9203_v43, %v18246_v30  ;;  %v6319_v20 = vrot.slane %v6311_v44, %v18246_v30  ;;  %v15424_v10 = vpop.xlane.xlu1 %1390 }
 0x1c9   :  { %1478 = vadd.xlane.f32.xlu1 %v18301_v22  ;;  %v9210_v34 = vrot.slane %v9202_v3, %v18246_v30  ;;  %v6326_v18 = vrot.slane %v6312_v40, %v18246_v30  ;;  %v6191_v12 = vrot.slane %v6181_v51, %v18246_v30  ;;  %v6198_v24 = vrot.slane %v6182_v46, %v18246_v30 }
 0x1ca   :  { %1476 = vadd.xlane.f32.xlu0 %v18302_v13  ;;  %v4081_v37 = vrot.slane %v15045_v16, %v18235_v17  ;;  %v4085_v50 = vrot.slane %v15045_v16, %v18236_v48  ;;  %v6205_v26 = vrot.slane %v6183_v32, %v18246_v30  ;;  %v6212_v47 = vrot.slane %v6184_v60, %v18246_v30  ;;  %v15442_v60 = vpop.xlane.xlu0 %1260 }
 0x1cb   :  { %v4089_v31 = vrot.slane %v15045_v16, %v18240_v41  ;;  %v4093_v61 = vrot.slane %v15045_v16, %v18241_v62  ;;  %v4097_v22 = vrot.slane %v15045_v16, %v18242_v23  ;;  %v4101_v13 = vrot.slane %v15045_v16, %v18243_v63 }
 0x1cc   :  { %v4105_v15 = vrot.slane %v15045_v16, %v18244_v14  ;;  %v4109_v4 = vrot.slane %v15045_v16, %v14625_v38  ;;  %v18304_v5 = vrot.slane %v15187_v25, %v18246_v30  ;;  %v18305_v49 = vrot.slane %v15185_v19, %v18246_v30 }
 0x1cd   :  { %v18306_v33 = vrot.slane %v15191_v1, %v18246_v30  ;;  %v18307_v11 = vrot.slane %v15189_v7, %v18246_v30  ;;  %v15412_v36 = vcombine.low %v9308_v2, %v9315_v9  ;;  %v15414_v6 = vcombine.low %v6417_v8, %v6424_v59  ;;  %v18308_v2 = vld [vmem:[#allocation18_spill] sm:$0xff] }
 0x1ce   :  { %v15402_v21 = vcombine.low %v18305_v49, %v18304_v5  ;;  %v15416_v16 = vcombine.low %v6074_v35, %v6081_v28  ;;  %v15418_v25 = vcombine.low %v9553_v45, %v9560_v29  ;;  %v15420_v42 = vcombine.low %v9210_v34, %v9217_v53  ;;  %v18309_v34 = vld [vmem:[#allocation14_spill] sm:$0xff] }
 0x1cf   :  { %v15410_v39 = vcombine.low %v18307_v11, %v18306_v33  ;;  %v15422_v19 = vcombine.low %v6319_v20, %v6326_v18  ;;  %v15426_v1 = vcombine.low %v6191_v12, %v6198_v24  ;;  %v15428_v3 = vcombine.low %v6205_v26, %v6212_v47  ;;  %v15466_v47 = vpop.xlane.xlu1 %1274  ;;  %v18310_v33 = vld [vmem:[#allocation43_spill] sm:$0xff] }
 0x1d0   :  { %v9415_v7 = vcombine.low %v4081_v37, %v4085_v50  ;;  %v9416_v43 = vcombine.low %v4089_v31, %v4093_v61  ;;  %v9417_v44 = vcombine.low %v4097_v22, %v4101_v13  ;;  %v9418_v40 = vcombine.low %v4105_v15, %v4109_v4 }
 0x1d1   :  { %v1905_v9 = vrot.slane %v18308_v2, %v18235_v17  ;;  %v1909_v51 = vrot.slane %v18308_v2, %v18236_v48  ;;  %v1913_v46 = vrot.slane %v18308_v2, %v18240_v41  ;;  %v1917_v8 = vrot.slane %v18308_v2, %v18241_v62 }
 0x1d2   :  { %v1921_v59 = vrot.slane %v18308_v2, %v18242_v23  ;;  %v1925_v32 = vrot.slane %v18308_v2, %v18243_v63  ;;  %v1929_v35 = vrot.slane %v18308_v2, %v18244_v14  ;;  %v1933_v28 = vrot.slane %v18308_v2, %v14625_v38  ;;  %v15478_v2 = vpop.xlane.xlu0 %1388 }
 0x1d3   :  { %v2225_v45 = vrot.slane %v15053_v57, %v18235_v17  ;;  %v2229_v29 = vrot.slane %v15053_v57, %v18236_v48  ;;  %v2233_v53 = vrot.slane %v15053_v57, %v18240_v41  ;;  %v2237_v20 = vrot.slane %v15053_v57, %v18241_v62 }
 0x1d4   :  { %v2241_v18 = vrot.slane %v15053_v57, %v18242_v23  ;;  %v2245_v12 = vrot.slane %v15053_v57, %v18243_v63  ;;  %v6221_v24 = vrot.slane %v15426_v1, %v18246_v30  ;;  %v9425_v37 = vrot.slane %v9415_v7, %v18246_v30 }
 0x1d5   :  { %v9432_v50 = vrot.slane %v9416_v43, %v18246_v30  ;;  %v9439_v26 = vrot.slane %v9417_v44, %v18246_v30  ;;  %v9446_v31 = vrot.slane %v9418_v40, %v18246_v30  ;;  %v6083_v61 = vcombine.low %v1905_v9, %v1909_v51  ;;  %v18311_v43 = vld [vmem:[#allocation19_spill] sm:$0xff]  ;;  %v18312_v9 = vld [vmem:[#allocation16_spill] sm:$0xff] }
 0x1d6   :  { %v2249_v22 = vrot.slane %v15053_v57, %v18244_v14  ;;  %v2253_v13 = vrot.slane %v15053_v57, %v14625_v38  ;;  %v6084_v15 = vcombine.low %v1913_v46, %v1917_v8  ;;  %v6085_v4 = vcombine.low %v1921_v59, %v1925_v32 }
 0x1d7   :  { %v6086_v5 = vcombine.low %v1929_v35, %v1933_v28  ;;  %v6573_v49 = vcombine.low %v2225_v45, %v2229_v29  ;;  %v6574_v11 = vcombine.low %v2233_v53, %v2237_v20  ;;  %v6575_v7 = vcombine.low %v2241_v18, %v2245_v12  ;;  %v15500_v20 = vpop.xlane.xlu1 %1402 }
 0x1d8   :  { %v2065_v44 = vrot.slane %v18311_v43, %v18235_v17  ;;  %v2069_v40 = vrot.slane %v18311_v43, %v18236_v48  ;;  %v2073_v57 = vrot.slane %v18311_v43, %v18240_v41  ;;  %v2077_v51 = vrot.slane %v18311_v43, %v18241_v62 }
 0x1d9   :  { %v2081_v46 = vrot.slane %v18311_v43, %v18242_v23  ;;  %v2085_v8 = vrot.slane %v18311_v43, %v18243_v63  ;;  %v15489_v59 = vcombine.low %v9425_v37, %v9432_v50  ;;  %v6576_v32 = vcombine.low %v2249_v22, %v2253_v13 }
 0x1da   :  { %12117 = vperm.xlu1 %13491, %v18309_v34   ;;  %v2089_v35 = vrot.slane %v18311_v43, %v18244_v14  ;;  %v2093_v28 = vrot.slane %v18311_v43, %v14625_v38  ;;  %v15495_v45 = vcombine.low %v9439_v26, %v9446_v31  ;;  %v6093_v29 = vrot.slane %v6083_v61, %v18246_v30 }
 0x1db   :  { %v6100_v34 = vrot.slane %v6084_v15, %v18246_v30  ;;  %v6107_v53 = vrot.slane %v6085_v4, %v18246_v30  ;;  %v6114_v18 = vrot.slane %v6086_v5, %v18246_v30  ;;  %v6583_v12 = vrot.slane %v6573_v49, %v18246_v30  ;;  %v15515_v5 = vpop.xlane.xlu0 %1272 }
 0x1dc   :  { %v6590_v37 = vrot.slane %v6574_v11, %v18246_v30  ;;  %v6597_v50 = vrot.slane %v6575_v7, %v18246_v30  ;;  %v6328_v26 = vcombine.low %v2065_v44, %v2069_v40  ;;  %v6329_v31 = vcombine.low %v2073_v57, %v2077_v51  ;;  %v18313_v7 = vld [vmem:[#allocation24_spill] sm:$0xff]  ;;  %v18314_v57 = vld [vmem:[#allocation22_spill] sm:$0xff] }
 0x1dd   :  { %v6330_v61 = vcombine.low %v2081_v46, %v2085_v8  ;;  %v6331_v22 = vcombine.low %v2089_v35, %v2093_v28  ;;  %v6604_v13 = vrot.slane %v6576_v32, %v18246_v30  ;;  %v4273_v15 = vrot.slane %v15109_v55, %v18235_v17  ;;  %v15535_v35 = vpop.xlane.xlu1 %1270 }
 0x1de   :  { %12309 = vperm.xlu1 %13491, %v18310_v33   ;;  %v4281_v4 = vrot.slane %v15109_v55, %v18240_v41  ;;  %v4289_v49 = vrot.slane %v15109_v55, %v18242_v23  ;;  %v4293_v33 = vrot.slane %v15109_v55, %v18243_v63  ;;  %v4297_v11 = vrot.slane %v15109_v55, %v18244_v14 }
 0x1df   :  { %v6228_v43 = vrot.slane %v15428_v3, %v18246_v30  ;;  %v6115_v44 = vcombine.low %v6093_v29, %v6100_v34  ;;  %v6116_v40 = vcombine.low %v6107_v53, %v6114_v18  ;;  %v6338_v51 = vrot.slane %v6328_v26, %v18246_v30 }
 0x1e0   :  { %12111 = vperm.xlu0 %13492, %v18312_v9   ;;  %v4301_v9 = vrot.slane %v15109_v55, %v14625_v38  ;;  %v6345_v46 = vrot.slane %v6329_v31, %v18246_v30  ;;  %v6352_v8 = vrot.slane %v6330_v61, %v18246_v30  ;;  %v6359_v32 = vrot.slane %v6331_v22, %v18246_v30  ;;  %v18316_v31 = vld [vmem:[#allocation17_spill] sm:$0xff] }
 0x1e1   :  { %v9455_v3 = vrot.slane %v15489_v59, %v18246_v30  ;;  %v9462_v28 = vrot.slane %v15495_v45, %v18246_v30  ;;  %v6605_v29 = vcombine.low %v6583_v12, %v6590_v37  ;;  %v9711_v18 = vcombine.low %v4289_v49, %v4293_v33  ;;  %v15550_v12 = vpop.xlane.xlu0 %1400  ;;  %v18317_v37 = vld [vmem:[#allocation33_spill] sm:$0xff] }
 0x1e2   :  { %12303 = vperm.xlu1 %13491, %v14996_v54   ;;  %v4277_v54 = vrot.slane %v15109_v55, %v18236_v48  ;;  %v9712_v26 = vcombine.low %v4297_v11, %v4301_v9  ;;  %v4113_v61 = vrot.slane %v18316_v31, %v18235_v17  ;;  %v4117_v22 = vrot.slane %v18316_v31, %v18236_v48 }
 0x1e3   :  { %v4121_v59 = vrot.slane %v18316_v31, %v18240_v41  ;;  %v4125_v45 = vrot.slane %v18316_v31, %v18241_v62  ;;  %v4137_v49 = vrot.slane %v18316_v31, %v18244_v14  ;;  %v4141_v33 = vrot.slane %v18316_v31, %v14625_v38 }
 0x1e4   :  { %12312 = vperm.xlu0 %13492, %v15047_v58   ;;  %v4285_v58 = vrot.slane %v15109_v55, %v18241_v62  ;;  %v6606_v55 = vcombine.low %v6597_v50, %v6604_v13  ;;  %v9709_v34 = vcombine.low %v4273_v15, %v4277_v54  ;;  %v6123_v50 = vrot.slane %v6115_v44, %v18246_v30 }
 0x1e5   :  { %v6130_v13 = vrot.slane %v6116_v40, %v18246_v30  ;;  %v6360_v15 = vcombine.low %v6338_v51, %v6345_v46  ;;  %v6361_v54 = vcombine.low %v6352_v8, %v6359_v32  ;;  %v6613_v11 = vrot.slane %v6605_v29, %v18246_v30 }
 0x1e6   :  { %12120 = vperm.xlu1 %13491, %v18313_v7   ;;  %v9710_v53 = vcombine.low %v4281_v4, %v4285_v58  ;;  %v18315_v7 = vld [vmem:[#allocation27_spill] sm:$0xff]  ;;  %v4129_v4 = vrot.slane %v18316_v31, %v18242_v23  ;;  %v4133_v58 = vrot.slane %v18316_v31, %v18243_v63  ;;  %v6620_v44 = vrot.slane %v6606_v55, %v18246_v30 }
 0x1e7   :  { %v9719_v40 = vrot.slane %v9709_v34, %v18246_v30  ;;  %v9733_v51 = vrot.slane %v9711_v18, %v18246_v30  ;;  %v9740_v46 = vrot.slane %v9712_v26, %v18246_v30  ;;  %v9464_v8 = vcombine.low %v4113_v61, %v4117_v22  ;;  %v18318_v18 = vld [vmem:[#allocation26_spill] sm:$0xff] }
 0x1e8   :  { %12306 = vperm.xlu0 %13492, %v18314_v57   ;;  %v9726_v9 = vrot.slane %v9710_v53, %v18246_v30  ;;  %v15567_v57 = vpop.xlane.xlu1 %1398  ;;  %v9465_v32 = vcombine.low %v4121_v59, %v4125_v45  ;;  %v15576_v29 = vcombine.low %v6221_v24, %v6228_v43  ;;  %v15578_v55 = vcombine.low %v9455_v3, %v9462_v28 }
 0x1e9   :  { %v6368_v34 = vrot.slane %v6360_v15, %v18246_v30  ;;  %v6375_v53 = vrot.slane %v6361_v54, %v18246_v30  ;;  %v2161_v26 = vrot.slane %v18318_v18, %v18235_v17  ;;  %v2165_v31 = vrot.slane %v18318_v18, %v18236_v48 }
 0x1ea   :  { %12114 = vperm.xlu1 %13491, %v18315_v7   ;;  %v9467_v7 = vcombine.low %v4137_v49, %v4141_v33  ;;  %v15588_v61 = vcombine.low %v6123_v50, %v6130_v13  ;;  %v15590_v1 = vcombine.low %v6613_v11, %v6620_v44  ;;  %v2169_v24 = vrot.slane %v18318_v18, %v18240_v41  ;;  %v18319_v49 = vld [vmem:[#allocation25_spill] sm:$0xff] }
 0x1eb   :  { %v2173_v43 = vrot.slane %v18318_v18, %v18241_v62  ;;  %v15597_v3 = vcombine.low %v9719_v40, %v9726_v9  ;;  %v15599_v28 = vcombine.low %v9733_v51, %v9740_v46  ;;  %v9474_v22 = vrot.slane %v9464_v8, %v18246_v30 }
 0x1ec   :  { %12324 = vperm.xlu0 %13492, %v18317_v37   ;;  %v9481_v59 = vrot.slane %v9465_v32, %v18246_v30  ;;  %v2177_v45 = vrot.slane %v18318_v18, %v18242_v23  ;;  %v2181_v37 = vrot.slane %v18318_v18, %v18243_v63  ;;  %v2185_v50 = vrot.slane %v18318_v18, %v18244_v14  ;;  %v15612_v13 = vpop.xlane.xlu1 %1282 }
 0x1ed   :  { %v15614_v15 = vcombine.low %v6368_v34, %v6375_v53  ;;  %v2001_v33 = vrot.slane %v18319_v49, %v18235_v17  ;;  %v2005_v11 = vrot.slane %v18319_v49, %v18236_v48  ;;  %v2009_v44 = vrot.slane %v18319_v49, %v18240_v41 }
 0x1ee   :  { %12129 = vperm.xlu1 %13491, %v15402_v21   ;;  %v9466_v21 = vcombine.low %v4129_v4, %v4133_v58  ;;  %v6475_v4 = vcombine.low %v2161_v26, %v2165_v31  ;;  %v6476_v58 = vcombine.low %v2169_v24, %v2173_v43  ;;  %v9749_v40 = vrot.slane %v15597_v3, %v18246_v30 }
 0x1ef   :  { %v9756_v9 = vrot.slane %v15599_v28, %v18246_v30  ;;  %v9496_v51 = vcombine.low %v9474_v22, %v9481_v59  ;;  %v2013_v46 = vrot.slane %v18319_v49, %v18241_v62  ;;  %v6477_v32 = vcombine.low %v2177_v45, %v2181_v37  ;;  %v18320_v22 = vld [vmem:[#allocation23_spill] sm:$0xff] }
 0x1f0   :  { %12318 = vperm.xlu0 %13492, %v15410_v39   ;;  %v15586_v39 = vpop.xlane.xlu0 %1268  ;;  %v9488_v54 = vrot.slane %v9466_v21, %v18246_v30  ;;  %v2017_v53 = vrot.slane %v18319_v49, %v18242_v23  ;;  %v2029_v26 = vrot.slane %v18319_v49, %v14625_v38  ;;  %v6492_v31 = vrot.slane %v6476_v58, %v18246_v30  ;;  %v15644_v3 = vpop.xlane.xlu1 %1410 }
 0x1f1   :  { %v6231_v24 = vcombine.low %v2009_v44, %v2013_v46  ;;  %v4209_v59 = vrot.slane %v18320_v22, %v18235_v17  ;;  %v4213_v45 = vrot.slane %v18320_v22, %v18236_v48  ;;  %v4217_v37 = vrot.slane %v18320_v22, %v18240_v41 }
 0x1f2   :  { %12321 = vperm.xlu1 %13491, %v15412_v36   ;;  %v2189_v36 = vrot.slane %v18318_v18, %v14625_v38  ;;  %v2025_v18 = vrot.slane %v18319_v49, %v18244_v14  ;;  %v4229_v44 = vrot.slane %v18320_v22, %v18243_v63 }
 0x1f4   :  { %12144 = vperm.xlu0 %13492, %v15414_v6   ;;  %v9495_v6 = vrot.slane %v9467_v7, %v18246_v30  ;;  %v15631_v8 = vpop.xlane.xlu0 %1396  ;;  %v6478_v34 = vcombine.low %v2185_v50, %v2189_v36  ;;  %v6485_v7 = vrot.slane %v6475_v4, %v18246_v30  ;;  %v6233_v28 = vcombine.low %v2025_v18, %v2029_v26 }
 0x1f5   :  { %v6499_v50 = vrot.slane %v6477_v32, %v18246_v30  ;;  %v4237_v32 = vrot.slane %v18320_v22, %v14625_v38 }
 0x1f6   :  { %12123 = vperm.xlu1 %13491, %v15416_v16   ;;  %v2021_v16 = vrot.slane %v18319_v49, %v18243_v63  ;;  %v9497_v21 = vcombine.low %v9488_v54, %v9495_v6  ;;  %v6506_v36 = vrot.slane %v6478_v34, %v18246_v30  ;;  %v9504_v6 = vrot.slane %v9496_v51, %v18246_v30 }
 0x1f7   :  { %v6261_v58 = vrot.slane %v6233_v28, %v18246_v30  ;;  %v4221_v49 = vrot.slane %v18320_v22, %v18241_v62  ;;  %v4233_v51 = vrot.slane %v18320_v22, %v18244_v14  ;;  %v6507_v46 = vcombine.low %v6485_v7, %v6492_v31  ;;  %v18321_v31 = vld [vmem:[#allocation21_spill] sm:$0xff] }
 0x1f8   :  { %12336 = vperm.xlu0 %13492, %v15418_v25   ;;  %v6230_v25 = vcombine.low %v2001_v33, %v2005_v11  ;;  %v6232_v43 = vcombine.low %v2017_v53, %v2021_v16  ;;  %v15663_v33 = vpop.xlane.xlu0 %1280  ;;  %v4225_v11 = vrot.slane %v18320_v22, %v18242_v23  ;;  %v9611_v34 = vcombine.low %v4209_v59, %v4213_v45 }
 0x1f9   :  { %v9612_v53 = vcombine.low %v4217_v37, %v4221_v49  ;;  %v9757_v16 = vcombine.low %v9749_v40, %v9756_v9  ;;  %v4049_v22 = vrot.slane %v18321_v31, %v18235_v17  ;;  %v4057_v40 = vrot.slane %v18321_v31, %v18240_v41 }
 0x1fa   :  { %12315 = vperm.xlu1 %13491, %v15420_v42   ;;  %v6240_v54 = vrot.slane %v6230_v25, %v18246_v30  ;;  %v6247_v42 = vrot.slane %v6231_v24, %v18246_v30  ;;  %v6254_v4 = vrot.slane %v6232_v43, %v18246_v30  ;;  %v9613_v26 = vcombine.low %v4225_v11, %v4229_v44  ;;  %v15676_v25 = vpop.xlane.xlu1 %1278 }
 0x1fb   :  { %v9614_v43 = vcombine.low %v4233_v51, %v4237_v32  ;;  %v9621_v28 = vrot.slane %v9611_v34, %v18246_v30  ;;  %v6515_v59 = vrot.slane %v6507_v46, %v18246_v30  ;;  %v4061_v37 = vrot.slane %v18321_v31, %v18241_v62  ;;  %v18322_v32 = vld [vmem:[#allocation32_spill] sm:$0xff] }
 0x1fc   :  { %12138 = vperm.xlu0 %13492, %v15422_v19   ;;  %v9511_v19 = vrot.slane %v9497_v21, %v18246_v30  ;;  %v6508_v21 = vcombine.low %v6499_v50, %v6506_v36  ;;  %v6262_v18 = vcombine.low %v6240_v54, %v6247_v42  ;;  %v6263_v24 = vcombine.low %v6254_v4, %v6261_v58  ;;  %v15692_v50 = vpop.xlane.xlu0 %1408 }
 0x1fd   :  { %v9635_v7 = vrot.slane %v9613_v26, %v18246_v30  ;;  %v9642_v45 = vrot.slane %v9614_v43, %v18246_v30  ;;  %v4065_v42 = vrot.slane %v18321_v31, %v18242_v23  ;;  %v4073_v58 = vrot.slane %v18321_v31, %v18244_v14 }
 0x1fe   :  { %12132 = vperm.xlu1 %13491, %v15576_v29   ;;  %v9628_v29 = vrot.slane %v9612_v53, %v18246_v30  ;;  %v9512_v9 = vcombine.low %v9504_v6, %v9511_v19  ;;  %v6522_v36 = vrot.slane %v6508_v21, %v18246_v30  ;;  %v6270_v6 = vrot.slane %v6262_v18, %v18246_v30  ;;  %v15706_v51 = vpop.xlane.xlu1 %1406 }
 0x1ff   :  { %v9644_v4 = vcombine.low %v9635_v7, %v9642_v45  ;;  %v4077_v49 = vrot.slane %v18321_v31, %v14625_v38  ;;  %v9367_v11 = vcombine.low %v4057_v40, %v4061_v37  ;;  %v2353_v34 = vrot.slane %v18322_v32, %v18235_v17 }
 0x200   :  { %12330 = vperm.xlu0 %13492, %v15578_v55   ;;  %v4053_v55 = vrot.slane %v18321_v31, %v18236_v48  ;;  %v9643_v54 = vcombine.low %v9621_v28, %v9628_v29  ;;  %v2357_v53 = vrot.slane %v18322_v32, %v18236_v48  ;;  %v2361_v21 = vrot.slane %v18322_v32, %v18240_v41 }
 0x201   :  { %v9369_v46 = vcombine.low %v4073_v58, %v4077_v49  ;;  %v9658_v26 = vrot.slane %v9644_v4, %v18246_v30  ;;  %v9383_v43 = vrot.slane %v9367_v11, %v18246_v30  ;;  %v2365_v7 = vrot.slane %v18322_v32, %v18241_v62 }
 0x202   :  { %12126 = vperm.xlu1 %13491, %v15588_v61   ;;  %v4069_v61 = vrot.slane %v18321_v31, %v18243_v63  ;;  %v9366_v19 = vcombine.low %v4049_v22, %v4053_v55  ;;  %v9651_v18 = vrot.slane %v9643_v54, %v18246_v30  ;;  %v15723_v31 = vpop.xlane.xlu0 %1276  ;;  %v2373_v55 = vrot.slane %v18322_v32, %v18243_v63  ;;  %v15734_v58 = vpop.xlane.xlu1 %1290 }
 0x203   :  { %v9397_v29 = vrot.slane %v9369_v46, %v18246_v30  ;;  %v2377_v40 = vrot.slane %v18322_v32, %v18244_v14  ;;  %v2381_v45 = vrot.slane %v18322_v32, %v14625_v38  ;;  %v6769_v37 = vcombine.low %v2353_v34, %v2357_v53  ;;  %v18323_v46 = vld [vmem:[#allocation20_spill] sm:$0xff] }
 0x204   :  { %12156 = vperm.xlu0 %13492, %v15590_v1   ;;  %v6277_v1 = vrot.slane %v6263_v24, %v18246_v30  ;;  %v9368_v44 = vcombine.low %v4065_v42, %v4069_v61  ;;  %v9376_v24 = vrot.slane %v9366_v19, %v18246_v30  ;;  %v9659_v42 = vcombine.low %v9651_v18, %v9658_v26 }
 0x205   :  { %v6772_v19 = vcombine.low %v2377_v40, %v2381_v45  ;;  %v6779_v11 = vrot.slane %v6769_v37, %v18246_v30  ;;  %v18324_v40 = vld [vmem:[#allocation28_spill] sm:$0xff] }
 0x206   :  { %12141 = vperm.xlu1 %13491, %v15614_v15   ;;  %v6523_v15 = vcombine.low %v6515_v59, %v6522_v36  ;;  %v9390_v28 = vrot.slane %v9368_v44, %v18246_v30  ;;  %v9398_v22 = vcombine.low %v9376_v24, %v9383_v43  ;;  %v6770_v36 = vcombine.low %v2361_v21, %v2365_v7  ;;  %v15749_v18 = vpop.xlane.xlu0 %1404  ;;  %v15762_v45 = vpop.xlane.xlu1 %1418 }
 0x207   :  { %v6278_v54 = vcombine.low %v6270_v6, %v6277_v1  ;;  %v2197_v6 = vrot.slane %v18323_v46, %v18236_v48  ;;  %v2201_v1 = vrot.slane %v18323_v46, %v18240_v41  ;;  %v6800_v34 = vrot.slane %v6772_v19, %v18246_v30 }
 0x208   :  { %12348 = vperm.xlu0 %13492, %v9757_v16   ;;  %v2369_v16 = vrot.slane %v18322_v32, %v18242_v23  ;;  %v9399_v59 = vcombine.low %v9390_v28, %v9397_v29  ;;  %v9406_v61 = vrot.slane %v9398_v22, %v18246_v30  ;;  %v2193_v32 = vrot.slane %v18323_v46, %v18235_v17 }
 0x209   :  { %v2205_v21 = vrot.slane %v18323_v46, %v18241_v62  ;;  %v2209_v24 = vrot.slane %v18323_v46, %v18242_v23  ;;  %v2213_v43 = vrot.slane %v18323_v46, %v18243_v63  ;;  %v2217_v29 = vrot.slane %v18323_v46, %v18244_v14 }
 0x20a   :  { %12333 = vperm.xlu1 %13491, %v9512_v9   ;;  %v6771_v4 = vcombine.low %v2369_v16, %v2373_v55  ;;  %v9413_v49 = vrot.slane %v9399_v59, %v18246_v30  ;;  %v6786_v9 = vrot.slane %v6770_v36, %v18246_v30  ;;  %v2221_v7 = vrot.slane %v18323_v46, %v14625_v38 }
 0x20b   :  { %v6524_v22 = vcombine.low %v2193_v32, %v2197_v6  ;;  %v6525_v16 = vcombine.low %v2201_v1, %v2205_v21  ;;  %v6526_v55 = vcombine.low %v2209_v24, %v2213_v43  ;;  %v4401_v59 = vrot.slane %v18324_v40, %v18235_v17  ;;  %v15783_v21 = vpop.xlane.xlu0 %1288 }
 0x20c   :  { %12150 = vperm.xlu0 %13492, %v6523_v15   ;;  %v6793_v44 = vrot.slane %v6771_v4, %v18246_v30  ;;  %v6801_v53 = vcombine.low %v6779_v11, %v6786_v9  ;;  %v9414_v26 = vcombine.low %v9406_v61, %v9413_v49  ;;  %v6527_v36 = vcombine.low %v2217_v29, %v2221_v7  ;;  %v18325_v61 = vld [vmem:[#allocation29_spill] sm:$0xff]  ;;  %v18326_v4 = vld [vmem:[#allocation7_spill] sm:$0xff] }
 0x20d   :  { %v1564_v49 = vadd.f32 %v18326_v4, %v18325_v61  ;;  %v6534_v19 = vrot.slane %v6524_v22, %v18246_v30  ;;  %v6541_v11 = vrot.slane %v6525_v16, %v18246_v30  ;;  %v4413_v32 = vrot.slane %v18324_v40, %v18241_v62 }
 0x20e   :  { %12135 = vperm.xlu1 %13491, %v6278_v54   ;;  %v6802_v15 = vcombine.low %v6793_v44, %v6800_v34  ;;  %v6809_v28 = vrot.slane %v6801_v53, %v18246_v30  ;;  %v4405_v54 = vrot.slane %v18324_v40, %v18236_v48  ;;  %v6548_v44 = vrot.slane %v6526_v55, %v18246_v30 }
 0x20f   :  { %v6555_v46 = vrot.slane %v6527_v36, %v18246_v30  ;;  %v6556_v6 = vcombine.low %v6534_v19, %v6541_v11  ;;  %v4417_v1 = vrot.slane %v18324_v40, %v18242_v23  ;;  %v4421_v34 = vrot.slane %v18324_v40, %v18243_v63 }
 0x210   :  { %12342 = vperm.xlu0 %13492, %v9659_v42   ;;  %v6816_v37 = vrot.slane %v6802_v15, %v18246_v30  ;;  %v4409_v42 = vrot.slane %v18324_v40, %v18240_v41  ;;  %v4425_v53 = vrot.slane %v18324_v40, %v18244_v14  ;;  %v4429_v24 = vrot.slane %v18324_v40, %v14625_v38 }
 0x211   :  { %v9905_v43 = vcombine.low %v4401_v59, %v4405_v54  ;;  %v6564_v29 = vrot.slane %v6556_v6, %v18246_v30  ;;  %v9907_v7 = vcombine.low %v4417_v1, %v4421_v34  ;;  %v4241_v61 = vrot.slane %v1564_v49, %v18235_v17 }
 0x212   :  { %12327 = vperm.xlu1 %13491, %v9414_v26   ;;  %v6817_v9 = vcombine.low %v6809_v28, %v6816_v37  ;;  %v6557_v26 = vcombine.low %v6548_v44, %v6555_v46  ;;  %v9906_v15 = vcombine.low %v4409_v42, %v4413_v32  ;;  %v1503_v28 = vadd.f32 %v18326_v4, %v15368_v56  ;;  %v15802_v46 = vpop.xlane.xlu1 %1286 }
 0x213   :  { %v9908_v16 = vcombine.low %v4425_v53, %v4429_v24  ;;  %v9915_v55 = vrot.slane %v9905_v43, %v18246_v30  ;;  %v9929_v36 = vrot.slane %v9907_v7, %v18246_v30  ;;  %v4245_v40 = vrot.slane %v1564_v49, %v18236_v48  ;;  %v18327_v53 = vld [vmem:[#allocation34_spill] sm:$0xff] }
 0x214   :  { %12168 = vperm.xlu0 %13492, %v6817_v9   ;;  %v6571_v22 = vrot.slane %v6557_v26, %v18246_v30  ;;  %v9922_v37 = vrot.slane %v9906_v15, %v18246_v30  ;;  %v4249_v59 = vrot.slane %v1564_v49, %v18240_v41  ;;  %v4253_v19 = vrot.slane %v1564_v49, %v18241_v62 }
 0x215   :  { %v9936_v56 = vrot.slane %v9908_v16, %v18246_v30  ;;  %v4257_v11 = vrot.slane %v1564_v49, %v18242_v23  ;;  %v4261_v9 = vrot.slane %v1564_v49, %v18243_v63  ;;  %v4265_v44 = vrot.slane %v1564_v49, %v18244_v14 }
 0x216   :  { %v6572_v54 = vcombine.low %v6564_v29, %v6571_v22  ;;  %v9937_v42 = vcombine.low %v9915_v55, %v9922_v37  ;;  %v4269_v1 = vrot.slane %v1564_v49, %v14625_v38  ;;  %v9660_v34 = vcombine.low %v4241_v61, %v4245_v40 }
 0x217   :  { %v9938_v32 = vcombine.low %v9929_v36, %v9936_v56  ;;  %v1498_v26 = vadd.f32 %v18326_v4, %v18327_v53  ;;  %v9661_v24 = vcombine.low %v4249_v59, %v4253_v19  ;;  %v9662_v43 = vcombine.low %v4257_v11, %v4261_v9 }
 0x218   :  { %12153 = vperm.xlu1 %13491, %v6572_v54   ;;  %v9945_v6 = vrot.slane %v9937_v42, %v18246_v30  ;;  %v2289_v15 = vrot.slane %v1503_v28, %v18235_v17  ;;  %v9663_v7 = vcombine.low %v4265_v44, %v4269_v1  ;;  %v9670_v22 = vrot.slane %v9660_v34, %v18246_v30  ;;  %v15823_v44 = vpop.xlane.xlu0 %1416 }
 0x219   :  { %v9952_v29 = vrot.slane %v9938_v32, %v18246_v30  ;;  %v2293_v16 = vrot.slane %v1503_v28, %v18236_v48  ;;  %v9677_v55 = vrot.slane %v9661_v24, %v18246_v30  ;;  %v9684_v37 = vrot.slane %v9662_v43, %v18246_v30 }
 0x21a   :  { %v2297_v49 = vrot.slane %v1503_v28, %v18240_v41  ;;  %v2301_v36 = vrot.slane %v1503_v28, %v18241_v62  ;;  %v9691_v40 = vrot.slane %v9663_v7, %v18246_v30  ;;  %v2305_v59 = vrot.slane %v1503_v28, %v18242_v23 }
 0x21b   :  { %v9953_v61 = vcombine.low %v9945_v6, %v9952_v29  ;;  %v2309_v54 = vrot.slane %v1503_v28, %v18243_v63  ;;  %v9692_v56 = vcombine.low %v9670_v22, %v9677_v55  ;;  %v2313_v42 = vrot.slane %v1503_v28, %v18244_v14 }
 0x21c   :  { %v2317_v19 = vrot.slane %v1503_v28, %v14625_v38  ;;  %v6671_v11 = vcombine.low %v2289_v15, %v2293_v16  ;;  %v1567_v9 = vadd.f32 %v18326_v4, %v15424_v10  ;;  %v9693_v32 = vcombine.low %v9684_v37, %v9691_v40 }
 0x21d   :  { %12360 = vperm.xlu0 %13492, %v9953_v61   ;;  %v6672_v6 = vcombine.low %v2297_v49, %v2301_v36  ;;  %v6673_v1 = vcombine.low %v2305_v59, %v2309_v54  ;;  %v9700_v34 = vrot.slane %v9692_v56, %v18246_v30  ;;  %v2129_v43 = vrot.slane %v1498_v26, %v18235_v17 }
 0x21e   :  { %v6674_v53 = vcombine.low %v2313_v42, %v2317_v19  ;;  %v6681_v24 = vrot.slane %v6671_v11, %v18246_v30  ;;  %v9707_v29 = vrot.slane %v9693_v32, %v18246_v30  ;;  %v2133_v10 = vrot.slane %v1498_v26, %v18236_v48  ;;  %v15841_v19 = vpop.xlane.xlu1 %1414 }
 0x21f   :  { %v6688_v28 = vrot.slane %v6672_v6, %v18246_v30  ;;  %v6695_v15 = vrot.slane %v6673_v1, %v18246_v30  ;;  %v2137_v22 = vrot.slane %v1498_v26, %v18240_v41  ;;  %v2141_v16 = vrot.slane %v1498_v26, %v18241_v62 }
 0x220   :  { %v6702_v7 = vrot.slane %v6674_v53, %v18246_v30  ;;  %v2145_v55 = vrot.slane %v1498_v26, %v18242_v23  ;;  %v9708_v37 = vcombine.low %v9700_v34, %v9707_v29  ;;  %v2149_v36 = vrot.slane %v1498_v26, %v18243_v63 }
 0x221   :  { %v6703_v49 = vcombine.low %v6681_v24, %v6688_v28  ;;  %v2153_v61 = vrot.slane %v1498_v26, %v18244_v14  ;;  %v2157_v59 = vrot.slane %v1498_v26, %v14625_v38  ;;  %v6426_v54 = vcombine.low %v2129_v43, %v2133_v10 }
 0x222   :  { %v6704_v40 = vcombine.low %v6695_v15, %v6702_v7  ;;  %v6427_v56 = vcombine.low %v2137_v22, %v2141_v16  ;;  %v1562_v42 = vadd.f32 %v18326_v4, %v15324_v0  ;;  %12345 = vperm.xlu1 %13491, %v9708_v37   ;;  %v6428_v32 = vcombine.low %v2145_v55, %v2149_v36  ;;  %v15859_v36 = vpop.xlane.xlu0 %1284 }
 0x223   :  { %v6711_v11 = vrot.slane %v6703_v49, %v18246_v30  ;;  %v4337_v6 = vrot.slane %v1567_v9, %v18235_v17  ;;  %v6429_v34 = vcombine.low %v2153_v61, %v2157_v59  ;;  %v6436_v53 = vrot.slane %v6426_v54, %v18246_v30 }
 0x224   :  { %v6718_v1 = vrot.slane %v6704_v40, %v18246_v30  ;;  %v6443_v26 = vrot.slane %v6427_v56, %v18246_v30  ;;  %v6450_v24 = vrot.slane %v6428_v32, %v18246_v30  ;;  %v4341_v43 = vrot.slane %v1567_v9, %v18236_v48 }
 0x225   :  { %v4345_v0 = vrot.slane %v1567_v9, %v18240_v41  ;;  %v4349_v29 = vrot.slane %v1567_v9, %v18241_v62  ;;  %v6457_v15 = vrot.slane %v6429_v34, %v18246_v30  ;;  %v4353_v7 = vrot.slane %v1567_v9, %v18242_v23 }
 0x226   :  { %v6719_v28 = vcombine.low %v6711_v11, %v6718_v1  ;;  %v6458_v10 = vcombine.low %v6436_v53, %v6443_v26  ;;  %v4357_v22 = vrot.slane %v1567_v9, %v18243_v63  ;;  %v4361_v16 = vrot.slane %v1567_v9, %v18244_v14 }
 0x227   :  { %v4365_v55 = vrot.slane %v1567_v9, %v14625_v38  ;;  %v9807_v37 = vcombine.low %v4337_v6, %v4341_v43  ;;  %v1509_v49 = vadd.f32 %v18326_v4, %v15466_v47  ;;  %v6459_v61 = vcombine.low %v6450_v24, %v6457_v15 }
 0x228   :  { %12162 = vperm.xlu0 %13492, %v6719_v28   ;;  %v6466_v40 = vrot.slane %v6458_v10, %v18246_v30  ;;  %v9808_v59 = vcombine.low %v4345_v0, %v4349_v29  ;;  %v9809_v54 = vcombine.low %v4353_v7, %v4357_v22  ;;  %v4177_v32 = vrot.slane %v1562_v42, %v18235_v17 }
 0x229   :  { %v9810_v56 = vcombine.low %v4361_v16, %v4365_v55  ;;  %v9817_v11 = vrot.slane %v9807_v37, %v18246_v30  ;;  %v6473_v1 = vrot.slane %v6459_v61, %v18246_v30  ;;  %v4181_v6 = vrot.slane %v1562_v42, %v18236_v48  ;;  %v15877_v55 = vpop.xlane.xlu1 %1298 }
 0x22a   :  { %v9824_v9 = vrot.slane %v9808_v59, %v18246_v30  ;;  %v4185_v47 = vrot.slane %v1562_v42, %v18240_v41  ;;  %v9831_v34 = vrot.slane %v9809_v54, %v18246_v30  ;;  %v4189_v26 = vrot.slane %v1562_v42, %v18241_v62 }
 0x22b   :  { %v9838_v53 = vrot.slane %v9810_v56, %v18246_v30  ;;  %v4193_v24 = vrot.slane %v1562_v42, %v18242_v23  ;;  %v6474_v43 = vcombine.low %v6466_v40, %v6473_v1  ;;  %v4197_v29 = vrot.slane %v1562_v42, %v18243_v63 }
 0x22c   :  { %v9839_v0 = vcombine.low %v9817_v11, %v9824_v9  ;;  %v4201_v28 = vrot.slane %v1562_v42, %v18244_v14  ;;  %v4205_v10 = vrot.slane %v1562_v42, %v14625_v38  ;;  %v9562_v7 = vcombine.low %v4177_v32, %v4181_v6 }
 0x22d   :  { %v9840_v15 = vcombine.low %v9831_v34, %v9838_v53  ;;  %v9563_v22 = vcombine.low %v4185_v47, %v4189_v26  ;;  %v1504_v16 = vadd.f32 %v18326_v4, %v15354_v52  ;;  %12147 = vperm.xlu1 %13491, %v6474_v43   ;;  %v9564_v61 = vcombine.low %v4193_v24, %v4197_v29  ;;  %v15895_v29 = vpop.xlane.xlu0 %1412 }
 0x22e   :  { %v9847_v37 = vrot.slane %v9839_v0, %v18246_v30  ;;  %v2481_v40 = vrot.slane %v1509_v49, %v18235_v17  ;;  %v9565_v54 = vcombine.low %v4201_v28, %v4205_v10  ;;  %v9572_v56 = vrot.slane %v9562_v7, %v18246_v30 }
 0x22f   :  { %v9854_v59 = vrot.slane %v9840_v15, %v18246_v30  ;;  %v9579_v42 = vrot.slane %v9563_v22, %v18246_v30  ;;  %v9586_v11 = vrot.slane %v9564_v61, %v18246_v30  ;;  %v2485_v32 = vrot.slane %v1509_v49, %v18236_v48 }
 0x230   :  { %v2489_v52 = vrot.slane %v1509_v49, %v18240_v41  ;;  %v2493_v1 = vrot.slane %v1509_v49, %v18241_v62  ;;  %v9593_v6 = vrot.slane %v9565_v54, %v18246_v30  ;;  %v2497_v34 = vrot.slane %v1509_v49, %v18242_v23 }
 0x231   :  { %v9855_v9 = vcombine.low %v9847_v37, %v9854_v59  ;;  %v9594_v47 = vcombine.low %v9572_v56, %v9579_v42  ;;  %v2501_v53 = vrot.slane %v1509_v49, %v18243_v63  ;;  %v2505_v26 = vrot.slane %v1509_v49, %v18244_v14 }
 0x232   :  { %v2509_v24 = vrot.slane %v1509_v49, %v14625_v38  ;;  %v6965_v43 = vcombine.low %v2481_v40, %v2485_v32  ;;  %v1573_v0 = vadd.f32 %v18326_v4, %v15500_v20  ;;  %v9595_v28 = vcombine.low %v9586_v11, %v9593_v6 }
 0x233   :  { %12354 = vperm.xlu0 %13492, %v9855_v9   ;;  %v9602_v15 = vrot.slane %v9594_v47, %v18246_v30  ;;  %v6966_v10 = vcombine.low %v2489_v52, %v2493_v1  ;;  %v6967_v7 = vcombine.low %v2497_v34, %v2501_v53  ;;  %v2321_v61 = vrot.slane %v1504_v16, %v18235_v17 }
 0x234   :  { %v6968_v22 = vcombine.low %v2505_v26, %v2509_v24  ;;  %v6975_v37 = vrot.slane %v6965_v43, %v18246_v30  ;;  %v9609_v59 = vrot.slane %v9595_v28, %v18246_v30  ;;  %v2325_v40 = vrot.slane %v1504_v16, %v18236_v48  ;;  %v15913_v24 = vpop.xlane.xlu1 %1426 }
 0x235   :  { %v6982_v49 = vrot.slane %v6966_v10, %v18246_v30  ;;  %v2329_v20 = vrot.slane %v1504_v16, %v18240_v41  ;;  %v6989_v54 = vrot.slane %v6967_v7, %v18246_v30  ;;  %v2333_v42 = vrot.slane %v1504_v16, %v18241_v62 }
 0x236   :  { %v6996_v56 = vrot.slane %v6968_v22, %v18246_v30  ;;  %v2337_v11 = vrot.slane %v1504_v16, %v18242_v23  ;;  %v9610_v32 = vcombine.low %v9602_v15, %v9609_v59  ;;  %v2341_v1 = vrot.slane %v1504_v16, %v18243_v63 }
 0x237   :  { %v6997_v52 = vcombine.low %v6975_v37, %v6982_v49  ;;  %v2345_v9 = vrot.slane %v1504_v16, %v18244_v14  ;;  %v2349_v47 = vrot.slane %v1504_v16, %v14625_v38  ;;  %v6720_v34 = vcombine.low %v2321_v61, %v2325_v40 }
 0x238   :  { %v6998_v6 = vcombine.low %v6989_v54, %v6996_v56  ;;  %v6721_v53 = vcombine.low %v2329_v20, %v2333_v42  ;;  %v1568_v26 = vadd.f32 %v18326_v4, %v15386_v27  ;;  %12339 = vperm.xlu1 %13491, %v9610_v32   ;;  %v6722_v28 = vcombine.low %v2337_v11, %v2341_v1  ;;  %v15931_v1 = vpop.xlane.xlu0 %1296 }
 0x239   :  { %v7005_v43 = vrot.slane %v6997_v52, %v18246_v30  ;;  %v4529_v15 = vrot.slane %v1573_v0, %v18235_v17  ;;  %v6723_v7 = vcombine.low %v2345_v9, %v2349_v47  ;;  %v6730_v22 = vrot.slane %v6720_v34, %v18246_v30 }
 0x23a   :  { %v7012_v10 = vrot.slane %v6998_v6, %v18246_v30  ;;  %v6737_v16 = vrot.slane %v6721_v53, %v18246_v30  ;;  %v6744_v37 = vrot.slane %v6722_v28, %v18246_v30  ;;  %v4533_v61 = vrot.slane %v1573_v0, %v18236_v48 }
 0x23b   :  { %v4537_v27 = vrot.slane %v1573_v0, %v18240_v41  ;;  %v4541_v59 = vrot.slane %v1573_v0, %v18241_v62  ;;  %v6751_v40 = vrot.slane %v6723_v7, %v18246_v30  ;;  %v4545_v54 = vrot.slane %v1573_v0, %v18242_v23 }
 0x23c   :  { %v7013_v49 = vcombine.low %v7005_v43, %v7012_v10  ;;  %v6752_v20 = vcombine.low %v6730_v22, %v6737_v16  ;;  %v4549_v56 = vrot.slane %v1573_v0, %v18243_v63  ;;  %v4553_v42 = vrot.slane %v1573_v0, %v18244_v14 }
 0x23d   :  { %v4557_v11 = vrot.slane %v1573_v0, %v14625_v38  ;;  %v10101_v32 = vcombine.low %v4529_v15, %v4533_v61  ;;  %v1507_v52 = vadd.f32 %v18326_v4, %v15535_v35  ;;  %v6753_v9 = vcombine.low %v6744_v37, %v6751_v40 }
 0x23e   :  { %12180 = vperm.xlu0 %13492, %v7013_v49   ;;  %v6760_v6 = vrot.slane %v6752_v20, %v18246_v30  ;;  %v10102_v47 = vcombine.low %v4537_v27, %v4541_v59  ;;  %v10103_v34 = vcombine.low %v4545_v54, %v4549_v56  ;;  %v4369_v28 = vrot.slane %v1568_v26, %v18235_v17 }
 0x23f   :  { %v10104_v53 = vcombine.low %v4553_v42, %v4557_v11  ;;  %v10111_v43 = vrot.slane %v10101_v32, %v18246_v30  ;;  %v6767_v10 = vrot.slane %v6753_v9, %v18246_v30  ;;  %v4373_v15 = vrot.slane %v1568_v26, %v18236_v48  ;;  %v15949_v11 = vpop.xlane.xlu1 %1294 }
 0x240   :  { %v10118_v0 = vrot.slane %v10102_v47, %v18246_v30  ;;  %v4377_v35 = vrot.slane %v1568_v26, %v18240_v41  ;;  %v10125_v7 = vrot.slane %v10103_v34, %v18246_v30  ;;  %v4381_v16 = vrot.slane %v1568_v26, %v18241_v62 }
 0x241   :  { %v10132_v22 = vrot.slane %v10104_v53, %v18246_v30  ;;  %v4385_v37 = vrot.slane %v1568_v26, %v18242_v23  ;;  %v6768_v61 = vcombine.low %v6760_v6, %v6767_v10  ;;  %v4389_v59 = vrot.slane %v1568_v26, %v18243_v63 }
 0x242   :  { %v10133_v27 = vcombine.low %v10111_v43, %v10118_v0  ;;  %v4393_v49 = vrot.slane %v1568_v26, %v18244_v14  ;;  %v4397_v20 = vrot.slane %v1568_v26, %v14625_v38  ;;  %v9856_v54 = vcombine.low %v4369_v28, %v4373_v15 }
 0x243   :  { %v10134_v40 = vcombine.low %v10125_v7, %v10132_v22  ;;  %v9857_v56 = vcombine.low %v4377_v35, %v4381_v16  ;;  %v1502_v42 = vadd.f32 %v18326_v4, %v15442_v60  ;;  %12165 = vperm.xlu1 %13491, %v6768_v61   ;;  %v9858_v9 = vcombine.low %v4385_v37, %v4389_v59  ;;  %v15967_v59 = vpop.xlane.xlu0 %1424 }
 0x244   :  { %v10141_v32 = vrot.slane %v10133_v27, %v18246_v30  ;;  %v2417_v6 = vrot.slane %v1507_v52, %v18235_v17  ;;  %v9859_v34 = vcombine.low %v4393_v49, %v4397_v20  ;;  %v9866_v53 = vrot.slane %v9856_v54, %v18246_v30 }
 0x245   :  { %v10148_v47 = vrot.slane %v10134_v40, %v18246_v30  ;;  %v9873_v26 = vrot.slane %v9857_v56, %v18246_v30  ;;  %v9880_v43 = vrot.slane %v9858_v9, %v18246_v30  ;;  %v2421_v28 = vrot.slane %v1507_v52, %v18236_v48 }
 0x246   :  { %v2425_v60 = vrot.slane %v1507_v52, %v18240_v41  ;;  %v2429_v10 = vrot.slane %v1507_v52, %v18241_v62  ;;  %v9887_v15 = vrot.slane %v9859_v34, %v18246_v30  ;;  %v2433_v7 = vrot.slane %v1507_v52, %v18242_v23 }
 0x247   :  { %v10149_v0 = vcombine.low %v10141_v32, %v10148_v47  ;;  %v9888_v35 = vcombine.low %v9866_v53, %v9873_v26  ;;  %v2437_v22 = vrot.slane %v1507_v52, %v18243_v63  ;;  %v2441_v16 = vrot.slane %v1507_v52, %v18244_v14 }
 0x248   :  { %v2445_v37 = vrot.slane %v1507_v52, %v14625_v38  ;;  %v6867_v61 = vcombine.low %v2417_v6, %v2421_v28  ;;  %v1571_v27 = vadd.f32 %v18326_v4, %v15567_v57  ;;  %v9889_v49 = vcombine.low %v9880_v43, %v9887_v15 }
 0x249   :  { %12372 = vperm.xlu0 %13492, %v10149_v0   ;;  %v9896_v40 = vrot.slane %v9888_v35, %v18246_v30  ;;  %v6868_v20 = vcombine.low %v2425_v60, %v2429_v10  ;;  %v6869_v54 = vcombine.low %v2433_v7, %v2437_v22  ;;  %v2257_v9 = vrot.slane %v1502_v42, %v18235_v17 }
 0x24a   :  { %v6870_v56 = vcombine.low %v2441_v16, %v2445_v37  ;;  %v6877_v32 = vrot.slane %v6867_v61, %v18246_v30  ;;  %v9903_v47 = vrot.slane %v9889_v49, %v18246_v30  ;;  %v2261_v6 = vrot.slane %v1502_v42, %v18236_v48  ;;  %v15985_v37 = vpop.xlane.xlu1 %1422 }
 0x24b   :  { %v6884_v52 = vrot.slane %v6868_v20, %v18246_v30  ;;  %v2265_v57 = vrot.slane %v1502_v42, %v18240_v41  ;;  %v6891_v34 = vrot.slane %v6869_v54, %v18246_v30  ;;  %v2269_v26 = vrot.slane %v1502_v42, %v18241_v62 }
 0x24c   :  { %v6898_v53 = vrot.slane %v6870_v56, %v18246_v30  ;;  %v2273_v43 = vrot.slane %v1502_v42, %v18242_v23  ;;  %v9904_v28 = vcombine.low %v9896_v40, %v9903_v47  ;;  %v2277_v10 = vrot.slane %v1502_v42, %v18243_v63 }
 0x24d   :  { %v6899_v60 = vcombine.low %v6877_v32, %v6884_v52  ;;  %v2281_v0 = vrot.slane %v1502_v42, %v18244_v14  ;;  %v2285_v35 = vrot.slane %v1502_v42, %v14625_v38  ;;  %v6622_v7 = vcombine.low %v2257_v9, %v2261_v6 }
 0x24e   :  { %v6900_v15 = vcombine.low %v6891_v34, %v6898_v53  ;;  %v6623_v22 = vcombine.low %v2265_v57, %v2269_v26  ;;  %v1566_v16 = vadd.f32 %v18326_v4, %v15478_v2  ;;  %12357 = vperm.xlu1 %13491, %v9904_v28   ;;  %v6624_v49 = vcombine.low %v2273_v43, %v2277_v10  ;;  %v16003_v10 = vpop.xlane.xlu0 %1292 }
 0x24f   :  { %v6907_v61 = vrot.slane %v6899_v60, %v18246_v30  ;;  %v4465_v40 = vrot.slane %v1571_v27, %v18235_v17  ;;  %v6625_v54 = vcombine.low %v2281_v0, %v2285_v35  ;;  %v6632_v56 = vrot.slane %v6622_v7, %v18246_v30 }
 0x250   :  { %v6914_v20 = vrot.slane %v6900_v15, %v18246_v30  ;;  %v6639_v42 = vrot.slane %v6623_v22, %v18246_v30  ;;  %v6646_v32 = vrot.slane %v6624_v49, %v18246_v30  ;;  %v4469_v9 = vrot.slane %v1571_v27, %v18236_v48 }
 0x251   :  { %v4473_v2 = vrot.slane %v1571_v27, %v18240_v41  ;;  %v4477_v47 = vrot.slane %v1571_v27, %v18241_v62  ;;  %v6653_v6 = vrot.slane %v6625_v54, %v18246_v30  ;;  %v4481_v34 = vrot.slane %v1571_v27, %v18242_v23 }
 0x252   :  { %v6915_v52 = vcombine.low %v6907_v61, %v6914_v20  ;;  %v6654_v57 = vcombine.low %v6632_v56, %v6639_v42  ;;  %v4485_v53 = vrot.slane %v1571_v27, %v18243_v63  ;;  %v4489_v26 = vrot.slane %v1571_v27, %v18244_v14 }
 0x253   :  { %v4493_v43 = vrot.slane %v1571_v27, %v14625_v38  ;;  %v10003_v28 = vcombine.low %v4465_v40, %v4469_v9  ;;  %v1513_v60 = vadd.f32 %v18326_v4, %v15612_v13  ;;  %v6655_v0 = vcombine.low %v6646_v32, %v6653_v6 }
 0x254   :  { %12174 = vperm.xlu0 %13492, %v6915_v52   ;;  %v6662_v15 = vrot.slane %v6654_v57, %v18246_v30  ;;  %v10004_v35 = vcombine.low %v4473_v2, %v4477_v47  ;;  %v10005_v7 = vcombine.low %v4481_v34, %v4485_v53  ;;  %v4305_v49 = vrot.slane %v1566_v16, %v18235_v17 }
 0x255   :  { %v10006_v22 = vcombine.low %v4489_v26, %v4493_v43  ;;  %v10013_v61 = vrot.slane %v10003_v28, %v18246_v30  ;;  %v6669_v20 = vrot.slane %v6655_v0, %v18246_v30  ;;  %v4309_v40 = vrot.slane %v1566_v16, %v18236_v48  ;;  %v16021_v43 = vpop.xlane.xlu1 %1306 }
 0x256   :  { %v10020_v27 = vrot.slane %v10004_v35, %v18246_v30  ;;  %v4313_v13 = vrot.slane %v1566_v16, %v18240_v41  ;;  %v10027_v54 = vrot.slane %v10005_v7, %v18246_v30  ;;  %v4317_v42 = vrot.slane %v1566_v16, %v18241_v62 }
 0x257   :  { %v10034_v56 = vrot.slane %v10006_v22, %v18246_v30  ;;  %v4321_v32 = vrot.slane %v1566_v16, %v18242_v23  ;;  %v6670_v9 = vcombine.low %v6662_v15, %v6669_v20  ;;  %v4325_v47 = vrot.slane %v1566_v16, %v18243_v63 }
 0x258   :  { %v10035_v2 = vcombine.low %v10013_v61, %v10020_v27  ;;  %v4329_v52 = vrot.slane %v1566_v16, %v18244_v14  ;;  %v4333_v57 = vrot.slane %v1566_v16, %v14625_v38  ;;  %v9758_v34 = vcombine.low %v4305_v49, %v4309_v40 }
 0x259   :  { %v10036_v6 = vcombine.low %v10027_v54, %v10034_v56  ;;  %v9759_v53 = vcombine.low %v4313_v13, %v4317_v42  ;;  %v1508_v26 = vadd.f32 %v18326_v4, %v15515_v5  ;;  %12159 = vperm.xlu1 %13491, %v6670_v9   ;;  %v9760_v0 = vcombine.low %v4321_v32, %v4325_v47  ;;  %v16039_v47 = vpop.xlane.xlu0 %1420 }
 0x25a   :  { %v10043_v28 = vrot.slane %v10035_v2, %v18246_v30  ;;  %v2609_v15 = vrot.slane %v1513_v60, %v18235_v17  ;;  %v9761_v7 = vcombine.low %v4329_v52, %v4333_v57  ;;  %v9768_v22 = vrot.slane %v9758_v34, %v18246_v30 }
 0x25b   :  { %v10050_v35 = vrot.slane %v10036_v6, %v18246_v30  ;;  %v9775_v16 = vrot.slane %v9759_v53, %v18246_v30  ;;  %v9782_v61 = vrot.slane %v9760_v0, %v18246_v30  ;;  %v2613_v49 = vrot.slane %v1513_v60, %v18236_v48 }
 0x25c   :  { %v2617_v5 = vrot.slane %v1513_v60, %v18240_v41  ;;  %v2621_v20 = vrot.slane %v1513_v60, %v18241_v62  ;;  %v9789_v40 = vrot.slane %v9761_v7, %v18246_v30  ;;  %v2625_v54 = vrot.slane %v1513_v60, %v18242_v23 }
 0x25d   :  { %v10051_v27 = vcombine.low %v10043_v28, %v10050_v35  ;;  %v9790_v13 = vcombine.low %v9768_v22, %v9775_v16  ;;  %v2629_v56 = vrot.slane %v1513_v60, %v18243_v63  ;;  %v2633_v42 = vrot.slane %v1513_v60, %v18244_v14 }
 0x25e   :  { %v2637_v32 = vrot.slane %v1513_v60, %v14625_v38  ;;  %v7161_v9 = vcombine.low %v2609_v15, %v2613_v49  ;;  %v1577_v2 = vadd.f32 %v18326_v4, %v15644_v3  ;;  %v9791_v52 = vcombine.low %v9782_v61, %v9789_v40 }
 0x25f   :  { %12366 = vperm.xlu0 %13492, %v10051_v27   ;;  %v9798_v6 = vrot.slane %v9790_v13, %v18246_v30  ;;  %v7162_v57 = vcombine.low %v2617_v5, %v2621_v20  ;;  %v7163_v34 = vcombine.low %v2625_v54, %v2629_v56  ;;  %v2449_v0 = vrot.slane %v1508_v26, %v18235_v17 }
 0x260   :  { %v7164_v53 = vcombine.low %v2633_v42, %v2637_v32  ;;  %v7171_v28 = vrot.slane %v7161_v9, %v18246_v30  ;;  %v9805_v35 = vrot.slane %v9791_v52, %v18246_v30  ;;  %v2453_v15 = vrot.slane %v1508_v26, %v18236_v48  ;;  %v16057_v32 = vpop.xlane.xlu1 %1434 }
 0x261   :  { %v7178_v60 = vrot.slane %v7162_v57, %v18246_v30  ;;  %v2457_v3 = vrot.slane %v1508_v26, %v18240_v41  ;;  %v7185_v7 = vrot.slane %v7163_v34, %v18246_v30  ;;  %v2461_v16 = vrot.slane %v1508_v26, %v18241_v62 }
 0x262   :  { %v7192_v22 = vrot.slane %v7164_v53, %v18246_v30  ;;  %v2465_v61 = vrot.slane %v1508_v26, %v18242_v23  ;;  %v9806_v49 = vcombine.low %v9798_v6, %v9805_v35  ;;  %v2469_v20 = vrot.slane %v1508_v26, %v18243_v63 }
 0x263   :  { %v7193_v5 = vcombine.low %v7171_v28, %v7178_v60  ;;  %v2473_v27 = vrot.slane %v1508_v26, %v18244_v14  ;;  %v2477_v13 = vrot.slane %v1508_v26, %v14625_v38  ;;  %v6916_v54 = vcombine.low %v2449_v0, %v2453_v15 }
 0x264   :  { %v7194_v40 = vcombine.low %v7185_v7, %v7192_v22  ;;  %v6917_v56 = vcombine.low %v2457_v3, %v2461_v16  ;;  %v1572_v42 = vadd.f32 %v18326_v4, %v15550_v12  ;;  %12351 = vperm.xlu1 %13491, %v9806_v49   ;;  %v6918_v52 = vcombine.low %v2465_v61, %v2469_v20  ;;  %v16075_v20 = vpop.xlane.xlu0 %1304 }
 0x265   :  { %v7201_v9 = vrot.slane %v7193_v5, %v18246_v30  ;;  %v4657_v6 = vrot.slane %v1577_v2, %v18235_v17  ;;  %v6919_v34 = vcombine.low %v2473_v27, %v2477_v13  ;;  %v6926_v53 = vrot.slane %v6916_v54, %v18246_v30 }
 0x266   :  { %v7208_v57 = vrot.slane %v7194_v40, %v18246_v30  ;;  %v6933_v26 = vrot.slane %v6917_v56, %v18246_v30  ;;  %v6940_v28 = vrot.slane %v6918_v52, %v18246_v30  ;;  %v4661_v0 = vrot.slane %v1577_v2, %v18236_v48 }
 0x267   :  { %v4665_v12 = vrot.slane %v1577_v2, %v18240_v41  ;;  %v4669_v35 = vrot.slane %v1577_v2, %v18241_v62  ;;  %v6947_v15 = vrot.slane %v6919_v34, %v18246_v30  ;;  %v4673_v7 = vrot.slane %v1577_v2, %v18242_v23 }
 0x268   :  { %v7209_v60 = vcombine.low %v7201_v9, %v7208_v57  ;;  %v6948_v3 = vcombine.low %v6926_v53, %v6933_v26  ;;  %v4677_v22 = vrot.slane %v1577_v2, %v18243_v63  ;;  %v4681_v16 = vrot.slane %v1577_v2, %v18244_v14 }
 0x269   :  { %v4685_v61 = vrot.slane %v1577_v2, %v14625_v38  ;;  %v10297_v49 = vcombine.low %v4657_v6, %v4661_v0  ;;  %v1511_v5 = vadd.f32 %v18326_v4, %v15676_v25  ;;  %v6949_v27 = vcombine.low %v6940_v28, %v6947_v15 }
 0x26a   :  { %12192 = vperm.xlu0 %13492, %v7209_v60   ;;  %v6956_v40 = vrot.slane %v6948_v3, %v18246_v30  ;;  %v10298_v13 = vcombine.low %v4665_v12, %v4669_v35  ;;  %v10299_v54 = vcombine.low %v4673_v7, %v4677_v22  ;;  %v4497_v52 = vrot.slane %v1572_v42, %v18235_v17 }
 0x26b   :  { %v10300_v56 = vcombine.low %v4681_v16, %v4685_v61  ;;  %v10307_v9 = vrot.slane %v10297_v49, %v18246_v30  ;;  %v6963_v57 = vrot.slane %v6949_v27, %v18246_v30  ;;  %v4501_v6 = vrot.slane %v1572_v42, %v18236_v48  ;;  %v16093_v61 = vpop.xlane.xlu1 %1302 }
 0x26c   :  { %v10314_v2 = vrot.slane %v10298_v13, %v18246_v30  ;;  %v4505_v25 = vrot.slane %v1572_v42, %v18240_v41  ;;  %v10321_v34 = vrot.slane %v10299_v54, %v18246_v30  ;;  %v4509_v26 = vrot.slane %v1572_v42, %v18241_v62 }
 0x26d   :  { %v10328_v53 = vrot.slane %v10300_v56, %v18246_v30  ;;  %v4513_v28 = vrot.slane %v1572_v42, %v18242_v23  ;;  %v6964_v0 = vcombine.low %v6956_v40, %v6963_v57  ;;  %v4517_v35 = vrot.slane %v1572_v42, %v18243_v63 }
 0x26e   :  { %v10329_v12 = vcombine.low %v10307_v9, %v10314_v2  ;;  %v4521_v60 = vrot.slane %v1572_v42, %v18244_v14  ;;  %v4525_v3 = vrot.slane %v1572_v42, %v14625_v38  ;;  %v10052_v7 = vcombine.low %v4497_v52, %v4501_v6 }
 0x26f   :  { %v10330_v15 = vcombine.low %v10321_v34, %v10328_v53  ;;  %v10053_v22 = vcombine.low %v4505_v25, %v4509_v26  ;;  %v1506_v16 = vadd.f32 %v18326_v4, %v15586_v39  ;;  %12177 = vperm.xlu1 %13491, %v6964_v0   ;;  %v10054_v27 = vcombine.low %v4513_v28, %v4517_v35  ;;  %v16111_v35 = vpop.xlane.xlu0 %1432 }
 0x270   :  { %v10337_v49 = vrot.slane %v10329_v12, %v18246_v30  ;;  %v2545_v40 = vrot.slane %v1511_v5, %v18235_v17  ;;  %v10055_v54 = vcombine.low %v4521_v60, %v4525_v3  ;;  %v10062_v56 = vrot.slane %v10052_v7, %v18246_v30 }
 0x271   :  { %v10344_v13 = vrot.slane %v10330_v15, %v18246_v30  ;;  %v10069_v42 = vrot.slane %v10053_v22, %v18246_v30  ;;  %v10076_v9 = vrot.slane %v10054_v27, %v18246_v30  ;;  %v2549_v52 = vrot.slane %v1511_v5, %v18236_v48 }
 0x272   :  { %v2553_v39 = vrot.slane %v1511_v5, %v18240_v41  ;;  %v2557_v57 = vrot.slane %v1511_v5, %v18241_v62  ;;  %v10083_v6 = vrot.slane %v10055_v54, %v18246_v30  ;;  %v2561_v34 = vrot.slane %v1511_v5, %v18242_v23 }
 0x273   :  { %v10345_v2 = vcombine.low %v10337_v49, %v10344_v13  ;;  %v10084_v25 = vcombine.low %v10062_v56, %v10069_v42  ;;  %v2565_v53 = vrot.slane %v1511_v5, %v18243_v63  ;;  %v2569_v26 = vrot.slane %v1511_v5, %v18244_v14 }
 0x274   :  { %v2573_v28 = vrot.slane %v1511_v5, %v14625_v38  ;;  %v7063_v0 = vcombine.low %v2545_v40, %v2549_v52  ;;  %v1575_v12 = vadd.f32 %v18326_v4, %v15706_v51  ;;  %v10085_v60 = vcombine.low %v10076_v9, %v10083_v6 }
 0x275   :  { %12384 = vperm.xlu0 %13492, %v10345_v2   ;;  %v10092_v15 = vrot.slane %v10084_v25, %v18246_v30  ;;  %v7064_v3 = vcombine.low %v2553_v39, %v2557_v57  ;;  %v7065_v7 = vcombine.low %v2561_v34, %v2565_v53  ;;  %v2385_v27 = vrot.slane %v1506_v16, %v18235_v17 }
 0x276   :  { %v7066_v22 = vcombine.low %v2569_v26, %v2573_v28  ;;  %v7073_v49 = vrot.slane %v7063_v0, %v18246_v30  ;;  %v10099_v13 = vrot.slane %v10085_v60, %v18246_v30  ;;  %v2389_v40 = vrot.slane %v1506_v16, %v18236_v48  ;;  %v16129_v28 = vpop.xlane.xlu1 %1430 }
 0x277   :  { %v7080_v5 = vrot.slane %v7064_v3, %v18246_v30  ;;  %v2393_v51 = vrot.slane %v1506_v16, %v18240_v41  ;;  %v7087_v54 = vrot.slane %v7065_v7, %v18246_v30  ;;  %v2397_v42 = vrot.slane %v1506_v16, %v18241_v62 }
 0x278   :  { %v7094_v56 = vrot.slane %v7066_v22, %v18246_v30  ;;  %v2401_v9 = vrot.slane %v1506_v16, %v18242_v23  ;;  %v10100_v52 = vcombine.low %v10092_v15, %v10099_v13  ;;  %v2405_v57 = vrot.slane %v1506_v16, %v18243_v63 }
 0x279   :  { %v7095_v39 = vcombine.low %v7073_v49, %v7080_v5  ;;  %v2409_v2 = vrot.slane %v1506_v16, %v18244_v14  ;;  %v2413_v25 = vrot.slane %v1506_v16, %v14625_v38  ;;  %v6818_v34 = vcombine.low %v2385_v27, %v2389_v40 }
 0x27a   :  { %v7096_v6 = vcombine.low %v7087_v54, %v7094_v56  ;;  %v6819_v53 = vcombine.low %v2393_v51, %v2397_v42  ;;  %v1570_v26 = vadd.f32 %v18326_v4, %v15631_v8  ;;  %12369 = vperm.xlu1 %13491, %v10100_v52   ;;  %v6820_v60 = vcombine.low %v2401_v9, %v2405_v57  ;;  %v16147_v57 = vpop.xlane.xlu0 %1300 }
 0x27b   :  { %v7103_v0 = vrot.slane %v7095_v39, %v18246_v30  ;;  %v4593_v15 = vrot.slane %v1575_v12, %v18235_v17  ;;  %v6821_v7 = vcombine.low %v2409_v2, %v2413_v25  ;;  %v6828_v22 = vrot.slane %v6818_v34, %v18246_v30 }
 0x27c   :  { %v7110_v3 = vrot.slane %v7096_v6, %v18246_v30  ;;  %v6835_v16 = vrot.slane %v6819_v53, %v18246_v30  ;;  %v6842_v49 = vrot.slane %v6820_v60, %v18246_v30  ;;  %v4597_v27 = vrot.slane %v1575_v12, %v18236_v48 }
 0x27d   :  { %v4601_v8 = vrot.slane %v1575_v12, %v18240_v41  ;;  %v4605_v13 = vrot.slane %v1575_v12, %v18241_v62  ;;  %v6849_v40 = vrot.slane %v6821_v7, %v18246_v30  ;;  %v4609_v54 = vrot.slane %v1575_v12, %v18242_v23 }
 0x27e   :  { %v7111_v5 = vcombine.low %v7103_v0, %v7110_v3  ;;  %v6850_v51 = vcombine.low %v6828_v22, %v6835_v16  ;;  %v4613_v56 = vrot.slane %v1575_v12, %v18243_v63  ;;  %v4617_v42 = vrot.slane %v1575_v12, %v18244_v14 }
 0x27f   :  { %v4621_v9 = vrot.slane %v1575_v12, %v14625_v38  ;;  %v10199_v52 = vcombine.low %v4593_v15, %v4597_v27  ;;  %v1517_v39 = vadd.f32 %v18326_v4, %v15734_v58  ;;  %v6851_v2 = vcombine.low %v6842_v49, %v6849_v40 }
 0x280   :  { %12186 = vperm.xlu0 %13492, %v7111_v5   ;;  %v6858_v6 = vrot.slane %v6850_v51, %v18246_v30  ;;  %v10200_v25 = vcombine.low %v4601_v8, %v4605_v13  ;;  %v10201_v34 = vcombine.low %v4609_v54, %v4613_v56  ;;  %v4433_v60 = vrot.slane %v1570_v26, %v18235_v17 }
 0x281   :  { %v10202_v53 = vcombine.low %v4617_v42, %v4621_v9  ;;  %v10209_v0 = vrot.slane %v10199_v52, %v18246_v30  ;;  %v6865_v3 = vrot.slane %v6851_v2, %v18246_v30  ;;  %v4437_v15 = vrot.slane %v1570_v26, %v18236_v48  ;;  %v16165_v9 = vpop.xlane.xlu1 %1314 }
 0x282   :  { %v10216_v12 = vrot.slane %v10200_v25, %v18246_v30  ;;  %v4441_v58 = vrot.slane %v1570_v26, %v18240_v41  ;;  %v10223_v7 = vrot.slane %v10201_v34, %v18246_v30  ;;  %v4445_v16 = vrot.slane %v1570_v26, %v18241_v62 }
 0x283   :  { %v10230_v22 = vrot.slane %v10202_v53, %v18246_v30  ;;  %v4449_v49 = vrot.slane %v1570_v26, %v18242_v23  ;;  %v6866_v27 = vcombine.low %v6858_v6, %v6865_v3  ;;  %v4453_v13 = vrot.slane %v1570_v26, %v18243_v63 }
 0x284   :  { %v10231_v8 = vcombine.low %v10209_v0, %v10216_v12  ;;  %v4457_v5 = vrot.slane %v1570_v26, %v18244_v14  ;;  %v4461_v51 = vrot.slane %v1570_v26, %v14625_v38  ;;  %v9954_v54 = vcombine.low %v4433_v60, %v4437_v15 }
 0x285   :  { %v10232_v40 = vcombine.low %v10223_v7, %v10230_v22  ;;  %v9955_v56 = vcombine.low %v4441_v58, %v4445_v16  ;;  %v1512_v42 = vadd.f32 %v18326_v4, %v15663_v33  ;;  %12171 = vperm.xlu1 %13491, %v6866_v27   ;;  %v9956_v2 = vcombine.low %v4449_v49, %v4453_v13  ;;  %v16183_v13 = vpop.xlane.xlu0 %1428 }
 0x286   :  { %v10239_v52 = vrot.slane %v10231_v8, %v18246_v30  ;;  %v2737_v6 = vrot.slane %v1517_v39, %v18235_v17  ;;  %v9957_v34 = vcombine.low %v4457_v5, %v4461_v51  ;;  %v9964_v53 = vrot.slane %v9954_v54, %v18246_v30 }
 0x287   :  { %v10246_v25 = vrot.slane %v10232_v40, %v18246_v30  ;;  %v9971_v26 = vrot.slane %v9955_v56, %v18246_v30  ;;  %v9978_v0 = vrot.slane %v9956_v2, %v18246_v30  ;;  %v2741_v60 = vrot.slane %v1517_v39, %v18236_v48 }
 0x288   :  { %v2745_v33 = vrot.slane %v1517_v39, %v18240_v41  ;;  %v2749_v3 = vrot.slane %v1517_v39, %v18241_v62  ;;  %v9985_v15 = vrot.slane %v9957_v34, %v18246_v30  ;;  %v2753_v7 = vrot.slane %v1517_v39, %v18242_v23 }
 0x289   :  { %v10247_v12 = vcombine.low %v10239_v52, %v10246_v25  ;;  %v9986_v58 = vcombine.low %v9964_v53, %v9971_v26  ;;  %v2757_v22 = vrot.slane %v1517_v39, %v18243_v63  ;;  %v2761_v16 = vrot.slane %v1517_v39, %v18244_v14 }
 0x28a   :  { %v2765_v49 = vrot.slane %v1517_v39, %v14625_v38  ;;  %v7357_v27 = vcombine.low %v2737_v6, %v2741_v60  ;;  %v1581_v8 = vadd.f32 %v18326_v4, %v15762_v45  ;;  %v9987_v5 = vcombine.low %v9978_v0, %v9985_v15 }
 0x28b   :  { %12378 = vperm.xlu0 %13492, %v10247_v12   ;;  %v9994_v40 = vrot.slane %v9986_v58, %v18246_v30  ;;  %v7358_v51 = vcombine.low %v2745_v33, %v2749_v3  ;;  %v7359_v54 = vcombine.low %v2753_v7, %v2757_v22  ;;  %v2577_v2 = vrot.slane %v1512_v42, %v18235_v17 }
 0x28c   :  { %v7360_v56 = vcombine.low %v2761_v16, %v2765_v49  ;;  %v7367_v52 = vrot.slane %v7357_v27, %v18246_v30  ;;  %v10001_v25 = vrot.slane %v9987_v5, %v18246_v30  ;;  %v2581_v6 = vrot.slane %v1512_v42, %v18236_v48  ;;  %v16201_v49 = vpop.xlane.xlu1 %1442 }
 0x28d   :  { %v7374_v39 = vrot.slane %v7358_v51, %v18246_v30  ;;  %v2585_v45 = vrot.slane %v1512_v42, %v18240_v41  ;;  %v7381_v34 = vrot.slane %v7359_v54, %v18246_v30  ;;  %v2589_v26 = vrot.slane %v1512_v42, %v18241_v62  ;;  %18328 = vst [vmem:[#allocation30_spill] sm:$0xff] %v16201_v49 }
 0x28e   :  { %v7388_v53 = vrot.slane %v7360_v56, %v18246_v30  ;;  %v2593_v0 = vrot.slane %v1512_v42, %v18242_v23  ;;  %v10002_v60 = vcombine.low %v9994_v40, %v10001_v25  ;;  %v2597_v3 = vrot.slane %v1512_v42, %v18243_v63 }
 0x28f   :  { %v7389_v33 = vcombine.low %v7367_v52, %v7374_v39  ;;  %v2601_v12 = vrot.slane %v1512_v42, %v18244_v14  ;;  %v2605_v58 = vrot.slane %v1512_v42, %v14625_v38  ;;  %v7112_v7 = vcombine.low %v2577_v2, %v2581_v6 }
 0x290   :  { %v7390_v15 = vcombine.low %v7381_v34, %v7388_v53  ;;  %v7113_v22 = vcombine.low %v2585_v45, %v2589_v26  ;;  %v1576_v16 = vadd.f32 %v18326_v4, %v15692_v50  ;;  %12363 = vperm.xlu1 %13491, %v10002_v60   ;;  %v7114_v5 = vcombine.low %v2593_v0, %v2597_v3  ;;  %v16219_v3 = vpop.xlane.xlu0 %1312 }
 0x291   :  { %v7397_v27 = vrot.slane %v7389_v33, %v18246_v30  ;;  %v4785_v40 = vrot.slane %v1581_v8, %v18235_v17  ;;  %v7115_v54 = vcombine.low %v2601_v12, %v2605_v58  ;;  %v7122_v56 = vrot.slane %v7112_v7, %v18246_v30 }
 0x292   :  { %v7404_v51 = vrot.slane %v7390_v15, %v18246_v30  ;;  %v7129_v42 = vrot.slane %v7113_v22, %v18246_v30  ;;  %v7136_v52 = vrot.slane %v7114_v5, %v18246_v30  ;;  %v4789_v2 = vrot.slane %v1581_v8, %v18236_v48 }
 0x293   :  { %v4793_v50 = vrot.slane %v1581_v8, %v18240_v41  ;;  %v4797_v25 = vrot.slane %v1581_v8, %v18241_v62  ;;  %v7143_v6 = vrot.slane %v7115_v54, %v18246_v30  ;;  %v4801_v34 = vrot.slane %v1581_v8, %v18242_v23 }
 0x294   :  { %v7405_v39 = vcombine.low %v7397_v27, %v7404_v51  ;;  %v7144_v45 = vcombine.low %v7122_v56, %v7129_v42  ;;  %v4805_v53 = vrot.slane %v1581_v8, %v18243_v63  ;;  %v4809_v26 = vrot.slane %v1581_v8, %v18244_v14 }
 0x295   :  { %v4813_v0 = vrot.slane %v1581_v8, %v14625_v38  ;;  %v10493_v60 = vcombine.low %v4785_v40, %v4789_v2  ;;  %v1515_v33 = vadd.f32 %v18326_v4, %v15802_v46  ;;  %v7145_v12 = vcombine.low %v7136_v52, %v7143_v6 }
 0x296   :  { %12204 = vperm.xlu0 %13492, %v7405_v39   ;;  %v7152_v15 = vrot.slane %v7144_v45, %v18246_v30  ;;  %v10494_v58 = vcombine.low %v4793_v50, %v4797_v25  ;;  %v10495_v7 = vcombine.low %v4801_v34, %v4805_v53  ;;  %v4625_v5 = vrot.slane %v1576_v16, %v18235_v17 }
 0x297   :  { %v10496_v22 = vcombine.low %v4809_v26, %v4813_v0  ;;  %v10503_v27 = vrot.slane %v10493_v60, %v18246_v30  ;;  %v7159_v51 = vrot.slane %v7145_v12, %v18246_v30  ;;  %v4629_v40 = vrot.slane %v1576_v16, %v18236_v48  ;;  %v16237_v0 = vpop.xlane.xlu1 %1310 }
 0x298   :  { %v10510_v8 = vrot.slane %v10494_v58, %v18246_v30  ;;  %v4633_v46 = vrot.slane %v1576_v16, %v18240_v41  ;;  %v10517_v54 = vrot.slane %v10495_v7, %v18246_v30  ;;  %v4637_v42 = vrot.slane %v1576_v16, %v18241_v62 }
 0x299   :  { %v10524_v56 = vrot.slane %v10496_v22, %v18246_v30  ;;  %v4641_v52 = vrot.slane %v1576_v16, %v18242_v23  ;;  %v7160_v2 = vcombine.low %v7152_v15, %v7159_v51  ;;  %v4645_v25 = vrot.slane %v1576_v16, %v18243_v63 }
 0x29a   :  { %v10525_v50 = vcombine.low %v10503_v27, %v10510_v8  ;;  %v4649_v39 = vrot.slane %v1576_v16, %v18244_v14  ;;  %v4653_v45 = vrot.slane %v1576_v16, %v14625_v38  ;;  %v10248_v34 = vcombine.low %v4625_v5, %v4629_v40 }
 0x29b   :  { %v10526_v6 = vcombine.low %v10517_v54, %v10524_v56  ;;  %v10249_v53 = vcombine.low %v4633_v46, %v4637_v42  ;;  %v1510_v26 = vadd.f32 %v18326_v4, %v15723_v31  ;;  %12189 = vperm.xlu1 %13491, %v7160_v2   ;;  %v10250_v12 = vcombine.low %v4641_v52, %v4645_v25  ;;  %v16255_v25 = vpop.xlane.xlu0 %1440 }
 0x29c   :  { %v10533_v60 = vrot.slane %v10525_v50, %v18246_v30  ;;  %v2673_v15 = vrot.slane %v1515_v33, %v18235_v17  ;;  %v10251_v7 = vcombine.low %v4649_v39, %v4653_v45  ;;  %v10258_v22 = vrot.slane %v10248_v34, %v18246_v30  ;;  %18329 = vst [vmem:[#allocation35_spill] sm:$0xff] %v16255_v25 }
 0x29d   :  { %v10540_v58 = vrot.slane %v10526_v6, %v18246_v30  ;;  %v10265_v16 = vrot.slane %v10249_v53, %v18246_v30  ;;  %v10272_v27 = vrot.slane %v10250_v12, %v18246_v30  ;;  %v2677_v5 = vrot.slane %v1515_v33, %v18236_v48 }
 0x29e   :  { %v2681_v31 = vrot.slane %v1515_v33, %v18240_v41  ;;  %v2685_v51 = vrot.slane %v1515_v33, %v18241_v62  ;;  %v10279_v40 = vrot.slane %v10251_v7, %v18246_v30  ;;  %v2689_v54 = vrot.slane %v1515_v33, %v18242_v23 }
 0x29f   :  { %v10541_v8 = vcombine.low %v10533_v60, %v10540_v58  ;;  %v10280_v46 = vcombine.low %v10258_v22, %v10265_v16  ;;  %v2693_v56 = vrot.slane %v1515_v33, %v18243_v63  ;;  %v2697_v42 = vrot.slane %v1515_v33, %v18244_v14 }
 0x2a0   :  { %v2701_v52 = vrot.slane %v1515_v33, %v14625_v38  ;;  %v7259_v2 = vcombine.low %v2673_v15, %v2677_v5  ;;  %v1579_v50 = vadd.f32 %v18326_v4, %v15841_v19  ;;  %v10281_v39 = vcombine.low %v10272_v27, %v10279_v40  ;;  %v16268_v5 = vpop.xlane.xlu1 %1438 }
 0x2a1   :  { %12396 = vperm.xlu0 %13492, %v10541_v8   ;;  %v10288_v6 = vrot.slane %v10280_v46, %v18246_v30  ;;  %v7260_v45 = vcombine.low %v2681_v31, %v2685_v51  ;;  %v7261_v34 = vcombine.low %v2689_v54, %v2693_v56  ;;  %v2513_v12 = vrot.slane %v1510_v26, %v18235_v17 }
 0x2a2   :  { %v7262_v53 = vcombine.low %v2697_v42, %v2701_v52  ;;  %v7269_v60 = vrot.slane %v7259_v2, %v18246_v30  ;;  %v10295_v58 = vrot.slane %v10281_v39, %v18246_v30  ;;  %v2517_v15 = vrot.slane %v1510_v26, %v18236_v48 }
 0x2a3   :  { %v7276_v33 = vrot.slane %v7260_v45, %v18246_v30  ;;  %v2521_v19 = vrot.slane %v1510_v26, %v18240_v41  ;;  %v7283_v7 = vrot.slane %v7261_v34, %v18246_v30  ;;  %v2525_v16 = vrot.slane %v1510_v26, %v18241_v62 }
 0x2a4   :  { %v7290_v22 = vrot.slane %v7262_v53, %v18246_v30  ;;  %v2529_v27 = vrot.slane %v1510_v26, %v18242_v23  ;;  %v10296_v31 = vcombine.low %v10288_v6, %v10295_v58  ;;  %v2533_v8 = vrot.slane %v1510_v26, %v18243_v63 }
 0x2a5   :  { %v7291_v51 = vcombine.low %v7269_v60, %v7276_v33  ;;  %v2537_v40 = vrot.slane %v1510_v26, %v18244_v14  ;;  %v2541_v54 = vrot.slane %v1510_v26, %v14625_v38  ;;  %v7014_v56 = vcombine.low %v2513_v12, %v2517_v15 }
 0x2a6   :  { %v7292_v46 = vcombine.low %v7283_v7, %v7290_v22  ;;  %v7015_v42 = vcombine.low %v2521_v19, %v2525_v16  ;;  %v1574_v52 = vadd.f32 %v18326_v4, %v15749_v18  ;;  %12381 = vperm.xlu1 %13491, %v10296_v31   ;;  %v7016_v39 = vcombine.low %v2529_v27, %v2533_v8  ;;  %v16286_v22 = vpop.xlane.xlu1 %1322 }
 0x2a7   :  { %v7299_v2 = vrot.slane %v7291_v51, %v18246_v30  ;;  %v4721_v45 = vrot.slane %v1579_v50, %v18235_v17  ;;  %v7017_v34 = vcombine.low %v2537_v40, %v2541_v54  ;;  %v7024_v53 = vrot.slane %v7014_v56, %v18246_v30  ;;  %v16293_v40 = vpop.xlane.xlu0 %1308 }
 0x2a8   :  { %v7306_v6 = vrot.slane %v7292_v46, %v18246_v30  ;;  %v7031_v60 = vrot.slane %v7015_v42, %v18246_v30  ;;  %v7038_v26 = vrot.slane %v7016_v39, %v18246_v30  ;;  %v4725_v12 = vrot.slane %v1579_v50, %v18236_v48 }
 0x2a9   :  { %v4729_v58 = vrot.slane %v1579_v50, %v18240_v41  ;;  %v4733_v18 = vrot.slane %v1579_v50, %v18241_v62  ;;  %v7045_v15 = vrot.slane %v7017_v34, %v18246_v30  ;;  %v4737_v7 = vrot.slane %v1579_v50, %v18242_v23 }
 0x2aa   :  { %v7307_v33 = vcombine.low %v7299_v2, %v7306_v6  ;;  %v7046_v19 = vcombine.low %v7024_v53, %v7031_v60  ;;  %v4741_v16 = vrot.slane %v1579_v50, %v18243_v63  ;;  %v4745_v27 = vrot.slane %v1579_v50, %v18244_v14 }
 0x2ab   :  { %v4749_v31 = vrot.slane %v1579_v50, %v14625_v38  ;;  %v10395_v51 = vcombine.low %v4721_v45, %v4725_v12  ;;  %v1521_v8 = vadd.f32 %v18326_v4, %v15877_v55  ;;  %v7047_v46 = vcombine.low %v7038_v26, %v7045_v15 }
 0x2ac   :  { %12198 = vperm.xlu0 %13492, %v7307_v33   ;;  %v7054_v54 = vrot.slane %v7046_v19, %v18246_v30  ;;  %v10396_v56 = vcombine.low %v4729_v58, %v4733_v18  ;;  %v10397_v42 = vcombine.low %v4737_v7, %v4741_v16  ;;  %v4561_v6 = vrot.slane %v1574_v52, %v18235_v17  ;;  %v16308_v19 = vpop.xlane.xlu1 %1450 }
 0x2ad   :  { %v10398_v2 = vcombine.low %v4745_v27, %v4749_v31  ;;  %v10405_v39 = vrot.slane %v10395_v51, %v18246_v30  ;;  %v7061_v34 = vrot.slane %v7047_v46, %v18246_v30  ;;  %v4565_v45 = vrot.slane %v1574_v52, %v18236_v48  ;;  %18330 = vst [vmem:[#allocation31_spill] sm:$0xff] %v16308_v19 }
 0x2ae   :  { %v10412_v50 = vrot.slane %v10396_v56, %v18246_v30  ;;  %v4569_v55 = vrot.slane %v1574_v52, %v18240_v41  ;;  %v10419_v53 = vrot.slane %v10397_v42, %v18246_v30  ;;  %v4573_v26 = vrot.slane %v1574_v52, %v18241_v62 }
 0x2af   :  { %v10426_v60 = vrot.slane %v10398_v2, %v18246_v30  ;;  %v4577_v12 = vrot.slane %v1574_v52, %v18242_v23  ;;  %v7062_v58 = vcombine.low %v7054_v54, %v7061_v34  ;;  %v4581_v33 = vrot.slane %v1574_v52, %v18243_v63 }
 0x2b0   :  { %v10427_v18 = vcombine.low %v10405_v39, %v10412_v50  ;;  %v4585_v15 = vrot.slane %v1574_v52, %v18244_v14  ;;  %v4589_v16 = vrot.slane %v1574_v52, %v14625_v38  ;;  %v10150_v27 = vcombine.low %v4561_v6, %v4565_v45 }
 0x2b1   :  { %v10428_v7 = vcombine.low %v10419_v53, %v10426_v60  ;;  %v10151_v31 = vcombine.low %v4569_v55, %v4573_v26  ;;  %v1516_v51 = vadd.f32 %v18326_v4, %v15783_v21  ;;  %12183 = vperm.xlu1 %13491, %v7062_v58   ;;  %v10152_v56 = vcombine.low %v4577_v12, %v4581_v33  ;;  %v16327_v33 = vpop.xlane.xlu0 %1436 }
 0x2b2   :  { %v10435_v46 = vrot.slane %v10427_v18, %v18246_v30  ;;  %v2865_v54 = vrot.slane %v1521_v8, %v18235_v17  ;;  %v10153_v2 = vcombine.low %v4585_v15, %v4589_v16  ;;  %v10160_v39 = vrot.slane %v10150_v27, %v18246_v30  ;;  %v16329_v15 = vpop.xlane.xlu1 %1318 }
 0x2b3   :  { %v10442_v42 = vrot.slane %v10428_v7, %v18246_v30  ;;  %v10167_v34 = vrot.slane %v10151_v31, %v18246_v30  ;;  %v10174_v52 = vrot.slane %v10152_v56, %v18246_v30  ;;  %v2869_v6 = vrot.slane %v1521_v8, %v18236_v48 }
 0x2b4   :  { %v2873_v50 = vrot.slane %v1521_v8, %v18240_v41  ;;  %v2877_v21 = vrot.slane %v1521_v8, %v18241_v62  ;;  %v10181_v55 = vrot.slane %v10153_v2, %v18246_v30  ;;  %v2881_v60 = vrot.slane %v1521_v8, %v18242_v23 }
 0x2b5   :  { %v10443_v45 = vcombine.low %v10435_v46, %v10442_v42  ;;  %v10182_v53 = vcombine.low %v10160_v39, %v10167_v34  ;;  %v2885_v26 = vrot.slane %v1521_v8, %v18243_v63  ;;  %v2889_v12 = vrot.slane %v1521_v8, %v18244_v14 }
 0x2b6   :  { %v2893_v58 = vrot.slane %v1521_v8, %v14625_v38  ;;  %v7553_v18 = vcombine.low %v2865_v54, %v2869_v6  ;;  %v10183_v7 = vcombine.low %v10174_v52, %v10181_v55  ;;  %v7554_v27 = vcombine.low %v2873_v50, %v2877_v21 }
 0x2b7   :  { %12390 = vperm.xlu0 %13492, %v10443_v45   ;;  %v10190_v16 = vrot.slane %v10182_v53, %v18246_v30  ;;  %v1585_v31 = vadd.f32 %v18326_v4, %v15913_v24  ;;  %v7555_v46 = vcombine.low %v2881_v60, %v2885_v26  ;;  %v2705_v54 = vrot.slane %v1516_v51, %v18235_v17 }
 0x2b8   :  { %v7556_v56 = vcombine.low %v2889_v12, %v2893_v58  ;;  %v7563_v42 = vrot.slane %v7553_v18, %v18246_v30  ;;  %v10197_v2 = vrot.slane %v10183_v7, %v18246_v30  ;;  %v7570_v8 = vrot.slane %v7554_v27, %v18246_v30  ;;  %v16349_v58 = vpop.xlane.xlu1 %1446 }
 0x2b9   :  { %v2709_v39 = vrot.slane %v1516_v51, %v18236_v48  ;;  %v7577_v34 = vrot.slane %v7555_v46, %v18246_v30  ;;  %v2713_v6 = vrot.slane %v1516_v51, %v18240_v41  ;;  %v2717_v24 = vrot.slane %v1516_v51, %v18241_v62  ;;  %18331 = vst [vmem:[#allocation40_spill] sm:$0xff] %v16349_v58 }
 0x2ba   :  { %v7584_v52 = vrot.slane %v7556_v56, %v18246_v30  ;;  %v10198_v50 = vcombine.low %v10190_v16, %v10197_v2  ;;  %v7585_v21 = vcombine.low %v7563_v42, %v7570_v8  ;;  %v2721_v45 = vrot.slane %v1516_v51, %v18242_v23 }
 0x2bb   :  { %v2725_v53 = vrot.slane %v1516_v51, %v18243_v63  ;;  %v2729_v60 = vrot.slane %v1516_v51, %v18244_v14  ;;  %v2733_v26 = vrot.slane %v1516_v51, %v14625_v38  ;;  %v1580_v12 = vadd.f32 %v18326_v4, %v15823_v44 }
 0x2bc   :  { %v7586_v55 = vcombine.low %v7577_v34, %v7584_v52  ;;  %12375 = vperm.xlu1 %13491, %v10198_v50   ;;  %v7593_v18 = vrot.slane %v7585_v21, %v18246_v30  ;;  %v7308_v7 = vcombine.low %v2705_v54, %v2709_v39  ;;  %v7309_v16 = vcombine.low %v2713_v6, %v2717_v24 }
 0x2bd   :  { %v7310_v46 = vcombine.low %v2721_v45, %v2725_v53  ;;  %v7311_v56 = vcombine.low %v2729_v60, %v2733_v26  ;;  %v4913_v42 = vrot.slane %v1585_v31, %v18235_v17  ;;  %v4917_v8 = vrot.slane %v1585_v31, %v18236_v48  ;;  %v16364_v45 = vpop.xlane.xlu0 %1320 }
 0x2be   :  { %v7600_v27 = vrot.slane %v7586_v55, %v18246_v30  ;;  %v7318_v2 = vrot.slane %v7308_v7, %v18246_v30  ;;  %v7325_v51 = vrot.slane %v7309_v16, %v18246_v30  ;;  %v4921_v44 = vrot.slane %v1585_v31, %v18240_v41  ;;  %v16369_v7 = vpop.xlane.xlu1 %1330 }
 0x2bf   :  { %v7332_v52 = vrot.slane %v7310_v46, %v18246_v30  ;;  %v7339_v54 = vrot.slane %v7311_v56, %v18246_v30  ;;  %v4925_v39 = vrot.slane %v1585_v31, %v18241_v62  ;;  %v4929_v24 = vrot.slane %v1585_v31, %v18242_v23 }
 0x2c0   :  { %v7601_v34 = vcombine.low %v7593_v18, %v7600_v27  ;;  %v7340_v6 = vcombine.low %v7318_v2, %v7325_v51  ;;  %v4933_v50 = vrot.slane %v1585_v31, %v18243_v63  ;;  %v4937_v21 = vrot.slane %v1585_v31, %v18244_v14 }
 0x2c1   :  { %v7341_v55 = vcombine.low %v7332_v52, %v7339_v54  ;;  %v4941_v53 = vrot.slane %v1585_v31, %v14625_v38  ;;  %v10689_v60 = vcombine.low %v4913_v42, %v4917_v8  ;;  %v10690_v26 = vcombine.low %v4921_v44, %v4925_v39 }
 0x2c2   :  { %12216 = vperm.xlu0 %13492, %v7601_v34   ;;  %v1519_v18 = vadd.f32 %v18326_v4, %v15949_v11  ;;  %v7348_v16 = vrot.slane %v7340_v6, %v18246_v30  ;;  %v10691_v27 = vcombine.low %v4929_v24, %v4933_v50  ;;  %v4753_v46 = vrot.slane %v1580_v12, %v18235_v17 }
 0x2c3   :  { %v7355_v56 = vrot.slane %v7341_v55, %v18246_v30  ;;  %v10692_v2 = vcombine.low %v4937_v21, %v4941_v53  ;;  %v10699_v51 = vrot.slane %v10689_v60, %v18246_v30  ;;  %v10706_v34 = vrot.slane %v10690_v26, %v18246_v30  ;;  %v16386_v26 = vpop.xlane.xlu1 %1458 }
 0x2c4   :  { %v10713_v31 = vrot.slane %v10691_v27, %v18246_v30  ;;  %v4757_v42 = vrot.slane %v1580_v12, %v18236_v48  ;;  %v4761_v11 = vrot.slane %v1580_v12, %v18240_v41  ;;  %v4765_v8 = vrot.slane %v1580_v12, %v18241_v62 }
 0x2c5   :  { %v7356_v44 = vcombine.low %v7348_v16, %v7355_v56  ;;  %v10720_v52 = vrot.slane %v10692_v2, %v18246_v30  ;;  %v10721_v54 = vcombine.low %v10699_v51, %v10706_v34  ;;  %v4769_v39 = vrot.slane %v1580_v12, %v18242_v23 }
 0x2c6   :  { %v4773_v6 = vrot.slane %v1580_v12, %v18243_v63  ;;  %v4777_v24 = vrot.slane %v1580_v12, %v18244_v14  ;;  %v4781_v50 = vrot.slane %v1580_v12, %v14625_v38  ;;  %v10444_v21 = vcombine.low %v4753_v46, %v4757_v42 }
 0x2c7   :  { %12201 = vperm.xlu1 %13491, %v7356_v44   ;;  %v10722_v55 = vcombine.low %v10713_v31, %v10720_v52  ;;  %v10729_v53 = vrot.slane %v10721_v54, %v18246_v30  ;;  %v10445_v60 = vcombine.low %v4761_v11, %v4765_v8  ;;  %v2801_v2 = vrot.slane %v1519_v18, %v18235_v17 }
 0x2c8   :  { %v10446_v16 = vcombine.low %v4769_v39, %v4773_v6  ;;  %v10447_v27 = vcombine.low %v4777_v24, %v4781_v50  ;;  %v10454_v56 = vrot.slane %v10444_v21, %v18246_v30  ;;  %v1514_v51 = vadd.f32 %v18326_v4, %v15859_v36 }
 0x2c9   :  { %v10736_v34 = vrot.slane %v10722_v55, %v18246_v30  ;;  %v10461_v12 = vrot.slane %v10445_v60, %v18246_v30  ;;  %v2805_v46 = vrot.slane %v1519_v18, %v18236_v48  ;;  %v2809_v11 = vrot.slane %v1519_v18, %v18240_v41  ;;  %v16405_v55 = vpop.xlane.xlu0 %1448 }
 0x2ca   :  { %v10468_v31 = vrot.slane %v10446_v16, %v18246_v30  ;;  %v10475_v42 = vrot.slane %v10447_v27, %v18246_v30  ;;  %v2813_v8 = vrot.slane %v1519_v18, %v18241_v62  ;;  %v2817_v54 = vrot.slane %v1519_v18, %v18242_v23  ;;  %18332 = vst [vmem:[#allocation36_spill] sm:$0xff] %v16405_v55  ;;  %v16408_v27 = vpop.xlane.xlu1 %1326 }
 0x2cb   :  { %v10737_v44 = vcombine.low %v10729_v53, %v10736_v34  ;;  %v10476_v52 = vcombine.low %v10454_v56, %v10461_v12  ;;  %v2821_v36 = vrot.slane %v1519_v18, %v18243_v63  ;;  %v2825_v6 = vrot.slane %v1519_v18, %v18244_v14 }
 0x2cc   :  { %v10477_v39 = vcombine.low %v10468_v31, %v10475_v42  ;;  %v2829_v24 = vrot.slane %v1519_v18, %v14625_v38  ;;  %v7455_v50 = vcombine.low %v2801_v2, %v2805_v46  ;;  %v1583_v21 = vadd.f32 %v18326_v4, %v15985_v37 }
 0x2cd   :  { %12408 = vperm.xlu0 %13492, %v10737_v44   ;;  %v10484_v60 = vrot.slane %v10476_v52, %v18246_v30  ;;  %v7456_v53 = vcombine.low %v2809_v11, %v2813_v8  ;;  %v7457_v16 = vcombine.low %v2817_v54, %v2821_v36  ;;  %v2641_v18 = vrot.slane %v1514_v51, %v18235_v17 }
 0x2ce   :  { %v10491_v56 = vrot.slane %v10477_v39, %v18246_v30  ;;  %v7458_v34 = vcombine.low %v2825_v6, %v2829_v24  ;;  %v7465_v12 = vrot.slane %v7455_v50, %v18246_v30  ;;  %v2645_v46 = vrot.slane %v1514_v51, %v18236_v48 }
 0x2cf   :  { %v7472_v2 = vrot.slane %v7456_v53, %v18246_v30  ;;  %v7479_v37 = vrot.slane %v7457_v16, %v18246_v30  ;;  %v2649_v31 = vrot.slane %v1514_v51, %v18240_v41  ;;  %v2653_v8 = vrot.slane %v1514_v51, %v18241_v62 }
 0x2d0   :  { %v10492_v42 = vcombine.low %v10484_v60, %v10491_v56  ;;  %v7486_v11 = vrot.slane %v7458_v34, %v18246_v30  ;;  %v2657_v44 = vrot.slane %v1514_v51, %v18242_v23  ;;  %v2661_v54 = vrot.slane %v1514_v51, %v18243_v63  ;;  %v16426_v34 = vpop.xlane.xlu1 %1454 }
 0x2d1   :  { %v7487_v52 = vcombine.low %v7465_v12, %v7472_v2  ;;  %v2665_v36 = vrot.slane %v1514_v51, %v18244_v14  ;;  %v2669_v39 = vrot.slane %v1514_v51, %v14625_v38  ;;  %v7210_v24 = vcombine.low %v2641_v18, %v2645_v46 }
 0x2d2   :  { %12393 = vperm.xlu1 %13491, %v10492_v42   ;;  %v7488_v6 = vcombine.low %v7479_v37, %v7486_v11  ;;  %v7211_v50 = vcombine.low %v2649_v31, %v2653_v8  ;;  %v1578_v60 = vadd.f32 %v18326_v4, %v15895_v29  ;;  %v7212_v16 = vcombine.low %v2657_v44, %v2661_v54 }
 0x2d3   :  { %v7495_v53 = vrot.slane %v7487_v52, %v18246_v30  ;;  %v7213_v56 = vcombine.low %v2665_v36, %v2669_v39  ;;  %v7220_v2 = vrot.slane %v7210_v24, %v18246_v30  ;;  %v4849_v51 = vrot.slane %v1583_v21, %v18235_v17  ;;  %v16440_v36 = vpop.xlane.xlu0 %1316 }
 0x2d4   :  { %v7502_v12 = vrot.slane %v7488_v6, %v18246_v30  ;;  %v7227_v19 = vrot.slane %v7211_v50, %v18246_v30  ;;  %v7234_v18 = vrot.slane %v7212_v16, %v18246_v30  ;;  %v4853_v29 = vrot.slane %v1583_v21, %v18236_v48 }
 0x2d5   :  { %v7241_v37 = vrot.slane %v7213_v56, %v18246_v30  ;;  %v4857_v46 = vrot.slane %v1583_v21, %v18240_v41  ;;  %v4861_v11 = vrot.slane %v1583_v21, %v18241_v62  ;;  %v4865_v44 = vrot.slane %v1583_v21, %v18242_v23 }
 0x2d6   :  { %v7503_v31 = vcombine.low %v7495_v53, %v7502_v12  ;;  %v7242_v42 = vcombine.low %v7220_v2, %v7227_v19  ;;  %v4869_v52 = vrot.slane %v1583_v21, %v18243_v63  ;;  %v4873_v54 = vrot.slane %v1583_v21, %v18244_v14  ;;  %v16448_v12 = vpop.xlane.xlu1 %1338 }
 0x2d7   :  { %v7243_v8 = vcombine.low %v7234_v18, %v7241_v37  ;;  %v4877_v6 = vrot.slane %v1583_v21, %v14625_v38  ;;  %v10591_v24 = vcombine.low %v4849_v51, %v4853_v29  ;;  %v10592_v50 = vcombine.low %v4857_v46, %v4861_v11 }
 0x2d8   :  { %12210 = vperm.xlu0 %13492, %v7503_v31   ;;  %v7250_v39 = vrot.slane %v7242_v42, %v18246_v30  ;;  %v1525_v19 = vadd.f32 %v18326_v4, %v16021_v43  ;;  %v10593_v16 = vcombine.low %v4865_v44, %v4869_v52  ;;  %v4689_v56 = vrot.slane %v1578_v60, %v18235_v17 }
 0x2d9   :  { %v7257_v53 = vrot.slane %v7243_v8, %v18246_v30  ;;  %v10594_v2 = vcombine.low %v4873_v54, %v4877_v6  ;;  %v10601_v18 = vrot.slane %v10591_v24, %v18246_v30  ;;  %v10608_v37 = vrot.slane %v10592_v50, %v18246_v30 }
 0x2da   :  { %v4693_v31 = vrot.slane %v1578_v60, %v18236_v48  ;;  %v10615_v51 = vrot.slane %v10593_v16, %v18246_v30  ;;  %v4697_v29 = vrot.slane %v1578_v60, %v18240_v41  ;;  %v4701_v43 = vrot.slane %v1578_v60, %v18241_v62 }
 0x2db   :  { %v7258_v21 = vcombine.low %v7250_v39, %v7257_v53  ;;  %v10622_v46 = vrot.slane %v10594_v2, %v18246_v30  ;;  %v10623_v42 = vcombine.low %v10601_v18, %v10608_v37  ;;  %v4705_v11 = vrot.slane %v1578_v60, %v18242_v23  ;;  %v16464_v18 = vpop.xlane.xlu1 %1466 }
 0x2dc   :  { %v4709_v8 = vrot.slane %v1578_v60, %v18243_v63  ;;  %v4713_v44 = vrot.slane %v1578_v60, %v18244_v14  ;;  %v4717_v52 = vrot.slane %v1578_v60, %v14625_v38  ;;  %v10346_v54 = vcombine.low %v4689_v56, %v4693_v31 }
 0x2dd   :  { %12195 = vperm.xlu1 %13491, %v7258_v21   ;;  %v10347_v39 = vcombine.low %v4697_v29, %v4701_v43  ;;  %v10624_v6 = vcombine.low %v10615_v51, %v10622_v46  ;;  %v10631_v24 = vrot.slane %v10623_v42, %v18246_v30  ;;  %v2993_v56 = vrot.slane %v1525_v19, %v18235_v17 }
 0x2de   :  { %v10348_v50 = vcombine.low %v4705_v11, %v4709_v8  ;;  %v10349_v53 = vcombine.low %v4713_v44, %v4717_v52  ;;  %v10356_v16 = vrot.slane %v10346_v54, %v18246_v30  ;;  %v2997_v31 = vrot.slane %v1525_v19, %v18236_v48  ;;  %v16478_v52 = vpop.xlane.xlu0 %1444 }
 0x2df   :  { %v10363_v2 = vrot.slane %v10347_v39, %v18246_v30  ;;  %v10638_v37 = vrot.slane %v10624_v6, %v18246_v30  ;;  %v1520_v51 = vadd.f32 %v18326_v4, %v15931_v1  ;;  %v3001_v43 = vrot.slane %v1525_v19, %v18240_v41  ;;  %18333 = vst [vmem:[#allocation9_spill] sm:$0xff] %v16478_v52 }
 0x2e0   :  { %v10370_v21 = vrot.slane %v10348_v50, %v18246_v30  ;;  %v10377_v55 = vrot.slane %v10349_v53, %v18246_v30  ;;  %v3005_v46 = vrot.slane %v1525_v19, %v18241_v62  ;;  %v3009_v8 = vrot.slane %v1525_v19, %v18242_v23  ;;  %v16483_v53 = vpop.xlane.xlu1 %1334 }
 0x2e1   :  { %v10378_v60 = vcombine.low %v10356_v16, %v10363_v2  ;;  %v10639_v29 = vcombine.low %v10631_v24, %v10638_v37  ;;  %v3013_v44 = vrot.slane %v1525_v19, %v18243_v63  ;;  %v3017_v54 = vrot.slane %v1525_v19, %v18244_v14 }
 0x2e2   :  { %v10379_v42 = vcombine.low %v10370_v21, %v10377_v55  ;;  %v3021_v39 = vrot.slane %v1525_v19, %v14625_v38  ;;  %v7749_v1 = vcombine.low %v2993_v56, %v2997_v31  ;;  %v7750_v24 = vcombine.low %v3001_v43, %v3005_v46 }
 0x2e3   :  { %v10386_v11 = vrot.slane %v10378_v60, %v18246_v30  ;;  %12402 = vperm.xlu0 %13492, %v10639_v29   ;;  %v7751_v50 = vcombine.low %v3009_v8, %v3013_v44  ;;  %v2833_v2 = vrot.slane %v1520_v51, %v18235_v17  ;;  %v2837_v29 = vrot.slane %v1520_v51, %v18236_v48 }
 0x2e4   :  { %v10393_v6 = vrot.slane %v10379_v42, %v18246_v30  ;;  %v7752_v55 = vcombine.low %v3017_v54, %v3021_v39  ;;  %v7759_v16 = vrot.slane %v7749_v1, %v18246_v30  ;;  %v7766_v21 = vrot.slane %v7750_v24, %v18246_v30  ;;  %v16499_v1 = vpop.xlane.xlu0 %1328 }
 0x2e5   :  { %v7773_v60 = vrot.slane %v7751_v50, %v18246_v30  ;;  %v1523_v19 = vadd.f32 %v18326_v4, %v16093_v61  ;;  %v2841_v31 = vrot.slane %v1520_v51, %v18240_v41  ;;  %v2845_v43 = vrot.slane %v1520_v51, %v18241_v62  ;;  %v16502_v50 = vpop.xlane.xlu1 %1462 }
 0x2e6   :  { %v10394_v37 = vcombine.low %v10386_v11, %v10393_v6  ;;  %v7780_v56 = vrot.slane %v7752_v55, %v18246_v30  ;;  %v7781_v46 = vcombine.low %v7759_v16, %v7766_v21  ;;  %v2849_v42 = vrot.slane %v1520_v51, %v18242_v23 }
 0x2e7   :  { %v2853_v11 = vrot.slane %v1520_v51, %v18243_v63  ;;  %v2857_v44 = vrot.slane %v1520_v51, %v18244_v14  ;;  %v2861_v54 = vrot.slane %v1520_v51, %v14625_v38  ;;  %v7504_v39 = vcombine.low %v2833_v2, %v2837_v29 }
 0x2e8   :  { %12387 = vperm.xlu1 %13491, %v10394_v37   ;;  %v7782_v8 = vcombine.low %v7773_v60, %v7780_v56  ;;  %v7789_v61 = vrot.slane %v7781_v46, %v18246_v30  ;;  %v7505_v6 = vcombine.low %v2841_v31, %v2845_v43  ;;  %v2929_v21 = vrot.slane %v1523_v19, %v18235_v17 }
 0x2e9   :  { %v7506_v24 = vcombine.low %v2849_v42, %v2853_v11  ;;  %v7507_v16 = vcombine.low %v2857_v44, %v2861_v54  ;;  %v7514_v37 = vrot.slane %v7504_v39, %v18246_v30  ;;  %v1584_v60 = vadd.f32 %v18326_v4, %v15967_v59 }
 0x2ea   :  { %v7796_v55 = vrot.slane %v7782_v8, %v18246_v30  ;;  %v7521_v51 = vrot.slane %v7505_v6, %v18246_v30  ;;  %v2933_v29 = vrot.slane %v1523_v19, %v18236_v48  ;;  %v2937_v43 = vrot.slane %v1523_v19, %v18240_v41  ;;  %v16519_v6 = vpop.xlane.xlu0 %1456 }
 0x2eb   :  { %v7528_v2 = vrot.slane %v7506_v24, %v18246_v30  ;;  %v7535_v31 = vrot.slane %v7507_v16, %v18246_v30  ;;  %v2941_v46 = vrot.slane %v1523_v19, %v18241_v62  ;;  %v2945_v11 = vrot.slane %v1523_v19, %v18242_v23  ;;  %18334 = vst [vmem:[#allocation38_spill] sm:$0xff] %v16519_v6  ;;  %v16522_v16 = vpop.xlane.xlu1 %1346 }
 0x2ec   :  { %v7797_v56 = vcombine.low %v7789_v61, %v7796_v55  ;;  %v7536_v42 = vcombine.low %v7514_v37, %v7521_v51  ;;  %v2949_v8 = vrot.slane %v1523_v19, %v18243_v63  ;;  %v2953_v44 = vrot.slane %v1523_v19, %v18244_v14 }
 0x2ed   :  { %v7537_v59 = vcombine.low %v7528_v2, %v7535_v31  ;;  %v2957_v54 = vrot.slane %v1523_v19, %v14625_v38  ;;  %v7651_v39 = vcombine.low %v2929_v21, %v2933_v29  ;;  %v7652_v24 = vcombine.low %v2937_v43, %v2941_v46 }
 0x2ee   :  { %12228 = vperm.xlu0 %13492, %v7797_v56   ;;  %v7544_v61 = vrot.slane %v7536_v42, %v18246_v30  ;;  %v7653_v55 = vcombine.low %v2945_v11, %v2949_v8  ;;  %v4881_v2 = vrot.slane %v1584_v60, %v18235_v17  ;;  %v1529_v56 = vadd.f32 %v18326_v4, %v16165_v9 }
 0x2ef   :  { %v7551_v37 = vrot.slane %v7537_v59, %v18246_v30  ;;  %v7654_v51 = vcombine.low %v2953_v44, %v2957_v54  ;;  %v7661_v58 = vrot.slane %v7651_v39, %v18246_v30  ;;  %v7668_v19 = vrot.slane %v7652_v24, %v18246_v30  ;;  %v16539_v24 = vpop.xlane.xlu0 %1324 }
 0x2f0   :  { %v7675_v21 = vrot.slane %v7653_v55, %v18246_v30  ;;  %v4885_v29 = vrot.slane %v1584_v60, %v18236_v48  ;;  %v4889_v46 = vrot.slane %v1584_v60, %v18240_v41  ;;  %v4893_v42 = vrot.slane %v1584_v60, %v18241_v62 }
 0x2f1   :  { %v7552_v31 = vcombine.low %v7544_v61, %v7551_v37  ;;  %v7682_v43 = vrot.slane %v7654_v51, %v18246_v30  ;;  %v7683_v11 = vcombine.low %v7661_v58, %v7668_v19  ;;  %v4897_v8 = vrot.slane %v1584_v60, %v18242_v23  ;;  %v16542_v51 = vpop.xlane.xlu1 %1474 }
 0x2f2   :  { %v4901_v59 = vrot.slane %v1584_v60, %v18243_v63  ;;  %v4905_v44 = vrot.slane %v1584_v60, %v18244_v14  ;;  %v4909_v54 = vrot.slane %v1584_v60, %v14625_v38  ;;  %v10640_v39 = vcombine.low %v4881_v2, %v4885_v29  ;;  %18335 = vst [vmem:[#allocation8_spill] sm:$0xff] %v16542_v51 }
 0x2f3   :  { %12213 = vperm.xlu1 %13491, %v7552_v31   ;;  %v7684_v9 = vcombine.low %v7675_v21, %v7682_v43  ;;  %v7691_v61 = vrot.slane %v7683_v11, %v18246_v30  ;;  %v10641_v55 = vcombine.low %v4889_v46, %v4893_v42  ;;  %v3121_v21 = vrot.slane %v1529_v56, %v18235_v17 }
 0x2f4   :  { %v10642_v37 = vcombine.low %v4897_v8, %v4901_v59  ;;  %v10643_v19 = vcombine.low %v4905_v44, %v4909_v54  ;;  %v10650_v52 = vrot.slane %v10640_v39, %v18246_v30  ;;  %v1518_v31 = vadd.f32 %v18326_v4, %v16003_v10 }
 0x2f5   :  { %v7698_v58 = vrot.slane %v7684_v9, %v18246_v30  ;;  %v10657_v60 = vrot.slane %v10641_v55, %v18246_v30  ;;  %v3125_v29 = vrot.slane %v1529_v56, %v18236_v48  ;;  %v3129_v42 = vrot.slane %v1529_v56, %v18240_v41  ;;  %v16561_v55 = vpop.xlane.xlu0 %1452 }
 0x2f6   :  { %v10664_v2 = vrot.slane %v10642_v37, %v18246_v30  ;;  %v10671_v46 = vrot.slane %v10643_v19, %v18246_v30  ;;  %v3133_v11 = vrot.slane %v1529_v56, %v18241_v62  ;;  %v3137_v59 = vrot.slane %v1529_v56, %v18242_v23  ;;  %v16564_v19 = vpop.xlane.xlu1 %1342 }
 0x2f7   :  { %v7699_v43 = vcombine.low %v7691_v61, %v7698_v58  ;;  %v10672_v8 = vcombine.low %v10650_v52, %v10657_v60  ;;  %v3141_v9 = vrot.slane %v1529_v56, %v18243_v63  ;;  %v3145_v44 = vrot.slane %v1529_v56, %v18244_v14 }
 0x2f8   :  { %v10673_v10 = vcombine.low %v10664_v2, %v10671_v46  ;;  %v3149_v54 = vrot.slane %v1529_v56, %v14625_v38  ;;  %v7945_v39 = vcombine.low %v3121_v21, %v3125_v29  ;;  %v1527_v61 = vadd.f32 %v18326_v4, %v16237_v0 }
 0x2f9   :  { %12222 = vperm.xlu0 %13492, %v7699_v43   ;;  %v10680_v37 = vrot.slane %v10672_v8, %v18246_v30  ;;  %v7946_v58 = vcombine.low %v3129_v42, %v3133_v11  ;;  %v7947_v52 = vcombine.low %v3137_v59, %v3141_v9  ;;  %v2769_v46 = vrot.slane %v1518_v31, %v18235_v17  ;;  %v16579_v49 = vpop.xlane.xlu0 %1336 }
 0x2fa   :  { %v10687_v60 = vrot.slane %v10673_v10, %v18246_v30  ;;  %v7948_v43 = vcombine.low %v3145_v44, %v3149_v54  ;;  %v7955_v2 = vrot.slane %v7945_v39, %v18246_v30  ;;  %v2773_v0 = vrot.slane %v1518_v31, %v18236_v48  ;;  %v16582_v25 = vpop.xlane.xlu1 %1470 }
 0x2fb   :  { %v7962_v56 = vrot.slane %v7946_v58, %v18246_v30  ;;  %v7969_v21 = vrot.slane %v7947_v52, %v18246_v30  ;;  %v2777_v29 = vrot.slane %v1518_v31, %v18240_v41  ;;  %v2781_v11 = vrot.slane %v1518_v31, %v18241_v62 }
 0x2fc   :  { %v10688_v8 = vcombine.low %v10680_v37, %v10687_v60  ;;  %v7976_v42 = vrot.slane %v7948_v43, %v18246_v30  ;;  %v2785_v59 = vrot.slane %v1518_v31, %v18242_v23  ;;  %v2789_v10 = vrot.slane %v1518_v31, %v18243_v63 }
 0x2fd   :  { %v7977_v9 = vcombine.low %v7955_v2, %v7962_v56  ;;  %v2793_v44 = vrot.slane %v1518_v31, %v18244_v14  ;;  %v2797_v54 = vrot.slane %v1518_v31, %v14625_v38  ;;  %v7406_v58 = vcombine.low %v2769_v46, %v2773_v0 }
 0x2fe   :  { %12405 = vperm.xlu1 %13491, %v10688_v8   ;;  %v7978_v39 = vcombine.low %v7969_v21, %v7976_v42  ;;  %v7407_v52 = vcombine.low %v2777_v29, %v2781_v11  ;;  %v7408_v60 = vcombine.low %v2785_v59, %v2789_v10  ;;  %v3057_v31 = vrot.slane %v1527_v61, %v18235_v17 }
 0x2ff   :  { %v7985_v37 = vrot.slane %v7977_v9, %v18246_v30  ;;  %v7409_v43 = vcombine.low %v2793_v44, %v2797_v54  ;;  %v7416_v56 = vrot.slane %v7406_v58, %v18246_v30  ;;  %v3061_v0 = vrot.slane %v1527_v61, %v18236_v48 }
 0x300   :  { %v7992_v2 = vrot.slane %v7978_v39, %v18246_v30  ;;  %v7423_v51 = vrot.slane %v7407_v52, %v18246_v30  ;;  %v7430_v21 = vrot.slane %v7408_v60, %v18246_v30  ;;  %v3065_v29 = vrot.slane %v1527_v61, %v18240_v41 }
 0x301   :  { %v7437_v46 = vrot.slane %v7409_v43, %v18246_v30  ;;  %v1582_v8 = vadd.f32 %v18326_v4, %v16039_v47  ;;  %v3069_v59 = vrot.slane %v1527_v61, %v18241_v62  ;;  %v3073_v10 = vrot.slane %v1527_v61, %v18242_v23  ;;  %v16600_v43 = vpop.xlane.xlu0 %1464 }
 0x302   :  { %v7993_v42 = vcombine.low %v7985_v37, %v7992_v2  ;;  %v7438_v11 = vcombine.low %v7416_v56, %v7423_v51  ;;  %v3077_v44 = vrot.slane %v1527_v61, %v18243_v63  ;;  %v3081_v54 = vrot.slane %v1527_v61, %v18244_v14  ;;  %18336 = vst [vmem:[#allocation37_spill] sm:$0xff] %v16600_v43  ;;  %v16603_v37 = vpop.xlane.xlu1 %1354 }
 0x303   :  { %v7439_v9 = vcombine.low %v7430_v21, %v7437_v46  ;;  %v3085_v58 = vrot.slane %v1527_v61, %v14625_v38  ;;  %v7847_v52 = vcombine.low %v3057_v31, %v3061_v0  ;;  %v7848_v60 = vcombine.low %v3065_v29, %v3069_v59 }
 0x304   :  { %12240 = vperm.xlu0 %13492, %v7993_v42   ;;  %v7446_v39 = vrot.slane %v7438_v11, %v18246_v30  ;;  %v7849_v51 = vcombine.low %v3073_v10, %v3077_v44  ;;  %v1533_v46 = vadd.f32 %v18326_v4, %v16286_v22  ;;  %v4817_v29 = vrot.slane %v1582_v8, %v18235_v17 }
 0x305   :  { %v7453_v47 = vrot.slane %v7439_v9, %v18246_v30  ;;  %v7850_v2 = vcombine.low %v3081_v54, %v3085_v58  ;;  %v7857_v56 = vrot.slane %v7847_v52, %v18246_v30  ;;  %v7864_v21 = vrot.slane %v7848_v60, %v18246_v30  ;;  %v16619_v58 = vpop.xlane.xlu0 %1332 }
 0x306   :  { %v7871_v61 = vrot.slane %v7849_v51, %v18246_v30  ;;  %v4821_v11 = vrot.slane %v1582_v8, %v18236_v48  ;;  %v4825_v59 = vrot.slane %v1582_v8, %v18240_v41  ;;  %v4829_v9 = vrot.slane %v1582_v8, %v18241_v62 }
 0x307   :  { %v7454_v42 = vcombine.low %v7446_v39, %v7453_v47  ;;  %v7878_v31 = vrot.slane %v7850_v2, %v18246_v30  ;;  %v7879_v0 = vcombine.low %v7857_v56, %v7864_v21  ;;  %v4833_v10 = vrot.slane %v1582_v8, %v18242_v23  ;;  %v16624_v2 = vpop.xlane.xlu1 %1482 }
 0x308   :  { %v4837_v54 = vrot.slane %v1582_v8, %v18243_v63  ;;  %v4841_v39 = vrot.slane %v1582_v8, %v18244_v14  ;;  %v4845_v52 = vrot.slane %v1582_v8, %v14625_v38  ;;  %v10542_v60 = vcombine.low %v4817_v29, %v4821_v11  ;;  %18337 = vst [vmem:[#allocation41_spill] sm:$0xff] %v16624_v2 }
 0x309   :  { %12207 = vperm.xlu1 %13491, %v7454_v42   ;;  %v7880_v44 = vcombine.low %v7871_v61, %v7878_v31  ;;  %v7887_v22 = vrot.slane %v7879_v0, %v18246_v30  ;;  %v10543_v47 = vcombine.low %v4825_v59, %v4829_v9  ;;  %v1524_v51 = vadd.f32 %v18326_v4, %v16075_v20 }
 0x30a   :  { %v10544_v21 = vcombine.low %v4833_v10, %v4837_v54  ;;  %v3249_v42 = vrot.slane %v1533_v46, %v18235_v17  ;;  %v10545_v61 = vcombine.low %v4841_v39, %v4845_v52  ;;  %v10552_v31 = vrot.slane %v10542_v60, %v18246_v30  ;;  %v16639_v60 = vpop.xlane.xlu0 %1460 }
 0x30b   :  { %v7894_v56 = vrot.slane %v7880_v44, %v18246_v30  ;;  %v10559_v0 = vrot.slane %v10543_v47, %v18246_v30  ;;  %v3253_v43 = vrot.slane %v1533_v46, %v18236_v48  ;;  %v3257_v11 = vrot.slane %v1533_v46, %v18240_v41  ;;  %18338 = vst [vmem:[#allocation39_spill] sm:$0xff] %v16639_v60  ;;  %v16642_v2 = vpop.xlane.xlu1 %1350 }
 0x30c   :  { %v10566_v29 = vrot.slane %v10544_v21, %v18246_v30  ;;  %v3261_v20 = vrot.slane %v1533_v46, %v18241_v62  ;;  %v10573_v59 = vrot.slane %v10545_v61, %v18246_v30  ;;  %v3265_v10 = vrot.slane %v1533_v46, %v18242_v23 }
 0x30d   :  { %v7895_v8 = vcombine.low %v7887_v22, %v7894_v56  ;;  %v10574_v9 = vcombine.low %v10552_v31, %v10559_v0  ;;  %v3269_v44 = vrot.slane %v1533_v46, %v18243_v63  ;;  %v3273_v54 = vrot.slane %v1533_v46, %v18244_v14 }
 0x30e   :  { %v3277_v39 = vrot.slane %v1533_v46, %v14625_v38  ;;  %v8141_v52 = vcombine.low %v3249_v42, %v3253_v43  ;;  %v8142_v22 = vcombine.low %v3257_v11, %v3261_v20  ;;  %v10575_v47 = vcombine.low %v10566_v29, %v10573_v59 }
 0x30f   :  { %12234 = vperm.xlu0 %13492, %v7895_v8   ;;  %v10582_v56 = vrot.slane %v10574_v9, %v18246_v30  ;;  %v8143_v21 = vcombine.low %v3265_v10, %v3269_v44  ;;  %v1531_v8 = vadd.f32 %v18326_v4, %v16329_v15  ;;  %v2961_v42 = vrot.slane %v1524_v51, %v18235_v17 }
 0x310   :  { %v8144_v61 = vcombine.low %v3273_v54, %v3277_v39  ;;  %v8151_v31 = vrot.slane %v8141_v52, %v18246_v30  ;;  %v8158_v0 = vrot.slane %v8142_v22, %v18246_v30  ;;  %v10589_v46 = vrot.slane %v10575_v47, %v18246_v30  ;;  %v16658_v52 = vpop.xlane.xlu0 %1344 }
 0x311   :  { %v8165_v43 = vrot.slane %v8143_v21, %v18246_v30  ;;  %v2965_v20 = vrot.slane %v1524_v51, %v18236_v48  ;;  %v2969_v59 = vrot.slane %v1524_v51, %v18240_v41  ;;  %v2973_v10 = vrot.slane %v1524_v51, %v18241_v62 }
 0x312   :  { %v8172_v29 = vrot.slane %v8144_v61, %v18246_v30  ;;  %v8173_v11 = vcombine.low %v8151_v31, %v8158_v0  ;;  %v10590_v9 = vcombine.low %v10582_v56, %v10589_v46  ;;  %v2977_v44 = vrot.slane %v1524_v51, %v18242_v23  ;;  %v16662_v31 = vpop.xlane.xlu1 %1478 }
 0x313   :  { %v2981_v39 = vrot.slane %v1524_v51, %v18243_v63  ;;  %v2985_v22 = vrot.slane %v1524_v51, %v18244_v14  ;;  %v2989_v47 = vrot.slane %v1524_v51, %v14625_v38  ;;  %v7700_v21 = vcombine.low %v2961_v42, %v2965_v20  ;;  %18339 = vst [vmem:[#allocation10_spill] sm:$0xff] %v16662_v31 }
 0x314   :  { %v8174_v54 = vcombine.low %v8165_v43, %v8172_v29  ;;  %v8181_v15 = vrot.slane %v8173_v11, %v18246_v30  ;;  %12399 = vperm.xlu1 %13491, %v10590_v9   ;;  %v7701_v61 = vcombine.low %v2969_v59, %v2973_v10  ;;  %v3185_v46 = vrot.slane %v1531_v8, %v18235_v17 }
 0x315   :  { %v7702_v0 = vcombine.low %v2977_v44, %v2981_v39  ;;  %v7703_v43 = vcombine.low %v2985_v22, %v2989_v47  ;;  %v7710_v29 = vrot.slane %v7700_v21, %v18246_v30  ;;  %v3189_v9 = vrot.slane %v1531_v8, %v18236_v48 }
 0x316   :  { %v8188_v56 = vrot.slane %v8174_v54, %v18246_v30  ;;  %v7717_v11 = vrot.slane %v7701_v61, %v18246_v30  ;;  %v1522_v60 = vadd.f32 %v18326_v4, %v16147_v57  ;;  %v3193_v20 = vrot.slane %v1531_v8, %v18240_v41  ;;  %v16679_v57 = vpop.xlane.xlu0 %1472 }
 0x317   :  { %v7724_v42 = vrot.slane %v7702_v0, %v18246_v30  ;;  %v7731_v59 = vrot.slane %v7703_v43, %v18246_v30  ;;  %v3197_v44 = vrot.slane %v1531_v8, %v18241_v62  ;;  %v3201_v54 = vrot.slane %v1531_v8, %v18242_v23  ;;  %v16684_v43 = vpop.permute.xlu1 %12117 }
 0x318   :  { %v8189_v51 = vcombine.low %v8181_v15, %v8188_v56  ;;  %v7732_v10 = vcombine.low %v7710_v29, %v7717_v11  ;;  %v3205_v39 = vrot.slane %v1531_v8, %v18243_v63  ;;  %v3209_v22 = vrot.slane %v1531_v8, %v18244_v14  ;;  %18340 = vst [vmem:[#allocation11_spill] sm:$0xff] %v16684_v43 }
 0x319   :  { %v3213_v47 = vrot.slane %v1531_v8, %v14625_v38  ;;  %v7733_v15 = vcombine.low %v7724_v42, %v7731_v59  ;;  %v8043_v61 = vcombine.low %v3185_v46, %v3189_v9  ;;  %v8044_v56 = vcombine.low %v3193_v20, %v3197_v44 }
 0x31a   :  { %12252 = vperm.xlu0 %13492, %v8189_v51   ;;  %v7740_v21 = vrot.slane %v7732_v10, %v18246_v30  ;;  %v1537_v0 = vadd.f32 %v18326_v4, %v16369_v7  ;;  %v8045_v29 = vcombine.low %v3201_v54, %v3205_v39  ;;  %v2897_v51 = vrot.slane %v1522_v60, %v18235_v17 }
 0x31b   :  { %v8046_v11 = vcombine.low %v3209_v22, %v3213_v47  ;;  %v7747_v31 = vrot.slane %v7733_v15, %v18246_v30  ;;  %v8053_v8 = vrot.slane %v8043_v61, %v18246_v30  ;;  %v8060_v6 = vrot.slane %v8044_v56, %v18246_v30  ;;  %v16701_v56 = vpop.xlane.xlu0 %1340 }
 0x31c   :  { %v2901_v42 = vrot.slane %v1522_v60, %v18236_v48  ;;  %v8067_v46 = vrot.slane %v8045_v29, %v18246_v30  ;;  %v2905_v7 = vrot.slane %v1522_v60, %v18240_v41  ;;  %v2909_v20 = vrot.slane %v1522_v60, %v18241_v62 }
 0x31d   :  { %v8074_v9 = vrot.slane %v8046_v11, %v18246_v30  ;;  %v7748_v59 = vcombine.low %v7740_v21, %v7747_v31  ;;  %v8075_v10 = vcombine.low %v8053_v8, %v8060_v6  ;;  %v2913_v44 = vrot.slane %v1522_v60, %v18242_v23  ;;  %v16704_v21 = vpop.permute.xlu1 %12309 }
 0x31e   :  { %v2917_v54 = vrot.slane %v1522_v60, %v18243_v63  ;;  %v2921_v22 = vrot.slane %v1522_v60, %v18244_v14  ;;  %v2925_v47 = vrot.slane %v1522_v60, %v14625_v38  ;;  %v7602_v15 = vcombine.low %v2897_v51, %v2901_v42  ;;  %18341 = vst [vmem:[#allocation42_spill] sm:$0xff] %v16704_v21 }
 0x31f   :  { %v8076_v39 = vcombine.low %v8067_v46, %v8074_v9  ;;  %v1528_v61 = vadd.f32 %v18326_v4, %v16219_v3  ;;  %12225 = vperm.xlu1 %13491, %v7748_v59   ;;  %v8083_v29 = vrot.slane %v8075_v10, %v18246_v30  ;;  %v7603_v31 = vcombine.low %v2905_v7, %v2909_v20 }
 0x320   :  { %v7604_v6 = vcombine.low %v2913_v44, %v2917_v54  ;;  %v7605_v8 = vcombine.low %v2921_v22, %v2925_v47  ;;  %v7612_v46 = vrot.slane %v7602_v15, %v18246_v30  ;;  %v3377_v60 = vrot.slane %v1537_v0, %v18235_v17 }
 0x321   :  { %v8090_v11 = vrot.slane %v8076_v39, %v18246_v30  ;;  %v7619_v51 = vrot.slane %v7603_v31, %v18246_v30  ;;  %v3381_v42 = vrot.slane %v1537_v0, %v18236_v48  ;;  %v3385_v9 = vrot.slane %v1537_v0, %v18240_v41  ;;  %v16722_v21 = vpop.permute.xlu1 %12303 }
 0x322   :  { %v7626_v3 = vrot.slane %v7604_v6, %v18246_v30  ;;  %v7633_v7 = vrot.slane %v7605_v8, %v18246_v30  ;;  %v3389_v20 = vrot.slane %v1537_v0, %v18241_v62  ;;  %v3393_v10 = vrot.slane %v1537_v0, %v18242_v23  ;;  %v16719_v6 = vpop.xlane.xlu0 %1468  ;;  %18342 = vst [vmem:[#allocation13_spill] sm:$0xff] %v16722_v21 }
 0x323   :  { %v8091_v59 = vcombine.low %v8083_v29, %v8090_v11  ;;  %v7634_v44 = vcombine.low %v7612_v46, %v7619_v51  ;;  %v3397_v54 = vrot.slane %v1537_v0, %v18243_v63  ;;  %v3401_v39 = vrot.slane %v1537_v0, %v18244_v14 }
 0x324   :  { %v3405_v22 = vrot.slane %v1537_v0, %v14625_v38  ;;  %v7635_v47 = vcombine.low %v7626_v3, %v7633_v7  ;;  %v8337_v15 = vcombine.low %v3377_v60, %v3381_v42  ;;  %v8338_v31 = vcombine.low %v3385_v9, %v3389_v20 }
 0x325   :  { %12246 = vperm.xlu0 %13492, %v8091_v59   ;;  %v7642_v29 = vrot.slane %v7634_v44, %v18246_v30  ;;  %v8339_v11 = vcombine.low %v3393_v10, %v3397_v54  ;;  %v3089_v0 = vrot.slane %v1528_v61, %v18235_v17  ;;  %v3093_v42 = vrot.slane %v1528_v61, %v18236_v48 }
 0x326   :  { %v8340_v8 = vcombine.low %v3401_v39, %v3405_v22  ;;  %v7649_v46 = vrot.slane %v7635_v47, %v18246_v30  ;;  %v8347_v51 = vrot.slane %v8337_v15, %v18246_v30  ;;  %v8354_v43 = vrot.slane %v8338_v31, %v18246_v30 }
 0x327   :  { %v8361_v3 = vrot.slane %v8339_v11, %v18246_v30  ;;  %v1535_v9 = vadd.f32 %v18326_v4, %v16408_v27  ;;  %v3097_v20 = vrot.slane %v1528_v61, %v18240_v41  ;;  %v3101_v44 = vrot.slane %v1528_v61, %v18241_v62  ;;  %v16740_v27 = vpop.xlane.xlu0 %1352 }
 0x328   :  { %v8368_v60 = vrot.slane %v8340_v8, %v18246_v30  ;;  %v7650_v59 = vcombine.low %v7642_v29, %v7649_v46  ;;  %v8369_v7 = vcombine.low %v8347_v51, %v8354_v43  ;;  %v3105_v54 = vrot.slane %v1528_v61, %v18242_v23  ;;  %v16743_v8 = vpop.permute.xlu1 %12120 }
 0x329   :  { %v3109_v39 = vrot.slane %v1528_v61, %v18243_v63  ;;  %v3113_v47 = vrot.slane %v1528_v61, %v18244_v14  ;;  %v3117_v15 = vrot.slane %v1528_v61, %v14625_v38  ;;  %v7896_v31 = vcombine.low %v3089_v0, %v3093_v42  ;;  %18343 = vst [vmem:[#allocation12_spill] sm:$0xff] %v16743_v8 }
 0x32a   :  { %v8370_v10 = vcombine.low %v8361_v3, %v8368_v60  ;;  %12219 = vperm.xlu1 %13491, %v7650_v59   ;;  %v8377_v22 = vrot.slane %v8369_v7, %v18246_v30  ;;  %v7897_v29 = vcombine.low %v3097_v20, %v3101_v44  ;;  %v3313_v3 = vrot.slane %v1535_v9, %v18235_v17 }
 0x32b   :  { %v7898_v11 = vcombine.low %v3105_v54, %v3109_v39  ;;  %v7899_v46 = vcombine.low %v3113_v47, %v3117_v15  ;;  %v7906_v51 = vrot.slane %v7896_v31, %v18246_v30  ;;  %v3317_v60 = vrot.slane %v1535_v9, %v18236_v48 }
 0x32c   :  { %v8384_v43 = vrot.slane %v8370_v10, %v18246_v30  ;;  %v1526_v59 = vadd.f32 %v18326_v4, %v16293_v40  ;;  %v7913_v0 = vrot.slane %v7897_v29, %v18246_v30  ;;  %v3321_v20 = vrot.slane %v1535_v9, %v18240_v41  ;;  %v16763_v8 = vpop.permute.xlu1 %12114 }
 0x32d   :  { %v7920_v42 = vrot.slane %v7898_v11, %v18246_v30  ;;  %v7927_v7 = vrot.slane %v7899_v46, %v18246_v30  ;;  %v3325_v10 = vrot.slane %v1535_v9, %v18241_v62  ;;  %v3329_v44 = vrot.slane %v1535_v9, %v18242_v23  ;;  %18345 = vst [vmem:[#allocation14_spill] sm:$0xff] %v16763_v8 }
 0x32e   :  { %v8385_v61 = vcombine.low %v8377_v22, %v8384_v43  ;;  %v7928_v54 = vcombine.low %v7906_v51, %v7913_v0  ;;  %v3333_v39 = vrot.slane %v1535_v9, %v18243_v63  ;;  %v3337_v47 = vrot.slane %v1535_v9, %v18244_v14  ;;  %v16759_v43 = vpop.xlane.xlu0 %1480 }
 0x32f   :  { %v7929_v40 = vcombine.low %v7920_v42, %v7927_v7  ;;  %v3341_v22 = vrot.slane %v1535_v9, %v14625_v38  ;;  %v8239_v15 = vcombine.low %v3313_v3, %v3317_v60  ;;  %v8240_v31 = vcombine.low %v3321_v20, %v3325_v10  ;;  %18344 = vst [vmem:[#allocation18_spill] sm:$0xff] %v16759_v43 }
 0x330   :  { %12264 = vperm.xlu0 %13492, %v8385_v61   ;;  %v7936_v29 = vrot.slane %v7928_v54, %v18246_v30  ;;  %v8241_v11 = vcombine.low %v3329_v44, %v3333_v39  ;;  %v3025_v46 = vrot.slane %v1526_v59, %v18235_v17  ;;  %v1541_v9 = vadd.f32 %v18326_v4, %v16448_v12 }
 0x331   :  { %v7943_v51 = vrot.slane %v7929_v40, %v18246_v30  ;;  %v8242_v61 = vcombine.low %v3337_v47, %v3341_v22  ;;  %v8249_v0 = vrot.slane %v8239_v15, %v18246_v30  ;;  %v8256_v42 = vrot.slane %v8240_v31, %v18246_v30 }
 0x332   :  { %v8263_v3 = vrot.slane %v8241_v11, %v18246_v30  ;;  %v3029_v60 = vrot.slane %v1526_v59, %v18236_v48  ;;  %v3033_v7 = vrot.slane %v1526_v59, %v18240_v41  ;;  %v3037_v54 = vrot.slane %v1526_v59, %v18241_v62  ;;  %v16782_v11 = vpop.xlane.xlu0 %1348 }
 0x333   :  { %v7944_v20 = vcombine.low %v7936_v29, %v7943_v51  ;;  %v8270_v10 = vrot.slane %v8242_v61, %v18246_v30  ;;  %v8271_v44 = vcombine.low %v8249_v0, %v8256_v42  ;;  %v3041_v39 = vrot.slane %v1526_v59, %v18242_v23  ;;  %v16785_v42 = vpop.permute.xlu1 %12129 }
 0x334   :  { %v3045_v47 = vrot.slane %v1526_v59, %v18243_v63  ;;  %v3049_v40 = vrot.slane %v1526_v59, %v18244_v14  ;;  %v3053_v15 = vrot.slane %v1526_v59, %v14625_v38  ;;  %v7798_v31 = vcombine.low %v3025_v46, %v3029_v60  ;;  %18346 = vst [vmem:[#allocation43_spill] sm:$0xff] %v16785_v42 }
 0x335   :  { %12237 = vperm.xlu1 %13491, %v7944_v20   ;;  %v8272_v12 = vcombine.low %v8263_v3, %v8270_v10  ;;  %v8279_v22 = vrot.slane %v8271_v44, %v18246_v30  ;;  %v1532_v29 = vadd.f32 %v18326_v4, %v16364_v45  ;;  %v7799_v51 = vcombine.low %v3033_v7, %v3037_v54 }
 0x336   :  { %v7800_v61 = vcombine.low %v3041_v39, %v3045_v47  ;;  %v3505_v0 = vrot.slane %v1541_v9, %v18235_v17  ;;  %v7801_v20 = vcombine.low %v3049_v40, %v3053_v15  ;;  %v7808_v3 = vrot.slane %v7798_v31, %v18246_v30 }
 0x337   :  { %v8286_v21 = vrot.slane %v8272_v12, %v18246_v30  ;;  %v3509_v10 = vrot.slane %v1541_v9, %v18236_v48  ;;  %v7815_v59 = vrot.slane %v7799_v51, %v18246_v30  ;;  %v3513_v45 = vrot.slane %v1541_v9, %v18240_v41 }
 0x338   :  { %v7822_v46 = vrot.slane %v7800_v61, %v18246_v30  ;;  %v3517_v60 = vrot.slane %v1541_v9, %v18241_v62  ;;  %v7829_v44 = vrot.slane %v7801_v20, %v18246_v30  ;;  %v3521_v54 = vrot.slane %v1541_v9, %v18242_v23 }
 0x339   :  { %v8287_v7 = vcombine.low %v8279_v22, %v8286_v21  ;;  %v3525_v39 = vrot.slane %v1541_v9, %v18243_v63  ;;  %v7830_v47 = vcombine.low %v7808_v3, %v7815_v59  ;;  %v3529_v40 = vrot.slane %v1541_v9, %v18244_v14  ;;  %v16801_v21 = vpop.xlane.xlu0 %1476  ;;  %v16806_v59 = vpop.permute.xlu1 %12321 }
 0x33a   :  { %v3533_v12 = vrot.slane %v1541_v9, %v14625_v38  ;;  %v8533_v15 = vcombine.low %v3505_v0, %v3509_v10  ;;  %v1539_v31 = vadd.f32 %v18326_v4, %v16483_v53  ;;  %v7831_v51 = vcombine.low %v7822_v46, %v7829_v44  ;;  %18347 = vst [vmem:[#allocation19_spill] sm:$0xff] %v16806_v59 }
 0x33b   :  { %12258 = vperm.xlu0 %13492, %v8287_v7   ;;  %v8534_v61 = vcombine.low %v3513_v45, %v3517_v60  ;;  %v8535_v42 = vcombine.low %v3521_v54, %v3525_v39  ;;  %v7838_v22 = vrot.slane %v7830_v47, %v18246_v30  ;;  %v3217_v3 = vrot.slane %v1532_v29, %v18235_v17 }
 0x33c   :  { %v8536_v20 = vcombine.low %v3529_v40, %v3533_v12  ;;  %v8543_v8 = vrot.slane %v8533_v15, %v18246_v30  ;;  %v7845_v9 = vrot.slane %v7831_v51, %v18246_v30  ;;  %v3221_v10 = vrot.slane %v1532_v29, %v18236_v48 }
 0x33d   :  { %v8550_v0 = vrot.slane %v8534_v61, %v18246_v30  ;;  %v8557_v53 = vrot.slane %v8535_v42, %v18246_v30  ;;  %v3225_v45 = vrot.slane %v1532_v29, %v18240_v41  ;;  %v3229_v60 = vrot.slane %v1532_v29, %v18241_v62  ;;  %v16818_v40 = vpop.permute.xlu0 %12111  ;;  %v16826_v43 = vpop.permute.xlu1 %12123 }
 0x33e   :  { %v8564_v46 = vrot.slane %v8536_v20, %v18246_v30  ;;  %v3233_v7 = vrot.slane %v1532_v29, %v18242_v23  ;;  %v7846_v44 = vcombine.low %v7838_v22, %v7845_v9  ;;  %v3237_v39 = vrot.slane %v1532_v29, %v18243_v63 }
 0x33f   :  { %v8565_v54 = vcombine.low %v8543_v8, %v8550_v0  ;;  %v3241_v47 = vrot.slane %v1532_v29, %v18244_v14  ;;  %v3245_v42 = vrot.slane %v1532_v29, %v14625_v38  ;;  %v8092_v15 = vcombine.low %v3217_v3, %v3221_v10 }
 0x340   :  { %v8566_v12 = vcombine.low %v8557_v53, %v8564_v46  ;;  %v8093_v51 = vcombine.low %v3225_v45, %v3229_v60  ;;  %12231 = vperm.xlu1 %13491, %v7846_v44   ;;  %v8094_v20 = vcombine.low %v3233_v7, %v3237_v39  ;;  %v3441_v59 = vrot.slane %v1539_v31, %v18235_v17 }
 0x341   :  { %v8573_v61 = vrot.slane %v8565_v54, %v18246_v30  ;;  %v8095_v8 = vcombine.low %v3241_v47, %v3245_v42  ;;  %v8102_v9 = vrot.slane %v8092_v15, %v18246_v30  ;;  %v3445_v29 = vrot.slane %v1539_v31, %v18236_v48  ;;  %v16838_v47 = vpop.permute.xlu0 %12312 }
 0x342   :  { %v8580_v22 = vrot.slane %v8566_v12, %v18246_v30  ;;  %v8109_v0 = vrot.slane %v8093_v51, %v18246_v30  ;;  %v8116_v53 = vrot.slane %v8094_v20, %v18246_v30  ;;  %v3449_v3 = vrot.slane %v1539_v31, %v18240_v41  ;;  %18348 = vst [vmem:[#allocation16_spill] sm:$0xff] %v16838_v47 }
 0x343   :  { %v8123_v46 = vrot.slane %v8095_v8, %v18246_v30  ;;  %v3453_v60 = vrot.slane %v1539_v31, %v18241_v62  ;;  %v1530_v7 = vadd.f32 %v18326_v4, %v16440_v36  ;;  %v3457_v44 = vrot.slane %v1539_v31, %v18242_v23 }
 0x344   :  { %v8581_v10 = vcombine.low %v8573_v61, %v8580_v22  ;;  %v8124_v45 = vcombine.low %v8102_v9, %v8109_v0  ;;  %v3461_v54 = vrot.slane %v1539_v31, %v18243_v63  ;;  %v3465_v39 = vrot.slane %v1539_v31, %v18244_v14  ;;  %v16844_v9 = vpop.permute.xlu1 %12315 }
 0x345   :  { %v8125_v12 = vcombine.low %v8116_v53, %v8123_v46  ;;  %v3469_v15 = vrot.slane %v1539_v31, %v14625_v38  ;;  %v8435_v51 = vcombine.low %v3441_v59, %v3445_v29  ;;  %v8436_v61 = vcombine.low %v3449_v3, %v3453_v60 }
 0x346   :  { %12276 = vperm.xlu0 %13492, %v8581_v10   ;;  %v8132_v42 = vrot.slane %v8124_v45, %v18246_v30  ;;  %v8437_v20 = vcombine.low %v3457_v44, %v3461_v54  ;;  %v3153_v46 = vrot.slane %v1530_v7, %v18235_v17  ;;  %v1545_v31 = vadd.f32 %v18326_v4, %v16522_v16  ;;  %v16854_v45 = vpop.permute.xlu0 %12306 }
 0x347   :  { %v8139_v22 = vrot.slane %v8125_v12, %v18246_v30  ;;  %v8438_v36 = vcombine.low %v3465_v39, %v3469_v15  ;;  %v8445_v8 = vrot.slane %v8435_v51, %v18246_v30  ;;  %v8452_v0 = vrot.slane %v8436_v61, %v18246_v30 }
 0x348   :  { %v8459_v47 = vrot.slane %v8437_v20, %v18246_v30  ;;  %v3157_v29 = vrot.slane %v1530_v7, %v18236_v48  ;;  %v3161_v3 = vrot.slane %v1530_v7, %v18240_v41  ;;  %v3165_v44 = vrot.slane %v1530_v7, %v18241_v62 }
 0x349   :  { %v8140_v10 = vcombine.low %v8132_v42, %v8139_v22  ;;  %v8466_v53 = vrot.slane %v8438_v36, %v18246_v30  ;;  %v8467_v59 = vcombine.low %v8445_v8, %v8452_v0  ;;  %v3169_v54 = vrot.slane %v1530_v7, %v18242_v23 }
 0x34a   :  { %v3173_v39 = vrot.slane %v1530_v7, %v18243_v63  ;;  %v3177_v42 = vrot.slane %v1530_v7, %v18244_v14  ;;  %v3181_v16 = vrot.slane %v1530_v7, %v14625_v38  ;;  %v7994_v51 = vcombine.low %v3153_v46, %v3157_v29 }
 0x34b   :  { %12249 = vperm.xlu1 %13491, %v8140_v10   ;;  %v8468_v60 = vcombine.low %v8459_v47, %v8466_v53  ;;  %v8475_v12 = vrot.slane %v8467_v59, %v18246_v30  ;;  %v7995_v61 = vcombine.low %v3161_v3, %v3165_v44  ;;  %v1536_v20 = vadd.f32 %v18326_v4, %v16499_v1  ;;  %v16865_v47 = vpop.permute.xlu1 %12132  ;;  %v16875_v3 = vpop.permute.xlu0 %12324 }
 0x34c   :  { %18349 = vst [vmem:[#allocation24_spill] sm:$0xff] %v16865_v47  ;;  %v7996_v22 = vcombine.low %v3169_v54, %v3173_v39  ;;  %v7997_v36 = vcombine.low %v3177_v42, %v3181_v16  ;;  %v3633_v8 = vrot.slane %v1545_v31, %v18235_v17  ;;  %v8004_v10 = vrot.slane %v7994_v51, %v18246_v30 }
 0x34d   :  { %v8482_v15 = vrot.slane %v8468_v60, %v18246_v30  ;;  %v8011_v53 = vrot.slane %v7995_v61, %v18246_v30  ;;  %v3637_v7 = vrot.slane %v1545_v31, %v18236_v48  ;;  %v3641_v29 = vrot.slane %v1545_v31, %v18240_v41  ;;  %18350 = vst [vmem:[#allocation22_spill] sm:$0xff] %v16875_v3 }
 0x34e   :  { %v8018_v59 = vrot.slane %v7996_v22, %v18246_v30  ;;  %v8025_v46 = vrot.slane %v7997_v36, %v18246_v30  ;;  %v3645_v1 = vrot.slane %v1545_v31, %v18241_v62  ;;  %v3649_v44 = vrot.slane %v1545_v31, %v18242_v23 }
 0x34f   :  { %v8483_v0 = vcombine.low %v8475_v12, %v8482_v15  ;;  %v8026_v60 = vcombine.low %v8004_v10, %v8011_v53  ;;  %v3653_v54 = vrot.slane %v1545_v31, %v18243_v63  ;;  %v3657_v39 = vrot.slane %v1545_v31, %v18244_v14  ;;  %v16882_v22 = vpop.permute.xlu1 %12126 }
 0x350   :  { %v8027_v12 = vcombine.low %v8018_v59, %v8025_v46  ;;  %v3661_v42 = vrot.slane %v1545_v31, %v14625_v38  ;;  %v8729_v16 = vcombine.low %v3633_v8, %v3637_v7  ;;  %v8730_v15 = vcombine.low %v3641_v29, %v3645_v1  ;;  %v16893_v1 = vpop.permute.xlu0 %12318 }
 0x351   :  { %12270 = vperm.xlu0 %13492, %v8483_v0   ;;  %v8034_v51 = vrot.slane %v8026_v60, %v18246_v30  ;;  %v8731_v61 = vcombine.low %v3649_v44, %v3653_v54  ;;  %v3345_v59 = vrot.slane %v1536_v20, %v18235_v17  ;;  %v3349_v31 = vrot.slane %v1536_v20, %v18236_v48 }
 0x352   :  { %v8041_v36 = vrot.slane %v8027_v12, %v18246_v30  ;;  %v8732_v0 = vcombine.low %v3657_v39, %v3661_v42  ;;  %v8739_v10 = vrot.slane %v8729_v16, %v18246_v30  ;;  %v8746_v53 = vrot.slane %v8730_v15, %v18246_v30 }
 0x353   :  { %v8753_v3 = vrot.slane %v8731_v61, %v18246_v30  ;;  %v1543_v8 = vadd.f32 %v18326_v4, %v16564_v19  ;;  %v3353_v60 = vrot.slane %v1536_v20, %v18240_v41  ;;  %v3357_v44 = vrot.slane %v1536_v20, %v18241_v62 }
 0x354   :  { %v8042_v7 = vcombine.low %v8034_v51, %v8041_v36  ;;  %v8760_v46 = vrot.slane %v8732_v0, %v18246_v30  ;;  %v8761_v29 = vcombine.low %v8739_v10, %v8746_v53  ;;  %v3361_v54 = vrot.slane %v1536_v20, %v18242_v23  ;;  %v16904_v36 = vpop.permute.xlu1 %12141 }
 0x355   :  { %v3365_v42 = vrot.slane %v1536_v20, %v18243_v63  ;;  %v3369_v19 = vrot.slane %v1536_v20, %v18244_v14  ;;  %v1534_v16 = vadd.f32 %v18326_v4, %v16539_v24  ;;  %v3373_v15 = vrot.slane %v1536_v20, %v14625_v38  ;;  %18351 = vst [vmem:[#allocation27_spill] sm:$0xff] %v16904_v36 }
 0x356   :  { %12243 = vperm.xlu1 %13491, %v8042_v7   ;;  %v8762_v39 = vcombine.low %v8753_v3, %v8760_v46  ;;  %v8769_v12 = vrot.slane %v8761_v29, %v18246_v30  ;;  %v8288_v51 = vcombine.low %v3345_v59, %v3349_v31  ;;  %v8289_v61 = vcombine.low %v3353_v60, %v3357_v44  ;;  %v16915_v60 = vpop.permute.xlu0 %12144 }
 0x357   :  { %v8290_v10 = vcombine.low %v3361_v54, %v3365_v42  ;;  %v3569_v3 = vrot.slane %v1543_v8, %v18235_v17  ;;  %v3573_v53 = vrot.slane %v1543_v8, %v18236_v48  ;;  %v8291_v7 = vcombine.low %v3369_v19, %v3373_v15  ;;  %18352 = vst [vmem:[#allocation17_spill] sm:$0xff] %v16915_v60 }
 0x358   :  { %v8776_v0 = vrot.slane %v8762_v39, %v18246_v30  ;;  %v8298_v46 = vrot.slane %v8288_v51, %v18246_v30  ;;  %v8305_v29 = vrot.slane %v8289_v61, %v18246_v30  ;;  %v3577_v24 = vrot.slane %v1543_v8, %v18240_v41  ;;  %v16924_v36 = vpop.permute.xlu1 %12333 }
 0x359   :  { %v8312_v20 = vrot.slane %v8290_v10, %v18246_v30  ;;  %v3581_v59 = vrot.slane %v1543_v8, %v18241_v62  ;;  %v3585_v31 = vrot.slane %v1543_v8, %v18242_v23  ;;  %v8319_v44 = vrot.slane %v8291_v7, %v18246_v30  ;;  %18353 = vst [vmem:[#allocation33_spill] sm:$0xff] %v16924_v36 }
 0x35a   :  { %v8777_v47 = vcombine.low %v8769_v12, %v8776_v0  ;;  %v8320_v54 = vcombine.low %v8298_v46, %v8305_v29  ;;  %v3589_v39 = vrot.slane %v1543_v8, %v18243_v63  ;;  %v3593_v42 = vrot.slane %v1543_v8, %v18244_v14 }
 0x35b   :  { %v3597_v19 = vrot.slane %v1543_v8, %v14625_v38  ;;  %v8631_v15 = vcombine.low %v3569_v3, %v3573_v53  ;;  %v8632_v12 = vcombine.low %v3577_v24, %v3581_v59  ;;  %v1549_v51 = vadd.f32 %v18326_v4, %v16603_v37 }
 0x35c   :  { %12288 = vperm.xlu0 %13492, %v8777_v47   ;;  %v8321_v61 = vcombine.low %v8312_v20, %v8319_v44  ;;  %v8328_v0 = vrot.slane %v8320_v54, %v18246_v30  ;;  %v8633_v10 = vcombine.low %v3585_v31, %v3589_v39  ;;  %v3281_v47 = vrot.slane %v1534_v16, %v18235_v17  ;;  %v16935_v31 = vpop.permute.xlu0 %12336 }
 0x35d   :  { %v8634_v7 = vcombine.low %v3593_v42, %v3597_v19  ;;  %v8641_v46 = vrot.slane %v8631_v15, %v18246_v30  ;;  %v8648_v29 = vrot.slane %v8632_v12, %v18246_v30  ;;  %v3285_v53 = vrot.slane %v1534_v16, %v18236_v48  ;;  %18354 = vst [vmem:[#allocation26_spill] sm:$0xff] %v16935_v31 }
 0x35e   :  { %v8335_v8 = vrot.slane %v8321_v61, %v18246_v30  ;;  %v8655_v3 = vrot.slane %v8633_v10, %v18246_v30  ;;  %v3289_v37 = vrot.slane %v1534_v16, %v18240_v41  ;;  %v3293_v59 = vrot.slane %v1534_v16, %v18241_v62 }
 0x35f   :  { %v8662_v24 = vrot.slane %v8634_v7, %v18246_v30  ;;  %v8663_v20 = vcombine.low %v8641_v46, %v8648_v29  ;;  %v3297_v54 = vrot.slane %v1534_v16, %v18242_v23  ;;  %v3301_v39 = vrot.slane %v1534_v16, %v18243_v63  ;;  %v16945_v29 = vpop.permute.xlu1 %12135 }
 0x360   :  { %v8336_v44 = vcombine.low %v8328_v0, %v8335_v8  ;;  %v3305_v42 = vrot.slane %v1534_v16, %v18244_v14  ;;  %v3309_v12 = vrot.slane %v1534_v16, %v14625_v38  ;;  %v8190_v61 = vcombine.low %v3281_v47, %v3285_v53 }
 0x361   :  { %v8664_v19 = vcombine.low %v8655_v3, %v8662_v24  ;;  %v8671_v15 = vrot.slane %v8663_v20, %v18246_v30  ;;  %v1540_v10 = vadd.f32 %v18326_v4, %v16579_v49  ;;  %v8191_v7 = vcombine.low %v3289_v37, %v3293_v59 }
 0x362   :  { %12261 = vperm.xlu1 %13491, %v8336_v44   ;;  %v8192_v46 = vcombine.low %v3297_v54, %v3301_v39  ;;  %v3761_v0 = vrot.slane %v1549_v51, %v18235_v17  ;;  %v8193_v36 = vcombine.low %v3305_v42, %v3309_v12  ;;  %v8200_v3 = vrot.slane %v8190_v61, %v18246_v30  ;;  %v16957_v54 = vpop.permute.xlu0 %12138 }
 0x363   :  { %v8678_v8 = vrot.slane %v8664_v19, %v18246_v30  ;;  %v3765_v24 = vrot.slane %v1549_v51, %v18236_v48  ;;  %v8207_v16 = vrot.slane %v8191_v7, %v18246_v30  ;;  %v3769_v49 = vrot.slane %v1549_v51, %v18240_v41  ;;  %18355 = vst [vmem:[#allocation25_spill] sm:$0xff] %v16957_v54 }
 0x364   :  { %v8214_v47 = vrot.slane %v8192_v46, %v18246_v30  ;;  %v3773_v53 = vrot.slane %v1549_v51, %v18241_v62  ;;  %v8221_v20 = vrot.slane %v8193_v36, %v18246_v30  ;;  %v3777_v59 = vrot.slane %v1549_v51, %v18242_v23 }
 0x365   :  { %v8679_v37 = vcombine.low %v8671_v15, %v8678_v8  ;;  %v3781_v44 = vrot.slane %v1549_v51, %v18243_v63  ;;  %v8222_v39 = vcombine.low %v8200_v3, %v8207_v16  ;;  %v3785_v42 = vrot.slane %v1549_v51, %v18244_v14  ;;  %v16966_v3 = vpop.permute.xlu1 %12327 }
 0x366   :  { %v3789_v19 = vrot.slane %v1549_v51, %v14625_v38  ;;  %v8925_v12 = vcombine.low %v3761_v0, %v3765_v24  ;;  %v1547_v61 = vadd.f32 %v18326_v4, %v16642_v2  ;;  %v8223_v7 = vcombine.low %v8214_v47, %v8221_v20 }
 0x367   :  { %12282 = vperm.xlu0 %13492, %v8679_v37   ;;  %v8926_v15 = vcombine.low %v3769_v49, %v3773_v53  ;;  %v8927_v46 = vcombine.low %v3777_v59, %v3781_v44  ;;  %v8230_v36 = vrot.slane %v8222_v39, %v18246_v30  ;;  %v3473_v54 = vrot.slane %v1540_v10, %v18235_v17  ;;  %v16978_v39 = vpop.permute.xlu0 %12330 }
 0x368   :  { %v8928_v8 = vcombine.low %v3785_v42, %v3789_v19  ;;  %v8935_v31 = vrot.slane %v8925_v12, %v18246_v30  ;;  %v8237_v16 = vrot.slane %v8223_v7, %v18246_v30  ;;  %v3477_v2 = vrot.slane %v1540_v10, %v18236_v48 }
 0x369   :  { %v8942_v51 = vrot.slane %v8926_v15, %v18246_v30  ;;  %v8949_v0 = vrot.slane %v8927_v46, %v18246_v30  ;;  %v3481_v47 = vrot.slane %v1540_v10, %v18240_v41  ;;  %v3485_v49 = vrot.slane %v1540_v10, %v18241_v62  ;;  %v16986_v60 = vpop.permute.xlu1 %12153 }
 0x36a   :  { %v8956_v24 = vrot.slane %v8928_v8, %v18246_v30  ;;  %v3489_v53 = vrot.slane %v1540_v10, %v18242_v23  ;;  %v8238_v37 = vcombine.low %v8230_v36, %v8237_v16  ;;  %v3493_v59 = vrot.slane %v1540_v10, %v18243_v63  ;;  %18356 = vst [vmem:[#allocation23_spill] sm:$0xff] %v16986_v60 }
 0x36b   :  { %v8957_v20 = vcombine.low %v8935_v31, %v8942_v51  ;;  %v3497_v44 = vrot.slane %v1540_v10, %v18244_v14  ;;  %v3501_v19 = vrot.slane %v1540_v10, %v14625_v38  ;;  %v8484_v12 = vcombine.low %v3473_v54, %v3477_v2 }
 0x36c   :  { %v8958_v42 = vcombine.low %v8949_v0, %v8956_v24  ;;  %v8485_v7 = vcombine.low %v3481_v47, %v3485_v49  ;;  %12255 = vperm.xlu1 %13491, %v8238_v37   ;;  %v8486_v46 = vcombine.low %v3489_v53, %v3493_v59  ;;  %v3697_v8 = vrot.slane %v1547_v61, %v18235_v17 }
 0x36d   :  { %v8965_v15 = vrot.slane %v8957_v20, %v18246_v30  ;;  %v8487_v31 = vcombine.low %v3497_v44, %v3501_v19  ;;  %v8494_v16 = vrot.slane %v8484_v12, %v18246_v30  ;;  %v3701_v10 = vrot.slane %v1547_v61, %v18236_v48 }
 0x36e   :  { %v8972_v36 = vrot.slane %v8958_v42, %v18246_v30  ;;  %v8501_v51 = vrot.slane %v8485_v7, %v18246_v30  ;;  %v8508_v0 = vrot.slane %v8486_v46, %v18246_v30  ;;  %v3705_v54 = vrot.slane %v1547_v61, %v18240_v41  ;;  %v16997_v42 = vpop.permute.xlu0 %12156 }
 0x36f   :  { %v3709_v2 = vrot.slane %v1547_v61, %v18241_v62  ;;  %v8515_v47 = vrot.slane %v8487_v31, %v18246_v30  ;;  %v3713_v53 = vrot.slane %v1547_v61, %v18242_v23  ;;  %v3717_v37 = vrot.slane %v1547_v61, %v18243_v63  ;;  %18357 = vst [vmem:[#allocation21_spill] sm:$0xff] %v16997_v42 }
 0x370   :  { %v8973_v24 = vcombine.low %v8965_v15, %v8972_v36  ;;  %v8516_v49 = vcombine.low %v8494_v16, %v8501_v51  ;;  %v3721_v20 = vrot.slane %v1547_v61, %v18244_v14  ;;  %v3725_v59 = vrot.slane %v1547_v61, %v14625_v38  ;;  %v17005_v61 = vpop.permute.xlu1 %12345 }
 0x371   :  { %v8827_v44 = vcombine.low %v3697_v8, %v3701_v10  ;;  %v8517_v19 = vcombine.low %v8508_v0, %v8515_v47  ;;  %v8828_v7 = vcombine.low %v3705_v54, %v3709_v2  ;;  %v1538_v15 = vadd.f32 %v18326_v4, %v16619_v58  ;;  %18358 = vst [vmem:[#allocation32_spill] sm:$0xff] %v17005_v61 }
 0x372   :  { %12300 = vperm.xlu0 %13492, %v8973_v24   ;;  %v8524_v12 = vrot.slane %v8516_v49, %v18246_v30  ;;  %v8829_v46 = vcombine.low %v3713_v53, %v3717_v37  ;;  %v8830_v36 = vcombine.low %v3721_v20, %v3725_v59  ;;  %v1587_v47 = vadd.f32 %v18326_v4, %v16129_v28  ;;  %v17013_v49 = vpop.permute.xlu0 %12348 }
 0x373   :  { %v8837_v31 = vrot.slane %v8827_v44, %v18246_v30  ;;  %v8531_v16 = vrot.slane %v8517_v19, %v18246_v30  ;;  %v8844_v51 = vrot.slane %v8828_v7, %v18246_v30  ;;  %v3409_v2 = vrot.slane %v1538_v15, %v18235_v17  ;;  %18359 = vst [vmem:[#allocation20_spill] sm:$0xff] %v17013_v49 }
 0x374   :  { %v8851_v8 = vrot.slane %v8829_v46, %v18246_v30  ;;  %v8858_v0 = vrot.slane %v8830_v36, %v18246_v30  ;;  %v3413_v58 = vrot.slane %v1538_v15, %v18236_v48  ;;  %v3417_v37 = vrot.slane %v1538_v15, %v18240_v41 }
 0x375   :  { %v8532_v10 = vcombine.low %v8524_v12, %v8531_v16  ;;  %v8859_v24 = vcombine.low %v8837_v31, %v8844_v51  ;;  %v3421_v20 = vrot.slane %v1538_v15, %v18241_v62  ;;  %v3425_v44 = vrot.slane %v1538_v15, %v18242_v23  ;;  %v17023_v31 = vpop.permute.xlu1 %12147 }
 0x376   :  { %v8860_v54 = vcombine.low %v8851_v8, %v8858_v0  ;;  %v3429_v19 = vrot.slane %v1538_v15, %v18243_v63  ;;  %v3433_v12 = vrot.slane %v1538_v15, %v18244_v14  ;;  %v3437_v7 = vrot.slane %v1538_v15, %v14625_v38  ;;  %18360 = vst [vmem:[#allocation28_spill] sm:$0xff] %v17023_v31 }
 0x377   :  { %12273 = vperm.xlu1 %13491, %v8532_v10   ;;  %v8867_v53 = vrot.slane %v8859_v24, %v18246_v30  ;;  %v8386_v28 = vcombine.low %v3409_v2, %v3413_v58  ;;  %v8387_v46 = vcombine.low %v3417_v37, %v3421_v20  ;;  %v1544_v51 = vadd.f32 %v18326_v4, %v16658_v52  ;;  %v17033_v58 = vpop.permute.xlu0 %12150 }
 0x378   :  { %v8874_v59 = vrot.slane %v8860_v54, %v18246_v30  ;;  %v8388_v16 = vcombine.low %v3425_v44, %v3429_v19  ;;  %v8389_v8 = vcombine.low %v3433_v12, %v3437_v7  ;;  %v4977_v54 = vrot.slane %v1587_v47, %v18235_v17 }
 0x379   :  { %v8396_v0 = vrot.slane %v8386_v28, %v18246_v30  ;;  %v8403_v10 = vrot.slane %v8387_v46, %v18246_v30  ;;  %v4981_v15 = vrot.slane %v1587_v47, %v18236_v48  ;;  %v4985_v2 = vrot.slane %v1587_v47, %v18240_v41 }
 0x37a   :  { %v8875_v36 = vcombine.low %v8867_v53, %v8874_v59  ;;  %v8410_v24 = vrot.slane %v8388_v16, %v18246_v30  ;;  %v8417_v53 = vrot.slane %v8389_v8, %v18246_v30  ;;  %v4989_v52 = vrot.slane %v1587_v47, %v18241_v62 }
 0x37b   :  { %v8418_v37 = vcombine.low %v8396_v0, %v8403_v10  ;;  %v4993_v20 = vrot.slane %v1587_v47, %v18242_v23  ;;  %v4997_v59 = vrot.slane %v1587_v47, %v18243_v63  ;;  %v5001_v44 = vrot.slane %v1587_v47, %v18244_v14  ;;  %v17043_v0 = vpop.permute.xlu1 %12339 }
 0x37c   :  { %12294 = vperm.xlu0 %13492, %v8875_v36   ;;  %v5005_v19 = vrot.slane %v1587_v47, %v14625_v38  ;;  %v10787_v12 = vcombine.low %v4977_v54, %v4981_v15  ;;  %v8419_v7 = vcombine.low %v8410_v24, %v8417_v53  ;;  %v10788_v46 = vcombine.low %v4985_v2, %v4989_v52  ;;  %v17054_v2 = vpop.permute.xlu0 %12342 }
 0x37d   :  { %v8426_v28 = vrot.slane %v8418_v37, %v18246_v30  ;;  %v10789_v36 = vcombine.low %v4993_v20, %v4997_v59  ;;  %18361 = vst [vmem:[#allocation29_spill] sm:$0xff] %v17043_v0  ;;  %v3601_v61 = vrot.slane %v1544_v51, %v18235_v17  ;;  %v3605_v24 = vrot.slane %v1544_v51, %v18236_v48 }
 0x37e   :  { %v10790_v16 = vcombine.low %v5001_v44, %v5005_v19  ;;  %v10797_v8 = vrot.slane %v10787_v12, %v18246_v30  ;;  %v8433_v10 = vrot.slane %v8419_v7, %v18246_v30  ;;  %v10804_v49 = vrot.slane %v10788_v46, %v18246_v30 }
 0x37f   :  { %v10811_v31 = vrot.slane %v10789_v36, %v18246_v30  ;;  %v3609_v54 = vrot.slane %v1544_v51, %v18240_v41  ;;  %v1589_v15 = vadd.f32 %v18326_v4, %v16057_v32  ;;  %v3613_v52 = vrot.slane %v1544_v51, %v18241_v62 }
 0x380   :  { %v10818_v47 = vrot.slane %v10790_v16, %v18246_v30  ;;  %v8434_v53 = vcombine.low %v8426_v28, %v8433_v10  ;;  %v10819_v37 = vcombine.low %v10797_v8, %v10804_v49  ;;  %v3617_v59 = vrot.slane %v1544_v51, %v18242_v23  ;;  %v17063_v49 = vpop.permute.xlu1 %12165 }
 0x381   :  { %v3621_v44 = vrot.slane %v1544_v51, %v18243_v63  ;;  %v3625_v12 = vrot.slane %v1544_v51, %v18244_v14  ;;  %v3629_v7 = vrot.slane %v1544_v51, %v14625_v38  ;;  %v8680_v46 = vcombine.low %v3601_v61, %v3605_v24  ;;  %18362 = vst [vmem:[#allocation7_spill] sm:$0xff] %v17063_v49  ;;  %v17072_v61 = vpop.permute.xlu0 %12168 }
 0x382   :  { %v10820_v20 = vcombine.low %v10811_v31, %v10818_v47  ;;  %12267 = vperm.xlu1 %13491, %v8434_v53   ;;  %v10827_v19 = vrot.slane %v10819_v37, %v18246_v30  ;;  %v8681_v36 = vcombine.low %v3609_v54, %v3613_v52  ;;  %v1542_v31 = vadd.f32 %v18326_v4, %v16701_v56 }
 0x383   :  { %v8682_v28 = vcombine.low %v3617_v59, %v3621_v44  ;;  %v8683_v16 = vcombine.low %v3625_v12, %v3629_v7  ;;  %v5041_v8 = vrot.slane %v1589_v15, %v18235_v17  ;;  %v5045_v10 = vrot.slane %v1589_v15, %v18236_v48 }
 0x384   :  { %v10834_v32 = vrot.slane %v10820_v20, %v18246_v30  ;;  %v8690_v53 = vrot.slane %v8680_v46, %v18246_v30  ;;  %v8697_v51 = vrot.slane %v8681_v36, %v18246_v30  ;;  %v5049_v54 = vrot.slane %v1589_v15, %v18240_v41 }
 0x385   :  { %v8704_v37 = vrot.slane %v8682_v28, %v18246_v30  ;;  %v8711_v24 = vrot.slane %v8683_v16, %v18246_v30  ;;  %v5053_v56 = vrot.slane %v1589_v15, %v18241_v62  ;;  %v5057_v52 = vrot.slane %v1589_v15, %v18242_v23 }
 0x386   :  { %v10835_v47 = vcombine.low %v10827_v19, %v10834_v32  ;;  %v8712_v20 = vcombine.low %v8690_v53, %v8697_v51  ;;  %v5061_v59 = vrot.slane %v1589_v15, %v18243_v63  ;;  %v5065_v44 = vrot.slane %v1589_v15, %v18244_v14 }
 0x387   :  { %v5069_v19 = vrot.slane %v1589_v15, %v14625_v38  ;;  %v1591_v12 = vadd.f32 %v18326_v4, %v16268_v5  ;;  %v8713_v7 = vcombine.low %v8704_v37, %v8711_v24  ;;  %v10885_v32 = vcombine.low %v5041_v8, %v5045_v10  ;;  %v17095_v24 = vpop.permute.xlu0 %12360 }
 0x388   :  { %12414 = vperm.xlu0 %13492, %v10835_v47   ;;  %v10886_v46 = vcombine.low %v5049_v54, %v5053_v56  ;;  %v8720_v36 = vrot.slane %v8712_v20, %v18246_v30  ;;  %v10887_v28 = vcombine.low %v5057_v52, %v5061_v59  ;;  %v3537_v0 = vrot.slane %v1542_v31, %v18235_v17  ;;  %v17085_v47 = vpop.permute.xlu1 %12357 }
 0x389   :  { %v10888_v16 = vcombine.low %v5065_v44, %v5069_v19  ;;  %18363 = vst [vmem:[#allocation34_spill] sm:$0xff] %v17085_v47  ;;  %v8727_v53 = vrot.slane %v8713_v7, %v18246_v30  ;;  %v10895_v51 = vrot.slane %v10885_v32, %v18246_v30  ;;  %v3541_v60 = vrot.slane %v1542_v31, %v18236_v48 }
 0x38a   :  { %v10902_v15 = vrot.slane %v10886_v46, %v18246_v30  ;;  %v10909_v5 = vrot.slane %v10887_v28, %v18246_v30  ;;  %v3545_v10 = vrot.slane %v1542_v31, %v18240_v41  ;;  %v3549_v37 = vrot.slane %v1542_v31, %v18241_v62  ;;  %18364 = vst [vmem:[#allocation44_spill] sm:$0xff] %v17095_v24 }
 0x38b   :  { %v10916_v8 = vrot.slane %v10888_v16, %v18246_v30  ;;  %v8728_v54 = vcombine.low %v8720_v36, %v8727_v53  ;;  %v3553_v52 = vrot.slane %v1542_v31, %v18242_v23  ;;  %v3557_v20 = vrot.slane %v1542_v31, %v18243_v63 }
 0x38c   :  { %v10917_v56 = vcombine.low %v10895_v51, %v10902_v15  ;;  %v3561_v44 = vrot.slane %v1542_v31, %v18244_v14  ;;  %v3565_v19 = vrot.slane %v1542_v31, %v14625_v38  ;;  %v8582_v7 = vcombine.low %v3537_v0, %v3541_v60 }
 0x38d   :  { %v10918_v59 = vcombine.low %v10909_v5, %v10916_v8  ;;  %v1548_v32 = vadd.f32 %v18326_v4, %v16740_v27  ;;  %12285 = vperm.xlu1 %13491, %v8728_v54   ;;  %v8583_v28 = vcombine.low %v3545_v10, %v3549_v37  ;;  %v8584_v16 = vcombine.low %v3553_v52, %v3557_v20  ;;  %v17107_v5 = vpop.permute.xlu1 %12159 }
 0x38e   :  { %v10925_v46 = vrot.slane %v10917_v56, %v18246_v30  ;;  %v8585_v53 = vcombine.low %v3561_v44, %v3565_v19  ;;  %v8592_v51 = vrot.slane %v8582_v7, %v18246_v30  ;;  %v5105_v15 = vrot.slane %v1591_v12, %v18235_v17  ;;  %v17116_v56 = vpop.permute.xlu0 %12162 }
 0x38f   :  { %v10932_v36 = vrot.slane %v10918_v59, %v18246_v30  ;;  %v8599_v31 = vrot.slane %v8583_v28, %v18246_v30  ;;  %v8606_v60 = vrot.slane %v8584_v16, %v18246_v30  ;;  %v5109_v27 = vrot.slane %v1591_v12, %v18236_v48 }
 0x390   :  { %v5113_v0 = vrot.slane %v1591_v12, %v18240_v41  ;;  %v8613_v10 = vrot.slane %v8585_v53, %v18246_v30  ;;  %v5117_v37 = vrot.slane %v1591_v12, %v18241_v62  ;;  %v5121_v54 = vrot.slane %v1591_v12, %v18242_v23 }
 0x391   :  { %v10933_v8 = vcombine.low %v10925_v46, %v10932_v36  ;;  %v8614_v52 = vcombine.low %v8592_v51, %v8599_v31  ;;  %v5125_v20 = vrot.slane %v1591_v12, %v18243_v63  ;;  %v5129_v59 = vrot.slane %v1591_v12, %v18244_v14  ;;  %v17129_v49 = vpop.permute.xlu1 %12351 }
 0x392   :  { %v5133_v44 = vrot.slane %v1591_v12, %v14625_v38  ;;  %v1599_v19 = vadd.f32 %v18326_v4, %v16426_v34  ;;  %v8615_v7 = vcombine.low %v8606_v60, %v8613_v10  ;;  %v10983_v46 = vcombine.low %v5105_v15, %v5109_v27 }
 0x393   :  { %12420 = vperm.xlu0 %13492, %v10933_v8   ;;  %v10984_v28 = vcombine.low %v5113_v0, %v5117_v37  ;;  %v8622_v16 = vrot.slane %v8614_v52, %v18246_v30  ;;  %v10985_v36 = vcombine.low %v5121_v54, %v5125_v20  ;;  %v3729_v47 = vrot.slane %v1548_v32, %v18235_v17  ;;  %v17137_v54 = vpop.permute.xlu0 %12354 }
 0x394   :  { %v10986_v53 = vcombine.low %v5129_v59, %v5133_v44  ;;  %v8629_v51 = vrot.slane %v8615_v7, %v18246_v30  ;;  %v10993_v31 = vrot.slane %v10983_v46, %v18246_v30  ;;  %v3733_v12 = vrot.slane %v1548_v32, %v18236_v48 }
 0x395   :  { %v11000_v24 = vrot.slane %v10984_v28, %v18246_v30  ;;  %v11007_v34 = vrot.slane %v10985_v36, %v18246_v30  ;;  %v3737_v60 = vrot.slane %v1548_v32, %v18240_v41  ;;  %v3741_v27 = vrot.slane %v1548_v32, %v18241_v62 }
 0x396   :  { %v11014_v15 = vrot.slane %v10986_v53, %v18246_v30  ;;  %v8630_v0 = vcombine.low %v8622_v16, %v8629_v51  ;;  %v3745_v10 = vrot.slane %v1548_v32, %v18242_v23  ;;  %v3749_v37 = vrot.slane %v1548_v32, %v18243_v63 }
 0x397   :  { %v11015_v8 = vcombine.low %v10993_v31, %v11000_v24  ;;  %v3753_v20 = vrot.slane %v1548_v32, %v18244_v14  ;;  %v3757_v59 = vrot.slane %v1548_v32, %v14625_v38  ;;  %v8876_v44 = vcombine.low %v3729_v47, %v3733_v12  ;;  %v17151_v12 = vpop.permute.xlu1 %12177 }
 0x398   :  { %v11016_v52 = vcombine.low %v11007_v34, %v11014_v15  ;;  %v1546_v7 = vadd.f32 %v18326_v4, %v16782_v11  ;;  %12279 = vperm.xlu1 %13491, %v8630_v0   ;;  %v8877_v28 = vcombine.low %v3737_v60, %v3741_v27  ;;  %v8878_v24 = vcombine.low %v3745_v10, %v3749_v37 }
 0x399   :  { %v11023_v46 = vrot.slane %v11015_v8, %v18246_v30  ;;  %v8879_v36 = vcombine.low %v3753_v20, %v3757_v59  ;;  %v8886_v53 = vrot.slane %v8876_v44, %v18246_v30  ;;  %v5361_v51 = vrot.slane %v1599_v19, %v18235_v17 }
 0x39a   :  { %v11030_v16 = vrot.slane %v11016_v52, %v18246_v30  ;;  %v8893_v31 = vrot.slane %v8877_v28, %v18246_v30  ;;  %v8900_v32 = vrot.slane %v8878_v24, %v18246_v30  ;;  %v5365_v47 = vrot.slane %v1599_v19, %v18236_v48  ;;  %v17159_v52 = vpop.permute.xlu0 %12180 }
 0x39b   :  { %v5369_v11 = vrot.slane %v1599_v19, %v18240_v41  ;;  %v8907_v15 = vrot.slane %v8879_v36, %v18246_v30  ;;  %v5373_v60 = vrot.slane %v1599_v19, %v18241_v62  ;;  %v5377_v27 = vrot.slane %v1599_v19, %v18242_v23  ;;  %18365 = vst [vmem:[#allocation45_spill] sm:$0xff] %v17159_v52 }
 0x39c   :  { %v11031_v34 = vcombine.low %v11023_v46, %v11030_v16  ;;  %v8908_v0 = vcombine.low %v8886_v53, %v8893_v31  ;;  %v5381_v8 = vrot.slane %v1599_v19, %v18243_v63  ;;  %v5385_v10 = vrot.slane %v1599_v19, %v18244_v14 }
 0x39d   :  { %v5389_v37 = vrot.slane %v1599_v19, %v14625_v38  ;;  %v8909_v20 = vcombine.low %v8900_v32, %v8907_v15  ;;  %v11375_v59 = vcombine.low %v5361_v51, %v5365_v47  ;;  %v11376_v44 = vcombine.low %v5369_v11, %v5373_v60  ;;  %v17171_v47 = vpop.permute.xlu1 %12369 }
 0x39e   :  { %12426 = vperm.xlu0 %13492, %v11031_v34   ;;  %v8916_v46 = vrot.slane %v8908_v0, %v18246_v30  ;;  %v11377_v28 = vcombine.low %v5377_v27, %v5381_v8  ;;  %v3665_v31 = vrot.slane %v1546_v7, %v18235_v17  ;;  %v1601_v19 = vadd.f32 %v18326_v4, %v16386_v26 }
 0x39f   :  { %v11378_v24 = vcombine.low %v5385_v10, %v5389_v37  ;;  %v8923_v16 = vrot.slane %v8909_v20, %v18246_v30  ;;  %v11385_v36 = vrot.slane %v11375_v59, %v18246_v30  ;;  %v11392_v53 = vrot.slane %v11376_v44, %v18246_v30  ;;  %18366 = vst [vmem:[#allocation46_spill] sm:$0xff] %v17171_v47  ;;  %v17178_v37 = vpop.permute.xlu0 %12372 }
 0x3a0   :  { %v11399_v34 = vrot.slane %v11377_v28, %v18246_v30  ;;  %v3669_v32 = vrot.slane %v1546_v7, %v18236_v48  ;;  %v3673_v60 = vrot.slane %v1546_v7, %v18240_v41  ;;  %v3677_v27 = vrot.slane %v1546_v7, %v18241_v62  ;;  %18367 = vst [vmem:[#allocation47_spill] sm:$0xff] %v17178_v37 }
 0x3a1   :  { %v11406_v51 = vrot.slane %v11378_v24, %v18246_v30  ;;  %v8924_v11 = vcombine.low %v8916_v46, %v8923_v16  ;;  %v11407_v15 = vcombine.low %v11385_v36, %v11392_v53  ;;  %v3681_v8 = vrot.slane %v1546_v7, %v18242_v23 }
 0x3a2   :  { %v3685_v10 = vrot.slane %v1546_v7, %v18243_v63  ;;  %v3689_v26 = vrot.slane %v1546_v7, %v18244_v14  ;;  %v3693_v59 = vrot.slane %v1546_v7, %v14625_v38  ;;  %v8778_v44 = vcombine.low %v3665_v31, %v3669_v32 }
 0x3a3   :  { %v11408_v0 = vcombine.low %v11399_v34, %v11406_v51  ;;  %12297 = vperm.xlu1 %13491, %v8924_v11   ;;  %v11415_v20 = vrot.slane %v11407_v15, %v18246_v30  ;;  %v8779_v46 = vcombine.low %v3673_v60, %v3677_v27  ;;  %v1586_v28 = vadd.f32 %v18326_v4, %v16183_v13  ;;  %v17192_v13 = vpop.permute.xlu1 %12171 }
 0x3a4   :  { %v8780_v16 = vcombine.low %v3681_v8, %v3685_v10  ;;  %v5425_v36 = vrot.slane %v1601_v19, %v18235_v17  ;;  %v8781_v53 = vcombine.low %v3689_v26, %v3693_v59  ;;  %v8788_v34 = vrot.slane %v8778_v44, %v18246_v30  ;;  %v17199_v44 = vpop.permute.xlu0 %12174 }
 0x3a5   :  { %v11422_v24 = vrot.slane %v11408_v0, %v18246_v30  ;;  %v8795_v51 = vrot.slane %v8779_v46, %v18246_v30  ;;  %v5429_v11 = vrot.slane %v1601_v19, %v18236_v48  ;;  %v5433_v31 = vrot.slane %v1601_v19, %v18240_v41 }
 0x3a6   :  { %v8802_v7 = vrot.slane %v8780_v16, %v18246_v30  ;;  %v5437_v32 = vrot.slane %v1601_v19, %v18241_v62  ;;  %v8809_v60 = vrot.slane %v8781_v53, %v18246_v30  ;;  %v5441_v0 = vrot.slane %v1601_v19, %v18242_v23 }
 0x3a7   :  { %v11423_v15 = vcombine.low %v11415_v20, %v11422_v24  ;;  %v8810_v27 = vcombine.low %v8788_v34, %v8795_v51  ;;  %v5445_v8 = vrot.slane %v1601_v19, %v18243_v63  ;;  %v5449_v10 = vrot.slane %v1601_v19, %v18244_v14 }
 0x3a8   :  { %v5453_v26 = vrot.slane %v1601_v19, %v14625_v38  ;;  %v11473_v20 = vcombine.low %v5425_v36, %v5429_v11  ;;  %v11474_v59 = vcombine.low %v5433_v31, %v5437_v32  ;;  %v8811_v46 = vcombine.low %v8802_v7, %v8809_v60  ;;  %v17212_v32 = vpop.permute.xlu1 %12363 }
 0x3a9   :  { %12450 = vperm.xlu0 %13492, %v11423_v15   ;;  %v8818_v24 = vrot.slane %v8810_v27, %v18246_v30  ;;  %v11475_v16 = vcombine.low %v5441_v0, %v5445_v8  ;;  %v4945_v37 = vrot.slane %v1586_v28, %v18235_v17  ;;  %v4949_v19 = vrot.slane %v1586_v28, %v18236_v48 }
 0x3aa   :  { %v11476_v47 = vcombine.low %v5449_v10, %v5453_v26  ;;  %v11483_v53 = vrot.slane %v11473_v20, %v18246_v30  ;;  %v11490_v34 = vrot.slane %v11474_v59, %v18246_v30  ;;  %v8825_v51 = vrot.slane %v8811_v46, %v18246_v30  ;;  %v17222_v59 = vpop.permute.xlu0 %12366 }
 0x3ab   :  { %v11497_v15 = vrot.slane %v11475_v16, %v18246_v30  ;;  %v1603_v36 = vadd.f32 %v18326_v4, %v16502_v50  ;;  %v4953_v31 = vrot.slane %v1586_v28, %v18240_v41  ;;  %v4957_v27 = vrot.slane %v1586_v28, %v18241_v62  ;;  %18368 = vst [vmem:[#allocation48_spill] sm:$0xff] %v17222_v59 }
 0x3ac   :  { %v11504_v11 = vrot.slane %v11476_v47, %v18246_v30  ;;  %v11505_v7 = vcombine.low %v11483_v53, %v11490_v34  ;;  %v8826_v60 = vcombine.low %v8818_v24, %v8825_v51  ;;  %v4961_v0 = vrot.slane %v1586_v28, %v18242_v23 }
 0x3ad   :  { %v4965_v8 = vrot.slane %v1586_v28, %v18243_v63  ;;  %v4969_v20 = vrot.slane %v1586_v28, %v18244_v14  ;;  %v4973_v50 = vrot.slane %v1586_v28, %v14625_v38  ;;  %v1588_v47 = vadd.f32 %v18326_v4, %v16111_v35 }
 0x3ae   :  { %v11506_v10 = vcombine.low %v11497_v15, %v11504_v11  ;;  %v11513_v26 = vrot.slane %v11505_v7, %v18246_v30  ;;  %12291 = vperm.xlu1 %13491, %v8826_v60   ;;  %v10738_v46 = vcombine.low %v4945_v37, %v4949_v19  ;;  %v10739_v24 = vcombine.low %v4953_v31, %v4957_v27  ;;  %v17234_v27 = vpop.permute.xlu1 %12189 }
 0x3af   :  { %v10740_v16 = vcombine.low %v4961_v0, %v4965_v8  ;;  %v10741_v34 = vcombine.low %v4969_v20, %v4973_v50  ;;  %v5489_v51 = vrot.slane %v1603_v36, %v18235_v17  ;;  %v5493_v15 = vrot.slane %v1603_v36, %v18236_v48  ;;  %18369 = vst [vmem:[#allocation49_spill] sm:$0xff] %v17234_v27 }
 0x3b0   :  { %v11520_v53 = vrot.slane %v11506_v10, %v18246_v30  ;;  %v10748_v11 = vrot.slane %v10738_v46, %v18246_v30  ;;  %v10755_v28 = vrot.slane %v10739_v24, %v18246_v30  ;;  %v5497_v35 = vrot.slane %v1603_v36, %v18240_v41 }
 0x3b1   :  { %v10762_v7 = vrot.slane %v10740_v16, %v18246_v30  ;;  %v10769_v37 = vrot.slane %v10741_v34, %v18246_v30  ;;  %v5501_v19 = vrot.slane %v1603_v36, %v18241_v62  ;;  %v5505_v31 = vrot.slane %v1603_v36, %v18242_v23 }
 0x3b2   :  { %v11521_v60 = vcombine.low %v11513_v26, %v11520_v53  ;;  %v10770_v0 = vcombine.low %v10748_v11, %v10755_v28  ;;  %v5509_v8 = vrot.slane %v1603_v36, %v18243_v63  ;;  %v5513_v10 = vrot.slane %v1603_v36, %v18244_v14  ;;  %v17242_v53 = vpop.permute.xlu0 %12192 }
 0x3b3   :  { %v5517_v20 = vrot.slane %v1603_v36, %v14625_v38  ;;  %v1605_v50 = vadd.f32 %v18326_v4, %v16464_v18  ;;  %v10771_v26 = vcombine.low %v10762_v7, %v10769_v37  ;;  %v11571_v46 = vcombine.low %v5489_v51, %v5493_v15  ;;  %18370 = vst [vmem:[#allocation50_spill] sm:$0xff] %v17242_v53 }
 0x3b4   :  { %12456 = vperm.xlu0 %13492, %v11521_v60   ;;  %v11572_v24 = vcombine.low %v5497_v35, %v5501_v19  ;;  %v10778_v16 = vrot.slane %v10770_v0, %v18246_v30  ;;  %v11573_v34 = vcombine.low %v5505_v31, %v5509_v8  ;;  %v5009_v11 = vrot.slane %v1588_v47, %v18235_v17  ;;  %v17255_v0 = vpop.permute.xlu1 %12381 }
 0x3b5   :  { %v11574_v27 = vcombine.low %v5513_v10, %v5517_v20  ;;  %v10785_v28 = vrot.slane %v10771_v26, %v18246_v30  ;;  %v11581_v59 = vrot.slane %v11571_v46, %v18246_v30  ;;  %v5013_v18 = vrot.slane %v1588_v47, %v18236_v48  ;;  %18371 = vst [vmem:[#allocation51_spill] sm:$0xff] %v17255_v0 }
 0x3b6   :  { %v11588_v36 = vrot.slane %v11572_v24, %v18246_v30  ;;  %v11595_v7 = vrot.slane %v11573_v34, %v18246_v30  ;;  %v5017_v15 = vrot.slane %v1588_v47, %v18240_v41  ;;  %v5021_v35 = vrot.slane %v1588_v47, %v18241_v62 }
 0x3b7   :  { %v11602_v51 = vrot.slane %v11574_v27, %v18246_v30  ;;  %v10786_v60 = vcombine.low %v10778_v16, %v10785_v28  ;;  %v5025_v19 = vrot.slane %v1588_v47, %v18242_v23  ;;  %v5029_v31 = vrot.slane %v1588_v47, %v18243_v63 }
 0x3b8   :  { %v11603_v37 = vcombine.low %v11581_v59, %v11588_v36  ;;  %v5033_v10 = vrot.slane %v1588_v47, %v18244_v14  ;;  %v5037_v20 = vrot.slane %v1588_v47, %v14625_v38  ;;  %v10836_v26 = vcombine.low %v5009_v11, %v5013_v18  ;;  %v17264_v36 = vpop.permute.xlu0 %12384 }
 0x3b9   :  { %v11604_v8 = vcombine.low %v11595_v7, %v11602_v51  ;;  %v1590_v27 = vadd.f32 %v18326_v4, %v16327_v33  ;;  %12411 = vperm.xlu1 %13491, %v10786_v60   ;;  %v10837_v24 = vcombine.low %v5017_v15, %v5021_v35  ;;  %v10838_v59 = vcombine.low %v5025_v19, %v5029_v31 }
 0x3ba   :  { %v11611_v46 = vrot.slane %v11603_v37, %v18246_v30  ;;  %v10839_v34 = vcombine.low %v5033_v10, %v5037_v20  ;;  %v10846_v28 = vrot.slane %v10836_v26, %v18246_v30  ;;  %18372 = vst [vmem:[#allocation52_spill] sm:$0xff] %v17264_v36  ;;  %v5553_v7 = vrot.slane %v1605_v50, %v18235_v17  ;;  %v17277_v10 = vpop.permute.xlu1 %12183 }
 0x3bb   :  { %v11618_v16 = vrot.slane %v11604_v8, %v18246_v30  ;;  %v10853_v47 = vrot.slane %v10837_v24, %v18246_v30  ;;  %v10860_v11 = vrot.slane %v10838_v59, %v18246_v30  ;;  %v5557_v33 = vrot.slane %v1605_v50, %v18236_v48  ;;  %18373 = vst [vmem:[#allocation53_spill] sm:$0xff] %v17277_v10 }
 0x3bc   :  { %v5561_v18 = vrot.slane %v1605_v50, %v18240_v41  ;;  %v10867_v15 = vrot.slane %v10839_v34, %v18246_v30  ;;  %v5565_v35 = vrot.slane %v1605_v50, %v18241_v62  ;;  %v5569_v60 = vrot.slane %v1605_v50, %v18242_v23  ;;  %v17287_v53 = vpop.permute.xlu0 %12186 }
 0x3bd   :  { %v11619_v51 = vcombine.low %v11611_v46, %v11618_v16  ;;  %v10868_v37 = vcombine.low %v10846_v28, %v10853_v47  ;;  %v5573_v19 = vrot.slane %v1605_v50, %v18243_v63  ;;  %v5577_v31 = vrot.slane %v1605_v50, %v18244_v14  ;;  %18374 = vst [vmem:[#allocation54_spill] sm:$0xff] %v17287_v53 }
 0x3be   :  { %v5581_v8 = vrot.slane %v1605_v50, %v14625_v38  ;;  %v1607_v20 = vadd.f32 %v18326_v4, %v16582_v25  ;;  %v10869_v26 = vcombine.low %v10860_v11, %v10867_v15  ;;  %v11669_v46 = vcombine.low %v5553_v7, %v5557_v33 }
 0x3bf   :  { %12462 = vperm.xlu0 %13492, %v11619_v51   ;;  %v11670_v24 = vcombine.low %v5561_v18, %v5565_v35  ;;  %v10876_v59 = vrot.slane %v10868_v37, %v18246_v30  ;;  %v11671_v16 = vcombine.low %v5569_v60, %v5573_v19  ;;  %v5073_v28 = vrot.slane %v1590_v27, %v18235_v17 }
 0x3c0   :  { %v11672_v34 = vcombine.low %v5577_v31, %v5581_v8  ;;  %v10883_v47 = vrot.slane %v10869_v26, %v18246_v30  ;;  %v11679_v0 = vrot.slane %v11669_v46, %v18246_v30  ;;  %v5077_v36 = vrot.slane %v1590_v27, %v18236_v48  ;;  %v17297_v8 = vpop.permute.xlu1 %12375 }
 0x3c1   :  { %v11686_v50 = vrot.slane %v11670_v24, %v18246_v30  ;;  %v11693_v25 = vrot.slane %v11671_v16, %v18246_v30  ;;  %v5081_v11 = vrot.slane %v1590_v27, %v18240_v41  ;;  %v5085_v33 = vrot.slane %v1590_v27, %v18241_v62  ;;  %18375 = vst [vmem:[#allocation55_spill] sm:$0xff] %v17297_v8 }
 0x3c2   :  { %v11700_v7 = vrot.slane %v11672_v34, %v18246_v30  ;;  %v10884_v18 = vcombine.low %v10876_v59, %v10883_v47  ;;  %v5089_v15 = vrot.slane %v1590_v27, %v18242_v23  ;;  %v5093_v35 = vrot.slane %v1590_v27, %v18243_v63 }
 0x3c3   :  { %v11701_v51 = vcombine.low %v11679_v0, %v11686_v50  ;;  %v5097_v37 = vrot.slane %v1590_v27, %v18244_v14  ;;  %v5101_v19 = vrot.slane %v1590_v27, %v14625_v38  ;;  %v10934_v31 = vcombine.low %v5073_v28, %v5077_v36  ;;  %v17309_v50 = vpop.permute.xlu0 %12378 }
 0x3c4   :  { %v11702_v60 = vcombine.low %v11693_v25, %v11700_v7  ;;  %v1598_v26 = vadd.f32 %v18326_v4, %v16561_v55  ;;  %12417 = vperm.xlu1 %13491, %v10884_v18   ;;  %v10935_v24 = vcombine.low %v5081_v11, %v5085_v33  ;;  %v10936_v0 = vcombine.low %v5089_v15, %v5093_v35 }
 0x3c5   :  { %v11709_v46 = vrot.slane %v11701_v51, %v18246_v30  ;;  %v10937_v16 = vcombine.low %v5097_v37, %v5101_v19  ;;  %v10944_v34 = vrot.slane %v10934_v31, %v18246_v30  ;;  %v5617_v47 = vrot.slane %v1607_v20, %v18235_v17  ;;  %18376 = vst [vmem:[#allocation56_spill] sm:$0xff] %v17309_v50  ;;  %v17317_v31 = vpop.permute.xlu1 %12201 }
 0x3c6   :  { %v11716_v59 = vrot.slane %v11702_v60, %v18246_v30  ;;  %v10951_v27 = vrot.slane %v10935_v24, %v18246_v30  ;;  %v10958_v36 = vrot.slane %v10936_v0, %v18246_v30  ;;  %v5621_v28 = vrot.slane %v1607_v20, %v18236_v48  ;;  %18377 = vst [vmem:[#allocation57_spill] sm:$0xff] %v17317_v31 }
 0x3c7   :  { %v5625_v55 = vrot.slane %v1607_v20, %v18240_v41  ;;  %v10965_v7 = vrot.slane %v10937_v16, %v18246_v30  ;;  %v5629_v11 = vrot.slane %v1607_v20, %v18241_v62  ;;  %v5633_v33 = vrot.slane %v1607_v20, %v18242_v23 }
 0x3c8   :  { %v11717_v25 = vcombine.low %v11709_v46, %v11716_v59  ;;  %v10966_v18 = vcombine.low %v10944_v34, %v10951_v27  ;;  %v5637_v51 = vrot.slane %v1607_v20, %v18243_v63  ;;  %v5641_v15 = vrot.slane %v1607_v20, %v18244_v14 }
 0x3c9   :  { %v5645_v35 = vrot.slane %v1607_v20, %v14625_v38  ;;  %v10967_v60 = vcombine.low %v10958_v36, %v10965_v7  ;;  %v11767_v37 = vcombine.low %v5617_v47, %v5621_v28  ;;  %v11768_v19 = vcombine.low %v5625_v55, %v5629_v11  ;;  %v17327_v28 = vpop.permute.xlu0 %12204 }
 0x3ca   :  { %12468 = vperm.xlu0 %13492, %v11717_v25   ;;  %v10974_v46 = vrot.slane %v10966_v18, %v18246_v30  ;;  %v11769_v24 = vcombine.low %v5633_v33, %v5637_v51  ;;  %v5329_v27 = vrot.slane %v1598_v26, %v18235_v17  ;;  %v5333_v47 = vrot.slane %v1598_v26, %v18236_v48 }
 0x3cb   :  { %v11770_v0 = vcombine.low %v5641_v15, %v5645_v35  ;;  %v10981_v59 = vrot.slane %v10967_v60, %v18246_v30  ;;  %v11777_v16 = vrot.slane %v11767_v37, %v18246_v30  ;;  %v11784_v34 = vrot.slane %v11768_v19, %v18246_v30  ;;  %18378 = vst [vmem:[#allocation58_spill] sm:$0xff] %v17327_v28 }
 0x3cc   :  { %v11791_v20 = vrot.slane %v11769_v24, %v18246_v30  ;;  %v1608_v55 = vadd.f32 %v18326_v4, %v16679_v57  ;;  %v5337_v11 = vrot.slane %v1598_v26, %v18240_v41  ;;  %v5341_v18 = vrot.slane %v1598_v26, %v18241_v62  ;;  %v17338_v57 = vpop.permute.xlu1 %12393 }
 0x3cd   :  { %v11798_v36 = vrot.slane %v11770_v0, %v18246_v30  ;;  %v10982_v25 = vcombine.low %v10974_v46, %v10981_v59  ;;  %v11799_v7 = vcombine.low %v11777_v16, %v11784_v34  ;;  %v5345_v51 = vrot.slane %v1598_v26, %v18242_v23  ;;  %18379 = vst [vmem:[#allocation59_spill] sm:$0xff] %v17338_v57  ;;  %v18380_v46 = vld [vmem:[#allocation38_spill] sm:$0xff]  ;;  %v17349_v57 = vpop.permute.xlu0 %12396 }
 0x3ce   :  { %v5349_v15 = vrot.slane %v1598_v26, %v18243_v63  ;;  %v5353_v60 = vrot.slane %v1598_v26, %v18244_v14  ;;  %v5357_v37 = vrot.slane %v1598_v26, %v14625_v38  ;;  %v11326_v19 = vcombine.low %v5329_v27, %v5333_v47  ;;  %18381 = vst [vmem:[#allocation38_spill] sm:$0xff] %v17349_v57 }
 0x3cf   :  { %v11800_v33 = vcombine.low %v11791_v20, %v11798_v36  ;;  %12423 = vperm.xlu1 %13491, %v10982_v25   ;;  %v11807_v35 = vrot.slane %v11799_v7, %v18246_v30  ;;  %v1600_v24 = vadd.f32 %v18326_v4, %v18380_v46  ;;  %v11327_v59 = vcombine.low %v5337_v11, %v5341_v18 }
 0x3d0   :  { %v11328_v16 = vcombine.low %v5345_v51, %v5349_v15  ;;  %v11329_v34 = vcombine.low %v5353_v60, %v5357_v37  ;;  %v11336_v20 = vrot.slane %v11326_v19, %v18246_v30  ;;  %v5649_v36 = vrot.slane %v1608_v55, %v18235_v17 }
 0x3d1   :  { %v11814_v0 = vrot.slane %v11800_v33, %v18246_v30  ;;  %v5653_v25 = vrot.slane %v1608_v55, %v18236_v48  ;;  %v11343_v26 = vrot.slane %v11327_v59, %v18246_v30  ;;  %v5657_v47 = vrot.slane %v1608_v55, %v18240_v41  ;;  %v17357_v59 = vpop.permute.xlu1 %12195 }
 0x3d2   :  { %v11350_v27 = vrot.slane %v11328_v16, %v18246_v30  ;;  %v11357_v33 = vrot.slane %v11329_v34, %v18246_v30  ;;  %v5661_v11 = vrot.slane %v1608_v55, %v18241_v62  ;;  %v5665_v18 = vrot.slane %v1608_v55, %v18242_v23  ;;  %18382 = vst [vmem:[#allocation60_spill] sm:$0xff] %v17357_v59 }
 0x3d3   :  { %v11815_v7 = vcombine.low %v11807_v35, %v11814_v0  ;;  %v5669_v51 = vrot.slane %v1608_v55, %v18243_v63  ;;  %v11358_v15 = vcombine.low %v11336_v20, %v11343_v26  ;;  %v5673_v35 = vrot.slane %v1608_v55, %v18244_v14 }
 0x3d4   :  { %v5677_v60 = vrot.slane %v1608_v55, %v14625_v38  ;;  %v11816_v37 = vcombine.low %v5649_v36, %v5653_v25  ;;  %v11359_v19 = vcombine.low %v11350_v27, %v11357_v33  ;;  %v11817_v46 = vcombine.low %v5657_v47, %v5661_v11  ;;  %v18383_v55 = vld [vmem:[#allocation8_spill] sm:$0xff]  ;;  %v17370_v33 = vpop.permute.xlu0 %12198 }
 0x3d5   :  { %12474 = vperm.xlu0 %13492, %v11815_v7   ;;  %v11818_v0 = vcombine.low %v5665_v18, %v5669_v51  ;;  %v11366_v16 = vrot.slane %v11358_v15, %v18246_v30  ;;  %v5393_v26 = vrot.slane %v1600_v24, %v18235_v17  ;;  %v1609_v36 = vadd.f32 %v18326_v4, %v18383_v55  ;;  %v17378_v55 = vpop.permute.xlu1 %12387 }
 0x3d6   :  { %v11819_v34 = vcombine.low %v5673_v35, %v5677_v60  ;;  %v11826_v57 = vrot.slane %v11816_v37, %v18246_v30  ;;  %v11373_v31 = vrot.slane %v11359_v19, %v18246_v30  ;;  %v11833_v7 = vrot.slane %v11817_v46, %v18246_v30  ;;  %18384 = vst [vmem:[#allocation8_spill] sm:$0xff] %v17370_v33 }
 0x3d7   :  { %v11840_v20 = vrot.slane %v11818_v0, %v18246_v30  ;;  %v5397_v27 = vrot.slane %v1600_v24, %v18236_v48  ;;  %v5401_v47 = vrot.slane %v1600_v24, %v18240_v41  ;;  %v5405_v51 = vrot.slane %v1600_v24, %v18241_v62  ;;  %18385 = vst [vmem:[#allocation61_spill] sm:$0xff] %v17378_v55 }
 0x3d8   :  { %v11847_v25 = vrot.slane %v11819_v34, %v18246_v30  ;;  %v11374_v11 = vcombine.low %v11366_v16, %v11373_v31  ;;  %v11848_v18 = vcombine.low %v11826_v57, %v11833_v7  ;;  %v5409_v35 = vrot.slane %v1600_v24, %v18242_v23  ;;  %v18386_v31 = vld [vmem:[#allocation39_spill] sm:$0xff] }
 0x3d9   :  { %v5413_v60 = vrot.slane %v1600_v24, %v18243_v63  ;;  %v5417_v37 = vrot.slane %v1600_v24, %v18244_v14  ;;  %v5421_v46 = vrot.slane %v1600_v24, %v14625_v38  ;;  %v11424_v0 = vcombine.low %v5393_v26, %v5397_v27 }
 0x3da   :  { %v11849_v15 = vcombine.low %v11840_v20, %v11847_v25  ;;  %12447 = vperm.xlu1 %13491, %v11374_v11   ;;  %v11856_v19 = vrot.slane %v11848_v18, %v18246_v30  ;;  %v11425_v34 = vcombine.low %v5401_v47, %v5405_v51  ;;  %v1602_v57 = vadd.f32 %v18326_v4, %v18386_v31  ;;  %v17390_v51 = vpop.permute.xlu0 %12390 }
 0x3db   :  { %v11426_v7 = vcombine.low %v5409_v35, %v5413_v60  ;;  %v5681_v20 = vrot.slane %v1609_v36, %v18235_v17  ;;  %v11427_v25 = vcombine.low %v5417_v37, %v5421_v46  ;;  %v11434_v33 = vrot.slane %v11424_v0, %v18246_v30  ;;  %18387 = vst [vmem:[#allocation39_spill] sm:$0xff] %v17390_v51 }
 0x3dc   :  { %v11863_v16 = vrot.slane %v11849_v15, %v18246_v30  ;;  %v11441_v11 = vrot.slane %v11425_v34, %v18246_v30  ;;  %v5685_v18 = vrot.slane %v1609_v36, %v18236_v48  ;;  %v5689_v27 = vrot.slane %v1609_v36, %v18240_v41 }
 0x3dd   :  { %v11448_v26 = vrot.slane %v11426_v7, %v18246_v30  ;;  %v5693_v47 = vrot.slane %v1609_v36, %v18241_v62  ;;  %v11455_v15 = vrot.slane %v11427_v25, %v18246_v30  ;;  %v5697_v60 = vrot.slane %v1609_v36, %v18242_v23  ;;  %v17400_v25 = vpop.permute.xlu1 %12213 }
 0x3de   :  { %v11864_v24 = vcombine.low %v11856_v19, %v11863_v16  ;;  %v11456_v35 = vcombine.low %v11434_v33, %v11441_v11  ;;  %v5701_v37 = vrot.slane %v1609_v36, %v18243_v63  ;;  %v5705_v46 = vrot.slane %v1609_v36, %v18244_v14 }
 0x3df   :  { %v5709_v19 = vrot.slane %v1609_v36, %v14625_v38  ;;  %v11865_v0 = vcombine.low %v5681_v20, %v5685_v18  ;;  %v11866_v34 = vcombine.low %v5689_v27, %v5693_v47  ;;  %v1610_v31 = vadd.f32 %v18326_v4, %v16801_v21 }
 0x3e0   :  { %12477 = vperm.xlu0 %13492, %v11864_v24   ;;  %v11457_v16 = vcombine.low %v11448_v26, %v11455_v15  ;;  %v11464_v7 = vrot.slane %v11456_v35, %v18246_v30  ;;  %v11867_v55 = vcombine.low %v5697_v60, %v5701_v37  ;;  %v5457_v51 = vrot.slane %v1602_v57, %v18235_v17  ;;  %v17412_v35 = vpop.permute.xlu0 %12216 }
 0x3e1   :  { %v11868_v33 = vcombine.low %v5705_v46, %v5709_v19  ;;  %v11875_v11 = vrot.slane %v11865_v0, %v18246_v30  ;;  %v11882_v24 = vrot.slane %v11866_v34, %v18246_v30  ;;  %v5461_v18 = vrot.slane %v1602_v57, %v18236_v48 }
 0x3e2   :  { %v11471_v36 = vrot.slane %v11457_v16, %v18246_v30  ;;  %v11889_v20 = vrot.slane %v11867_v55, %v18246_v30  ;;  %v5465_v21 = vrot.slane %v1602_v57, %v18240_v41  ;;  %v5469_v47 = vrot.slane %v1602_v57, %v18241_v62 }
 0x3e3   :  { %v11896_v26 = vrot.slane %v11868_v33, %v18246_v30  ;;  %v11897_v27 = vcombine.low %v11875_v11, %v11882_v24  ;;  %v5473_v15 = vrot.slane %v1602_v57, %v18242_v23  ;;  %v5477_v37 = vrot.slane %v1602_v57, %v18243_v63  ;;  %v18388_v33 = vld [vmem:[#allocation37_spill] sm:$0xff] }
 0x3e4   :  { %v11472_v60 = vcombine.low %v11464_v7, %v11471_v36  ;;  %v5481_v46 = vrot.slane %v1602_v57, %v18244_v14  ;;  %v5485_v55 = vrot.slane %v1602_v57, %v14625_v38  ;;  %v11522_v34 = vcombine.low %v5457_v51, %v5461_v18  ;;  %v17421_v7 = vpop.permute.xlu1 %12405 }
 0x3e5   :  { %v11898_v19 = vcombine.low %v11889_v20, %v11896_v26  ;;  %v11905_v0 = vrot.slane %v11897_v27, %v18246_v30  ;;  %v11523_v16 = vcombine.low %v5465_v21, %v5469_v47  ;;  %v1604_v11 = vadd.f32 %v18326_v4, %v18388_v33  ;;  %18389 = vst [vmem:[#allocation37_spill] sm:$0xff] %v17421_v7 }
 0x3e6   :  { %12453 = vperm.xlu1 %13491, %v11472_v60   ;;  %v11524_v24 = vcombine.low %v5473_v15, %v5477_v37  ;;  %v11525_v59 = vcombine.low %v5481_v46, %v5485_v55  ;;  %v5713_v28 = vrot.slane %v1610_v31, %v18235_v17  ;;  %v11532_v50 = vrot.slane %v11522_v34, %v18246_v30  ;;  %v17433_v37 = vpop.permute.xlu0 %12408 }
 0x3e7   :  { %v11912_v36 = vrot.slane %v11898_v19, %v18246_v30  ;;  %v11539_v57 = vrot.slane %v11523_v16, %v18246_v30  ;;  %v5717_v20 = vrot.slane %v1610_v31, %v18236_v48  ;;  %v5721_v21 = vrot.slane %v1610_v31, %v18240_v41  ;;  %18390 = vst [vmem:[#allocation62_spill] sm:$0xff] %v17433_v37  ;;  %v18391_v16 = vld [vmem:[#allocation10_spill] sm:$0xff] }
 0x3e8   :  { %v11546_v51 = vrot.slane %v11524_v24, %v18246_v30  ;;  %v11553_v18 = vrot.slane %v11525_v59, %v18246_v30  ;;  %v5725_v26 = vrot.slane %v1610_v31, %v18241_v62  ;;  %v5729_v15 = vrot.slane %v1610_v31, %v18242_v23 }
 0x3e9   :  { %v11913_v27 = vcombine.low %v11905_v0, %v11912_v36  ;;  %v11554_v47 = vcombine.low %v11532_v50, %v11539_v57  ;;  %v5733_v60 = vrot.slane %v1610_v31, %v18243_v63  ;;  %v5737_v55 = vrot.slane %v1610_v31, %v18244_v14 }
 0x3ea   :  { %v11555_v46 = vcombine.low %v11546_v51, %v11553_v18  ;;  %v5741_v19 = vrot.slane %v1610_v31, %v14625_v38  ;;  %v11914_v34 = vcombine.low %v5713_v28, %v5717_v20  ;;  %v1611_v59 = vadd.f32 %v18326_v4, %v18391_v16  ;;  %v17443_v18 = vpop.permute.xlu1 %12207 }
 0x3eb   :  { %12480 = vperm.xlu0 %13492, %v11913_v27   ;;  %v11562_v33 = vrot.slane %v11554_v47, %v18246_v30  ;;  %v11915_v0 = vcombine.low %v5721_v21, %v5725_v26  ;;  %v11916_v50 = vcombine.low %v5729_v15, %v5733_v60  ;;  %v5521_v51 = vrot.slane %v1604_v11, %v18235_v17 }
 0x3ec   :  { %v11569_v24 = vrot.slane %v11555_v46, %v18246_v30  ;;  %v11917_v36 = vcombine.low %v5737_v55, %v5741_v19  ;;  %v11924_v57 = vrot.slane %v11914_v34, %v18246_v30  ;;  %v5525_v20 = vrot.slane %v1604_v11, %v18236_v48  ;;  %v17455_v34 = vpop.permute.xlu0 %12210 }
 0x3ed   :  { %v11931_v31 = vrot.slane %v11915_v0, %v18246_v30  ;;  %v11938_v28 = vrot.slane %v11916_v50, %v18246_v30  ;;  %v5529_v27 = vrot.slane %v1604_v11, %v18240_v41  ;;  %v5533_v26 = vrot.slane %v1604_v11, %v18241_v62 }
 0x3ee   :  { %v11570_v47 = vcombine.low %v11562_v33, %v11569_v24  ;;  %v11945_v21 = vrot.slane %v11917_v36, %v18246_v30  ;;  %v5537_v15 = vrot.slane %v1604_v11, %v18242_v23  ;;  %v5541_v46 = vrot.slane %v1604_v11, %v18243_v63  ;;  %v17465_v8 = vpop.permute.xlu1 %12399 }
 0x3ef   :  { %v11946_v60 = vcombine.low %v11924_v57, %v11931_v31  ;;  %v5545_v55 = vrot.slane %v1604_v11, %v18244_v14  ;;  %v5549_v19 = vrot.slane %v1604_v11, %v14625_v38  ;;  %v1606_v16 = vadd.f32 %v18326_v4, %v16719_v6  ;;  %18392 = vst [vmem:[#allocation10_spill] sm:$0xff] %v17465_v8 }
 0x3f0   :  { %12459 = vperm.xlu1 %13491, %v11570_v47   ;;  %v11947_v33 = vcombine.low %v11938_v28, %v11945_v21  ;;  %v11620_v0 = vcombine.low %v5521_v51, %v5525_v20  ;;  %v11621_v50 = vcombine.low %v5529_v27, %v5533_v26  ;;  %v11622_v36 = vcombine.low %v5537_v15, %v5541_v46 }
 0x3f1   :  { %v11954_v24 = vrot.slane %v11946_v60, %v18246_v30  ;;  %v11623_v37 = vcombine.low %v5545_v55, %v5549_v19  ;;  %v5745_v57 = vrot.slane %v1611_v59, %v18235_v17  ;;  %v5749_v53 = vrot.slane %v1611_v59, %v18236_v48  ;;  %v17475_v19 = vpop.permute.xlu0 %12402 }
 0x3f2   :  { %v11961_v31 = vrot.slane %v11947_v33, %v18246_v30  ;;  %v11630_v7 = vrot.slane %v11620_v0, %v18246_v30  ;;  %v11637_v11 = vrot.slane %v11621_v50, %v18246_v30  ;;  %v11644_v6 = vrot.slane %v11622_v36, %v18246_v30  ;;  %18393 = vst [vmem:[#allocation63_spill] sm:$0xff] %v17475_v19  ;;  %v18394_v36 = vld [vmem:[#allocation18_spill] sm:$0xff] }
 0x3f3   :  { %v11651_v51 = vrot.slane %v11623_v37, %v18246_v30  ;;  %v5753_v28 = vrot.slane %v1611_v59, %v18240_v41  ;;  %v5757_v20 = vrot.slane %v1611_v59, %v18241_v62  ;;  %v5761_v21 = vrot.slane %v1611_v59, %v18242_v23 }
 0x3f4   :  { %v11962_v27 = vcombine.low %v11954_v24, %v11961_v31  ;;  %v11652_v47 = vcombine.low %v11630_v7, %v11637_v11  ;;  %v5765_v26 = vrot.slane %v1611_v59, %v18243_v63  ;;  %v5769_v60 = vrot.slane %v1611_v59, %v18244_v14 }
 0x3f5   :  { %v11653_v15 = vcombine.low %v11644_v6, %v11651_v51  ;;  %v5773_v46 = vrot.slane %v1611_v59, %v14625_v38  ;;  %v11963_v55 = vcombine.low %v5745_v57, %v5749_v53  ;;  %v11964_v33 = vcombine.low %v5753_v28, %v5757_v20  ;;  %v17485_v57 = vpop.permute.xlu1 %12225 }
 0x3f6   :  { %12483 = vperm.xlu0 %13492, %v11962_v27   ;;  %v11660_v37 = vrot.slane %v11652_v47, %v18246_v30  ;;  %v11965_v0 = vcombine.low %v5761_v21, %v5765_v26  ;;  %v1612_v31 = vadd.f32 %v18326_v4, %v18394_v36  ;;  %v5585_v53 = vrot.slane %v1606_v16, %v18235_v17 }
 0x3f7   :  { %v11667_v50 = vrot.slane %v11653_v15, %v18246_v30  ;;  %v11966_v7 = vcombine.low %v5769_v60, %v5773_v46  ;;  %v11973_v24 = vrot.slane %v11963_v55, %v18246_v30  ;;  %v11980_v11 = vrot.slane %v11964_v33, %v18246_v30  ;;  %18395 = vst [vmem:[#allocation18_spill] sm:$0xff] %v17485_v57  ;;  %v17494_v46 = vpop.permute.xlu0 %12228 }
 0x3f8   :  { %v11987_v59 = vrot.slane %v11965_v0, %v18246_v30  ;;  %v5589_v28 = vrot.slane %v1606_v16, %v18236_v48  ;;  %v5593_v20 = vrot.slane %v1606_v16, %v18240_v41  ;;  %v5597_v47 = vrot.slane %v1606_v16, %v18241_v62  ;;  %18396 = vst [vmem:[#allocation64_spill] sm:$0xff] %v17494_v46 }
 0x3f9   :  { %v11668_v6 = vcombine.low %v11660_v37, %v11667_v50  ;;  %v11994_v51 = vrot.slane %v11966_v7, %v18246_v30  ;;  %v11995_v27 = vcombine.low %v11973_v24, %v11980_v11  ;;  %v5601_v21 = vrot.slane %v1606_v16, %v18242_v23  ;;  %v18397_v50 = vld [vmem:[#allocation35_spill] sm:$0xff] }
 0x3fa   :  { %v5605_v15 = vrot.slane %v1606_v16, %v18243_v63  ;;  %v5609_v60 = vrot.slane %v1606_v16, %v18244_v14  ;;  %v5613_v37 = vrot.slane %v1606_v16, %v14625_v38  ;;  %v11718_v33 = vcombine.low %v5585_v53, %v5589_v28 }
 0x3fb   :  { %12465 = vperm.xlu1 %13491, %v11668_v6   ;;  %v11996_v26 = vcombine.low %v11987_v59, %v11994_v51  ;;  %v12003_v55 = vrot.slane %v11995_v27, %v18246_v30  ;;  %v11719_v0 = vcombine.low %v5593_v20, %v5597_v47  ;;  %v1592_v7 = vadd.f32 %v18326_v4, %v18397_v50  ;;  %v17505_v27 = vpop.permute.xlu1 %12219 }
 0x3fc   :  { %v11720_v36 = vcombine.low %v5601_v21, %v5605_v15  ;;  %v5777_v11 = vrot.slane %v1612_v31, %v18235_v17  ;;  %v11721_v59 = vcombine.low %v5609_v60, %v5613_v37  ;;  %v11728_v6 = vrot.slane %v11718_v33, %v18246_v30 }
 0x3fd   :  { %v12010_v24 = vrot.slane %v11996_v26, %v18246_v30  ;;  %v11735_v51 = vrot.slane %v11719_v0, %v18246_v30  ;;  %v5781_v19 = vrot.slane %v1612_v31, %v18236_v48  ;;  %v5785_v28 = vrot.slane %v1612_v31, %v18240_v41  ;;  %v17515_v0 = vpop.permute.xlu0 %12222 }
 0x3fe   :  { %v11742_v53 = vrot.slane %v11720_v36, %v18246_v30  ;;  %v5789_v20 = vrot.slane %v1612_v31, %v18241_v62  ;;  %v11749_v47 = vrot.slane %v11721_v59, %v18246_v30  ;;  %v5793_v26 = vrot.slane %v1612_v31, %v18242_v23 }
 0x3ff   :  { %v12011_v16 = vcombine.low %v12003_v55, %v12010_v24  ;;  %v11750_v21 = vcombine.low %v11728_v6, %v11735_v51  ;;  %v5797_v15 = vrot.slane %v1612_v31, %v18243_v63  ;;  %v5801_v60 = vrot.slane %v1612_v31, %v18244_v14  ;;  %v18398_v51 = vld [vmem:[#allocation41_spill] sm:$0xff] }
 0x400   :  { %v5805_v37 = vrot.slane %v1612_v31, %v14625_v38  ;;  %v12012_v33 = vcombine.low %v5777_v11, %v5781_v19  ;;  %v12013_v55 = vcombine.low %v5785_v28, %v5789_v20  ;;  %v11751_v50 = vcombine.low %v11742_v53, %v11749_v47  ;;  %v17525_v11 = vpop.permute.xlu1 %12237 }
 0x401   :  { %12486 = vperm.xlu0 %13492, %v12011_v16   ;;  %v11758_v24 = vrot.slane %v11750_v21, %v18246_v30  ;;  %v12014_v36 = vcombine.low %v5793_v26, %v5797_v15  ;;  %v1613_v16 = vadd.f32 %v18326_v4, %v18398_v51  ;;  %v5137_v19 = vrot.slane %v1592_v7, %v18235_v17 }
 0x402   :  { %v12015_v8 = vcombine.low %v5801_v60, %v5805_v37  ;;  %v12022_v59 = vrot.slane %v12012_v33, %v18246_v30  ;;  %v12029_v6 = vrot.slane %v12013_v55, %v18246_v30  ;;  %v11765_v46 = vrot.slane %v11751_v50, %v18246_v30  ;;  %18399 = vst [vmem:[#allocation35_spill] sm:$0xff] %v17525_v11  ;;  %v17534_v55 = vpop.permute.xlu0 %12240 }
 0x403   :  { %v12036_v31 = vrot.slane %v12014_v36, %v18246_v30  ;;  %v5141_v20 = vrot.slane %v1592_v7, %v18236_v48  ;;  %v5145_v47 = vrot.slane %v1592_v7, %v18240_v41  ;;  %v5149_v26 = vrot.slane %v1592_v7, %v18241_v62  ;;  %18400 = vst [vmem:[#allocation41_spill] sm:$0xff] %v17534_v55 }
 0x404   :  { %v12043_v53 = vrot.slane %v12015_v8, %v18246_v30  ;;  %v12044_v28 = vcombine.low %v12022_v59, %v12029_v6  ;;  %v11766_v21 = vcombine.low %v11758_v24, %v11765_v46  ;;  %v5153_v15 = vrot.slane %v1592_v7, %v18242_v23  ;;  %v18401_v6 = vld [vmem:[#allocation30_spill] sm:$0xff]  ;;  %v17545_v11 = vpop.permute.xlu1 %12231 }
 0x405   :  { %v5157_v33 = vrot.slane %v1592_v7, %v18243_v63  ;;  %v5161_v8 = vrot.slane %v1592_v7, %v18244_v14  ;;  %v5165_v50 = vrot.slane %v1592_v7, %v14625_v38  ;;  %v11032_v36 = vcombine.low %v5137_v19, %v5141_v20  ;;  %18402 = vst [vmem:[#allocation30_spill] sm:$0xff] %v17545_v11 }
 0x406   :  { %v12045_v60 = vcombine.low %v12036_v31, %v12043_v53  ;;  %v12052_v37 = vrot.slane %v12044_v28, %v18246_v30  ;;  %12471 = vperm.xlu1 %13491, %v11766_v21   ;;  %v11033_v59 = vcombine.low %v5145_v47, %v5149_v26  ;;  %v1593_v46 = vadd.f32 %v18326_v4, %v18401_v6  ;;  %v18404_v6 = vld [vmem:[#allocation9_spill] sm:$0xff] }
 0x407   :  { %v11034_v51 = vcombine.low %v5153_v15, %v5157_v33  ;;  %v5809_v31 = vrot.slane %v1613_v16, %v18235_v17  ;;  %v11035_v53 = vcombine.low %v5161_v8, %v5165_v50  ;;  %v11042_v28 = vrot.slane %v11032_v36, %v18246_v30 }
 0x408   :  { %v12059_v24 = vrot.slane %v12045_v60, %v18246_v30  ;;  %v11049_v55 = vrot.slane %v11033_v59, %v18246_v30  ;;  %v5813_v21 = vrot.slane %v1613_v16, %v18236_v48  ;;  %v5817_v20 = vrot.slane %v1613_v16, %v18240_v41  ;;  %v17555_v59 = vpop.permute.xlu0 %12234 }
 0x409   :  { %v11056_v19 = vrot.slane %v11034_v51, %v18246_v30  ;;  %v5821_v47 = vrot.slane %v1613_v16, %v18241_v62  ;;  %v11063_v26 = vrot.slane %v11035_v53, %v18246_v30  ;;  %v5825_v60 = vrot.slane %v1613_v16, %v18242_v23  ;;  %18403 = vst [vmem:[#allocation65_spill] sm:$0xff] %v17555_v59 }
 0x40a   :  { %v12060_v7 = vcombine.low %v12052_v37, %v12059_v24  ;;  %v11064_v15 = vcombine.low %v11042_v28, %v11049_v55  ;;  %v5829_v33 = vrot.slane %v1613_v16, %v18243_v63  ;;  %v5833_v8 = vrot.slane %v1613_v16, %v18244_v14 }
 0x40b   :  { %v5837_v50 = vrot.slane %v1613_v16, %v14625_v38  ;;  %v12061_v36 = vcombine.low %v5809_v31, %v5813_v21  ;;  %v12062_v37 = vcombine.low %v5817_v20, %v5821_v47  ;;  %v1594_v24 = vadd.f32 %v18326_v4, %v18404_v6  ;;  %v17567_v47 = vpop.permute.xlu1 %12249 }
 0x40c   :  { %12489 = vperm.xlu0 %13492, %v12060_v7   ;;  %v11065_v51 = vcombine.low %v11056_v19, %v11063_v26  ;;  %v11072_v53 = vrot.slane %v11064_v15, %v18246_v30  ;;  %v12063_v55 = vcombine.low %v5825_v60, %v5829_v33  ;;  %v5169_v57 = vrot.slane %v1593_v46, %v18235_v17 }
 0x40d   :  { %v12064_v28 = vcombine.low %v5833_v8, %v5837_v50  ;;  %v12071_v11 = vrot.slane %v12061_v36, %v18246_v30  ;;  %v12078_v7 = vrot.slane %v12062_v37, %v18246_v30  ;;  %v5173_v21 = vrot.slane %v1593_v46, %v18236_v48  ;;  %18405 = vst [vmem:[#allocation9_spill] sm:$0xff] %v17567_v47  ;;  %v17576_v47 = vpop.permute.xlu0 %12252 }
 0x40e   :  { %v11079_v16 = vrot.slane %v11065_v51, %v18246_v30  ;;  %v12085_v31 = vrot.slane %v12063_v55, %v18246_v30  ;;  %v5177_v20 = vrot.slane %v1593_v46, %v18240_v41  ;;  %v5181_v15 = vrot.slane %v1593_v46, %v18241_v62  ;;  %18406 = vst [vmem:[#allocation66_spill] sm:$0xff] %v17576_v47 }
 0x40f   :  { %v12092_v19 = vrot.slane %v12064_v28, %v18246_v30  ;;  %v12093_v26 = vcombine.low %v12071_v11, %v12078_v7  ;;  %v5185_v60 = vrot.slane %v1593_v46, %v18242_v23  ;;  %v5189_v8 = vrot.slane %v1593_v46, %v18243_v63  ;;  %v18407_v28 = vld [vmem:[#allocation40_spill] sm:$0xff] }
 0x410   :  { %v11080_v33 = vcombine.low %v11072_v53, %v11079_v16  ;;  %v5193_v50 = vrot.slane %v1593_v46, %v18244_v14  ;;  %v5197_v36 = vrot.slane %v1593_v46, %v14625_v38  ;;  %v11081_v51 = vcombine.low %v5169_v57, %v5173_v21 }
 0x411   :  { %v12094_v37 = vcombine.low %v12085_v31, %v12092_v19  ;;  %v12101_v6 = vrot.slane %v12093_v26, %v18246_v30  ;;  %v11082_v55 = vcombine.low %v5177_v20, %v5181_v15  ;;  %v1595_v11 = vadd.f32 %v18326_v4, %v18407_v28  ;;  %v17588_v19 = vpop.permute.xlu1 %12243  ;;  %v17596_v28 = vpop.permute.xlu0 %12246 }
 0x412   :  { %12429 = vperm.xlu1 %13491, %v11080_v33   ;;  %v11083_v7 = vcombine.low %v5185_v60, %v5189_v8  ;;  %v11084_v59 = vcombine.low %v5193_v50, %v5197_v36  ;;  %v11091_v16 = vrot.slane %v11081_v51, %v18246_v30  ;;  %v5201_v46 = vrot.slane %v1594_v24, %v18235_v17 }
 0x413   :  { %v12108_v53 = vrot.slane %v12094_v37, %v18246_v30  ;;  %v11098_v10 = vrot.slane %v11082_v55, %v18246_v30  ;;  %v5205_v21 = vrot.slane %v1594_v24, %v18236_v48  ;;  %v5209_v20 = vrot.slane %v1594_v24, %v18240_v41  ;;  %18408 = vst [vmem:[#allocation40_spill] sm:$0xff] %v17588_v19 }
 0x414   :  { %v11105_v31 = vrot.slane %v11083_v7, %v18246_v30  ;;  %v11112_v57 = vrot.slane %v11084_v59, %v18246_v30  ;;  %v5213_v60 = vrot.slane %v1594_v24, %v18241_v62  ;;  %v5217_v33 = vrot.slane %v1594_v24, %v18242_v23  ;;  %18409 = vst [vmem:[#allocation67_spill] sm:$0xff] %v17596_v28 }
 0x415   :  { %v12109_v26 = vcombine.low %v12101_v6, %v12108_v53  ;;  %v11113_v15 = vcombine.low %v11091_v16, %v11098_v10  ;;  %v5221_v50 = vrot.slane %v1594_v24, %v18243_v63  ;;  %v5225_v36 = vrot.slane %v1594_v24, %v18244_v14 }
 0x416   :  { %v11114_v8 = vcombine.low %v11105_v31, %v11112_v57  ;;  %v5229_v37 = vrot.slane %v1594_v24, %v14625_v38  ;;  %v11130_v51 = vcombine.low %v5201_v46, %v5205_v21  ;;  %v11131_v55 = vcombine.low %v5209_v20, %v5213_v60 }
 0x417   :  { %12492 = vperm.xlu0 %13492, %v12109_v26   ;;  %v11121_v59 = vrot.slane %v11113_v15, %v18246_v30  ;;  %v11132_v6 = vcombine.low %v5217_v33, %v5221_v50  ;;  %v5233_v26 = vrot.slane %v1595_v11, %v18235_v17  ;;  %v17604_v15 = vpop.permute.xlu1 %12261  ;;  %v5237_v21 = vrot.slane %v1595_v11, %v18236_v48  ;;  %v18410_v50 = vld [vmem:[#allocation36_spill] sm:$0xff] }
 0x418   :  { %v11128_v10 = vrot.slane %v11114_v8, %v18246_v30  ;;  %v11133_v7 = vcombine.low %v5225_v36, %v5229_v37  ;;  %v11140_v53 = vrot.slane %v11130_v51, %v18246_v30  ;;  %v11147_v16 = vrot.slane %v11131_v55, %v18246_v30  ;;  %v17615_v55 = vpop.permute.xlu0 %12264 }
 0x419   :  { %v11154_v57 = vrot.slane %v11132_v6, %v18246_v30  ;;  %v5241_v20 = vrot.slane %v1595_v11, %v18240_v41  ;;  %v5245_v33 = vrot.slane %v1595_v11, %v18241_v62  ;;  %v5249_v8 = vrot.slane %v1595_v11, %v18242_v23 }
 0x41a   :  { %v11129_v31 = vcombine.low %v11121_v59, %v11128_v10  ;;  %v11161_v24 = vrot.slane %v11133_v7, %v18246_v30  ;;  %v11162_v46 = vcombine.low %v11140_v53, %v11147_v16  ;;  %v1596_v36 = vadd.f32 %v18326_v4, %v18410_v50 }
 0x41b   :  { %v5253_v59 = vrot.slane %v1595_v11, %v18243_v63  ;;  %v5257_v51 = vrot.slane %v1595_v11, %v18244_v14  ;;  %v5261_v6 = vrot.slane %v1595_v11, %v14625_v38  ;;  %v11179_v7 = vcombine.low %v5233_v26, %v5237_v21 }
 0x41c   :  { %12432 = vperm.xlu1 %13491, %v11129_v31   ;;  %v11163_v60 = vcombine.low %v11154_v57, %v11161_v24  ;;  %v11170_v37 = vrot.slane %v11162_v46, %v18246_v30  ;;  %v11180_v53 = vcombine.low %v5241_v20, %v5245_v33  ;;  %v17621_v46 = vpop.permute.xlu1 %12255  ;;  %v5265_v28 = vrot.slane %v1596_v36, %v18235_v17 }
 0x41d   :  { %v11181_v16 = vcombine.low %v5249_v8, %v5253_v59  ;;  %v11182_v57 = vcombine.low %v5257_v51, %v5261_v6  ;;  %v11189_v24 = vrot.slane %v11179_v7, %v18246_v30  ;;  %v5269_v19 = vrot.slane %v1596_v36, %v18236_v48  ;;  %v17633_v59 = vpop.permute.xlu0 %12258 }
 0x41e   :  { %v11177_v10 = vrot.slane %v11163_v60, %v18246_v30  ;;  %v11196_v50 = vrot.slane %v11180_v53, %v18246_v30  ;;  %v18411_v60 = vld [vmem:[#allocation31_spill] sm:$0xff]  ;;  %v5273_v20 = vrot.slane %v1596_v36, %v18240_v41  ;;  %v5277_v33 = vrot.slane %v1596_v36, %v18241_v62 }
 0x41f   :  { %v11203_v47 = vrot.slane %v11181_v16, %v18246_v30  ;;  %v1597_v11 = vadd.f32 %v18326_v4, %v18411_v60  ;;  %v11210_v26 = vrot.slane %v11182_v57, %v18246_v30  ;;  %v5281_v8 = vrot.slane %v1596_v36, %v18242_v23 }
 0x420   :  { %v11178_v31 = vcombine.low %v11170_v37, %v11177_v10  ;;  %v11211_v21 = vcombine.low %v11189_v24, %v11196_v50  ;;  %v5285_v37 = vrot.slane %v1596_v36, %v18243_v63  ;;  %v5289_v6 = vrot.slane %v1596_v36, %v18244_v14  ;;  %v17640_v24 = vpop.permute.xlu1 %12273 }
 0x421   :  { %v11212_v51 = vcombine.low %v11203_v47, %v11210_v26  ;;  %v5293_v4 = vrot.slane %v1596_v36, %v14625_v38  ;;  %v11228_v7 = vcombine.low %v5265_v28, %v5269_v19  ;;  %v11229_v53 = vcombine.low %v5273_v20, %v5277_v33 }
 0x422   :  { %12435 = vperm.xlu1 %13491, %v11178_v31   ;;  %v11219_v10 = vrot.slane %v11211_v21, %v18246_v30  ;;  %v11230_v16 = vcombine.low %v5281_v8, %v5285_v37  ;;  %v5297_v57 = vrot.slane %v1597_v11, %v18235_v17  ;;  %v5301_v52 = vrot.slane %v1597_v11, %v18236_v48  ;;  %v17651_v8 = vpop.permute.xlu0 %12276 }
 0x423   :  { %v11226_v31 = vrot.slane %v11212_v51, %v18246_v30  ;;  %v11231_v50 = vcombine.low %v5289_v6, %v5293_v4  ;;  %v11238_v60 = vrot.slane %v11228_v7, %v18246_v30  ;;  %v11245_v47 = vrot.slane %v11229_v53, %v18246_v30 }
 0x424   :  { %v11252_v26 = vrot.slane %v11230_v16, %v18246_v30  ;;  %v5305_v19 = vrot.slane %v1597_v11, %v18240_v41  ;;  %v5309_v28 = vrot.slane %v1597_v11, %v18241_v62  ;;  %v5313_v17 = vrot.slane %v1597_v11, %v18242_v23  ;;  %v12268_v53 = vpop.permute.xlu1 %12267 }
 0x425   :  { %v11227_v21 = vcombine.low %v11219_v10, %v11226_v31  ;;  %v11259_v36 = vrot.slane %v11231_v50, %v18246_v30  ;;  %v11260_v20 = vcombine.low %v11238_v60, %v11245_v47  ;;  %v5317_v33 = vrot.slane %v1597_v11, %v18243_v63 }
 0x426   :  { %v5321_v37 = vrot.slane %v1597_v11, %v18244_v14  ;;  %v5325_v51 = vrot.slane %v1597_v11, %v14625_v38  ;;  %v11277_v10 = vcombine.low %v5297_v57, %v5301_v52  ;;  %v11278_v48 = vcombine.low %v5305_v19, %v5309_v28  ;;  %v12271_v57 = vpop.permute.xlu0 %12270 }
 0x427   :  { %12438 = vperm.xlu1 %13491, %v11227_v21   ;;  %v11261_v6 = vcombine.low %v11252_v26, %v11259_v36  ;;  %v11268_v41 = vrot.slane %v11260_v20, %v18246_v30  ;;  %v11279_v62 = vcombine.low %v5313_v17, %v5317_v33  ;;  %v18412_v63 = vlaneseq  ;;  %v18413_v33 = vld [vmem:[#allocation6_spill] sm:$0xff] }
 0x428   :  { %v11280_v4 = vcombine.low %v5321_v37, %v5325_v51  ;;  %v11287_v7 = vrot.slane %v11277_v10, %v18246_v30  ;;  %v11294_v23 = vrot.slane %v11278_v48, %v18246_v30  ;;  %v12286_v36 = vpop.permute.xlu1 %12285 }
 0x429   :  { %v17659_v16 = vand.u32 127, %v18412_v63  ;;  %v11275_v31 = vrot.slane %v11261_v6, %v18246_v30  ;;  %v11301_v14 = vrot.slane %v11279_v62, %v18246_v30 }
 0x42a   :  { %v11308_v38 = vrot.slane %v11280_v4, %v18246_v30  ;;  %v11309_v52 = vcombine.low %v11287_v7, %v11294_v23  ;;  %v12289_v7 = vpop.permute.xlu0 %12288 }
 0x42b   :  { %v11276_v11 = vcombine.low %v11268_v41, %v11275_v31  ;;  %v12500_v50 = vadd.s32 4294967288, %v17659_v16  ;;  %v12507_v26 = vadd.s32 4294967280, %v17659_v16  ;;  %v12514_v21 = vadd.s32 4294967272, %v17659_v16 }
 0x42c   :  { %v11310_v60 = vcombine.low %v11301_v14, %v11308_v38  ;;  %v11317_v47 = vrot.slane %v11309_v52, %v18246_v30  ;;  %v12521_v19 = vadd.s32 4294967264, %v17659_v16  ;;  %v12542_v20 = vadd.s32 4294967240, %v17659_v16 }
 0x42d   :  { %12441 = vperm.xlu1 %13491, %v11276_v11   ;;  %v12535_v17 = vadd.s32 4294967248, %v17659_v16  ;;  %v17674_v37 = vsub.s32 %v17659_v16, %v18413_v33  ;;  %v17677_v51 = vsub.s32 %v12500_v50, %v18413_v33  ;;  %v12528_v10 = vadd.s32 4294967256, %v17659_v16 }
 0x42e   :  { %v11324_v28 = vrot.slane %v11310_v60, %v18246_v30  ;;  %v17681_v6 = vsub.s32 %v12507_v26, %v18413_v33  ;;  %v17684_v41 = vsub.s32 %v12514_v21, %v18413_v33  ;;  %v17687_v62 = vsub.s32 %v12521_v19, %v18413_v33  ;;  %v12280_v60 = vpop.permute.xlu1 %12279 }
 0x42f   :  { %v12549_v4 = vadd.s32 4294967232, %v17659_v16  ;;  %v12770_v23 = vrot.slane %v17633_v59, %v17677_v51  ;;  %v12766_v63 = vrot.slane %v17621_v46, %v17674_v37  ;;  %v17695_v31 = vsub.s32 %v12542_v20, %v18413_v33 }
 0x430   :  { %v11325_v48 = vcombine.low %v11317_v47, %v11324_v28  ;;  %v17698_v14 = vsub.s32 %v12535_v17, %v18413_v33  ;;  %v12775_v38 = vrot.slane %v17604_v15, %v17681_v6  ;;  %v12785_v52 = vrot.slane %v12268_v53, %v17687_v62 }
 0x431   :  { %v17704_v11 = vsub.s32 %v12528_v10, %v18413_v33  ;;  %v12556_v50 = vadd.s32 4294967224, %v17659_v16  ;;  %v12780_v59 = vrot.slane %v17615_v55, %v17684_v41  ;;  %v12771_v46 = vsel %vm12505_vm2, %v12770_v23, %v12766_v63  ;;  %v12283_v55 = vpop.permute.xlu0 %12282 }
 0x432   :  { %12444 = vperm.xlu1 %13491, %v11325_v48   ;;  %v12563_v47 = vadd.s32 4294967216, %v17659_v16  ;;  %v17712_v26 = vsub.s32 %v12549_v4, %v18413_v33  ;;  %v12776_v15 = vsel %vm12512_vm3, %v12775_v38, %v12771_v46  ;;  %v12570_v53 = vadd.s32 4294967208, %v17659_v16 }
 0x433   :  { %v12790_v21 = vrot.slane %v12271_v57, %v17704_v11  ;;  %v12781_v19 = vsel %vm12519_vm4, %v12780_v59, %v12776_v15  ;;  %v12795_v28 = vrot.slane %v17640_v24, %v17698_v14  ;;  %v17723_v10 = vsub.s32 %v12556_v50, %v18413_v33  ;;  %v17747_v15 = vpop.permute.xlu1 %12297 }
 0x434   :  { %v12786_v20 = vsel %vm12526_vm5, %v12785_v52, %v12781_v19  ;;  %v12805_v17 = vrot.slane %v12280_v60, %v17712_v26  ;;  %v12800_v48 = vrot.slane %v17651_v8, %v17695_v31  ;;  %v17729_v4 = vsub.s32 %v12563_v47, %v18413_v33  ;;  %18415 = vst [vmem:[#allocation31_spill] sm:$0xff] %v17747_v15 }
 0x435   :  { %v12791_v57 = vsel %vm12533_vm6, %v12790_v21, %v12786_v20  ;;  %v17733_v24 = vsub.s32 %v12570_v53, %v18413_v33  ;;  %v12810_v63 = vrot.slane %v12283_v55, %v17723_v10  ;;  %v17745_v47 = vpop.permute.xlu0 %12300  ;;  %v12849_v20 = vrot.slane %v16854_v45, %v17677_v51  ;;  %v18422_v45 = vld [vmem:[#allocation42_spill] sm:$0xff] }
 0x436   :  { %v12796_v23 = vsel %vm12540_vm7, %v12795_v28, %v12791_v57  ;;  %v12815_v52 = vrot.slane %v12286_v36, %v17729_v4  ;;  %18414 = vst [vmem:[#allocation36_spill] sm:$0xff] %v17745_v47  ;;  %v12499_v57 = vrot.slane %v16818_v40, %v17674_v37 }
 0x437   :  { %v12801_v38 = vsel %vm12547_vm8, %v12800_v48, %v12796_v23  ;;  %v12820_v50 = vrot.slane %v12289_v7, %v17733_v24  ;;  %v17751_v36 = vpop.permute.xlu1 %12291  ;;  %v18419_v23 = vld [vmem:[#allocation13_spill] sm:$0xff] }
 0x438   :  { %v12806_v8 = vsel %vm12554_vm9, %v12805_v17, %v12801_v38  ;;  %v18418_v17 = vld [vmem:[#allocation14_spill] sm:$0xff] }
 0x439   :  { %v12811_v59 = vsel %vm12561_vm10, %v12810_v63, %v12806_v8  ;;  %v17749_v53 = vpop.permute.xlu0 %12294  ;;  %v12504_v48 = vrot.slane %v18418_v17, %v17677_v51  ;;  %v12845_v63 = vrot.slane %v18419_v23, %v17674_v37  ;;  %v12525_v23 = vrot.slane %v16826_v43, %v17687_v62 }
 0x43a   :  { %v12816_v46 = vsel %vm12568_vm11, %v12815_v52, %v12811_v59 }
 0x43b   :  { %v17743_v60 = vsel %vm12575_vm12, %v12820_v50, %v12816_v46  ;;  %v17755_v19 = vpop.permute.xlu1 %12411  ;;  %v12850_v52 = vsel %vm12505_vm2, %v12849_v20, %v12845_v63  ;;  %v12506_v8 = vsel %vm12505_vm2, %v12504_v48, %v12499_v57  ;;  %v18421_v50 = vld [vmem:[#allocation11_spill] sm:$0xff]  ;;  %v12854_v46 = vrot.slane %v18422_v45, %v17681_v6  ;;  %v18423_v48 = vld [vmem:[#allocation16_spill] sm:$0xff] }
 0x43c   :  { %v12511_v59 = vrot.slane %v18421_v50, %v17681_v6  ;;  %v12864_v20 = vrot.slane %v16844_v9, %v17687_v62  ;;  %v12859_v57 = vrot.slane %v18423_v48, %v17684_v41  ;;  %v18424_v63 = vld [vmem:[#allocation12_spill] sm:$0xff]  ;;  %v12532_v45 = vrot.slane %v16882_v22, %v17704_v11  ;;  %v18425_v22 = vld [vmem:[#allocation43_spill] sm:$0xff] }
 0x43d   :  { %v17753_v21 = vpop.permute.xlu0 %12414  ;;  %v12855_v17 = vsel %vm12512_vm3, %v12854_v46, %v12850_v52  ;;  %v12518_v50 = vrot.slane %v18424_v63, %v17684_v41  ;;  %v12869_v46 = vrot.slane %v16893_v1, %v17704_v11  ;;  %v12598_v63 = vadd.s32 4294967176, %v17659_v16 }
 0x43e   :  { %v12513_v40 = vsel %vm12512_vm3, %v12511_v59, %v12506_v8  ;;  %v12860_v8 = vsel %vm12519_vm4, %v12859_v57, %v12855_v17  ;;  %v12539_v47 = vrot.slane %v18425_v22, %v17698_v14  ;;  %v18426_v17 = vld [vmem:[#allocation19_spill] sm:$0xff]  ;;  %v12584_v57 = vadd.s32 4294967192, %v17659_v16  ;;  %v18428_v22 = vld [vmem:[#allocation22_spill] sm:$0xff] }
 0x43f   :  { %v17759_v55 = vpop.permute.xlu1 %12417  ;;  %v12520_v52 = vsel %vm12519_vm4, %v12518_v50, %v12513_v40  ;;  %v12865_v59 = vsel %vm12526_vm5, %v12864_v20, %v12860_v8  ;;  %v12553_v1 = vrot.slane %v16945_v29, %v17712_v26  ;;  %v17819_v8 = vsub.s32 %v12598_v63, %v18413_v33 }
 0x440   :  { %v12527_v43 = vsel %vm12526_vm5, %v12525_v23, %v12520_v52  ;;  %v12870_v40 = vsel %vm12533_vm6, %v12869_v46, %v12865_v59  ;;  %v12874_v23 = vrot.slane %v18426_v17, %v17698_v14  ;;  %v12884_v59 = vrot.slane %v16966_v3, %v17712_v26  ;;  %v18429_v17 = vld [vmem:[#allocation17_spill] sm:$0xff] }
 0x441   :  { %v17757_v7 = vpop.permute.xlu0 %12420  ;;  %v12534_v48 = vsel %vm12533_vm6, %v12532_v45, %v12527_v43  ;;  %v18427_v45 = vld [vmem:[#allocation24_spill] sm:$0xff]  ;;  %v12591_v46 = vadd.s32 4294967184, %v17659_v16  ;;  %v12879_v29 = vrot.slane %v18428_v22, %v17695_v31  ;;  %v12889_v22 = vrot.slane %v16978_v39, %v17723_v10  ;;  %v18432_v39 = vld [vmem:[#allocation27_spill] sm:$0xff] }
 0x442   :  { %18416 = vst [vmem:[#allocation6_spill] sm:$0xff] %v17757_v7  ;;  %v12541_v20 = vsel %vm12540_vm7, %v12539_v47, %v12534_v48  ;;  %v12546_v52 = vrot.slane %v18427_v45, %v17695_v31  ;;  %v12875_v43 = vsel %vm12540_vm7, %v12874_v23, %v12870_v40  ;;  %v12577_v47 = vadd.s32 4294967200, %v17659_v16  ;;  %v18430_v7 = vld [vmem:[#allocation26_spill] sm:$0xff] }
 0x443   :  { %v12574_v45 = vrot.slane %v18429_v17, %v17733_v24  ;;  %v12899_v40 = vrot.slane %v18430_v7, %v17733_v24  ;;  %v17836_v23 = vsub.s32 %v12584_v57, %v18413_v33  ;;  %v12608_v16 = vrot.slane %v17107_v5, %v17674_v37 }
 0x444   :  { %v12548_v63 = vsel %vm12547_vm8, %v12546_v52, %v12541_v20  ;;  %v12880_v52 = vsel %vm12547_vm8, %v12879_v29, %v12875_v43  ;;  %v12612_v5 = vrot.slane %v17116_v56, %v17677_v51  ;;  %v12567_v17 = vrot.slane %v18432_v39, %v17729_v4 }
 0x445   :  { %v17761_v28 = vpop.permute.xlu0 %12426  ;;  %v12555_v3 = vsel %vm12554_vm9, %v12553_v1, %v12548_v63  ;;  %v12885_v57 = vsel %vm12554_vm9, %v12884_v59, %v12880_v52  ;;  %v17852_v1 = vsub.s32 %v12591_v46, %v18413_v33  ;;  %v18433_v63 = vld [vmem:[#allocation33_spill] sm:$0xff]  ;;  %v12687_v59 = vrot.slane %v17443_v18, %v17674_v37  ;;  %v18434_v18 = vld [vmem:[#allocation7_spill] sm:$0xff] }
 0x446   :  { %18417 = vst [vmem:[#allocation68_spill] sm:$0xff] %v17761_v28  ;;  %v12894_v20 = vrot.slane %v18433_v63, %v17729_v4  ;;  %v12588_v46 = vrot.slane %v17033_v58, %v17836_v23  ;;  %v12909_v56 = vrot.slane %v17054_v2, %v17836_v23  ;;  %v12890_v52 = vsel %vm12561_vm10, %v12889_v22, %v12885_v57  ;;  %v18435_v2 = vld [vmem:[#allocation23_spill] sm:$0xff] }
 0x447   :  { %v12691_v58 = vrot.slane %v17455_v34, %v17677_v51  ;;  %v12595_v39 = vrot.slane %v18435_v2, %v17852_v1  ;;  %v12928_v22 = vrot.slane %v17137_v54, %v17677_v51  ;;  %v12627_v57 = vrot.slane %v17192_v13, %v17687_v62 }
 0x449   :  { %v17779_v30 = vpop.permute.xlu0 %12450  ;;  %v12692_v63 = vsel %vm12505_vm2, %v12691_v58, %v12687_v59  ;;  %v18439_v59 = vld [vmem:[#allocation34_spill] sm:$0xff] }
 0x44a   :  { %v17771_v38 = vpop.permute.xlu1 %12423  ;;  %v12933_v58 = vrot.slane %v18439_v59, %v17681_v6 }
 0x44b   :  { %18420 = vst [vmem:[#allocation14_spill] sm:$0xff] %v17771_v38  ;;  %v18431_v38 = vld [vmem:[#allocation25_spill] sm:$0xff] }
 0x44c   :  { %v12560_v15 = vrot.slane %v18431_v38, %v17723_v10  ;;  %v17857_v38 = vsub.s32 %v12577_v47, %v18413_v33  ;;  %v12613_v33 = vsel %vm12505_vm2, %v12612_v5, %v12608_v16  ;;  %v12924_v47 = vrot.slane %v17129_v49, %v17674_v37  ;;  %v18436_v49 = vld [vmem:[#allocation28_spill] sm:$0xff] }
 0x44d   :  { %v17799_v9 = vpop.permute.xlu0 %12456 }
 0x44e   :  { %v12562_v43 = vsel %vm12561_vm10, %v12560_v15, %v12555_v3  ;;  %v12622_v15 = vrot.slane %v17072_v61, %v17684_v41  ;;  %v12617_v3 = vrot.slane %v18434_v18, %v17681_v6  ;;  %v12581_v5 = vrot.slane %v18436_v49, %v17857_v38  ;;  %v18437_v18 = vld [vmem:[#allocation44_spill] sm:$0xff] }
 0x44f   :  { %v12569_v16 = vsel %vm12568_vm11, %v12567_v17, %v12562_v43  ;;  %v12938_v2 = vrot.slane %v18437_v18, %v17684_v41  ;;  %v12929_v17 = vsel %vm12505_vm2, %v12928_v22, %v12924_v47  ;;  %v12696_v43 = vrot.slane %v17400_v25, %v17681_v6 }
 0x450   :  { %v12618_v61 = vsel %vm12512_vm3, %v12617_v3, %v12613_v33  ;;  %v12576_v54 = vsel %vm12575_vm12, %v12574_v45, %v12569_v16  ;;  %v12895_v33 = vsel %vm12568_vm11, %v12894_v20, %v12890_v52  ;;  %v18438_v3 = vld [vmem:[#allocation29_spill] sm:$0xff]  ;;  %v12706_v47 = vrot.slane %v17505_v27, %v17687_v62 }
 0x451   :  { %v17826_v48 = vpop.permute.xlu0 %12462  ;;  %v12904_v13 = vrot.slane %v18438_v3, %v17857_v38  ;;  %v12583_v49 = vsel %vm12582_vm13, %v12581_v5, %v12576_v54  ;;  %v12623_v18 = vsel %vm12519_vm4, %v12622_v15, %v12618_v61  ;;  %v12697_v42 = vsel %vm12512_vm3, %v12696_v43, %v12692_v63  ;;  %v18440_v5 = vld [vmem:[#allocation32_spill] sm:$0xff]  ;;  %v18441_v3 = vld [vmem:[#allocation45_spill] sm:$0xff] }
 0x452   :  { %v12934_v45 = vsel %vm12512_vm3, %v12933_v58, %v12929_v17  ;;  %v12628_v20 = vsel %vm12526_vm5, %v12627_v57, %v12623_v18  ;;  %v12943_v52 = vrot.slane %v17212_v32, %v17687_v62  ;;  %v12701_v16 = vrot.slane %v17412_v35, %v17684_v41 }
 0x453   :  { %v12914_v15 = vrot.slane %v18440_v5, %v17852_v1  ;;  %v12900_v22 = vsel %vm12575_vm12, %v12899_v40, %v12895_v33  ;;  %v12632_v27 = vrot.slane %v17199_v44, %v17704_v11  ;;  %v12590_v61 = vsel %vm12589_vm14, %v12588_v46, %v12583_v49 }
 0x454   :  { %v12905_v63 = vsel %vm12582_vm13, %v12904_v13, %v12900_v22  ;;  %v12702_v57 = vsel %vm12519_vm4, %v12701_v16, %v12697_v42  ;;  %v12939_v43 = vsel %vm12519_vm4, %v12938_v2, %v12934_v45  ;;  %v12637_v46 = vrot.slane %v17151_v12, %v17698_v14  ;;  %v18445_v16 = vld [vmem:[#allocation47_spill] sm:$0xff]  ;;  %v18446_v22 = vld [vmem:[#allocation46_spill] sm:$0xff] }
 0x455   :  { %v17793_v28 = vpop.permute.xlu1 %12447  ;;  %v17873_v29 = vpop.permute.xlu0 %12468  ;;  %v12633_v35 = vsel %vm12533_vm6, %v12632_v27, %v12628_v20  ;;  %v12707_v40 = vsel %vm12526_vm5, %v12706_v47, %v12702_v57  ;;  %v12944_v54 = vsel %vm12526_vm5, %v12943_v52, %v12939_v43  ;;  %v12711_v42 = vrot.slane %v17515_v0, %v17704_v11  ;;  %v18443_v0 = vld [vmem:[#allocation53_spill] sm:$0xff]  ;;  %v18447_v57 = vld [vmem:[#allocation50_spill] sm:$0xff] }
 0x456   :  { %v13082_v32 = vrot.slane %v17793_v28, %v17674_v37  ;;  %v13086_v28 = vrot.slane %v17779_v30, %v17677_v51  ;;  %v17944_v33 = vsel %vm12596_vm15, %v12595_v39, %v12590_v61  ;;  %v12910_v2 = vsel %vm12589_vm14, %v12909_v56, %v12905_v63  ;;  %v18444_v56 = vld [vmem:[#allocation18_spill] sm:$0xff] }
 0x457   :  { %v12642_v13 = vrot.slane %v18441_v3, %v17695_v31  ;;  %v12638_v58 = vsel %vm12540_vm7, %v12637_v46, %v12633_v35  ;;  %v12647_v49 = vrot.slane %v18443_v0, %v17712_v26  ;;  %v12712_v30 = vsel %vm12533_vm6, %v12711_v42, %v12707_v40  ;;  %v18449_v46 = vld [vmem:[#allocation64_spill] sm:$0xff]  ;;  %v18450_v42 = vld [vmem:[#allocation55_spill] sm:$0xff] }
 0x458   :  { %v13087_v39 = vsel %vm12505_vm2, %v13086_v28, %v13082_v32  ;;  %v12716_v47 = vrot.slane %v18444_v56, %v17698_v14  ;;  %v17965_v52 = vsel %vm12596_vm15, %v12914_v15, %v12910_v2  ;;  %v12958_v5 = vrot.slane %v18445_v16, %v17695_v31  ;;  %v18448_v15 = vld [vmem:[#allocation30_spill] sm:$0xff] }
 0x459   :  { %v17911_v25 = vpop.permute.xlu0 %12474  ;;  %v12953_v27 = vrot.slane %v18446_v22, %v17698_v14  ;;  %v13096_v61 = vrot.slane %v17799_v9, %v17684_v41  ;;  %v12662_v32 = vrot.slane %v18447_v57, %v17733_v24  ;;  %v12643_v35 = vsel %vm12547_vm8, %v12642_v13, %v12638_v58  ;;  %v18451_v2 = vld [vmem:[#allocation10_spill] sm:$0xff]  ;;  %v18452_v58 = vld [vmem:[#allocation52_spill] sm:$0xff] }
 0x45a   :  { %v12726_v43 = vrot.slane %v18448_v15, %v17712_v26  ;;  %v12648_v40 = vsel %vm12554_vm9, %v12647_v49, %v12643_v35  ;;  %v12963_v28 = vrot.slane %v18450_v42, %v17712_v26  ;;  %v13003_v3 = vrot.slane %v18451_v2, %v17674_v37  ;;  %v18453_v49 = vld [vmem:[#allocation54_spill] sm:$0xff]  ;;  %v18454_v37 = vld [vmem:[#allocation56_spill] sm:$0xff]  ;;  %v18460_v42 = vld [vmem:[#allocation51_spill] sm:$0xff] }
 0x45b   :  { %v12978_v0 = vrot.slane %v18452_v58, %v17733_v24  ;;  %v12968_v56 = vrot.slane %v18454_v37, %v17723_v10  ;;  %v12825_v37 = vrot.slane %v17751_v36, %v17857_v38  ;;  %v18466_v36 = vld [vmem:[#allocation8_spill] sm:$0xff] }
 0x45d   :  { %v17951_v12 = vpop.permute.xlu0 %12477 }
 0x461   :  { %v17808_v50 = vpop.permute.xlu1 %12453 }
 0x462   :  { %v13091_v44 = vrot.slane %v17808_v50, %v17681_v6  ;;  %v18442_v50 = vld [vmem:[#allocation48_spill] sm:$0xff] }
 0x463   :  { %v12948_v59 = vrot.slane %v18442_v50, %v17704_v11 }
 0x464   :  { %v13092_v45 = vsel %vm12512_vm3, %v13091_v44, %v13087_v39 }
 0x465   :  { %v12949_v18 = vsel %vm12533_vm6, %v12948_v59, %v12944_v54  ;;  %v12721_v54 = vrot.slane %v18449_v46, %v17695_v31  ;;  %v13097_v9 = vsel %vm12519_vm4, %v13096_v61, %v13092_v45  ;;  %v18457_v61 = vld [vmem:[#allocation65_spill] sm:$0xff] }
 0x466   :  { %v12954_v44 = vsel %vm12540_vm7, %v12953_v27, %v12949_v18  ;;  %v17990_v13 = vpop.permute.xlu0 %12480  ;;  %v13106_v18 = vrot.slane %v17826_v48, %v17704_v11  ;;  %v12731_v57 = vrot.slane %v18457_v61, %v17723_v10  ;;  %v12672_v61 = vrot.slane %v18466_v36, %v17836_v23 }
 0x467   :  { %v12959_v27 = vsel %vm12547_vm8, %v12958_v5, %v12954_v44  ;;  %v18459_v5 = vld [vmem:[#allocation37_spill] sm:$0xff] }
 0x468   :  { %v13012_v44 = vrot.slane %v18459_v5, %v17681_v6  ;;  %v18463_v6 = vld [vmem:[#allocation62_spill] sm:$0xff] }
 0x46b   :  { %v17848_v7 = vpop.permute.xlu1 %12459 }
 0x46c   :  { %v13101_v20 = vrot.slane %v17848_v7, %v17687_v62  ;;  %v12717_v7 = vsel %vm12540_vm7, %v12716_v47, %v12712_v30  ;;  %v12652_v30 = vrot.slane %v18453_v49, %v17723_v10  ;;  %v18455_v47 = vld [vmem:[#allocation49_spill] sm:$0xff] }
 0x46d   :  { %v12722_v39 = vsel %vm12547_vm8, %v12721_v54, %v12717_v7  ;;  %v12657_v45 = vrot.slane %v18455_v47, %v17729_v4  ;;  %v12964_v7 = vsel %vm12554_vm9, %v12963_v28, %v12959_v27  ;;  %v12973_v28 = vrot.slane %v18460_v42, %v17729_v4  ;;  %v18469_v42 = vld [vmem:[#allocation57_spill] sm:$0xff] }
 0x46e   :  { %v13102_v50 = vsel %vm12526_vm5, %v13101_v20, %v13097_v9  ;;  %v18456_v20 = vld [vmem:[#allocation63_spill] sm:$0xff]  ;;  %v12727_v16 = vsel %vm12554_vm9, %v12726_v43, %v12722_v39  ;;  %v12653_v22 = vsel %vm12561_vm10, %v12652_v30, %v12648_v40  ;;  %v18458_v43 = vld [vmem:[#allocation58_spill] sm:$0xff]  ;;  %v13116_v9 = vrot.slane %v17873_v29, %v17695_v31 }
 0x46f   :  { %v13107_v48 = vsel %vm12533_vm6, %v13106_v18, %v13102_v50  ;;  %v12682_v40 = vrot.slane %v18458_v43, %v17819_v8  ;;  %v12732_v54 = vsel %vm12561_vm10, %v12731_v57, %v12727_v16  ;;  %v12658_v2 = vsel %vm12568_vm11, %v12657_v45, %v12653_v22  ;;  %v18480_v43 = vld [vmem:[#allocation20_spill] sm:$0xff] }
 0x470   :  { %v12969_v49 = vsel %vm12561_vm10, %v12968_v56, %v12964_v7  ;;  %v13017_v30 = vrot.slane %v18463_v6, %v17684_v41  ;;  %v13022_v47 = vrot.slane %v17755_v19, %v17687_v62  ;;  %v18464_v56 = vld [vmem:[#allocation41_spill] sm:$0xff]  ;;  %v18465_v41 = vld [vmem:[#allocation40_spill] sm:$0xff]  ;;  %v13126_v22 = vrot.slane %v17911_v25, %v17723_v10  ;;  %v18467_v62 = vld [vmem:[#allocation39_spill] sm:$0xff] }
 0x471   :  { %v12484_v58 = vpop.permute.xlu0 %12483  ;;  %v12746_v16 = vrot.slane %v18465_v41, %v17857_v38  ;;  %v12988_v19 = vrot.slane %v18467_v62, %v17836_v23 }
 0x472   :  { %v13141_v36 = vrot.slane %v12484_v58, %v17857_v38  ;;  %v18478_v58 = vld [vmem:[#allocation68_spill] sm:$0xff] }
 0x476   :  { %v17893_v34 = vpop.permute.xlu1 %12465 }
 0x477   :  { %v13111_v59 = vrot.slane %v17893_v34, %v17698_v14  ;;  %v13007_v34 = vrot.slane %v18456_v20, %v17677_v51  ;;  %v12663_v20 = vsel %vm12575_vm12, %v12662_v32, %v12658_v2  ;;  %v12974_v32 = vsel %vm12568_vm11, %v12973_v28, %v12969_v49 }
 0x478   :  { %v12677_v28 = vrot.slane %v18469_v42, %v17852_v1 }
 0x479   :  { %v13008_v15 = vsel %vm12505_vm2, %v13007_v34, %v13003_v3  ;;  %v13112_v46 = vsel %vm12540_vm7, %v13111_v59, %v13107_v48  ;;  %v18461_v3 = vld [vmem:[#allocation60_spill] sm:$0xff]  ;;  %v12741_v34 = vrot.slane %v18464_v56, %v17733_v24  ;;  %v18468_v48 = vld [vmem:[#allocation61_spill] sm:$0xff]  ;;  %v18475_v56 = vld [vmem:[#allocation6_spill] sm:$0xff] }
 0x47a   :  { %v12667_v50 = vrot.slane %v18461_v3, %v17857_v38  ;;  %v13013_v39 = vsel %vm12512_vm3, %v13012_v44, %v13008_v15  ;;  %v13117_v29 = vsel %vm12547_vm8, %v13116_v9, %v13112_v46  ;;  %v12983_v7 = vrot.slane %v18468_v48, %v17857_v38 }
 0x47b   :  { %v13018_v46 = vsel %vm12519_vm4, %v13017_v30, %v13013_v39  ;;  %v13032_v44 = vrot.slane %v17759_v55, %v17698_v14  ;;  %v12830_v3 = vrot.slane %v17749_v53, %v17836_v23  ;;  %v18470_v14 = vld [vmem:[#allocation67_spill] sm:$0xff]  ;;  %v13136_v53 = vrot.slane %v17990_v13, %v17733_v24 }
 0x47c   :  { %v12668_v57 = vsel %vm12582_vm13, %v12667_v50, %v12663_v20  ;;  %v13023_v5 = vsel %vm12526_vm5, %v13022_v47, %v13018_v46  ;;  %v12487_v9 = vpop.permute.xlu0 %12486  ;;  %v12751_v55 = vrot.slane %v18470_v14, %v17836_v23  ;;  %v13037_v13 = vrot.slane %v18475_v56, %v17695_v31 }
 0x47d   :  { %v12673_v50 = vsel %vm12589_vm14, %v12672_v61, %v12668_v57  ;;  %v18476_v61 = vld [vmem:[#allocation66_spill] sm:$0xff]  ;;  %v13047_v46 = vrot.slane %v18478_v58, %v17723_v10 }
 0x47e   :  { %v12678_v41 = vsel %vm12596_vm15, %v12677_v28, %v12673_v50  ;;  %v12761_v62 = vrot.slane %v18476_v61, %v17819_v8  ;;  %v12919_v50 = vrot.slane %v18480_v43, %v17819_v8 }
 0x47f   :  { %v12683_v10 = vsel %vm12603_vm0, %v12682_v40, %v12678_v41 }
 0x481   :  { %v17929_v17 = vpop.permute.xlu1 %12471 }
 0x482   :  { %v13121_v51 = vrot.slane %v17929_v17, %v17712_v26  ;;  %v18462_v17 = vld [vmem:[#allocation35_spill] sm:$0xff] }
 0x483   :  { %v12736_v59 = vrot.slane %v18462_v17, %v17729_v4  ;;  %v12979_v17 = vsel %vm12575_vm12, %v12978_v0, %v12974_v32  ;;  %v18477_v32 = vld [vmem:[#allocation36_spill] sm:$0xff] }
 0x484   :  { %v13122_v45 = vsel %vm12554_vm9, %v13121_v51, %v13117_v29  ;;  %v12826_v51 = vsel %vm12582_vm13, %v12825_v37, %v17743_v60  ;;  %v13027_v60 = vrot.slane %v17753_v21, %v17704_v11  ;;  %v18471_v21 = vld [vmem:[#allocation31_spill] sm:$0xff]  ;;  %v18472_v29 = vld [vmem:[#allocation14_spill] sm:$0xff]  ;;  %v12840_v48 = vrot.slane %v18477_v32, %v17819_v8 }
 0x485   :  { %v12737_v18 = vsel %vm12568_vm11, %v12736_v59, %v12732_v54  ;;  %v13127_v25 = vsel %vm12561_vm10, %v13126_v22, %v13122_v45  ;;  %v13131_v54 = vrot.slane %v17951_v12, %v17729_v4  ;;  %v12984_v59 = vsel %vm12582_vm13, %v12983_v7, %v12979_v17  ;;  %v18473_v37 = vld [vmem:[#allocation59_spill] sm:$0xff]  ;;  %v18474_v45 = vld [vmem:[#allocation9_spill] sm:$0xff] }
 0x486   :  { %v12742_v15 = vsel %vm12575_vm12, %v12741_v34, %v12737_v18  ;;  %v12831_v49 = vsel %vm12589_vm14, %v12830_v3, %v12826_v51  ;;  %v13028_v6 = vsel %vm12533_vm6, %v13027_v60, %v13023_v5  ;;  %v12835_v0 = vrot.slane %v18471_v21, %v17852_v1  ;;  %v18481_v17 = vld [vmem:[#allocation21_spill] sm:$0xff] }
 0x487   :  { %v12747_v2 = vsel %vm12582_vm13, %v12746_v16, %v12742_v15  ;;  %v13132_v12 = vsel %vm12568_vm11, %v13131_v54, %v13127_v25  ;;  %v13033_v39 = vsel %vm12540_vm7, %v13032_v44, %v13028_v6  ;;  %v13042_v18 = vrot.slane %v18472_v29, %v17712_v26  ;;  %v12490_v26 = vpop.permute.xlu0 %12489  ;;  %v18479_v54 = vld [vmem:[#allocation38_spill] sm:$0xff] }
 0x488   :  { %v12752_v11 = vsel %vm12589_vm14, %v12751_v55, %v12747_v2  ;;  %v12993_v47 = vrot.slane %v18473_v37, %v17852_v1  ;;  %v12756_v20 = vrot.slane %v18474_v45, %v17852_v1  ;;  %v13137_v34 = vsel %vm12575_vm12, %v13136_v53, %v13132_v12 }
 0x489   :  { %v12989_v16 = vsel %vm12589_vm14, %v12988_v19, %v12984_v59  ;;  %v12836_v22 = vsel %vm12596_vm15, %v12835_v0, %v12831_v49  ;;  %v13038_v31 = vsel %vm12547_vm8, %v13037_v13, %v13033_v39  ;;  %v13142_v15 = vsel %vm12582_vm13, %v13141_v36, %v13137_v34  ;;  %v18483_v0 = vld [vmem:[#allocation15_spill] sm:$0xff] }
 0x48a   :  { %v12757_v57 = vsel %vm12596_vm15, %v12756_v20, %v12752_v11  ;;  %v13043_v7 = vsel %vm12554_vm9, %v13042_v18, %v13038_v31  ;;  %v13146_v25 = vrot.slane %v12487_v9, %v17836_v23  ;;  %v12841_v44 = vsel %vm12603_vm0, %v12840_v48, %v12836_v22 }
 0x48b   :  { %v12998_v42 = vrot.slane %v18479_v54, %v17819_v8  ;;  %v12994_v28 = vsel %vm12596_vm15, %v12993_v47, %v12989_v16  ;;  %v12762_v9 = vsel %vm12603_vm0, %v12761_v62, %v12757_v57  ;;  %v13151_v2 = vrot.slane %v12490_v26, %v17852_v1 }
 0x48c   :  { %v18482_v14 = vrot.slane %v18481_v17, %v17819_v8  ;;  %v12920_v11 = vsel %vm12603_vm0, %v12919_v50, %v17965_v52 }
 0x48d   :  { %v17973_v63 = vpop.permute.xlu1 %12429  ;;  %v12999_v55 = vsel %vm12603_vm0, %v12998_v42, %v12994_v28 }
 0x48e   :  { %v13052_v19 = vrot.slane %v17973_v63, %v17729_v4  ;;  %v13147_v63 = vsel %vm12589_vm14, %v13146_v25, %v13142_v15 }
 0x48f   :  { %v13152_v12 = vsel %vm12596_vm15, %v13151_v2, %v13147_v63 }
 0x492   :  { %v12493_v60 = vpop.permute.xlu0 %12492 }
 0x493   :  { %v13156_v6 = vrot.slane %v12493_v60, %v17819_v8 }
 0x495   :  { %v13157_v29 = vsel %vm12603_vm0, %v13156_v6, %v13152_v12 }
 0x497   :  { %v18014_v35 = vpop.permute.xlu1 %12432 }
 0x498   :  { %v13057_v51 = vrot.slane %v18014_v35, %v17733_v24  ;;  %v13048_v24 = vsel %vm12561_vm10, %v13047_v46, %v13043_v7 }
 0x499   :  { %v13053_v3 = vsel %vm12568_vm11, %v13052_v19, %v13048_v24 }
 0x49a   :  { %v13058_v40 = vsel %vm12575_vm12, %v13057_v51, %v13053_v3 }
 0x49d   :  { %v18053_v27 = vpop.permute.xlu1 %12435 }
 0x49e   :  { %v13062_v4 = vrot.slane %v18053_v27, %v17857_v38  ;;  %v13159_v27 = vcombine.low %v12762_v9, %v12841_v44 }
 0x4a0   :  { %v13063_v59 = vsel %vm12582_vm13, %v13062_v4, %v13058_v40  ;;  %v13175_v39 = vrot.slane %v13159_v27, %v18483_v0 }
 0x4a2   :  { %v12439_v30 = vpop.permute.xlu1 %12438 }
 0x4a3   :  { %v13067_v35 = vrot.slane %v12439_v30, %v17836_v23  ;;  %v12604_v23 = vsel %vm12603_vm0, %v18482_v14, %v17944_v33  ;;  %v13160_v33 = vcombine.low %v12920_v11, %v12999_v55 }
 0x4a5   :  { %v13068_v53 = vsel %vm12589_vm14, %v13067_v35, %v13063_v59  ;;  %v13182_v20 = vrot.slane %v13160_v33, %v18483_v0 }
 0x4a8   :  { %v12442_v5 = vpop.permute.xlu1 %12441 }
 0x4a9   :  { %v13072_v38 = vrot.slane %v12442_v5, %v17852_v1  ;;  %v13158_v1 = vcombine.low %v12604_v23, %v12683_v10 }
 0x4ab   :  { %v13073_v21 = vsel %vm12596_vm15, %v13072_v38, %v13068_v53  ;;  %v13168_v47 = vrot.slane %v13158_v1, %v18483_v0 }
 0x4ad   :  { %v12445_v49 = vpop.permute.xlu1 %12444 }
 0x4ae   :  { %v13077_v30 = vrot.slane %v12445_v49, %v17819_v8  ;;  %v13190_v8 = vcombine.low %v13168_v47, %v13175_v39 }
 0x4b0   :  { %v13078_v18 = vsel %vm12603_vm0, %v13077_v30, %v13073_v21  ;;  %v13198_v52 = vrot.slane %v13190_v8, %v18483_v0 }
 0x4b1   :  { %v13161_v37 = vcombine.low %v13078_v18, %v13157_v29 }
 0x4b3   :  { %v13189_v45 = vrot.slane %v13161_v37, %v18483_v0 }
 0x4b5   :  { %v13191_v56 = vcombine.low %v13182_v20, %v13189_v45 }
 0x4b7   :  { %v13205_v13 = vrot.slane %v13191_v56, %v18483_v0 }
 0x4b9   :  { %v13206_v34 = vcombine.low %v13198_v52, %v13205_v13 }
 0x4bb   :  { %13208 = vst [vmem:[#allocation3] sm:$0xff] %v13206_v34 }
 0x4bc   :  { %13506 = shalt.err (!%p13503_p4)
}
 0x4bd   :  { %13218 = dma.vmem_to_hbm [thread:$0]  %s13216_s3, 128, %s18172_s5, [#allocation4]  }
 0x4be   :  { %13515 = dma.done.wait [#allocation4], 128  }
 0x4bf   :  { %13516 = vsyncadd [#allocation4], 4294967168 }
 0x4c0   :  { %13222 = vsyncpa [#allocation4], 1 }

</bundles_post_ra>
